<compile_context>
chip_gen: v7x
topology: tpu7x:2x2x1
jax: 0.10.0
libtpu: 0.0.40
codegen_flags: <defaults>
</compile_context>

<pallas_src>
import jax
import jax.numpy as jnp
from jax.experimental import pallas as pl
from jax.experimental.pallas import tpu as pltpu

_BN_EPS = 1e-5
_K = 5                      # kernel size of every conv
_PAD = 2                    # padding of every conv
_STRIDES = (2, 2, 3, 3, 3)
_CHANNELS = ((1, 4), (4, 8), (8, 16), (16, 32), (32, 60))
_LEAD = 8                   # leading zero rows in conv scratch buffers (sublane aligned)
_TRAIL = 2                  # trailing zero rows


# ============================================================================
# Fused whole-network Pallas kernel (one grid step = one branch of one group)
# ============================================================================
def _store_padded(buf_ref, h):
    """Write activation h into a conv scratch buffer with zeroed halo rows.
    Layout: rows [0,_LEAD)=0 (aligned store), rows [_LEAD,_LEAD+l)=h, last _TRAIL=0."""
    w = buf_ref.shape[1]
    l = h.shape[0]
    buf_ref[0:_LEAD, :] = jnp.zeros((_LEAD, w), jnp.float32)
    buf_ref[_LEAD:_LEAD + l, :] = h
    buf_ref[_LEAD + l:_LEAD + l + _TRAIL, :] = jnp.zeros((_TRAIL, w), jnp.float32)


def _conv_from_buf(buf_ref, w_ref, t_ref, stride):
    """Strided-window Conv1d (+folded BN) + ReLU.

    Tap k of the size-5 / stride-s conv is the strided sublane slice of the padded
    scratch starting at row _LEAD - _PAD + k; one MXU matmul per tap against the
    block-diagonal channel-mix weight w_ref[k]; f32 accumulation."""
    l_in = buf_ref.shape[0] - _LEAD - _TRAIL
    l_out = (l_in + 2 * _PAD - _K) // stride + 1
    acc = None
    for k in range(_K):
        a = buf_ref[pl.ds(_LEAD - _PAD + k, l_out, stride=stride), :]
        y = jnp.dot(a.astype(jnp.bfloat16), w_ref[k],
                    preferred_element_type=jnp.float32)
        acc = y if acc is None else acc + y
    return jnp.maximum(acc + t_ref[...], 0.0)


def _basicnet_kernel(x_ref, w0_ref, t0_ref,
                     w1_ref, t1_ref, w2_ref, t2_ref, w3_ref, t3_ref,
                     w4_ref, t4_ref, w5_ref, t5_ref,
                     vmap_ref, ones_ref, z0_ref,
                     o_ref,
                     buf1, buf2, buf3, buf4, buf5, zacc):
    f32 = jnp.float32

    # ---- init Conv2d(1, 1, (5, T), padding=(2, 0)) + BN2d + ReLU -------------------
    # x_ref: (L + 2*PAD, G*T) bf16 (rows pre-padded in the wrapper); taps are read
    # straight from the ref; block-diag weight (G*T, G) -> h == x.view(N, 1, -1).
    l0 = x_ref.shape[0] - 2 * _PAD
    acc = None
    for k in range(_K):
        y = jnp.dot(x_ref[pl.ds(k, l0), :], w0_ref[k], preferred_element_type=f32)
        acc = y if acc is None else acc + y
    _store_padded(buf1, jnp.maximum(acc + t0_ref[...], 0.0))

    # ---- Conv1d + BN1d + ReLU stack (strided sublane reads, no selection matmuls) --
    _store_padded(buf2, _conv_from_buf(buf1, w1_ref, t1_ref, _STRIDES[0]))
    _store_padded(buf3, _conv_from_buf(buf2, w2_ref, t2_ref, _STRIDES[1]))
    _store_padded(buf4, _conv_from_buf(buf3, w3_ref, t3_ref, _STRIDES[2]))
    _store_padded(buf5, _conv_from_buf(buf4, w4_ref, t4_ref, _STRIDES[3]))
    h5 = _conv_from_buf(buf5, w5_ref, t5_ref, _STRIDES[4])          # (6, G*60) f32

    # ---- AvgPool1d(2) + fc_final + fc_cls folded into one per-lane weight map ------
    # vmap[r, p*60+c] = 0.5 * (wc_branch @ Wf_branch)[c*3 + r//2]; multiply, reduce
    # over the 6 positions, then one tiny matmul sums each pair's 60-lane block ->
    # this branch's contribution to every sample's pre-sigmoid logit (fully batched).
    col = jnp.sum(h5 * vmap_ref[...], axis=0, keepdims=True)        # (1, G*60)
    zc = jnp.dot(col, ones_ref[...], preferred_element_type=f32)    # (1, G)

    @pl.when(pl.program_id(1) == 0)        # x-branch pass: start the logit
    def _():
        zacc[...] = zc + z0_ref[...]

    @pl.when(pl.program_id(1) == 1)        # y-branch pass: finish + sigmoid + cat
    def _():
        z = zacc[...] + zc
        p = 1.0 / (1.0 + jnp.exp(-z))
        o_ref[0:1, :] = p
        o_ref[1:2, :] = 1.0 - p


# ============================================================================
# One-time weight preparation (outside the hot path)
# ============================================================================
def _fold_bn_scale_shift(bias, bn):
    gamma, beta, mean, var = bn
    s = gamma / jnp.sqrt(var + _BN_EPS)
    t = beta + (bias - mean) * s
    return s, t


def _block_diag_same(tap, g):
    """tap: (K, c_in, c_out) -> (K, g*c_in, g*c_out) with g identical diagonal blocks."""
    k, ci, co = tap.shape
    out = jnp.zeros((k, g * ci, g * co), jnp.float32)
    for p in range(g):
        out = out.at[:, p * ci:(p + 1) * ci, p * co:(p + 1) * co].set(tap)
    return out


def prepare_operands(params, n_batch, length, group_pairs=None):
    """BN folding, per-branch block-diagonal conv weights (fixed group of G pairs),
    folded fc_final∘AvgPool∘fc_cls weight map, bf16 casts.  All done once."""
    if group_pairs is None:
        # G*60 lanes at conv5: 240 (G=4) / 120 (G=2); G must divide n_batch.
        group_pairs = 4 if n_batch % 4 == 0 else (2 if n_batch % 2 == 0 else 1)
    g = group_pairs
    assert n_batch % g == 0, "group_pairs must divide the batch size"
    branches = (params["fe_x"], params["fe_y"])
    bf16, f32 = jnp.bfloat16, jnp.float32

    # init Conv2d + BN2d (single channel -> scalar scale/shift per branch)
    w0b, t0b = [], []
    for p in branches:
        s, t = _fold_bn_scale_shift(p["init_b"], p["init_bn"])
        tap = (p["init_w"][0, 0] * s[0])[:, :, None]                 # (K, T, 1)
        w0b.append(_block_diag_same(tap, g))                         # (K, G*T, G)
        t0b.append(jnp.full((1, g), t[0], f32))
    ops = [jnp.stack(w0b).astype(bf16), jnp.stack(t0b).astype(f32)]

    # conv1..conv5 (+ BN1d)
    for li in range(1, 6):
        wb, tb = [], []
        for p in branches:
            s, t = _fold_bn_scale_shift(p[f"b{li}"], p[f"bn{li}"])
            w = p[f"w{li}"] * s[:, None, None]                       # (Cout, Cin, K)
            tap = jnp.transpose(w, (2, 1, 0))                        # (K, Cin, Cout)
            wb.append(_block_diag_same(tap, g))
            tb.append(jnp.tile(t, g)[None, :])                       # (1, G*Cout)
        ops += [jnp.stack(wb).astype(bf16), jnp.stack(tb).astype(f32)]

    # fc_final ∘ AvgPool1d(2) ∘ fc_cls folded into a (6, G*60) per-lane weight map.
    c5 = _CHANNELS[-1][1]                                            # 60
    l = length
    for s in _STRIDES:
        l = (l + 2 * _PAD - _K) // s + 1
    n_pool = l // 2
    assert 2 * n_pool == l and n_pool * c5 == branches[0]["fcf_w"].shape[1], (
        "length is inconsistent with the module's hard-coded reshape(-1, 180)")
    wc = params["cls_w"].reshape(-1)                                 # (1024,)
    d = branches[0]["fcf_w"].shape[0]                                # 512
    vmaps = []
    zconst = params["cls_b"].reshape(())
    for bi, p in enumerate(branches):
        wslice = wc[bi * d:(bi + 1) * d]
        v = wslice @ p["fcf_w"]                                      # (180,)
        zconst = zconst + wslice @ p["fcf_b"]
        vm = v.reshape(c5, n_pool).T                                 # (3, 60)  [j, c]
        vm6 = 0.5 * jnp.repeat(vm, 2, axis=0)                        # (6, 60)  row r -> j=r//2
        vmaps.append(jnp.tile(vm6, (1, g)))                          # (6, G*60)
    ones_red = jnp.kron(jnp.eye(g, dtype=f32), jnp.ones((c5, 1), f32))   # (G*60, G)
    ops += [jnp.stack(vmaps).astype(f32), ones_red, zconst.reshape(1, 1).astype(f32)]
    return tuple(ops)


# ============================================================================
# Forward wrapper (single pallas_call, grid = (sample groups, branch))
# ============================================================================
def _pack_inputs(x, y, g_pairs):
    """(N,1,L,T) x 2 -> (2*N//G, L + 2*PAD, G*T) bf16.
    Group axis: x-sample groups first, then y-sample groups; within a group the lane
    order is (pair-major, type-minor), matching the block-diagonal weights."""
    n, _, length, typ = x.shape
    pairs = jnp.concatenate([x, y], axis=0)[:, 0]                    # (2N, L, T)
    grp = pairs.reshape(2 * n // g_pairs, g_pairs, length, typ)
    grp = jnp.transpose(grp, (0, 2, 1, 3)).reshape(2 * n // g_pairs, length,
                                                   g_pairs * typ)
    grp = jnp.pad(grp, ((0, 0), (_PAD, _PAD), (0, 0)))
    return grp.astype(jnp.bfloat16)


def basic_net_forward(ops, x, y):
    """x, y: (N, 1, length, type) float32 (NCHW, same as the PyTorch module)."""
    (w0, t0, w1, t1, w2, t2, w3, t3, w4, t4, w5, t5, vmap, ones_red, z0) = ops
    n_batch, _, length, typ = x.shape
    g_pairs = ones_red.shape[1]            # samples (pairs of one branch) per grid step
    assert n_batch % g_pairs == 0
    gpb = n_batch // g_pairs               # sample-groups per branch

    xpk = _pack_inputs(x, y, g_pairs)      # (2*gpb, L + 4, G*T) bf16

    lens = [length]
    for s in _STRIDES:
        lens.append((lens[-1] + 2 * _PAD - _K) // s + 1)
    c_in = tuple(ci for ci, _ in _CHANNELS)                          # (1, 4, 8, 16, 32)

    def _branch_spec(a):                   # operand indexed by branch (grid axis 1)
        zeros = (0,) * (a.ndim - 1)

        def imap(i, br):
            return (br,) + zeros
        return pl.BlockSpec((None,) + tuple(a.shape[1:]), imap)

    def _fixed_spec(a):                    # same block for every grid step
        zeros = (0,) * a.ndim

        def imap(i, br):
            return zeros
        return pl.BlockSpec(tuple(a.shape), imap)

    in_specs = [
        pl.BlockSpec((None, length + 2 * _PAD, g_pairs * typ),
                     lambda i, br: (br * gpb + i, 0, 0)),
        _branch_spec(w0), _branch_spec(t0),
        _branch_spec(w1), _branch_spec(t1),
        _branch_spec(w2), _branch_spec(t2),
        _branch_spec(w3), _branch_spec(t3),
        _branch_spec(w4), _branch_spec(t4),
        _branch_spec(w5), _branch_spec(t5),
        _branch_spec(vmap),
        _fixed_spec(ones_red),
        _fixed_spec(z0),
    ]
    scratch = [pltpu.VMEM((lens[li] + _LEAD + _TRAIL, g_pairs * c_in[li]), jnp.float32)
               for li in range(5)]
    scratch.append(pltpu.VMEM((1, g_pairs), jnp.float32))            # logit accumulator

    out = pl.pallas_call(
        _basicnet_kernel,
        out_shape=jax.ShapeDtypeStruct((gpb, 2, g_pairs), jnp.float32),
        grid_spec=pltpu.PrefetchScalarGridSpec(
            num_scalar_prefetch=0,
            grid=(gpb, 2),                 # (sample-group, branch); branch accumulates
            in_specs=in_specs,
            out_specs=pl.BlockSpec((None, 2, g_pairs), lambda i, br: (i, 0, 0)),
            scratch_shapes=scratch),
        compiler_params=pltpu.CompilerParams(
            dimension_semantics=("parallel", "arbitrary")),
    )(xpk, *ops)

    # (group, [p, 1-p], sample-in-group) -> (N, 2)
    return out.transpose(0, 2, 1).reshape(n_batch, 2)


# ============================================================================
# Pure-JAX reference (mirrors the PyTorch forward, inference-mode BN)
# ============================================================================
def _ref_feature_extractor(p, x):
    n, _, length, _ = x.shape
    s0, t0 = _fold_bn_scale_shift(p["init_b"], p["init_bn"])
    xp = jnp.pad(x[:, 0], ((0, 0), (_PAD, _PAD), (0, 0)))             # (N, L+4, T)
    w0 = p["init_w"][0, 0]                                            # (5, T)
    h = sum(jnp.einsum("nlt,t->nl", xp[:, k:k + length, :], w0[k]) for k in range(_K))
    h = jnp.maximum(h * s0[0] + t0[0], 0.0)[:, None, :]               # (N, 1, L)
    for li, stride in enumerate(_STRIDES, start=1):
        w, b, bn = p[f"w{li}"], p[f"b{li}"], p[f"bn{li}"]
        c_out, c_in, k = w.shape
        l_in = h.shape[2]
        l_out = (l_in + 2 * _PAD - k) // stride + 1
        hp = jnp.pad(h, ((0, 0), (0, 0), (_PAD, _PAD)))
        cols = jnp.stack(
            [hp[:, :, kk:kk + (l_out - 1) * stride + 1:stride] for kk in range(k)],
            axis=-1)                                                  # (N, Cin, Lout, K)
        patches = cols.transpose(0, 2, 1, 3).reshape(n * l_out, c_in * k)
        sc, sh = _fold_bn_scale_shift(b, bn)
        y = jnp.maximum((patches @ w.reshape(c_out, c_in * k).T) * sc + sh, 0.0)
        h = y.reshape(n, l_out, c_out).transpose(0, 2, 1)
    c, l5 = h.shape[1], h.shape[2]
    h = h[:, :, : (l5 // 2) * 2].reshape(n, c, l5 // 2, 2).mean(axis=-1)
    flat = h.reshape(-1, p["fcf_w"].shape[1])
    return flat @ p["fcf_w"].T + p["fcf_b"]


def _ref_forward(params, x, y):
    fx = _ref_feature_extractor(params["fe_x"], x)
    fy = _ref_feature_extractor(params["fe_y"], y)
    f = jnp.concatenate([fx, fy], axis=-1)
    prob = jax.nn.sigmoid(f @ params["cls_w"].T + params["cls_b"])
    return jnp.concatenate([prob, 1.0 - prob], axis=-1)


# ============================================================================
# Deterministic parameter initialization (shapes mirror the PyTorch module)
# ============================================================================
def _uniform(key, shape, fan_in):
    bound = 1.0 / (fan_in ** 0.5)
    return jax.random.uniform(key, shape, jnp.float32, -bound, bound)


def _bn_params(key, c):
    k1, k2, k3, k4 = jax.random.split(key, 4)
    gamma = 1.0 + 0.1 * jax.random.normal(k1, (c,), jnp.float32)
    beta = 0.1 * jax.random.normal(k2, (c,), jnp.float32)
    mean = 0.1 * jax.random.normal(k3, (c,), jnp.float32)
    var = 1.0 + 0.1 * jax.random.uniform(k4, (c,), jnp.float32)
    return (gamma, beta, mean, var)


def init_fe_params(key, type_, out_dim=512):
    ks = jax.random.split(key, 20)
    p = {}
    p["init_w"] = _uniform(ks[0], (1, 1, _K, type_), _K * type_)
    p["init_b"] = _uniform(ks[1], (1,), _K * type_)
    p["init_bn"] = _bn_params(ks[2], 1)
    idx = 3
    for li, (ci, co) in enumerate(_CHANNELS, start=1):
        p[f"w{li}"] = _uniform(ks[idx], (co, ci, _K), ci * _K); idx += 1
        p[f"b{li}"] = _uniform(ks[idx], (co,), ci * _K); idx += 1
        p[f"bn{li}"] = _bn_params(ks[idx], co); idx += 1
    p["fcf_w"] = _uniform(ks[idx], (out_dim, 180), 180); idx += 1
    p["fcf_b"] = _uniform(ks[idx], (out_dim,), 180)
    return p


def init_basic_net_params(key, type_):
    kx, ky, kc1, kc2 = jax.random.split(key, 4)
    # NOTE: fc_x / fc_y exist in the PyTorch module but are unused in forward().
    return {
        "fe_x": init_fe_params(kx, type_),
        "fe_y": init_fe_params(ky, type_),
        "cls_w": _uniform(kc1, (1, 1024), 1024),
        "cls_b": _uniform(kc2, (1,), 1024),
    }


# ============================================================================
if __name__ == "__main__":
    # length=544 is the smallest DNA length consistent with the module's hard-coded
    # reshape(-1, 180): 544 -> 272 -> 136 -> 46 -> 16 -> 6 -> avgpool 3; 60 * 3 = 180.
    LENGTH, TYPE, BATCH = 544, 4, 2

    key = jax.random.PRNGKey(0)
    kp, kx, ky = jax.random.split(key, 3)
    params = init_basic_net_params(kp, TYPE)
    x = jax.random.normal(kx, (BATCH, 1, LENGTH, TYPE), jnp.float32)  # NCHW
    y = jax.random.normal(ky, (BATCH, 1, LENGTH, TYPE), jnp.float32)  # NCHW

    # One-time weight prep (BN fold / block-diag / fc+avgpool+cls fold / bf16 cast).
    ops = prepare_operands(params, n_batch=BATCH, length=LENGTH)

    fwd = jax.jit(basic_net_forward)
    out = jax.block_until_ready(fwd(ops, x, y))

    ref = _ref_forward(params, x, y)

    assert out.shape == (BATCH, 2)
    assert bool(jnp.all(jnp.isfinite(out)))
    # rows are (p, 1-p) pairs -> each row sums to 1
    assert bool(jnp.allclose(out.sum(axis=-1), 1.0, atol=1e-5))
    # bf16 inputs/conv matmuls vs f32 reference: loose tolerance on the probabilities
    assert bool(jnp.allclose(out, ref, atol=3e-2)), (out, ref)
    print("KERNEL_OK")
</pallas_src>

<mosaic_0001>
module attributes {stable_mosaic.version = 11 : i64} {
  func.func @_basicnet_kernel(%arg0: i32, %arg1: i32, %arg2: memref<1x548x8xbf16, #tpu.memory_space<vmem>>, %arg3: memref<1x5x8x2xbf16, #tpu.memory_space<vmem>>, %arg4: memref<1x1x2xf32, #tpu.memory_space<vmem>>, %arg5: memref<1x5x2x8xbf16, #tpu.memory_space<vmem>>, %arg6: memref<1x1x8xf32, #tpu.memory_space<vmem>>, %arg7: memref<1x5x8x16xbf16, #tpu.memory_space<vmem>>, %arg8: memref<1x1x16xf32, #tpu.memory_space<vmem>>, %arg9: memref<1x5x16x32xbf16, #tpu.memory_space<vmem>>, %arg10: memref<1x1x32xf32, #tpu.memory_space<vmem>>, %arg11: memref<1x5x32x64xbf16, #tpu.memory_space<vmem>>, %arg12: memref<1x1x64xf32, #tpu.memory_space<vmem>>, %arg13: memref<1x5x64x120xbf16, #tpu.memory_space<vmem>>, %arg14: memref<1x1x120xf32, #tpu.memory_space<vmem>>, %arg15: memref<1x6x120xf32, #tpu.memory_space<vmem>>, %arg16: memref<120x2xf32, #tpu.memory_space<vmem>>, %arg17: memref<1x1xf32, #tpu.memory_space<vmem>>, %arg18: memref<1x2x2xf32, #tpu.memory_space<vmem>>, %arg19: memref<554x2xf32, #tpu.memory_space<vmem>>, %arg20: memref<282x8xf32, #tpu.memory_space<vmem>>, %arg21: memref<146x16xf32, #tpu.memory_space<vmem>>, %arg22: memref<56x32xf32, #tpu.memory_space<vmem>>, %arg23: memref<26x64xf32, #tpu.memory_space<vmem>>, %arg24: memref<1x2xf32, #tpu.memory_space<vmem>>) attributes {dimension_semantics = [#tpu.dimension_semantics<parallel>, #tpu.dimension_semantics<arbitrary>], iteration_bounds = array<i64: 1, 2>, scalar_prefetch = 0 : i64, scratch_operands = 6 : i64, tpu.core_type = #tpu.core_type<tc>, window_params = [{transform_indices = @transform_0, window_bounds = array<i64: 1, 548, 8>}, {transform_indices = @transform_1, window_bounds = array<i64: 1, 5, 8, 2>}, {transform_indices = @transform_2, window_bounds = array<i64: 1, 1, 2>}, {transform_indices = @transform_3, window_bounds = array<i64: 1, 5, 2, 8>}, {transform_indices = @transform_4, window_bounds = array<i64: 1, 1, 8>}, {transform_indices = @transform_5, window_bounds = array<i64: 1, 5, 8, 16>}, {transform_indices = @transform_6, window_bounds = array<i64: 1, 1, 16>}, {transform_indices = @transform_7, window_bounds = array<i64: 1, 5, 16, 32>}, {transform_indices = @transform_8, window_bounds = array<i64: 1, 1, 32>}, {transform_indices = @transform_9, window_bounds = array<i64: 1, 5, 32, 64>}, {transform_indices = @transform_10, window_bounds = array<i64: 1, 1, 64>}, {transform_indices = @transform_11, window_bounds = array<i64: 1, 5, 64, 120>}, {transform_indices = @transform_12, window_bounds = array<i64: 1, 1, 120>}, {transform_indices = @transform_13, window_bounds = array<i64: 1, 6, 120>}, {pipeline_mode = #tpu.pipeline_mode<synchronous>, transform_indices = @transform_14, window_bounds = array<i64: 120, 2>}, {pipeline_mode = #tpu.pipeline_mode<synchronous>, transform_indices = @transform_15, window_bounds = array<i64: 1, 1>}, {transform_indices = @transform_16, window_bounds = array<i64: 1, 2, 2>}]} {
    %c0 = arith.constant 0 : index
    %c0_0 = arith.constant 0 : index
    %c0_1 = arith.constant 0 : index
    %0 = vector.load %arg2[%c0, %c0_0, %c0_1] : memref<1x548x8xbf16, #tpu.memory_space<vmem>>, vector<1x544x8xbf16>
    %1 = vector.shape_cast %0 : vector<1x544x8xbf16> to vector<544x8xbf16>
    %c0_2 = arith.constant 0 : index
    %c0_3 = arith.constant 0 : index
    %c0_4 = arith.constant 0 : index
    %c0_5 = arith.constant 0 : index
    %2 = vector.load %arg3[%c0_2, %c0_3, %c0_4, %c0_5] : memref<1x5x8x2xbf16, #tpu.memory_space<vmem>>, vector<1x1x8x2xbf16>
    %3 = vector.shape_cast %2 : vector<1x1x8x2xbf16> to vector<8x2xbf16>
    %cst = arith.constant dense<0.000000e+00> : vector<544x2xf32>
    %4 = tpu.matmul %1, %3, %cst {dimension_numbers = #tpu.dot_dimension_numbers<[1], [0], [0], [1], [0, 0, 1, 1], [], []>} : vector<544x8xbf16>, vector<8x2xbf16>, vector<544x2xf32> -> vector<544x2xf32>
    %c0_6 = arith.constant 0 : index
    %c1 = arith.constant 1 : index
    %c0_7 = arith.constant 0 : index
    %5 = vector.load %arg2[%c0_6, %c1, %c0_7] : memref<1x548x8xbf16, #tpu.memory_space<vmem>>, vector<1x544x8xbf16>
    %6 = vector.shape_cast %5 : vector<1x544x8xbf16> to vector<544x8xbf16>
    %c0_8 = arith.constant 0 : index
    %c1_9 = arith.constant 1 : index
    %c0_10 = arith.constant 0 : index
    %c0_11 = arith.constant 0 : index
    %7 = vector.load %arg3[%c0_8, %c1_9, %c0_10, %c0_11] : memref<1x5x8x2xbf16, #tpu.memory_space<vmem>>, vector<1x1x8x2xbf16>
    %8 = vector.shape_cast %7 : vector<1x1x8x2xbf16> to vector<8x2xbf16>
    %cst_12 = arith.constant dense<0.000000e+00> : vector<544x2xf32>
    %9 = tpu.matmul %6, %8, %cst_12 {dimension_numbers = #tpu.dot_dimension_numbers<[1], [0], [0], [1], [0, 0, 1, 1], [], []>} : vector<544x8xbf16>, vector<8x2xbf16>, vector<544x2xf32> -> vector<544x2xf32>
    %10 = arith.addf %4, %9 : vector<544x2xf32>
    %c0_13 = arith.constant 0 : index
    %c2 = arith.constant 2 : index
    %c0_14 = arith.constant 0 : index
    %11 = vector.load %arg2[%c0_13, %c2, %c0_14] : memref<1x548x8xbf16, #tpu.memory_space<vmem>>, vector<1x544x8xbf16>
    %12 = vector.shape_cast %11 : vector<1x544x8xbf16> to vector<544x8xbf16>
    %c0_15 = arith.constant 0 : index
    %c2_16 = arith.constant 2 : index
    %c0_17 = arith.constant 0 : index
    %c0_18 = arith.constant 0 : index
    %13 = vector.load %arg3[%c0_15, %c2_16, %c0_17, %c0_18] : memref<1x5x8x2xbf16, #tpu.memory_space<vmem>>, vector<1x1x8x2xbf16>
    %14 = vector.shape_cast %13 : vector<1x1x8x2xbf16> to vector<8x2xbf16>
    %cst_19 = arith.constant dense<0.000000e+00> : vector<544x2xf32>
    %15 = tpu.matmul %12, %14, %cst_19 {dimension_numbers = #tpu.dot_dimension_numbers<[1], [0], [0], [1], [0, 0, 1, 1], [], []>} : vector<544x8xbf16>, vector<8x2xbf16>, vector<544x2xf32> -> vector<544x2xf32>
    %16 = arith.addf %10, %15 : vector<544x2xf32>
    %c0_20 = arith.constant 0 : index
    %c3 = arith.constant 3 : index
    %c0_21 = arith.constant 0 : index
    %17 = vector.load %arg2[%c0_20, %c3, %c0_21] : memref<1x548x8xbf16, #tpu.memory_space<vmem>>, vector<1x544x8xbf16>
    %18 = vector.shape_cast %17 : vector<1x544x8xbf16> to vector<544x8xbf16>
    %c0_22 = arith.constant 0 : index
    %c3_23 = arith.constant 3 : index
    %c0_24 = arith.constant 0 : index
    %c0_25 = arith.constant 0 : index
    %19 = vector.load %arg3[%c0_22, %c3_23, %c0_24, %c0_25] : memref<1x5x8x2xbf16, #tpu.memory_space<vmem>>, vector<1x1x8x2xbf16>
    %20 = vector.shape_cast %19 : vector<1x1x8x2xbf16> to vector<8x2xbf16>
    %cst_26 = arith.constant dense<0.000000e+00> : vector<544x2xf32>
    %21 = tpu.matmul %18, %20, %cst_26 {dimension_numbers = #tpu.dot_dimension_numbers<[1], [0], [0], [1], [0, 0, 1, 1], [], []>} : vector<544x8xbf16>, vector<8x2xbf16>, vector<544x2xf32> -> vector<544x2xf32>
    %22 = arith.addf %16, %21 : vector<544x2xf32>
    %c0_27 = arith.constant 0 : index
    %c4 = arith.constant 4 : index
    %c0_28 = arith.constant 0 : index
    %23 = vector.load %arg2[%c0_27, %c4, %c0_28] : memref<1x548x8xbf16, #tpu.memory_space<vmem>>, vector<1x544x8xbf16>
    %24 = vector.shape_cast %23 : vector<1x544x8xbf16> to vector<544x8xbf16>
    %c0_29 = arith.constant 0 : index
    %c4_30 = arith.constant 4 : index
    %c0_31 = arith.constant 0 : index
    %c0_32 = arith.constant 0 : index
    %25 = vector.load %arg3[%c0_29, %c4_30, %c0_31, %c0_32] : memref<1x5x8x2xbf16, #tpu.memory_space<vmem>>, vector<1x1x8x2xbf16>
    %26 = vector.shape_cast %25 : vector<1x1x8x2xbf16> to vector<8x2xbf16>
    %cst_33 = arith.constant dense<0.000000e+00> : vector<544x2xf32>
    %27 = tpu.matmul %24, %26, %cst_33 {dimension_numbers = #tpu.dot_dimension_numbers<[1], [0], [0], [1], [0, 0, 1, 1], [], []>} : vector<544x8xbf16>, vector<8x2xbf16>, vector<544x2xf32> -> vector<544x2xf32>
    %28 = arith.addf %22, %27 : vector<544x2xf32>
    %c0_34 = arith.constant 0 : index
    %c0_35 = arith.constant 0 : index
    %c0_36 = arith.constant 0 : index
    %29 = vector.load %arg4[%c0_34, %c0_35, %c0_36] : memref<1x1x2xf32, #tpu.memory_space<vmem>>, vector<1x1x2xf32>
    %30 = vector.shape_cast %29 : vector<1x1x2xf32> to vector<1x2xf32>
    %31 = vector.broadcast %30 : vector<1x2xf32> to vector<544x2xf32>
    %32 = arith.addf %28, %31 : vector<544x2xf32>
    %cst_37 = arith.constant 0.000000e+00 : f32
    %33 = vector.broadcast %cst_37 : f32 to vector<544x2xf32>
    %34 = arith.maximumf %32, %33 : vector<544x2xf32>
    %cst_38 = arith.constant 0.000000e+00 : f32
    %35 = vector.broadcast %cst_38 : f32 to vector<8x2xf32>
    %c0_39 = arith.constant 0 : index
    %c0_40 = arith.constant 0 : index
    %36 = vector.load %arg19[%c0_39, %c0_40] : memref<554x2xf32, #tpu.memory_space<vmem>>, vector<8x2xf32>
    tpu.vector_store %arg19[%c0_39, %c0_40], %35 {strides = array<i32>} : memref<554x2xf32, #tpu.memory_space<vmem>>, vector<8x2xf32>,
    %c8 = arith.constant 8 : index
    %c0_41 = arith.constant 0 : index
    %37 = vector.load %arg19[%c8, %c0_41] : memref<554x2xf32, #tpu.memory_space<vmem>>, vector<544x2xf32>
    tpu.vector_store %arg19[%c8, %c0_41], %34 {strides = array<i32>} : memref<554x2xf32, #tpu.memory_space<vmem>>, vector<544x2xf32>,
    %cst_42 = arith.constant 0.000000e+00 : f32
    %38 = vector.broadcast %cst_42 : f32 to vector<2x2xf32>
    %c552 = arith.constant 552 : index
    %c0_43 = arith.constant 0 : index
    %39 = vector.load %arg19[%c552, %c0_43] : memref<554x2xf32, #tpu.memory_space<vmem>>, vector<2x2xf32>
    tpu.vector_store %arg19[%c552, %c0_43], %38 {strides = array<i32>} : memref<554x2xf32, #tpu.memory_space<vmem>>, vector<2x2xf32>,
    %c6 = arith.constant 6 : index
    %c0_44 = arith.constant 0 : index
    %40 = tpu.strided_load %arg19[%c6, %c0_44] {strides = array<i32: 2, 1>} : memref<554x2xf32, #tpu.memory_space<vmem>>, vector<272x2xf32>
    %41 = arith.truncf %40 : vector<272x2xf32> to vector<272x2xbf16>
    %c0_45 = arith.constant 0 : index
    %c0_46 = arith.constant 0 : index
    %c0_47 = arith.constant 0 : index
    %c0_48 = arith.constant 0 : index
    %42 = vector.load %arg5[%c0_45, %c0_46, %c0_47, %c0_48] : memref<1x5x2x8xbf16, #tpu.memory_space<vmem>>, vector<1x1x2x8xbf16>
    %43 = vector.shape_cast %42 : vector<1x1x2x8xbf16> to vector<2x8xbf16>
    %cst_49 = arith.constant dense<0.000000e+00> : vector<272x8xf32>
    %44 = tpu.matmul %41, %43, %cst_49 {dimension_numbers = #tpu.dot_dimension_numbers<[1], [0], [0], [1], [0, 0, 1, 1], [], []>} : vector<272x2xbf16>, vector<2x8xbf16>, vector<272x8xf32> -> vector<272x8xf32>
    %c7 = arith.constant 7 : index
    %c0_50 = arith.constant 0 : index
    %45 = tpu.strided_load %arg19[%c7, %c0_50] {strides = array<i32: 2, 1>} : memref<554x2xf32, #tpu.memory_space<vmem>>, vector<272x2xf32>
    %46 = arith.truncf %45 : vector<272x2xf32> to vector<272x2xbf16>
    %c0_51 = arith.constant 0 : index
    %c1_52 = arith.constant 1 : index
    %c0_53 = arith.constant 0 : index
    %c0_54 = arith.constant 0 : index
    %47 = vector.load %arg5[%c0_51, %c1_52, %c0_53, %c0_54] : memref<1x5x2x8xbf16, #tpu.memory_space<vmem>>, vector<1x1x2x8xbf16>
    %48 = vector.shape_cast %47 : vector<1x1x2x8xbf16> to vector<2x8xbf16>
    %cst_55 = arith.constant dense<0.000000e+00> : vector<272x8xf32>
    %49 = tpu.matmul %46, %48, %cst_55 {dimension_numbers = #tpu.dot_dimension_numbers<[1], [0], [0], [1], [0, 0, 1, 1], [], []>} : vector<272x2xbf16>, vector<2x8xbf16>, vector<272x8xf32> -> vector<272x8xf32>
    %50 = arith.addf %44, %49 : vector<272x8xf32>
    %c8_56 = arith.constant 8 : index
    %c0_57 = arith.constant 0 : index
    %51 = tpu.strided_load %arg19[%c8_56, %c0_57] {strides = array<i32: 2, 1>} : memref<554x2xf32, #tpu.memory_space<vmem>>, vector<272x2xf32>
    %52 = arith.truncf %51 : vector<272x2xf32> to vector<272x2xbf16>
    %c0_58 = arith.constant 0 : index
    %c2_59 = arith.constant 2 : index
    %c0_60 = arith.constant 0 : index
    %c0_61 = arith.constant 0 : index
    %53 = vector.load %arg5[%c0_58, %c2_59, %c0_60, %c0_61] : memref<1x5x2x8xbf16, #tpu.memory_space<vmem>>, vector<1x1x2x8xbf16>
    %54 = vector.shape_cast %53 : vector<1x1x2x8xbf16> to vector<2x8xbf16>
    %cst_62 = arith.constant dense<0.000000e+00> : vector<272x8xf32>
    %55 = tpu.matmul %52, %54, %cst_62 {dimension_numbers = #tpu.dot_dimension_numbers<[1], [0], [0], [1], [0, 0, 1, 1], [], []>} : vector<272x2xbf16>, vector<2x8xbf16>, vector<272x8xf32> -> vector<272x8xf32>
    %56 = arith.addf %50, %55 : vector<272x8xf32>
    %c9 = arith.constant 9 : index
    %c0_63 = arith.constant 0 : index
    %57 = tpu.strided_load %arg19[%c9, %c0_63] {strides = array<i32: 2, 1>} : memref<554x2xf32, #tpu.memory_space<vmem>>, vector<272x2xf32>
    %58 = arith.truncf %57 : vector<272x2xf32> to vector<272x2xbf16>
    %c0_64 = arith.constant 0 : index
    %c3_65 = arith.constant 3 : index
    %c0_66 = arith.constant 0 : index
    %c0_67 = arith.constant 0 : index
    %59 = vector.load %arg5[%c0_64, %c3_65, %c0_66, %c0_67] : memref<1x5x2x8xbf16, #tpu.memory_space<vmem>>, vector<1x1x2x8xbf16>
    %60 = vector.shape_cast %59 : vector<1x1x2x8xbf16> to vector<2x8xbf16>
    %cst_68 = arith.constant dense<0.000000e+00> : vector<272x8xf32>
    %61 = tpu.matmul %58, %60, %cst_68 {dimension_numbers = #tpu.dot_dimension_numbers<[1], [0], [0], [1], [0, 0, 1, 1], [], []>} : vector<272x2xbf16>, vector<2x8xbf16>, vector<272x8xf32> -> vector<272x8xf32>
    %62 = arith.addf %56, %61 : vector<272x8xf32>
    %c10 = arith.constant 10 : index
    %c0_69 = arith.constant 0 : index
    %63 = tpu.strided_load %arg19[%c10, %c0_69] {strides = array<i32: 2, 1>} : memref<554x2xf32, #tpu.memory_space<vmem>>, vector<272x2xf32>
    %64 = arith.truncf %63 : vector<272x2xf32> to vector<272x2xbf16>
    %c0_70 = arith.constant 0 : index
    %c4_71 = arith.constant 4 : index
    %c0_72 = arith.constant 0 : index
    %c0_73 = arith.constant 0 : index
    %65 = vector.load %arg5[%c0_70, %c4_71, %c0_72, %c0_73] : memref<1x5x2x8xbf16, #tpu.memory_space<vmem>>, vector<1x1x2x8xbf16>
    %66 = vector.shape_cast %65 : vector<1x1x2x8xbf16> to vector<2x8xbf16>
    %cst_74 = arith.constant dense<0.000000e+00> : vector<272x8xf32>
    %67 = tpu.matmul %64, %66, %cst_74 {dimension_numbers = #tpu.dot_dimension_numbers<[1], [0], [0], [1], [0, 0, 1, 1], [], []>} : vector<272x2xbf16>, vector<2x8xbf16>, vector<272x8xf32> -> vector<272x8xf32>
    %68 = arith.addf %62, %67 : vector<272x8xf32>
    %c0_75 = arith.constant 0 : index
    %c0_76 = arith.constant 0 : index
    %c0_77 = arith.constant 0 : index
    %69 = vector.load %arg6[%c0_75, %c0_76, %c0_77] : memref<1x1x8xf32, #tpu.memory_space<vmem>>, vector<1x1x8xf32>
    %70 = vector.shape_cast %69 : vector<1x1x8xf32> to vector<1x8xf32>
    %71 = vector.broadcast %70 : vector<1x8xf32> to vector<272x8xf32>
    %72 = arith.addf %68, %71 : vector<272x8xf32>
    %cst_78 = arith.constant 0.000000e+00 : f32
    %73 = vector.broadcast %cst_78 : f32 to vector<272x8xf32>
    %74 = arith.maximumf %72, %73 : vector<272x8xf32>
    %cst_79 = arith.constant 0.000000e+00 : f32
    %75 = vector.broadcast %cst_79 : f32 to vector<8x8xf32>
    %c0_80 = arith.constant 0 : index
    %c0_81 = arith.constant 0 : index
    %76 = vector.load %arg20[%c0_80, %c0_81] : memref<282x8xf32, #tpu.memory_space<vmem>>, vector<8x8xf32>
    tpu.vector_store %arg20[%c0_80, %c0_81], %75 {strides = array<i32>} : memref<282x8xf32, #tpu.memory_space<vmem>>, vector<8x8xf32>,
    %c8_82 = arith.constant 8 : index
    %c0_83 = arith.constant 0 : index
    %77 = vector.load %arg20[%c8_82, %c0_83] : memref<282x8xf32, #tpu.memory_space<vmem>>, vector<272x8xf32>
    tpu.vector_store %arg20[%c8_82, %c0_83], %74 {strides = array<i32>} : memref<282x8xf32, #tpu.memory_space<vmem>>, vector<272x8xf32>,
    %cst_84 = arith.constant 0.000000e+00 : f32
    %78 = vector.broadcast %cst_84 : f32 to vector<2x8xf32>
    %c280 = arith.constant 280 : index
    %c0_85 = arith.constant 0 : index
    %79 = vector.load %arg20[%c280, %c0_85] : memref<282x8xf32, #tpu.memory_space<vmem>>, vector<2x8xf32>
    tpu.vector_store %arg20[%c280, %c0_85], %78 {strides = array<i32>} : memref<282x8xf32, #tpu.memory_space<vmem>>, vector<2x8xf32>,
    %c6_86 = arith.constant 6 : index
    %c0_87 = arith.constant 0 : index
    %80 = tpu.strided_load %arg20[%c6_86, %c0_87] {strides = array<i32: 2, 1>} : memref<282x8xf32, #tpu.memory_space<vmem>>, vector<136x8xf32>
    %81 = arith.truncf %80 : vector<136x8xf32> to vector<136x8xbf16>
    %c0_88 = arith.constant 0 : index
    %c0_89 = arith.constant 0 : index
    %c0_90 = arith.constant 0 : index
    %c0_91 = arith.constant 0 : index
    %82 = vector.load %arg7[%c0_88, %c0_89, %c0_90, %c0_91] : memref<1x5x8x16xbf16, #tpu.memory_space<vmem>>, vector<1x1x8x16xbf16>
    %83 = vector.shape_cast %82 : vector<1x1x8x16xbf16> to vector<8x16xbf16>
    %cst_92 = arith.constant dense<0.000000e+00> : vector<136x16xf32>
    %84 = tpu.matmul %81, %83, %cst_92 {dimension_numbers = #tpu.dot_dimension_numbers<[1], [0], [0], [1], [0, 0, 1, 1], [], []>} : vector<136x8xbf16>, vector<8x16xbf16>, vector<136x16xf32> -> vector<136x16xf32>
    %c7_93 = arith.constant 7 : index
    %c0_94 = arith.constant 0 : index
    %85 = tpu.strided_load %arg20[%c7_93, %c0_94] {strides = array<i32: 2, 1>} : memref<282x8xf32, #tpu.memory_space<vmem>>, vector<136x8xf32>
    %86 = arith.truncf %85 : vector<136x8xf32> to vector<136x8xbf16>
    %c0_95 = arith.constant 0 : index
    %c1_96 = arith.constant 1 : index
    %c0_97 = arith.constant 0 : index
    %c0_98 = arith.constant 0 : index
    %87 = vector.load %arg7[%c0_95, %c1_96, %c0_97, %c0_98] : memref<1x5x8x16xbf16, #tpu.memory_space<vmem>>, vector<1x1x8x16xbf16>
    %88 = vector.shape_cast %87 : vector<1x1x8x16xbf16> to vector<8x16xbf16>
    %cst_99 = arith.constant dense<0.000000e+00> : vector<136x16xf32>
    %89 = tpu.matmul %86, %88, %cst_99 {dimension_numbers = #tpu.dot_dimension_numbers<[1], [0], [0], [1], [0, 0, 1, 1], [], []>} : vector<136x8xbf16>, vector<8x16xbf16>, vector<136x16xf32> -> vector<136x16xf32>
    %90 = arith.addf %84, %89 : vector<136x16xf32>
    %c8_100 = arith.constant 8 : index
    %c0_101 = arith.constant 0 : index
    %91 = tpu.strided_load %arg20[%c8_100, %c0_101] {strides = array<i32: 2, 1>} : memref<282x8xf32, #tpu.memory_space<vmem>>, vector<136x8xf32>
    %92 = arith.truncf %91 : vector<136x8xf32> to vector<136x8xbf16>
    %c0_102 = arith.constant 0 : index
    %c2_103 = arith.constant 2 : index
    %c0_104 = arith.constant 0 : index
    %c0_105 = arith.constant 0 : index
    %93 = vector.load %arg7[%c0_102, %c2_103, %c0_104, %c0_105] : memref<1x5x8x16xbf16, #tpu.memory_space<vmem>>, vector<1x1x8x16xbf16>
    %94 = vector.shape_cast %93 : vector<1x1x8x16xbf16> to vector<8x16xbf16>
    %cst_106 = arith.constant dense<0.000000e+00> : vector<136x16xf32>
    %95 = tpu.matmul %92, %94, %cst_106 {dimension_numbers = #tpu.dot_dimension_numbers<[1], [0], [0], [1], [0, 0, 1, 1], [], []>} : vector<136x8xbf16>, vector<8x16xbf16>, vector<136x16xf32> -> vector<136x16xf32>
    %96 = arith.addf %90, %95 : vector<136x16xf32>
    %c9_107 = arith.constant 9 : index
    %c0_108 = arith.constant 0 : index
    %97 = tpu.strided_load %arg20[%c9_107, %c0_108] {strides = array<i32: 2, 1>} : memref<282x8xf32, #tpu.memory_space<vmem>>, vector<136x8xf32>
    %98 = arith.truncf %97 : vector<136x8xf32> to vector<136x8xbf16>
    %c0_109 = arith.constant 0 : index
    %c3_110 = arith.constant 3 : index
    %c0_111 = arith.constant 0 : index
    %c0_112 = arith.constant 0 : index
    %99 = vector.load %arg7[%c0_109, %c3_110, %c0_111, %c0_112] : memref<1x5x8x16xbf16, #tpu.memory_space<vmem>>, vector<1x1x8x16xbf16>
    %100 = vector.shape_cast %99 : vector<1x1x8x16xbf16> to vector<8x16xbf16>
    %cst_113 = arith.constant dense<0.000000e+00> : vector<136x16xf32>
    %101 = tpu.matmul %98, %100, %cst_113 {dimension_numbers = #tpu.dot_dimension_numbers<[1], [0], [0], [1], [0, 0, 1, 1], [], []>} : vector<136x8xbf16>, vector<8x16xbf16>, vector<136x16xf32> -> vector<136x16xf32>
    %102 = arith.addf %96, %101 : vector<136x16xf32>
    %c10_114 = arith.constant 10 : index
    %c0_115 = arith.constant 0 : index
    %103 = tpu.strided_load %arg20[%c10_114, %c0_115] {strides = array<i32: 2, 1>} : memref<282x8xf32, #tpu.memory_space<vmem>>, vector<136x8xf32>
    %104 = arith.truncf %103 : vector<136x8xf32> to vector<136x8xbf16>
    %c0_116 = arith.constant 0 : index
    %c4_117 = arith.constant 4 : index
    %c0_118 = arith.constant 0 : index
    %c0_119 = arith.constant 0 : index
    %105 = vector.load %arg7[%c0_116, %c4_117, %c0_118, %c0_119] : memref<1x5x8x16xbf16, #tpu.memory_space<vmem>>, vector<1x1x8x16xbf16>
    %106 = vector.shape_cast %105 : vector<1x1x8x16xbf16> to vector<8x16xbf16>
    %cst_120 = arith.constant dense<0.000000e+00> : vector<136x16xf32>
    %107 = tpu.matmul %104, %106, %cst_120 {dimension_numbers = #tpu.dot_dimension_numbers<[1], [0], [0], [1], [0, 0, 1, 1], [], []>} : vector<136x8xbf16>, vector<8x16xbf16>, vector<136x16xf32> -> vector<136x16xf32>
    %108 = arith.addf %102, %107 : vector<136x16xf32>
    %c0_121 = arith.constant 0 : index
    %c0_122 = arith.constant 0 : index
    %c0_123 = arith.constant 0 : index
    %109 = vector.load %arg8[%c0_121, %c0_122, %c0_123] : memref<1x1x16xf32, #tpu.memory_space<vmem>>, vector<1x1x16xf32>
    %110 = vector.shape_cast %109 : vector<1x1x16xf32> to vector<1x16xf32>
    %111 = vector.broadcast %110 : vector<1x16xf32> to vector<136x16xf32>
    %112 = arith.addf %108, %111 : vector<136x16xf32>
    %cst_124 = arith.constant 0.000000e+00 : f32
    %113 = vector.broadcast %cst_124 : f32 to vector<136x16xf32>
    %114 = arith.maximumf %112, %113 : vector<136x16xf32>
    %cst_125 = arith.constant 0.000000e+00 : f32
    %115 = vector.broadcast %cst_125 : f32 to vector<8x16xf32>
    %c0_126 = arith.constant 0 : index
    %c0_127 = arith.constant 0 : index
    %116 = vector.load %arg21[%c0_126, %c0_127] : memref<146x16xf32, #tpu.memory_space<vmem>>, vector<8x16xf32>
    tpu.vector_store %arg21[%c0_126, %c0_127], %115 {strides = array<i32>} : memref<146x16xf32, #tpu.memory_space<vmem>>, vector<8x16xf32>,
    %c8_128 = arith.constant 8 : index
    %c0_129 = arith.constant 0 : index
    %117 = vector.load %arg21[%c8_128, %c0_129] : memref<146x16xf32, #tpu.memory_space<vmem>>, vector<136x16xf32>
    tpu.vector_store %arg21[%c8_128, %c0_129], %114 {strides = array<i32>} : memref<146x16xf32, #tpu.memory_space<vmem>>, vector<136x16xf32>,
    %cst_130 = arith.constant 0.000000e+00 : f32
    %118 = vector.broadcast %cst_130 : f32 to vector<2x16xf32>
    %c144 = arith.constant 144 : index
    %c0_131 = arith.constant 0 : index
    %119 = vector.load %arg21[%c144, %c0_131] : memref<146x16xf32, #tpu.memory_space<vmem>>, vector<2x16xf32>
    tpu.vector_store %arg21[%c144, %c0_131], %118 {strides = array<i32>} : memref<146x16xf32, #tpu.memory_space<vmem>>, vector<2x16xf32>,
    %c6_132 = arith.constant 6 : index
    %c0_133 = arith.constant 0 : index
    %120 = tpu.strided_load %arg21[%c6_132, %c0_133] {strides = array<i32: 3, 1>} : memref<146x16xf32, #tpu.memory_space<vmem>>, vector<46x16xf32>
    %121 = arith.truncf %120 : vector<46x16xf32> to vector<46x16xbf16>
    %c0_134 = arith.constant 0 : index
    %c0_135 = arith.constant 0 : index
    %c0_136 = arith.constant 0 : index
    %c0_137 = arith.constant 0 : index
    %122 = vector.load %arg9[%c0_134, %c0_135, %c0_136, %c0_137] : memref<1x5x16x32xbf16, #tpu.memory_space<vmem>>, vector<1x1x16x32xbf16>
    %123 = vector.shape_cast %122 : vector<1x1x16x32xbf16> to vector<16x32xbf16>
    %cst_138 = arith.constant dense<0.000000e+00> : vector<46x32xf32>
    %124 = tpu.matmul %121, %123, %cst_138 {dimension_numbers = #tpu.dot_dimension_numbers<[1], [0], [0], [1], [0, 0, 1, 1], [], []>} : vector<46x16xbf16>, vector<16x32xbf16>, vector<46x32xf32> -> vector<46x32xf32>
    %c7_139 = arith.constant 7 : index
    %c0_140 = arith.constant 0 : index
    %125 = tpu.strided_load %arg21[%c7_139, %c0_140] {strides = array<i32: 3, 1>} : memref<146x16xf32, #tpu.memory_space<vmem>>, vector<46x16xf32>
    %126 = arith.truncf %125 : vector<46x16xf32> to vector<46x16xbf16>
    %c0_141 = arith.constant 0 : index
    %c1_142 = arith.constant 1 : index
    %c0_143 = arith.constant 0 : index
    %c0_144 = arith.constant 0 : index
    %127 = vector.load %arg9[%c0_141, %c1_142, %c0_143, %c0_144] : memref<1x5x16x32xbf16, #tpu.memory_space<vmem>>, vector<1x1x16x32xbf16>
    %128 = vector.shape_cast %127 : vector<1x1x16x32xbf16> to vector<16x32xbf16>
    %cst_145 = arith.constant dense<0.000000e+00> : vector<46x32xf32>
    %129 = tpu.matmul %126, %128, %cst_145 {dimension_numbers = #tpu.dot_dimension_numbers<[1], [0], [0], [1], [0, 0, 1, 1], [], []>} : vector<46x16xbf16>, vector<16x32xbf16>, vector<46x32xf32> -> vector<46x32xf32>
    %130 = arith.addf %124, %129 : vector<46x32xf32>
    %c8_146 = arith.constant 8 : index
    %c0_147 = arith.constant 0 : index
    %131 = tpu.strided_load %arg21[%c8_146, %c0_147] {strides = array<i32: 3, 1>} : memref<146x16xf32, #tpu.memory_space<vmem>>, vector<46x16xf32>
    %132 = arith.truncf %131 : vector<46x16xf32> to vector<46x16xbf16>
    %c0_148 = arith.constant 0 : index
    %c2_149 = arith.constant 2 : index
    %c0_150 = arith.constant 0 : index
    %c0_151 = arith.constant 0 : index
    %133 = vector.load %arg9[%c0_148, %c2_149, %c0_150, %c0_151] : memref<1x5x16x32xbf16, #tpu.memory_space<vmem>>, vector<1x1x16x32xbf16>
    %134 = vector.shape_cast %133 : vector<1x1x16x32xbf16> to vector<16x32xbf16>
    %cst_152 = arith.constant dense<0.000000e+00> : vector<46x32xf32>
    %135 = tpu.matmul %132, %134, %cst_152 {dimension_numbers = #tpu.dot_dimension_numbers<[1], [0], [0], [1], [0, 0, 1, 1], [], []>} : vector<46x16xbf16>, vector<16x32xbf16>, vector<46x32xf32> -> vector<46x32xf32>
    %136 = arith.addf %130, %135 : vector<46x32xf32>
    %c9_153 = arith.constant 9 : index
    %c0_154 = arith.constant 0 : index
    %137 = tpu.strided_load %arg21[%c9_153, %c0_154] {strides = array<i32: 3, 1>} : memref<146x16xf32, #tpu.memory_space<vmem>>, vector<46x16xf32>
    %138 = arith.truncf %137 : vector<46x16xf32> to vector<46x16xbf16>
    %c0_155 = arith.constant 0 : index
    %c3_156 = arith.constant 3 : index
    %c0_157 = arith.constant 0 : index
    %c0_158 = arith.constant 0 : index
    %139 = vector.load %arg9[%c0_155, %c3_156, %c0_157, %c0_158] : memref<1x5x16x32xbf16, #tpu.memory_space<vmem>>, vector<1x1x16x32xbf16>
    %140 = vector.shape_cast %139 : vector<1x1x16x32xbf16> to vector<16x32xbf16>
    %cst_159 = arith.constant dense<0.000000e+00> : vector<46x32xf32>
    %141 = tpu.matmul %138, %140, %cst_159 {dimension_numbers = #tpu.dot_dimension_numbers<[1], [0], [0], [1], [0, 0, 1, 1], [], []>} : vector<46x16xbf16>, vector<16x32xbf16>, vector<46x32xf32> -> vector<46x32xf32>
    %142 = arith.addf %136, %141 : vector<46x32xf32>
    %c10_160 = arith.constant 10 : index
    %c0_161 = arith.constant 0 : index
    %143 = tpu.strided_load %arg21[%c10_160, %c0_161] {strides = array<i32: 3, 1>} : memref<146x16xf32, #tpu.memory_space<vmem>>, vector<46x16xf32>
    %144 = arith.truncf %143 : vector<46x16xf32> to vector<46x16xbf16>
    %c0_162 = arith.constant 0 : index
    %c4_163 = arith.constant 4 : index
    %c0_164 = arith.constant 0 : index
    %c0_165 = arith.constant 0 : index
    %145 = vector.load %arg9[%c0_162, %c4_163, %c0_164, %c0_165] : memref<1x5x16x32xbf16, #tpu.memory_space<vmem>>, vector<1x1x16x32xbf16>
    %146 = vector.shape_cast %145 : vector<1x1x16x32xbf16> to vector<16x32xbf16>
    %cst_166 = arith.constant dense<0.000000e+00> : vector<46x32xf32>
    %147 = tpu.matmul %144, %146, %cst_166 {dimension_numbers = #tpu.dot_dimension_numbers<[1], [0], [0], [1], [0, 0, 1, 1], [], []>} : vector<46x16xbf16>, vector<16x32xbf16>, vector<46x32xf32> -> vector<46x32xf32>
    %148 = arith.addf %142, %147 : vector<46x32xf32>
    %c0_167 = arith.constant 0 : index
    %c0_168 = arith.constant 0 : index
    %c0_169 = arith.constant 0 : index
    %149 = vector.load %arg10[%c0_167, %c0_168, %c0_169] : memref<1x1x32xf32, #tpu.memory_space<vmem>>, vector<1x1x32xf32>
    %150 = vector.shape_cast %149 : vector<1x1x32xf32> to vector<1x32xf32>
    %151 = vector.broadcast %150 : vector<1x32xf32> to vector<46x32xf32>
    %152 = arith.addf %148, %151 : vector<46x32xf32>
    %cst_170 = arith.constant 0.000000e+00 : f32
    %153 = vector.broadcast %cst_170 : f32 to vector<46x32xf32>
    %154 = arith.maximumf %152, %153 : vector<46x32xf32>
    %cst_171 = arith.constant 0.000000e+00 : f32
    %155 = vector.broadcast %cst_171 : f32 to vector<8x32xf32>
    %c0_172 = arith.constant 0 : index
    %c0_173 = arith.constant 0 : index
    %156 = vector.load %arg22[%c0_172, %c0_173] : memref<56x32xf32, #tpu.memory_space<vmem>>, vector<8x32xf32>
    tpu.vector_store %arg22[%c0_172, %c0_173], %155 {strides = array<i32>} : memref<56x32xf32, #tpu.memory_space<vmem>>, vector<8x32xf32>,
    %c8_174 = arith.constant 8 : index
    %c0_175 = arith.constant 0 : index
    %157 = vector.load %arg22[%c8_174, %c0_175] : memref<56x32xf32, #tpu.memory_space<vmem>>, vector<46x32xf32>
    tpu.vector_store %arg22[%c8_174, %c0_175], %154 {strides = array<i32>} : memref<56x32xf32, #tpu.memory_space<vmem>>, vector<46x32xf32>,
    %cst_176 = arith.constant 0.000000e+00 : f32
    %158 = vector.broadcast %cst_176 : f32 to vector<2x32xf32>
    %c54 = arith.constant 54 : index
    %c0_177 = arith.constant 0 : index
    %159 = vector.load %arg22[%c54, %c0_177] : memref<56x32xf32, #tpu.memory_space<vmem>>, vector<2x32xf32>
    tpu.vector_store %arg22[%c54, %c0_177], %158 {strides = array<i32>} : memref<56x32xf32, #tpu.memory_space<vmem>>, vector<2x32xf32>,
    %c6_178 = arith.constant 6 : index
    %c0_179 = arith.constant 0 : index
    %160 = tpu.strided_load %arg22[%c6_178, %c0_179] {strides = array<i32: 3, 1>} : memref<56x32xf32, #tpu.memory_space<vmem>>, vector<16x32xf32>
    %161 = arith.truncf %160 : vector<16x32xf32> to vector<16x32xbf16>
    %c0_180 = arith.constant 0 : index
    %c0_181 = arith.constant 0 : index
    %c0_182 = arith.constant 0 : index
    %c0_183 = arith.constant 0 : index
    %162 = vector.load %arg11[%c0_180, %c0_181, %c0_182, %c0_183] : memref<1x5x32x64xbf16, #tpu.memory_space<vmem>>, vector<1x1x32x64xbf16>
    %163 = vector.shape_cast %162 : vector<1x1x32x64xbf16> to vector<32x64xbf16>
    %cst_184 = arith.constant dense<0.000000e+00> : vector<16x64xf32>
    %164 = tpu.matmul %161, %163, %cst_184 {dimension_numbers = #tpu.dot_dimension_numbers<[1], [0], [0], [1], [0, 0, 1, 1], [], []>} : vector<16x32xbf16>, vector<32x64xbf16>, vector<16x64xf32> -> vector<16x64xf32>
    %c7_185 = arith.constant 7 : index
    %c0_186 = arith.constant 0 : index
    %165 = tpu.strided_load %arg22[%c7_185, %c0_186] {strides = array<i32: 3, 1>} : memref<56x32xf32, #tpu.memory_space<vmem>>, vector<16x32xf32>
    %166 = arith.truncf %165 : vector<16x32xf32> to vector<16x32xbf16>
    %c0_187 = arith.constant 0 : index
    %c1_188 = arith.constant 1 : index
    %c0_189 = arith.constant 0 : index
    %c0_190 = arith.constant 0 : index
    %167 = vector.load %arg11[%c0_187, %c1_188, %c0_189, %c0_190] : memref<1x5x32x64xbf16, #tpu.memory_space<vmem>>, vector<1x1x32x64xbf16>
    %168 = vector.shape_cast %167 : vector<1x1x32x64xbf16> to vector<32x64xbf16>
    %cst_191 = arith.constant dense<0.000000e+00> : vector<16x64xf32>
    %169 = tpu.matmul %166, %168, %cst_191 {dimension_numbers = #tpu.dot_dimension_numbers<[1], [0], [0], [1], [0, 0, 1, 1], [], []>} : vector<16x32xbf16>, vector<32x64xbf16>, vector<16x64xf32> -> vector<16x64xf32>
    %170 = arith.addf %164, %169 : vector<16x64xf32>
    %c8_192 = arith.constant 8 : index
    %c0_193 = arith.constant 0 : index
    %171 = tpu.strided_load %arg22[%c8_192, %c0_193] {strides = array<i32: 3, 1>} : memref<56x32xf32, #tpu.memory_space<vmem>>, vector<16x32xf32>
    %172 = arith.truncf %171 : vector<16x32xf32> to vector<16x32xbf16>
    %c0_194 = arith.constant 0 : index
    %c2_195 = arith.constant 2 : index
    %c0_196 = arith.constant 0 : index
    %c0_197 = arith.constant 0 : index
    %173 = vector.load %arg11[%c0_194, %c2_195, %c0_196, %c0_197] : memref<1x5x32x64xbf16, #tpu.memory_space<vmem>>, vector<1x1x32x64xbf16>
    %174 = vector.shape_cast %173 : vector<1x1x32x64xbf16> to vector<32x64xbf16>
    %cst_198 = arith.constant dense<0.000000e+00> : vector<16x64xf32>
    %175 = tpu.matmul %172, %174, %cst_198 {dimension_numbers = #tpu.dot_dimension_numbers<[1], [0], [0], [1], [0, 0, 1, 1], [], []>} : vector<16x32xbf16>, vector<32x64xbf16>, vector<16x64xf32> -> vector<16x64xf32>
    %176 = arith.addf %170, %175 : vector<16x64xf32>
    %c9_199 = arith.constant 9 : index
    %c0_200 = arith.constant 0 : index
    %177 = tpu.strided_load %arg22[%c9_199, %c0_200] {strides = array<i32: 3, 1>} : memref<56x32xf32, #tpu.memory_space<vmem>>, vector<16x32xf32>
    %178 = arith.truncf %177 : vector<16x32xf32> to vector<16x32xbf16>
    %c0_201 = arith.constant 0 : index
    %c3_202 = arith.constant 3 : index
    %c0_203 = arith.constant 0 : index
    %c0_204 = arith.constant 0 : index
    %179 = vector.load %arg11[%c0_201, %c3_202, %c0_203, %c0_204] : memref<1x5x32x64xbf16, #tpu.memory_space<vmem>>, vector<1x1x32x64xbf16>
    %180 = vector.shape_cast %179 : vector<1x1x32x64xbf16> to vector<32x64xbf16>
    %cst_205 = arith.constant dense<0.000000e+00> : vector<16x64xf32>
    %181 = tpu.matmul %178, %180, %cst_205 {dimension_numbers = #tpu.dot_dimension_numbers<[1], [0], [0], [1], [0, 0, 1, 1], [], []>} : vector<16x32xbf16>, vector<32x64xbf16>, vector<16x64xf32> -> vector<16x64xf32>
    %182 = arith.addf %176, %181 : vector<16x64xf32>
    %c10_206 = arith.constant 10 : index
    %c0_207 = arith.constant 0 : index
    %183 = tpu.strided_load %arg22[%c10_206, %c0_207] {strides = array<i32: 3, 1>} : memref<56x32xf32, #tpu.memory_space<vmem>>, vector<16x32xf32>
    %184 = arith.truncf %183 : vector<16x32xf32> to vector<16x32xbf16>
    %c0_208 = arith.constant 0 : index
    %c4_209 = arith.constant 4 : index
    %c0_210 = arith.constant 0 : index
    %c0_211 = arith.constant 0 : index
    %185 = vector.load %arg11[%c0_208, %c4_209, %c0_210, %c0_211] : memref<1x5x32x64xbf16, #tpu.memory_space<vmem>>, vector<1x1x32x64xbf16>
    %186 = vector.shape_cast %185 : vector<1x1x32x64xbf16> to vector<32x64xbf16>
    %cst_212 = arith.constant dense<0.000000e+00> : vector<16x64xf32>
    %187 = tpu.matmul %184, %186, %cst_212 {dimension_numbers = #tpu.dot_dimension_numbers<[1], [0], [0], [1], [0, 0, 1, 1], [], []>} : vector<16x32xbf16>, vector<32x64xbf16>, vector<16x64xf32> -> vector<16x64xf32>
    %188 = arith.addf %182, %187 : vector<16x64xf32>
    %c0_213 = arith.constant 0 : index
    %c0_214 = arith.constant 0 : index
    %c0_215 = arith.constant 0 : index
    %189 = vector.load %arg12[%c0_213, %c0_214, %c0_215] : memref<1x1x64xf32, #tpu.memory_space<vmem>>, vector<1x1x64xf32>
    %190 = vector.shape_cast %189 : vector<1x1x64xf32> to vector<1x64xf32>
    %191 = vector.broadcast %190 : vector<1x64xf32> to vector<16x64xf32>
    %192 = arith.addf %188, %191 : vector<16x64xf32>
    %cst_216 = arith.constant 0.000000e+00 : f32
    %193 = vector.broadcast %cst_216 : f32 to vector<16x64xf32>
    %194 = arith.maximumf %192, %193 : vector<16x64xf32>
    %cst_217 = arith.constant 0.000000e+00 : f32
    %195 = vector.broadcast %cst_217 : f32 to vector<8x64xf32>
    %c0_218 = arith.constant 0 : index
    %c0_219 = arith.constant 0 : index
    %196 = vector.load %arg23[%c0_218, %c0_219] : memref<26x64xf32, #tpu.memory_space<vmem>>, vector<8x64xf32>
    tpu.vector_store %arg23[%c0_218, %c0_219], %195 {strides = array<i32>} : memref<26x64xf32, #tpu.memory_space<vmem>>, vector<8x64xf32>,
    %c8_220 = arith.constant 8 : index
    %c0_221 = arith.constant 0 : index
    %197 = vector.load %arg23[%c8_220, %c0_221] : memref<26x64xf32, #tpu.memory_space<vmem>>, vector<16x64xf32>
    tpu.vector_store %arg23[%c8_220, %c0_221], %194 {strides = array<i32>} : memref<26x64xf32, #tpu.memory_space<vmem>>, vector<16x64xf32>,
    %cst_222 = arith.constant 0.000000e+00 : f32
    %198 = vector.broadcast %cst_222 : f32 to vector<2x64xf32>
    %c24 = arith.constant 24 : index
    %c0_223 = arith.constant 0 : index
    %199 = vector.load %arg23[%c24, %c0_223] : memref<26x64xf32, #tpu.memory_space<vmem>>, vector<2x64xf32>
    tpu.vector_store %arg23[%c24, %c0_223], %198 {strides = array<i32>} : memref<26x64xf32, #tpu.memory_space<vmem>>, vector<2x64xf32>,
    %c6_224 = arith.constant 6 : index
    %c0_225 = arith.constant 0 : index
    %200 = tpu.strided_load %arg23[%c6_224, %c0_225] {strides = array<i32: 3, 1>} : memref<26x64xf32, #tpu.memory_space<vmem>>, vector<6x64xf32>
    %201 = arith.truncf %200 : vector<6x64xf32> to vector<6x64xbf16>
    %c0_226 = arith.constant 0 : index
    %c0_227 = arith.constant 0 : index
    %c0_228 = arith.constant 0 : index
    %c0_229 = arith.constant 0 : index
    %202 = vector.load %arg13[%c0_226, %c0_227, %c0_228, %c0_229] : memref<1x5x64x120xbf16, #tpu.memory_space<vmem>>, vector<1x1x64x120xbf16>
    %203 = vector.shape_cast %202 : vector<1x1x64x120xbf16> to vector<64x120xbf16>
    %cst_230 = arith.constant dense<0.000000e+00> : vector<6x120xf32>
    %204 = tpu.matmul %201, %203, %cst_230 {dimension_numbers = #tpu.dot_dimension_numbers<[1], [0], [0], [1], [0, 0, 1, 1], [], []>} : vector<6x64xbf16>, vector<64x120xbf16>, vector<6x120xf32> -> vector<6x120xf32>
    %c7_231 = arith.constant 7 : index
    %c0_232 = arith.constant 0 : index
    %205 = tpu.strided_load %arg23[%c7_231, %c0_232] {strides = array<i32: 3, 1>} : memref<26x64xf32, #tpu.memory_space<vmem>>, vector<6x64xf32>
    %206 = arith.truncf %205 : vector<6x64xf32> to vector<6x64xbf16>
    %c0_233 = arith.constant 0 : index
    %c1_234 = arith.constant 1 : index
    %c0_235 = arith.constant 0 : index
    %c0_236 = arith.constant 0 : index
    %207 = vector.load %arg13[%c0_233, %c1_234, %c0_235, %c0_236] : memref<1x5x64x120xbf16, #tpu.memory_space<vmem>>, vector<1x1x64x120xbf16>
    %208 = vector.shape_cast %207 : vector<1x1x64x120xbf16> to vector<64x120xbf16>
    %cst_237 = arith.constant dense<0.000000e+00> : vector<6x120xf32>
    %209 = tpu.matmul %206, %208, %cst_237 {dimension_numbers = #tpu.dot_dimension_numbers<[1], [0], [0], [1], [0, 0, 1, 1], [], []>} : vector<6x64xbf16>, vector<64x120xbf16>, vector<6x120xf32> -> vector<6x120xf32>
    %210 = arith.addf %204, %209 : vector<6x120xf32>
    %c8_238 = arith.constant 8 : index
    %c0_239 = arith.constant 0 : index
    %211 = tpu.strided_load %arg23[%c8_238, %c0_239] {strides = array<i32: 3, 1>} : memref<26x64xf32, #tpu.memory_space<vmem>>, vector<6x64xf32>
    %212 = arith.truncf %211 : vector<6x64xf32> to vector<6x64xbf16>
    %c0_240 = arith.constant 0 : index
    %c2_241 = arith.constant 2 : index
    %c0_242 = arith.constant 0 : index
    %c0_243 = arith.constant 0 : index
    %213 = vector.load %arg13[%c0_240, %c2_241, %c0_242, %c0_243] : memref<1x5x64x120xbf16, #tpu.memory_space<vmem>>, vector<1x1x64x120xbf16>
    %214 = vector.shape_cast %213 : vector<1x1x64x120xbf16> to vector<64x120xbf16>
    %cst_244 = arith.constant dense<0.000000e+00> : vector<6x120xf32>
    %215 = tpu.matmul %212, %214, %cst_244 {dimension_numbers = #tpu.dot_dimension_numbers<[1], [0], [0], [1], [0, 0, 1, 1], [], []>} : vector<6x64xbf16>, vector<64x120xbf16>, vector<6x120xf32> -> vector<6x120xf32>
    %216 = arith.addf %210, %215 : vector<6x120xf32>
    %c9_245 = arith.constant 9 : index
    %c0_246 = arith.constant 0 : index
    %217 = tpu.strided_load %arg23[%c9_245, %c0_246] {strides = array<i32: 3, 1>} : memref<26x64xf32, #tpu.memory_space<vmem>>, vector<6x64xf32>
    %218 = arith.truncf %217 : vector<6x64xf32> to vector<6x64xbf16>
    %c0_247 = arith.constant 0 : index
    %c3_248 = arith.constant 3 : index
    %c0_249 = arith.constant 0 : index
    %c0_250 = arith.constant 0 : index
    %219 = vector.load %arg13[%c0_247, %c3_248, %c0_249, %c0_250] : memref<1x5x64x120xbf16, #tpu.memory_space<vmem>>, vector<1x1x64x120xbf16>
    %220 = vector.shape_cast %219 : vector<1x1x64x120xbf16> to vector<64x120xbf16>
    %cst_251 = arith.constant dense<0.000000e+00> : vector<6x120xf32>
    %221 = tpu.matmul %218, %220, %cst_251 {dimension_numbers = #tpu.dot_dimension_numbers<[1], [0], [0], [1], [0, 0, 1, 1], [], []>} : vector<6x64xbf16>, vector<64x120xbf16>, vector<6x120xf32> -> vector<6x120xf32>
    %222 = arith.addf %216, %221 : vector<6x120xf32>
    %c10_252 = arith.constant 10 : index
    %c0_253 = arith.constant 0 : index
    %223 = tpu.strided_load %arg23[%c10_252, %c0_253] {strides = array<i32: 3, 1>} : memref<26x64xf32, #tpu.memory_space<vmem>>, vector<6x64xf32>
    %224 = arith.truncf %223 : vector<6x64xf32> to vector<6x64xbf16>
    %c0_254 = arith.constant 0 : index
    %c4_255 = arith.constant 4 : index
    %c0_256 = arith.constant 0 : index
    %c0_257 = arith.constant 0 : index
    %225 = vector.load %arg13[%c0_254, %c4_255, %c0_256, %c0_257] : memref<1x5x64x120xbf16, #tpu.memory_space<vmem>>, vector<1x1x64x120xbf16>
    %226 = vector.shape_cast %225 : vector<1x1x64x120xbf16> to vector<64x120xbf16>
    %cst_258 = arith.constant dense<0.000000e+00> : vector<6x120xf32>
    %227 = tpu.matmul %224, %226, %cst_258 {dimension_numbers = #tpu.dot_dimension_numbers<[1], [0], [0], [1], [0, 0, 1, 1], [], []>} : vector<6x64xbf16>, vector<64x120xbf16>, vector<6x120xf32> -> vector<6x120xf32>
    %228 = arith.addf %222, %227 : vector<6x120xf32>
    %c0_259 = arith.constant 0 : index
    %c0_260 = arith.constant 0 : index
    %c0_261 = arith.constant 0 : index
    %229 = vector.load %arg14[%c0_259, %c0_260, %c0_261] : memref<1x1x120xf32, #tpu.memory_space<vmem>>, vector<1x1x120xf32>
    %230 = vector.shape_cast %229 : vector<1x1x120xf32> to vector<1x120xf32>
    %231 = vector.broadcast %230 : vector<1x120xf32> to vector<6x120xf32>
    %232 = arith.addf %228, %231 : vector<6x120xf32>
    %cst_262 = arith.constant 0.000000e+00 : f32
    %233 = vector.broadcast %cst_262 : f32 to vector<6x120xf32>
    %234 = arith.maximumf %232, %233 : vector<6x120xf32>
    %c0_263 = arith.constant 0 : index
    %c0_264 = arith.constant 0 : index
    %c0_265 = arith.constant 0 : index
    %235 = vector.load %arg15[%c0_263, %c0_264, %c0_265] : memref<1x6x120xf32, #tpu.memory_space<vmem>>, vector<1x6x120xf32>
    %236 = vector.shape_cast %235 : vector<1x6x120xf32> to vector<6x120xf32>
    %237 = arith.mulf %234, %236 : vector<6x120xf32>
    %cst_266 = arith.constant dense<0.000000e+00> : vector<120xf32>
    %238 = vector.multi_reduction <add>, %237, %cst_266 [0] : vector<6x120xf32> to vector<120xf32>
    %239 = vector.shape_cast %238 : vector<120xf32> to vector<1x120xf32>
    %c0_267 = arith.constant 0 : index
    %c0_268 = arith.constant 0 : index
    %240 = vector.load %arg16[%c0_267, %c0_268] : memref<120x2xf32, #tpu.memory_space<vmem>>, vector<120x2xf32>
    %cst_269 = arith.constant dense<0.000000e+00> : vector<1x2xf32>
    %241 = tpu.matmul %239, %240, %cst_269 {dimension_numbers = #tpu.dot_dimension_numbers<[1], [0], [0], [1], [0, 0, 1, 1], [], []>} : vector<1x120xf32>, vector<120x2xf32>, vector<1x2xf32> -> vector<1x2xf32>
    %c0_i32 = arith.constant 0 : i32
    %242 = arith.cmpi eq, %arg1, %c0_i32 : i32
    %243 = arith.extui %242 : i1 to i32
    %c0_i32_270 = arith.constant 0 : i32
    %244 = arith.cmpi ne, %243, %c0_i32_270 : i32
    scf.if %244 {
      %c0_272 = arith.constant 0 : index
      %c0_273 = arith.constant 0 : index
      %248 = vector.load %arg17[%c0_272, %c0_273] : memref<1x1xf32, #tpu.memory_space<vmem>>, vector<1x1xf32>
      %249 = vector.broadcast %248 : vector<1x1xf32> to vector<1x2xf32>
      %250 = arith.addf %241, %249 : vector<1x2xf32>
      %c0_274 = arith.constant 0 : index
      %c0_275 = arith.constant 0 : index
      %251 = vector.load %arg24[%c0_274, %c0_275] : memref<1x2xf32, #tpu.memory_space<vmem>>, vector<1x2xf32>
      tpu.vector_store %arg24[%c0_274, %c0_275], %250 {strides = array<i32>} : memref<1x2xf32, #tpu.memory_space<vmem>>, vector<1x2xf32>,
    } else {
    }
    %c1_i32 = arith.constant 1 : i32
    %245 = arith.cmpi eq, %arg1, %c1_i32 : i32
    %246 = arith.extui %245 : i1 to i32
    %c0_i32_271 = arith.constant 0 : i32
    %247 = arith.cmpi ne, %246, %c0_i32_271 : i32
    scf.if %247 {
      %c0_272 = arith.constant 0 : index
      %c0_273 = arith.constant 0 : index
      %248 = vector.load %arg24[%c0_272, %c0_273] : memref<1x2xf32, #tpu.memory_space<vmem>>, vector<1x2xf32>
      %249 = arith.addf %248, %241 : vector<1x2xf32>
      %cst_274 = arith.constant 0.000000e+00 : f32
      %250 = vector.broadcast %cst_274 : f32 to vector<1x2xf32>
      %251 = arith.subf %250, %249 : vector<1x2xf32>
      %252 = math.exp %251 : vector<1x2xf32>
      %cst_275 = arith.constant 1.000000e+00 : f32
      %253 = vector.broadcast %cst_275 : f32 to vector<1x2xf32>
      %254 = arith.addf %253, %252 : vector<1x2xf32>
      %cst_276 = arith.constant 1.000000e+00 : f32
      %255 = vector.broadcast %cst_276 : f32 to vector<1x2xf32>
      %256 = arith.divf %255, %254 : vector<1x2xf32>
      %c0_277 = arith.constant 0 : index
      %c0_278 = arith.constant 0 : index
      %c0_279 = arith.constant 0 : index
      %257 = vector.load %arg18[%c0_277, %c0_278, %c0_279] : memref<1x2x2xf32, #tpu.memory_space<vmem>>, vector<1x1x2xf32>
      %258 = vector.shape_cast %257 : vector<1x1x2xf32> to vector<1x2xf32>
      %259 = vector.shape_cast %256 : vector<1x2xf32> to vector<1x1x2xf32>
      tpu.vector_store %arg18[%c0_277, %c0_278, %c0_279], %259 {strides = array<i32>} : memref<1x2x2xf32, #tpu.memory_space<vmem>>, vector<1x1x2xf32>,
      %cst_280 = arith.constant 1.000000e+00 : f32
      %260 = vector.broadcast %cst_280 : f32 to vector<1x2xf32>
      %261 = arith.subf %260, %256 : vector<1x2xf32>
      %c0_281 = arith.constant 0 : index
      %c1_282 = arith.constant 1 : index
      %c0_283 = arith.constant 0 : index
      %262 = vector.load %arg18[%c0_281, %c1_282, %c0_283] : memref<1x2x2xf32, #tpu.memory_space<vmem>>, vector<1x1x2xf32>
      %263 = vector.shape_cast %262 : vector<1x1x2xf32> to vector<1x2xf32>
      %264 = vector.shape_cast %261 : vector<1x2xf32> to vector<1x1x2xf32>
      tpu.vector_store %arg18[%c0_281, %c1_282, %c0_283], %264 {strides = array<i32>} : memref<1x2x2xf32, #tpu.memory_space<vmem>>, vector<1x1x2xf32>,
    } else {
    }
    return
  }
  func.func @transform_0(%arg0: i32, %arg1: i32) -> (i32, i32, i32) {
    %c1_i32 = arith.constant 1 : i32
    %0 = arith.muli %arg1, %c1_i32 : i32
    %1 = arith.addi %0, %arg0 : i32
    %c0_i32 = arith.constant 0 : i32
    %c0_i32_0 = arith.constant 0 : i32
    %c0_i32_1 = arith.constant 0 : i32
    return %1, %c0_i32, %c0_i32_0 : i32, i32, i32
  }
  func.func @transform_1(%arg0: i32, %arg1: i32) -> (i32, i32, i32, i32) {
    %c0_i32 = arith.constant 0 : i32
    %c0_i32_0 = arith.constant 0 : i32
    %c0_i32_1 = arith.constant 0 : i32
    %c0_i32_2 = arith.constant 0 : i32
    return %arg1, %c0_i32, %c0_i32_0, %c0_i32_1 : i32, i32, i32, i32
  }
  func.func @transform_2(%arg0: i32, %arg1: i32) -> (i32, i32, i32) {
    %c0_i32 = arith.constant 0 : i32
    %c0_i32_0 = arith.constant 0 : i32
    %c0_i32_1 = arith.constant 0 : i32
    return %arg1, %c0_i32, %c0_i32_0 : i32, i32, i32
  }
  func.func @transform_3(%arg0: i32, %arg1: i32) -> (i32, i32, i32, i32) {
    %c0_i32 = arith.constant 0 : i32
    %c0_i32_0 = arith.constant 0 : i32
    %c0_i32_1 = arith.constant 0 : i32
    %c0_i32_2 = arith.constant 0 : i32
    return %arg1, %c0_i32, %c0_i32_0, %c0_i32_1 : i32, i32, i32, i32
  }
  func.func @transform_4(%arg0: i32, %arg1: i32) -> (i32, i32, i32) {
    %c0_i32 = arith.constant 0 : i32
    %c0_i32_0 = arith.constant 0 : i32
    %c0_i32_1 = arith.constant 0 : i32
    return %arg1, %c0_i32, %c0_i32_0 : i32, i32, i32
  }
  func.func @transform_5(%arg0: i32, %arg1: i32) -> (i32, i32, i32, i32) {
    %c0_i32 = arith.constant 0 : i32
    %c0_i32_0 = arith.constant 0 : i32
    %c0_i32_1 = arith.constant 0 : i32
    %c0_i32_2 = arith.constant 0 : i32
    return %arg1, %c0_i32, %c0_i32_0, %c0_i32_1 : i32, i32, i32, i32
  }
  func.func @transform_6(%arg0: i32, %arg1: i32) -> (i32, i32, i32) {
    %c0_i32 = arith.constant 0 : i32
    %c0_i32_0 = arith.constant 0 : i32
    %c0_i32_1 = arith.constant 0 : i32
    return %arg1, %c0_i32, %c0_i32_0 : i32, i32, i32
  }
  func.func @transform_7(%arg0: i32, %arg1: i32) -> (i32, i32, i32, i32) {
    %c0_i32 = arith.constant 0 : i32
    %c0_i32_0 = arith.constant 0 : i32
    %c0_i32_1 = arith.constant 0 : i32
    %c0_i32_2 = arith.constant 0 : i32
    return %arg1, %c0_i32, %c0_i32_0, %c0_i32_1 : i32, i32, i32, i32
  }
  func.func @transform_8(%arg0: i32, %arg1: i32) -> (i32, i32, i32) {
    %c0_i32 = arith.constant 0 : i32
    %c0_i32_0 = arith.constant 0 : i32
    %c0_i32_1 = arith.constant 0 : i32
    return %arg1, %c0_i32, %c0_i32_0 : i32, i32, i32
  }
  func.func @transform_9(%arg0: i32, %arg1: i32) -> (i32, i32, i32, i32) {
    %c0_i32 = arith.constant 0 : i32
    %c0_i32_0 = arith.constant 0 : i32
    %c0_i32_1 = arith.constant 0 : i32
    %c0_i32_2 = arith.constant 0 : i32
    return %arg1, %c0_i32, %c0_i32_0, %c0_i32_1 : i32, i32, i32, i32
  }
  func.func @transform_10(%arg0: i32, %arg1: i32) -> (i32, i32, i32) {
    %c0_i32 = arith.constant 0 : i32
    %c0_i32_0 = arith.constant 0 : i32
    %c0_i32_1 = arith.constant 0 : i32
    return %arg1, %c0_i32, %c0_i32_0 : i32, i32, i32
  }
  func.func @transform_11(%arg0: i32, %arg1: i32) -> (i32, i32, i32, i32) {
    %c0_i32 = arith.constant 0 : i32
    %c0_i32_0 = arith.constant 0 : i32
    %c0_i32_1 = arith.constant 0 : i32
    %c0_i32_2 = arith.constant 0 : i32
    return %arg1, %c0_i32, %c0_i32_0, %c0_i32_1 : i32, i32, i32, i32
  }
  func.func @transform_12(%arg0: i32, %arg1: i32) -> (i32, i32, i32) {
    %c0_i32 = arith.constant 0 : i32
    %c0_i32_0 = arith.constant 0 : i32
    %c0_i32_1 = arith.constant 0 : i32
    return %arg1, %c0_i32, %c0_i32_0 : i32, i32, i32
  }
  func.func @transform_13(%arg0: i32, %arg1: i32) -> (i32, i32, i32) {
    %c0_i32 = arith.constant 0 : i32
    %c0_i32_0 = arith.constant 0 : i32
    %c0_i32_1 = arith.constant 0 : i32
    return %arg1, %c0_i32, %c0_i32_0 : i32, i32, i32
  }
  func.func @transform_14(%arg0: i32, %arg1: i32) -> (i32, i32) {
    %c0_i32 = arith.constant 0 : i32
    %c0_i32_0 = arith.constant 0 : i32
    %c0_i32_1 = arith.constant 0 : i32
    return %c0_i32, %c0_i32_0 : i32, i32
  }
  func.func @transform_15(%arg0: i32, %arg1: i32) -> (i32, i32) {
    %c0_i32 = arith.constant 0 : i32
    %c0_i32_0 = arith.constant 0 : i32
    %c0_i32_1 = arith.constant 0 : i32
    return %c0_i32, %c0_i32_0 : i32, i32
  }
  func.func @transform_16(%arg0: i32, %arg1: i32) -> (i32, i32, i32) {
    %c0_i32 = arith.constant 0 : i32
    %c0_i32_0 = arith.constant 0 : i32
    %c0_i32_1 = arith.constant 0 : i32
    return %arg0, %c0_i32, %c0_i32_0 : i32, i32, i32
  }
}

</mosaic_0001>

<bundles_post_ra>
// kernel: basic_net_forward.1
= control target key start
LH: loop header
LB: loop body
LE: loop exit
PB: predicated region body
PF: predicated region fallthrough
CT: control target
= control target key end

     0   :  { %s10902_s23 = smov 0   ;;  %s10904_s24 = smov 0   ;;  %s13308_s0 = inlined_call_operand.vmem [shape: bf16[2,548,8], index: 0, kind: input, shape index: {}]   ;;  %s13309_s1 = inlined_call_operand.vmem [shape: bf16[2,5,8,2], index: 1, kind: input, shape index: {}]   ;;  %s13310_s2 = inlined_call_operand.vmem [shape: f32[2,1,2], index: 2, kind: input, shape index: {}]   ;;  %s13311_s3 = inlined_call_operand.vmem [shape: bf16[2,5,2,8], index: 3, kind: input, shape index: {}]   ;;  %s13312_s4 = inlined_call_operand.vmem [shape: f32[2,1,8], index: 4, kind: input, shape index: {}]   ;;  %s13313_s5 = inlined_call_operand.vmem [shape: bf16[2,5,8,16], index: 5, kind: input, shape index: {}]   ;;  %s13314_s6 = inlined_call_operand.vmem [shape: f32[2,1,16], index: 6, kind: input, shape index: {}]   ;;  %s13315_s7 = inlined_call_operand.vmem [shape: bf16[2,5,16,32], index: 7, kind: input, shape index: {}]   ;;  %s13316_s8 = inlined_call_operand.vmem [shape: f32[2,1,32], index: 8, kind: input, shape index: {}]   ;;  %s13317_s9 = inlined_call_operand.vmem [shape: bf16[2,5,32,64], index: 9, kind: input, shape index: {}]   ;;  %s13318_s10 = inlined_call_operand.vmem [shape: f32[2,1,64], index: 10, kind: input, shape index: {}]   ;;  %s13319_s11 = inlined_call_operand.vmem [shape: bf16[2,5,64,120], index: 11, kind: input, shape index: {}]   ;;  %s13320_s12 = inlined_call_operand.vmem [shape: f32[2,1,120], index: 12, kind: input, shape index: {}]   ;;  %s13321_s13 = inlined_call_operand.vmem [shape: f32[2,6,120], index: 13, kind: input, shape index: {}]   ;;  %s13322_s14 = inlined_call_operand.vmem [shape: f32[120,2], index: 14, kind: input, shape index: {}]   ;;  %s13323_s15 = inlined_call_operand.<no memory space> [shape: f32[1,1], index: 15, kind: input, shape index: {}]   ;;  %s13324_s16 = inlined_call_operand.vmem [shape: f32[1,2,2], index: 16, kind: output, shape index: {}]  }
   0x1   :  { %13370 = sst [smem:[#allocation9_spill]] %s13308_s0  ;;  %v21_v0 = vstv %s13323_s15  ;;  %s10906_s25 = smov 0  }
   0x2   :  { %22 = vst [vmem:[#allocation8] sm:$0x1] %v21_v0 }
   0x3 LB: > { %s37_s15 = sadd.s32 1, %s10804_s24  ;;  %p8385_p0 = scmp.ge.s32.totalorder %s10808_s25, 1  ;;  %s10808_s25 = sphi %s10906_s25, %s28_s25   ;;  %s10804_s24 = sphi %s10904_s24, %s13418_s24   ;;  %s10800_s23 = sphi %s10902_s23, %s13417_s23  }
   0x4   : > { %p38_p1 = scmp.ge.s32.totalorder %s37_s15, 2  ;;  %p596_p2 = scmp.lt.s32.totalorder %s10808_s25, 3 }
   0x6   : > { %s13420_s15 = smov (%p38_p1, %s37_s15), 0  ;;  %p597_p3 = pnand %p8385_p0, %p596_p2 }
   0x7   : > { %p698_p4 = scmp.lt.s32.totalorder (!%p597_p3), %s10800_s23, 1  ;;  %vm1385_vm0 = vcmask (!%p597_p3), 1043456   ;;  %s13371_s19 = sld [smem:[#allocation9_spill]] (!%p597_p3)  ;;  %vm1005_vm1 = vsmask.f32 (!%p597_p3), 7424  ;;  %vm1282_vm2 = vcmask (!%p597_p3), 64512  }
   0x8   : > { %600 = sbr.rel (%p597_p3) target bundleno = 3141 (0xc45), region = 84  ;;  %vm2076_vm3 = vcmask (!%p597_p3), 1046528   ;;  %vm2630_vm4 = vsmask.f32 (!%p597_p3), 6400  ;;  %vm3264_vm5 = vcmask (!%p597_p3), 1045504   ;;  %vm3955_vm6 = vcmask (!%p597_p3), 15360  }
   0x9   : > { %vm4251_vm7 = vcmask (!%p597_p3), 1040384   ;;  %vm10811_vm8 = vmmov (!%p597_p3), 0   ;;  %vm4025_vm9 = vcmask (!%p597_p3), 9216   ;;  %vm5789_vm10 = vcmask (!%p597_p3), 58368   ;;  %p8866_p5 = scmp.ne.s32.totalorder (!%p597_p3), %s10800_s23, 0 }
   0xa   : > { %vm6777_vm11 = vcmask (!%p597_p3), 130048   ;;  %vm6796_vm12 = vcmask (!%p597_p3), 123904   ;;  %vm7284_vm13 = vcmask (!%p597_p3), 261120   ;;  %vm7293_vm14 = vcmask (!%p597_p3), 254976  }
   0xb   : > { %vm7291_vm15 = vcmask (!%p597_p3), 259072  }
   0xf   : > { %s10924_s26 = scalar_select %p698_p4, %s10800_s23, 1 }
  0x11   : > { %s10657_s27 = smul.u32 20, %s10924_s26  ;;  %s711_s17 = scalar_lea.vmem %s13310_s2, %s10924_s26 }
  0x12   : > { %s10656_s28 = smul.u32 276, %s10924_s26  ;;  %s718_s22 = scalar_lea.vmem %s13312_s4, %s10924_s26 }
  0x13   : > { %s10933_s0 = scalar_lea.vmem %s13309_s1, %s10657_s27  ;;  %s10658_s21 = smul.u32 5, %s10924_s26 }
  0x14   : > { %v8393_v1 = vld [vmem:[%s10933_s0 + $0x4] sm:$0xf]  ;;  %s10939_s20 = scalar_lea.vmem %s13371_s19, %s10656_s28  ;;  %v828_v2 = vld [vmem:[%s10933_s0] sm:$0xf]  ;;  %s10659_s28 = smul.u32 40, %s10924_s26 }
  0x15   : > { %10650 = vmatprep.subr.msk.bf16.mxu0 %vm1385_vm0, %v8393_v1  ;;  %v1387_v3 = vsel %vm1385_vm0, %v8393_v1, 0  ;;  %v760_v4 = vld [vmem:[%s10939_s20] sm:$0xf]  ;;  %v10946_v5 = vld [vmem:[%s10939_s20 + $0x4] sm:$0xf]  ;;  %v10949_v6 = vld [vmem:[%s10939_s20 + $0x8] sm:$0xff]   ;;  %10651 = vmatprep.subr.msk.bf16.mxu1 %vm1385_vm0, %v8393_v1  ;;  %s11818_s29 = scalar_lea.vmem %s13311_s3, %s10658_s21  ;;  %s726_s19 = scalar_lea.vmem %s13314_s6, %s10924_s26 }
  0x16   : > { %9263 = vmatpush3.bf16.msra.mxu0 %v1387_v3  ;;  %v10953_v7 = vcombine.low %v760_v4, %v10946_v5  ;;  %10377 = vmatpush3.bf16.msra.mxu1 %v1387_v3  ;;  %v1014_v8 = vshll.u32 %v10949_v6, 16  ;;  %v1018_v9 = vshrl.u32 %v10949_v6, 16  ;;  %v10959_v10 = vld [vmem:[%s10939_s20 + $0x10] sm:$0xff]   ;;  %v10967_v15 = vld [vmem:[%s10939_s20 + $0x18] sm:$0xff]   ;;  %v10971_v17 = vld [vmem:[%s10939_s20 + $0x20] sm:$0xff]   ;;  %v1763_v30 = vsel %vm1385_vm0, %v828_v2, 0  ;;  %s734_s30 = scalar_lea.vmem %s13316_s8, %s10924_s26  ;;  %s742_s21 = scalar_lea.vmem %s13318_s10, %s10924_s26 }
  0x17   : > { %10652 = vmatprep.subr.msk.bf16.mxu0 %vm1385_vm0, %v828_v2  ;;  %v1022_v14 = vshll.u32 %v10959_v10, 16  ;;  %v1026_v16 = vshrl.u32 %v10959_v10, 16  ;;  %v10974_v19 = vld [vmem:[%s10939_s20 + $0x28] sm:$0xff]   ;;  %v1030_v22 = vshll.u32 %v10967_v15, 16  ;;  %v1038_v24 = vshll.u32 %v10971_v17, 16  ;;  %v10998_v35 = vld [vmem:[%s10939_s20 + $0x30] sm:$0xff]  }
  0x18   : > { %v1007_v11 = vshrl.u32 %v10953_v7, 16  ;;  %v1009_v12 = vshll.u32 %v10953_v7, 16  ;;  %v1016_v13 = vrot.slane %v1014_v8, 1  ;;  %v1034_v28 = vshrl.u32 %v10967_v15, 16  ;;  %v11008_v39 = vld [vmem:[%s10939_s20 + $0x38] sm:$0xff]   ;;  %v11020_v47 = vld [vmem:[%s10939_s20 + $0x40] sm:$0xff]  }
  0x19   : > { %v1024_v21 = vrot.slane %v1022_v14, 1  ;;  %v1032_v27 = vrot.slane %v1030_v22, 1  ;;  %v1042_v31 = vshrl.u32 %v10971_v17, 16  ;;  %v1046_v32 = vshll.u32 %v10974_v19, 16  ;;  %v11030_v51 = vld [vmem:[%s10939_s20 + $0x48] sm:$0xff]   ;;  %v11042_v59 = vld [vmem:[%s10939_s20 + $0x50] sm:$0xff]  }
  0x1a   : > { %v1011_v18 = vrot.slane %v1009_v12, 1  ;;  %v1020_v20 = vor.u32 %v1018_v9, %v1016_v13  ;;  %v1040_v34 = vrot.slane %v1038_v24, 1  ;;  %v1054_v40 = vshll.u32 %v10998_v35, 16  ;;  %v11052_v63 = vld [vmem:[%s10939_s20 + $0x58] sm:$0xff]  }
  0x1b   : > { %v1028_v26 = vor.u32 %v1026_v16, %v1024_v21  ;;  %v1036_v36 = vor.u32 %v1034_v28, %v1032_v27  ;;  %v1048_v38 = vrot.slane %v1046_v32, 1  ;;  %v1050_v42 = vshrl.u32 %v10974_v19, 16 }
  0x1c   : > { %v1012_v23 = vor.u32 %v1011_v18, %v1007_v11  ;;  %v1025_v25 = vsel %vm1005_vm1, %v1020_v20, %v1024_v21  ;;  %v1044_v37 = vor.u32 %v1042_v31, %v1040_v34  ;;  %v1058_v44 = vshrl.u32 %v10998_v35, 16 }
  0x1d   : > { %v1033_v33 = vsel %vm1005_vm1, %v1028_v26, %v1032_v27  ;;  %v1041_v41 = vsel %vm1005_vm1, %v1036_v36, %v1040_v34  ;;  %v1062_v45 = vshll.u32 %v11008_v39, 16  ;;  %v1056_v46 = vrot.slane %v1054_v40, 1  ;;  %v11086_v36 = vld [vmem:[%s10939_s20 + $0x70] sm:$0xff]  }
  0x1e   : > { %v1017_v29 = vsel %vm1005_vm1, %v1012_v23, %v1016_v13  ;;  %v1049_v43 = vsel %vm1005_vm1, %v1044_v37, %v1048_v38  ;;  %v1052_v48 = vor.u32 %v1050_v42, %v1048_v38  ;;  %v1070_v52 = vshll.u32 %v11020_v47, 16  ;;  %v11064_v13 = vld [vmem:[%s10939_s20 + $0x60] sm:$0xff]   ;;  %v11074_v23 = vld [vmem:[%s10939_s20 + $0x68] sm:$0xff]  }
  0x1f   : > { %9264 = vmatprep.mubr.msk.bf16.mxu0 %vm1282_vm2, %v1017_v29  ;;  %v1060_v49 = vor.u32 %v1058_v44, %v1056_v46  ;;  %v1064_v50 = vrot.slane %v1062_v45, 1  ;;  %v1066_v54 = vshrl.u32 %v11008_v39, 16  ;;  %v1074_v56 = vshrl.u32 %v11020_v47, 16  ;;  %v11092_v38 = vld [vmem:[%s10933_s0 + $0x8] sm:$0xf] }
  0x20   : > { %9265 = vmatmul.mubr.msk.bf16.vlgmr.msra.gmra.mrb[0].mxu0 %vm1282_vm2, %v1025_v25  ;;  %v1057_v53 = vsel %vm1005_vm1, %v1052_v48, %v1056_v46  ;;  %v13361_v57 = vshll.u32 %v11030_v51, 16  ;;  %v1072_v58 = vrot.slane %v1070_v52, 1  ;;  %v13355_v0 = vshll.u32 %v11042_v59, 16  ;;  %v11099_v46 = vld [vmem:[%s10939_s20 + $0x78] sm:$0xff]  }
  0x21   : > { %9333 = vmatpush3.bf16.msra.mxu0 %v1763_v30  ;;  %9268 = vmatprep.mubr.msk.bf16.mxu0 %vm1282_vm2, %v1033_v33  ;;  %v1065_v55 = vsel %vm1005_vm1, %v1060_v49, %v1064_v50  ;;  %v1068_v60 = vor.u32 %v1066_v54, %v1064_v50  ;;  %v1082_v2 = vshrl.u32 %v11030_v51, 16  ;;  %v13360_v4 = vshrl.u32 %v11042_v59, 16 }
  0x22   : > { %v1076_v61 = vor.u32 %v1074_v56, %v1072_v58  ;;  %v1080_v62 = vrot.slane %v13361_v57, 1  ;;  %v13349_v11 = vshll.u32 %v11052_v63, 16  ;;  %v1088_v12 = vrot.slane %v13355_v0, 1  ;;  %10653 = vmatprep.subr.msk.bf16.mxu0 %vm1385_vm0, %v11092_v38 }
  0x23   : > { %v1073_v1 = vsel %vm1005_vm1, %v1068_v60, %v1072_v58  ;;  %v13343_v25 = vshll.u32 %v11064_v13, 16  ;;  %v13354_v27 = vshrl.u32 %v11052_v63, 16  ;;  %v13348_v30 = vshrl.u32 %v11064_v13, 16 }
  0x24   : > { %v1081_v3 = vsel %vm1005_vm1, %v1076_v61, %v1080_v62  ;;  %v1084_v18 = vor.u32 %v1082_v2, %v1080_v62  ;;  %v1092_v20 = vor.u32 %v13360_v4, %v1088_v12  ;;  %v1096_v21 = vrot.slane %v13349_v11, 1  ;;  %v11113_v61 = vld [vmem:[%s10939_s20 + $0x80] sm:$0xff]  }
  0x25   : > { %v13337_v33 = vshll.u32 %v11074_v23, 16  ;;  %v1104_v34 = vrot.slane %v13343_v25, 1  ;;  %v13331_v48 = vshll.u32 %v11086_v36, 16  ;;  %v13342_v50 = vshrl.u32 %v11074_v23, 16 }
  0x26   : > { %v1089_v26 = vsel %vm1005_vm1, %v1084_v18, %v1088_v12  ;;  %v1097_v29 = vsel %vm1005_vm1, %v1092_v20, %v1096_v21  ;;  %v1100_v37 = vor.u32 %v13354_v27, %v1096_v21  ;;  %v13328_v58 = vshll.u32 %v11099_v46, 16  ;;  %v11123_v12 = vld [vmem:[%s10939_s20 + $0x88] sm:$0xff]  }
  0x27   : > { %v1120_v60 = vrot.slane %v13331_v48, 1  ;;  %v13325_v18 = vshll.u32 %v11113_v61, 16  ;;  %v13330_v21 = vshrl.u32 %v11099_v46, 16 }
  0x28   : > { %9269 = vmatmul.mubr.msk.bf16.gmra.mrb[4].mxu0 %vm1282_vm2, %v1041_v41  ;;  %v1108_v41 = vor.u32 %v13348_v30, %v1104_v34  ;;  %v1105_v49 = vsel %vm1005_vm1, %v1100_v37, %v1104_v34  ;;  %v13326_v34 = vshll.u32 %v11123_v12, 16 }
  0x29   : > { %9272 = vmatprep.mubr.msk.bf16.mxu0 %vm1282_vm2, %v1049_v43  ;;  %v1112_v43 = vrot.slane %v13337_v33, 1  ;;  %v1136_v37 = vrot.slane %v13325_v18, 1 }
  0x2b   : > { %v1116_v62 = vor.u32 %v13342_v50, %v1112_v43 }
  0x2d   : > { %v1121_v20 = vsel %vm1005_vm1, %v1116_v62, %v1120_v60 }
  0x30   : > { %9273 = vmatmul.mubr.msk.bf16.gmra.mrb[8].mxu0 %vm1282_vm2, %v1057_v53  ;;  %v1113_v53 = vsel %vm1005_vm1, %v1108_v41, %v1112_v43  ;;  %v11135_v41 = vld [vmem:[%s10939_s20 + $0x90] sm:$0xff]  }
  0x31   : > { %9276 = vmatprep.mubr.msk.bf16.mxu0 %vm1282_vm2, %v1065_v55  ;;  %v13336_v55 = vshrl.u32 %v11086_v36, 16  ;;  %v13329_v62 = vshll.u32 %v11135_v41, 16  ;;  %v13333_v18 = vshrl.u32 %v11135_v41, 16 }
  0x38   : > { %9277 = vmatmul.mubr.msk.bf16.gmra.mrb[12].mxu0 %vm1282_vm2, %v1073_v1  ;;  %v1124_v1 = vor.u32 %v13336_v55, %v1120_v60  ;;  %v11145_v60 = vld [vmem:[%s10939_s20 + $0x98] sm:$0xff]  }
  0x39   : > { %9280 = vmatprep.mubr.msk.bf16.mxu0 %vm1282_vm2, %v1081_v3  ;;  %v1128_v3 = vrot.slane %v13328_v58, 1  ;;  %v11167_v58 = vld [vmem:[%s10939_s20 + $0xa8] sm:$0xff]  }
  0x3a   : > { %v13346_v55 = vshrl.u32 %v11167_v58, 16 }
  0x3b   : > { %v1132_v43 = vor.u32 %v13330_v21, %v1128_v3  ;;  %v13340_v21 = vshrl.u32 %v11145_v60, 16 }
  0x40   : > { %9281 = vmatmul.mubr.msk.bf16.gmra.mrb[16].mxu0 %vm1282_vm2, %v1089_v26  ;;  %v1129_v26 = vsel %vm1005_vm1, %v1124_v1, %v1128_v3  ;;  %v1137_v1 = vsel %vm1005_vm1, %v1132_v43, %v1136_v37  ;;  %v13332_v3 = vshll.u32 %v11145_v60, 16 }
  0x41   : > { %9284 = vmatprep.mubr.msk.bf16.mxu0 %vm1282_vm2, %v1097_v29  ;;  %v13327_v29 = vshrl.u32 %v11113_v61, 16 }
  0x48   : > { %9285 = vmatmul.mubr.msk.bf16.gmra.mrb[20].mxu0 %vm1282_vm2, %v1105_v49  ;;  %v1140_v49 = vor.u32 %v13327_v29, %v1136_v37  ;;  %v11157_v29 = vld [vmem:[%s10939_s20 + $0xa0] sm:$0xff]  }
  0x49   : > { %9288 = vmatprep.mubr.msk.bf16.mxu0 %vm1282_vm2, %v1113_v53  ;;  %v1144_v53 = vrot.slane %v13326_v34, 1  ;;  %v1152_v34 = vrot.slane %v13329_v62, 1  ;;  %v13339_v48 = vshrl.u32 %v11157_v29, 16 }
  0x4b   : > { %v1156_v43 = vor.u32 %v13333_v18, %v1152_v34  ;;  %v11179_v18 = vld [vmem:[%s10939_s20 + $0xb0] sm:$0xff]  }
  0x4c   : > { %v13345_v33 = vshrl.u32 %v11179_v18, 16 }
  0x50   : > { %9289 = vmatmul.mubr.msk.bf16.gmra.mrb[24].mxu0 %vm1282_vm2, %v1121_v20  ;;  %v13334_v20 = vshrl.u32 %v11123_v12, 16 }
  0x51   : > { %9292 = vmatprep.mubr.msk.bf16.mxu0 %vm1282_vm2, %v1129_v26  ;;  %v1145_v26 = vsel %vm1005_vm1, %v1140_v49, %v1144_v53  ;;  %v1160_v49 = vrot.slane %v13332_v3, 1 }
  0x52   : > { %v1148_v37 = vor.u32 %v13334_v20, %v1144_v53  ;;  %v13338_v53 = vshll.u32 %v11167_v58, 16  ;;  %v11189_v20 = vld [vmem:[%s10939_s20 + $0xb8] sm:$0xff]  }
  0x53   : > { %v13352_v50 = vshrl.u32 %v11189_v20, 16 }
  0x54   : > { %v1153_v62 = vsel %vm1005_vm1, %v1148_v37, %v1152_v34  ;;  %v1164_v34 = vor.u32 %v13340_v21, %v1160_v49  ;;  %v11211_v21 = vld [vmem:[%s10939_s20 + $0xc8] sm:$0xff]  }
  0x55   : > { %v13358_v30 = vshrl.u32 %v11211_v21, 16 }
  0x58   : > { %9293 = vmatmul.mubr.msk.bf16.gmra.mrb[28].mxu0 %vm1282_vm2, %v1137_v1  ;;  %v13335_v1 = vshll.u32 %v11157_v29, 16 }
  0x59   : > { %9296 = vmatprep.mubr.msk.bf16.mxu0 %vm1282_vm2, %v1145_v26  ;;  %v1161_v26 = vsel %vm1005_vm1, %v1156_v43, %v1160_v49  ;;  %v1176_v43 = vrot.slane %v13338_v53, 1  ;;  %v13344_v49 = vshll.u32 %v11189_v20, 16 }
  0x5a   : > { %v1168_v3 = vrot.slane %v13335_v1, 1 }
  0x5c   : > { %v1172_v37 = vor.u32 %v13339_v48, %v1168_v3  ;;  %v1169_v1 = vsel %vm1005_vm1, %v1164_v34, %v1168_v3  ;;  %v11201_v48 = vld [vmem:[%s10939_s20 + $0xc0] sm:$0xff]   ;;  %v1180_v3 = vor.u32 %v13346_v55, %v1176_v43  ;;  %v11233_v55 = vld [vmem:[%s10939_s20 + $0xd8] sm:$0xff]  }
  0x5d   : > { %v13351_v25 = vshrl.u32 %v11201_v48, 16  ;;  %v13364_v27 = vshrl.u32 %v11233_v55, 16 }
  0x60   : > { %9297 = vmatmul.mubr.msk.bf16.gmra.mrb[32].mxu0 %vm1282_vm2, %v1153_v62  ;;  %v13341_v62 = vshll.u32 %v11179_v18, 16 }
  0x61   : > { %9300 = vmatprep.mubr.msk.bf16.mxu0 %vm1282_vm2, %v1161_v26  ;;  %v1177_v26 = vsel %vm1005_vm1, %v1172_v37, %v1176_v43  ;;  %v1192_v37 = vrot.slane %v13344_v49, 1  ;;  %v13350_v43 = vshll.u32 %v11211_v21, 16 }
  0x62   : > { %v1184_v53 = vrot.slane %v13341_v62, 1 }
  0x64   : > { %v1188_v34 = vor.u32 %v13345_v33, %v1184_v53  ;;  %v1185_v62 = vsel %vm1005_vm1, %v1180_v3, %v1184_v53  ;;  %v11223_v33 = vld [vmem:[%s10939_s20 + $0xd0] sm:$0xff]   ;;  %v1196_v53 = vor.u32 %v13352_v50, %v1192_v37  ;;  %v11255_v50 = vld [vmem:[%s10939_s20 + $0xe8] sm:$0xff]  }
  0x65   : > { %v13356_v11 = vshrl.u32 %v11223_v33, 16  ;;  %v1242_v4 = vshrl.u32 %v11255_v50, 16 }
  0x68   : > { %9301 = vmatmul.mubr.msk.bf16.gmra.mrb[36].mxu0 %vm1282_vm2, %v1169_v1  ;;  %v13347_v1 = vshll.u32 %v11201_v48, 16 }
  0x69   : > { %9304 = vmatprep.mubr.msk.bf16.mxu0 %vm1282_vm2, %v1177_v26  ;;  %v1193_v26 = vsel %vm1005_vm1, %v1188_v34, %v1192_v37  ;;  %v1208_v34 = vrot.slane %v13350_v43, 1  ;;  %v13357_v37 = vshll.u32 %v11233_v55, 16 }
  0x6a   : > { %v1200_v49 = vrot.slane %v13347_v1, 1 }
  0x6c   : > { %v1204_v3 = vor.u32 %v13351_v25, %v1200_v49  ;;  %v1201_v1 = vsel %vm1005_vm1, %v1196_v53, %v1200_v49  ;;  %v11245_v25 = vld [vmem:[%s10939_s20 + $0xe0] sm:$0xff]   ;;  %v1212_v49 = vor.u32 %v13358_v30, %v1208_v34  ;;  %v11277_v30 = vld [vmem:[%s10939_s20 + $0xf8] sm:$0xff]  }
  0x6d   : > { %v13362_v0 = vshrl.u32 %v11245_v25, 16 }
  0x70   : > { %9305 = vmatmul.mubr.msk.bf16.gmra.mrb[40].mxu0 %vm1282_vm2, %v1185_v62  ;;  %v13353_v62 = vshll.u32 %v11223_v33, 16 }
  0x71   : > { %9308 = vmatprep.mubr.msk.bf16.mxu0 %vm1282_vm2, %v1193_v26  ;;  %v1209_v26 = vsel %vm1005_vm1, %v1204_v3, %v1208_v34  ;;  %v1224_v3 = vrot.slane %v13357_v37, 1  ;;  %v13363_v34 = vshll.u32 %v11255_v50, 16  ;;  %v11267_v37 = vld [vmem:[%s10939_s20 + $0xf0] sm:$0xff]  }
  0x72   : > { %v1216_v43 = vrot.slane %v13353_v62, 1 }
  0x74   : > { %v1220_v53 = vor.u32 %v13356_v11, %v1216_v43  ;;  %v1217_v62 = vsel %vm1005_vm1, %v1212_v49, %v1216_v43  ;;  %v1228_v43 = vor.u32 %v13364_v27, %v1224_v3  ;;  %v11292_v27 = vld [vmem:[%s10939_s20 + $0x100] sm:$0xff]  }
  0x78   : > { %9309 = vmatmul.mubr.msk.bf16.gmra.mrb[44].mxu0 %vm1282_vm2, %v1201_v1  ;;  %v13359_v1 = vshll.u32 %v11245_v25, 16 }
  0x79   : > { %9312 = vmatprep.mubr.msk.bf16.mxu0 %vm1282_vm2, %v1209_v26  ;;  %v1225_v26 = vsel %vm1005_vm1, %v1220_v53, %v1224_v3  ;;  %v1240_v53 = vrot.slane %v13363_v34, 1  ;;  %v13368_v3 = vshll.u32 %v11277_v30, 16 }
  0x7a   : > { %v1232_v11 = vrot.slane %v13359_v1, 1 }
  0x7b   : > { %v1244_v34 = vor.u32 %v1242_v4, %v1240_v53 }
  0x7c   : > { %v1236_v49 = vor.u32 %v13362_v0, %v1232_v11  ;;  %v1233_v1 = vsel %vm1005_vm1, %v1228_v43, %v1232_v11  ;;  %v1256_v43 = vrot.slane %v13368_v3, 1 }
  0x7e   : > { %v1241_v57 = vsel %vm1005_vm1, %v1236_v49, %v1240_v53 }
  0x80   : > { %9313 = vmatmul.mubr.msk.bf16.gmra.mrb[48].mxu0 %vm1282_vm2, %v1217_v62  ;;  %v13365_v62 = vshll.u32 %v11267_v37, 16 }
  0x81   : > { %9316 = vmatprep.mubr.msk.bf16.mxu0 %vm1282_vm2, %v1225_v26  ;;  %v13366_v26 = vshrl.u32 %v11267_v37, 16 }
  0x82   : > { %v1248_v0 = vrot.slane %v13365_v62, 1  ;;  %v13367_v62 = vshll.u32 %v11292_v27, 16 }
  0x84   : > { %v1252_v11 = vor.u32 %v13366_v26, %v1248_v0  ;;  %v1249_v49 = vsel %vm1005_vm1, %v1244_v34, %v1248_v0  ;;  %v11308_v26 = vrot.slane %v13367_v62, 1  ;;  %v2249_v34 = vsel %vm1385_vm0, %v11092_v38, 0 }
  0x88   : > { %9317 = vmatmul.mubr.msk.bf16.gmra.mrb[52].mxu0 %vm1282_vm2, %v1233_v1  ;;  %v13369_v1 = vshrl.u32 %v11277_v30, 16 }
  0x89   : > { %9320 = vmatprep.mubr.msk.bf16.mxu0 %vm1282_vm2, %v1241_v57  ;;  %v1257_v57 = vsel %vm1005_vm1, %v1252_v11, %v1256_v43  ;;  %v8533_v11 = vld [vmem:[%s10933_s0 + $0xc] sm:$0xf] }
  0x8a   : > { %v1260_v53 = vor.u32 %v13369_v1, %v1256_v43  ;;  %v2883_v3 = vsel %vm1385_vm0, %v8533_v11, 0 }
  0x8c   : > { %v1265_v0 = vsel %vm1005_vm1, %v1260_v53, %v11308_v26 }
  0x90   : > { %9321 = vmatmul.mubr.msk.bf16.gmra.mrb[56].mxu0 %vm1282_vm2, %v1249_v49  ;;  %v2078_v49 = vrot.slane %v10949_v6, 1 }
  0x91   : > { %9324 = vmatprep.mubr.msk.bf16.mxu0 %vm1282_vm2, %v1257_v57  ;;  %v11390_v57 = vld [vmem:[%s10939_s20 + $0x108] sm:$0xff]  }
  0x98   : > { %9325 = vmatmul.mubr.msk.bf16.gmra.mrb[60].mxu0 %vm1282_vm2, %v1265_v0  ;;  %v2082_v0 = vrot.slane %v10967_v15, 1 }
  0x99   : > { %9334 = vmatprep.mubr.msk.bf16.mxu0 %vm1282_vm2, %v10953_v7  ;;  %v2070_v7 = vld [vmem:[%s10939_s20] sm:$0xe] }
  0x9a   : > { %v11381_v38 = vcombine.low %v2070_v7, %v10946_v5  ;;  %v2080_v5 = vrot.slane %v10959_v10, 1  ;;  %v2643_v7 = vrot.slane %v1026_v16, 1 }
  0x9c   : > { %v2077_v43 = vrot.slane %v11381_v38, 1  ;;  %v2081_v62 = vsel %vm2076_vm3, %v2078_v49, %v2080_v5  ;;  %v2083_v1 = vsel %vm2076_vm3, %v2080_v5, %v2082_v0 }
  0x9e   : > { %v2079_v53 = vsel %vm2076_vm3, %v2077_v43, %v2078_v49  ;;  %v2640_v43 = vrot.slane %v1014_v8, 2  ;;  %v2086_v8 = vrot.slane %v10974_v19, 1 }
  0xa0   : > { %9335 = vmatmul.mubr.msk.bf16.vlgmr.msra.gmra.mrb[0].mxu0 %vm1282_vm2, %v10949_v6 }
  0xa1   : > { %9403 = vmatpush3.bf16.msra.mxu0 %v2249_v34  ;;  %9338 = vmatprep.mubr.msk.bf16.mxu0 %vm1282_vm2, %v10959_v10  ;;  %v2644_v34 = vrot.slane %v1022_v14, 2  ;;  %v2084_v10 = vrot.slane %v10971_v17, 1  ;;  %v11413_v14 = vld [vmem:[%s10933_s0 + $0x10] sm:$0xf]  ;;  %s12936_s0 = scalar_lea.vmem %s13315_s7, %s10659_s28 }
  0xa2   : > { %10654 = vmatprep.subr.msk.bf16.mxu0 %vm1385_vm0, %v8533_v11 }
  0xa3   : > { %v11415_v16 = vor.u32 %v2644_v34, %v2643_v7  ;;  %v2094_v34 = vrot.slane %v11030_v51, 1 }
  0xa8   : > { %9339 = vmatmul.mubr.msk.bf16.gmra.mrb[4].mxu0 %vm1282_vm2, %v10967_v15  ;;  %v2655_v15 = vrot.slane %v1050_v42, 1 }
  0xa9   : > { %9342 = vmatprep.mubr.msk.bf16.mxu0 %vm1282_vm2, %v10971_v17 }
  0xb0   : > { %9343 = vmatmul.mubr.msk.bf16.gmra.mrb[8].mxu0 %vm1282_vm2, %v10974_v19  ;;  %v2663_v19 = vrot.slane %v1066_v54, 1 }
  0xb1   : > { %9346 = vmatprep.mubr.msk.bf16.mxu0 %vm1282_vm2, %v10998_v35 }
  0xb8   : > { %9347 = vmatmul.mubr.msk.bf16.gmra.mrb[12].mxu0 %vm1282_vm2, %v11008_v39 }
  0xb9   : > { %9350 = vmatprep.mubr.msk.bf16.mxu0 %vm1282_vm2, %v11020_v47 }
  0xc0   : > { %9351 = vmatmul.mubr.msk.bf16.gmra.mrb[16].mxu0 %vm1282_vm2, %v11030_v51 }
  0xc1   : > { %9354 = vmatprep.mubr.msk.bf16.mxu0 %vm1282_vm2, %v11042_v59 }
  0xc8   : > { %9355 = vmatmul.mubr.msk.bf16.gmra.mrb[20].mxu0 %vm1282_vm2, %v11052_v63 }
  0xc9   : > { %9358 = vmatprep.mubr.msk.bf16.mxu0 %vm1282_vm2, %v11064_v13 }
  0xd0   : > { %9359 = vmatmul.mubr.msk.bf16.gmra.mrb[24].mxu0 %vm1282_vm2, %v11074_v23 }
  0xd1   : > { %9362 = vmatprep.mubr.msk.bf16.mxu0 %vm1282_vm2, %v11086_v36 }
  0xd8   : > { %9363 = vmatmul.mubr.msk.bf16.gmra.mrb[28].mxu0 %vm1282_vm2, %v11099_v46 }
  0xd9   : > { %9366 = vmatprep.mubr.msk.bf16.mxu0 %vm1282_vm2, %v11113_v61 }
  0xe0   : > { %9367 = vmatmul.mubr.msk.bf16.gmra.mrb[32].mxu0 %vm1282_vm2, %v11123_v12 }
  0xe1   : > { %9370 = vmatprep.mubr.msk.bf16.mxu0 %vm1282_vm2, %v11135_v41 }
  0xe8   : > { %9371 = vmatmul.mubr.msk.bf16.gmra.mrb[36].mxu0 %vm1282_vm2, %v11145_v60 }
  0xe9   : > { %9374 = vmatprep.mubr.msk.bf16.mxu0 %vm1282_vm2, %v11157_v29 }
  0xf0   : > { %9375 = vmatmul.mubr.msk.bf16.gmra.mrb[40].mxu0 %vm1282_vm2, %v11167_v58 }
  0xf1   : > { %9378 = vmatprep.mubr.msk.bf16.mxu0 %vm1282_vm2, %v11179_v18 }
  0xf8   : > { %9379 = vmatmul.mubr.msk.bf16.gmra.mrb[44].mxu0 %vm1282_vm2, %v11189_v20 }
  0xf9   : > { %9382 = vmatprep.mubr.msk.bf16.mxu0 %vm1282_vm2, %v11201_v48 }
 0x100   : > { %9383 = vmatmul.mubr.msk.bf16.gmra.mrb[48].mxu0 %vm1282_vm2, %v11211_v21 }
 0x101   : > { %9386 = vmatprep.mubr.msk.bf16.mxu0 %vm1282_vm2, %v11223_v33 }
 0x108   : > { %9387 = vmatmul.mubr.msk.bf16.gmra.mrb[52].mxu0 %vm1282_vm2, %v11233_v55 }
 0x109   : > { %9390 = vmatprep.mubr.msk.bf16.mxu0 %vm1282_vm2, %v11245_v25 }
 0x110   : > { %9391 = vmatmul.mubr.msk.bf16.gmra.mrb[56].mxu0 %vm1282_vm2, %v11255_v50 }
 0x111   : > { %9394 = vmatprep.mubr.msk.bf16.mxu0 %vm1282_vm2, %v11267_v37 }
 0x118   : > { %9395 = vmatmul.mubr.msk.bf16.gmra.mrb[60].mxu0 %vm1282_vm2, %v11277_v30 }
 0x119   : > { %9398 = vmatprep.mubr.msk.bf16.mxu0 %vm1282_vm2, %v11292_v27 }
 0x120   : > { %9399 = vmatmul.mubr.msk.bf16.gmra.mrb[64].mxu0 %vm1282_vm2, %v11390_v57 }
 0x121   : > { %9404 = vmatprep.mubr.msk.bf16.mxu0 %vm1282_vm2, %v2079_v53  ;;  %v2639_v53 = vrot.slane %v1018_v9, 1  ;;  %v2085_v9 = vsel %vm2076_vm3, %v2082_v0, %v2084_v10  ;;  %v2092_v0 = vrot.slane %v11020_v47, 1 }
 0x123   : > { %v11418_v11 = vor.u32 %v2640_v43, %v2639_v53  ;;  %v2095_v43 = vsel %vm2076_vm3, %v2092_v0, %v2094_v34  ;;  %v2096_v53 = vrot.slane %v11042_v59, 1 }
 0x125   : > { %v11425_v6 = vsel %vm2630_vm4, %v11418_v11, %v11415_v16 }
 0x128   : > { %9405 = vmatmul.mubr.msk.bf16.vlgmr.msra.gmra.mrb[0].mxu0 %vm1282_vm2, %v2081_v62  ;;  %v2087_v62 = vsel %vm2076_vm3, %v2084_v10, %v2086_v8  ;;  %v2098_v10 = vrot.slane %v11052_v63, 1 }
 0x129   : > { %9473 = vmatpush3.bf16.msra.mxu0 %v2883_v3  ;;  %9408 = vmatprep.mubr.msk.bf16.mxu0 %vm1282_vm2, %v2083_v1  ;;  %v2088_v3 = vrot.slane %v10998_v35, 1  ;;  %v2090_v1 = vrot.slane %v11008_v39, 1  ;;  %v2667_v35 = vrot.slane %v1074_v56, 1  ;;  %v2671_v39 = vrot.slane %v1082_v2, 1 }
 0x12a   : > { %10655 = vmatprep.subr.msk.bf16.mxu0 %vm1385_vm0, %v11413_v14  ;;  %v13373_v56 = vshrl.u32 %v11042_v59, 16  ;;  %v13375_v2 = vshrl.u32 %v11052_v63, 16 }
 0x12b   : > { %v2089_v49 = vsel %vm2076_vm3, %v2086_v8, %v2088_v3  ;;  %v2091_v5 = vsel %vm2076_vm3, %v2088_v3, %v2090_v1  ;;  %v2093_v7 = vsel %vm2076_vm3, %v2090_v1, %v2092_v0  ;;  %v2097_v8 = vsel %vm2076_vm3, %v2094_v34, %v2096_v53 }
 0x12c   : > { %v2102_v3 = vrot.slane %v11074_v23, 1  ;;  %v2106_v0 = vrot.slane %v11099_v46, 1  ;;  %v2675_v47 = vrot.slane %v13373_v56, 1  ;;  %v13388_v56 = vshll.u32 %v11123_v12, 16 }
 0x130   : > { %9409 = vmatmul.mubr.msk.bf16.gmra.mrb[4].mxu0 %vm1282_vm2, %v2085_v9  ;;  %v2099_v9 = vsel %vm2076_vm3, %v2096_v53, %v2098_v10  ;;  %v2110_v53 = vrot.slane %v11123_v12, 1 }
 0x131   : > { %9412 = vmatprep.mubr.msk.bf16.mxu0 %vm1282_vm2, %v2087_v62  ;;  %v2100_v62 = vrot.slane %v11064_v13, 1 }
 0x133   : > { %v2101_v1 = vsel %vm2076_vm3, %v2098_v10, %v2100_v62 }
 0x138   : > { %9413 = vmatmul.mubr.msk.bf16.gmra.mrb[8].mxu0 %vm1282_vm2, %v2089_v49  ;;  %v2103_v49 = vsel %vm2076_vm3, %v2100_v62, %v2102_v3  ;;  %v2114_v62 = vrot.slane %v11145_v60, 1 }
 0x139   : > { %9416 = vmatprep.mubr.msk.bf16.mxu0 %vm1282_vm2, %v2091_v5  ;;  %v2104_v5 = vrot.slane %v11086_v36, 1 }
 0x13b   : > { %v2105_v34 = vsel %vm2076_vm3, %v2102_v3, %v2104_v5 }
 0x140   : > { %9417 = vmatmul.mubr.msk.bf16.gmra.mrb[12].mxu0 %vm1282_vm2, %v2093_v7  ;;  %v2107_v7 = vsel %vm2076_vm3, %v2104_v5, %v2106_v0  ;;  %v2118_v5 = vrot.slane %v11167_v58, 1 }
 0x141   : > { %9420 = vmatprep.mubr.msk.bf16.mxu0 %vm1282_vm2, %v2095_v43  ;;  %v2108_v43 = vrot.slane %v11113_v61, 1 }
 0x143   : > { %v2109_v10 = vsel %vm2076_vm3, %v2106_v0, %v2108_v43 }
 0x148   : > { %9421 = vmatmul.mubr.msk.bf16.gmra.mrb[16].mxu0 %vm1282_vm2, %v2097_v8  ;;  %v2111_v8 = vsel %vm2076_vm3, %v2108_v43, %v2110_v53  ;;  %v2122_v43 = vrot.slane %v11189_v20, 1 }
 0x149   : > { %9424 = vmatprep.mubr.msk.bf16.mxu0 %vm1282_vm2, %v2099_v9  ;;  %v2112_v9 = vrot.slane %v11135_v41, 1 }
 0x14b   : > { %v2113_v3 = vsel %vm2076_vm3, %v2110_v53, %v2112_v9 }
 0x150   : > { %9425 = vmatmul.mubr.msk.bf16.gmra.mrb[20].mxu0 %vm1282_vm2, %v2101_v1  ;;  %v2115_v1 = vsel %vm2076_vm3, %v2112_v9, %v2114_v62  ;;  %v2126_v9 = vrot.slane %v11211_v21, 1 }
 0x151   : > { %9428 = vmatprep.mubr.msk.bf16.mxu0 %vm1282_vm2, %v2103_v49  ;;  %v2116_v49 = vrot.slane %v11157_v29, 1 }
 0x153   : > { %v2117_v0 = vsel %vm2076_vm3, %v2114_v62, %v2116_v49 }
 0x158   : > { %9429 = vmatmul.mubr.msk.bf16.gmra.mrb[24].mxu0 %vm1282_vm2, %v2105_v34  ;;  %v2119_v34 = vsel %vm2076_vm3, %v2116_v49, %v2118_v5  ;;  %v2130_v49 = vrot.slane %v11233_v55, 1 }
 0x159   : > { %9432 = vmatprep.mubr.msk.bf16.mxu0 %vm1282_vm2, %v2107_v7  ;;  %v2120_v7 = vrot.slane %v11179_v18, 1 }
 0x15b   : > { %v2121_v53 = vsel %vm2076_vm3, %v2118_v5, %v2120_v7 }
 0x160   : > { %9433 = vmatmul.mubr.msk.bf16.gmra.mrb[28].mxu0 %vm1282_vm2, %v2109_v10  ;;  %v2123_v10 = vsel %vm2076_vm3, %v2120_v7, %v2122_v43  ;;  %v2134_v7 = vrot.slane %v11255_v50, 1 }
 0x161   : > { %9436 = vmatprep.mubr.msk.bf16.mxu0 %vm1282_vm2, %v2111_v8  ;;  %v2124_v8 = vrot.slane %v11201_v48, 1 }
 0x163   : > { %v2125_v62 = vsel %vm2076_vm3, %v2122_v43, %v2124_v8 }
 0x168   : > { %9437 = vmatmul.mubr.msk.bf16.gmra.mrb[32].mxu0 %vm1282_vm2, %v2113_v3  ;;  %v2127_v3 = vsel %vm2076_vm3, %v2124_v8, %v2126_v9  ;;  %v2138_v8 = vrot.slane %v11277_v30, 1 }
 0x169   : > { %9440 = vmatprep.mubr.msk.bf16.mxu0 %vm1282_vm2, %v2115_v1  ;;  %v2128_v1 = vrot.slane %v11223_v33, 1 }
 0x16b   : > { %v2129_v5 = vsel %vm2076_vm3, %v2126_v9, %v2128_v1 }
 0x170   : > { %9441 = vmatmul.mubr.msk.bf16.gmra.mrb[36].mxu0 %vm1282_vm2, %v2117_v0  ;;  %v2131_v0 = vsel %vm2076_vm3, %v2128_v1, %v2130_v49  ;;  %v2142_v1 = vrot.slane %v11390_v57, 1 }
 0x171   : > { %9444 = vmatprep.mubr.msk.bf16.mxu0 %vm1282_vm2, %v2119_v34  ;;  %v2132_v34 = vrot.slane %v11245_v25, 1 }
 0x173   : > { %v2133_v43 = vsel %vm2076_vm3, %v2130_v49, %v2132_v34  ;;  %v2632_v49 = vshrl.u32 %v11381_v38, 16 }
 0x178   : > { %9445 = vmatmul.mubr.msk.bf16.gmra.mrb[40].mxu0 %vm1282_vm2, %v2121_v53  ;;  %v2135_v53 = vsel %vm2076_vm3, %v2132_v34, %v2134_v7  ;;  %v11515_v34 = vld [vmem:[%s10939_s20 + $0x110] ss:$0 sps:$4 sm:$0x11]  }
 0x179   : > { %9448 = vmatprep.mubr.msk.bf16.mxu0 %vm1282_vm2, %v2123_v10  ;;  %v2136_v10 = vrot.slane %v11267_v37, 1 }
 0x17b   : > { %v2137_v9 = vsel %vm2076_vm3, %v2134_v7, %v2136_v10 }
 0x180   : > { %9449 = vmatmul.mubr.msk.bf16.gmra.mrb[44].mxu0 %vm1282_vm2, %v2125_v62  ;;  %v2139_v62 = vsel %vm2076_vm3, %v2136_v10, %v2138_v8  ;;  %v2144_v10 = vrot.slane %v11515_v34, 1 }
 0x181   : > { %9452 = vmatprep.mubr.msk.bf16.mxu0 %vm1282_vm2, %v2127_v3  ;;  %v2140_v3 = vrot.slane %v11292_v27, 1 }
 0x183   : > { %v2143_v7 = vsel %vm2076_vm3, %v2140_v3, %v2142_v1 }
 0x188   : > { %9453 = vmatmul.mubr.msk.bf16.gmra.mrb[48].mxu0 %vm1282_vm2, %v2129_v5  ;;  %v2635_v5 = vshll.u32 %v11381_v38, 16 }
 0x189   : > { %9456 = vmatprep.mubr.msk.bf16.mxu0 %vm1282_vm2, %v2131_v0  ;;  %v2141_v0 = vsel %vm2076_vm3, %v2138_v8, %v2140_v3  ;;  %v2647_v8 = vrot.slane %v1034_v28, 1  ;;  %v2648_v3 = vrot.slane %v1030_v22, 2  ;;  %v2656_v22 = vrot.slane %v1046_v32, 2 }
 0x18a   : > { %v2664_v32 = vrot.slane %v1062_v45, 2  ;;  %v13372_v45 = vshll.u32 %v11030_v51, 16  ;;  %v2679_v51 = vrot.slane %v13375_v2, 1  ;;  %v13389_v2 = vshrl.u32 %v11135_v41, 16 }
 0x18c   : > { %v2672_v54 = vrot.slane %v13372_v45, 2  ;;  %v13385_v45 = vshrl.u32 %v11113_v61, 16 }
 0x190   : > { %9457 = vmatmul.mubr.msk.bf16.gmra.mrb[52].mxu0 %vm1282_vm2, %v2133_v43  ;;  %v2634_v43 = vrot.slane %v2632_v49, 1  ;;  %v2649_v49 = vor.u32 %v2648_v3, %v2647_v8 }
 0x191   : > { %9460 = vmatprep.mubr.msk.bf16.mxu0 %vm1282_vm2, %v2135_v53  ;;  %v2637_v53 = vrot.slane %v2635_v5, 2  ;;  %v2651_v5 = vrot.slane %v1042_v31, 1 }
 0x192   : > { %v2650_v28 = vsel %vm2630_vm4, %v11415_v16, %v2649_v49  ;;  %v2660_v16 = vrot.slane %v1054_v40, 2  ;;  %v2668_v40 = vrot.slane %v1070_v52, 2  ;;  %v13374_v52 = vshll.u32 %v11042_v59, 16 }
 0x198   : > { %9461 = vmatmul.mubr.msk.bf16.gmra.mrb[56].mxu0 %vm1282_vm2, %v2137_v9  ;;  %v2638_v9 = vor.u32 %v2637_v53, %v2634_v43  ;;  %v2669_v43 = vor.u32 %v2668_v40, %v2667_v35  ;;  %v2673_v53 = vor.u32 %v2672_v54, %v2671_v39  ;;  %v13386_v54 = vshll.u32 %v11113_v61, 16 }
 0x199   : > { %9464 = vmatprep.mubr.msk.bf16.mxu0 %vm1282_vm2, %v2139_v62  ;;  %v2145_v62 = vsel %vm2076_vm3, %v2142_v1, %v2144_v10  ;;  %v2652_v1 = vrot.slane %v1038_v24, 2  ;;  %v2657_v24 = vor.u32 %v2656_v22, %v2655_v15  ;;  %v13379_v22 = vshrl.u32 %v11074_v23, 16 }
 0x19a   : > { %v2642_v38 = vsel %vm2630_vm4, %v2638_v9, %v11418_v11  ;;  %v3437_v11 = vsel %vm1385_vm0, %v11413_v14, 0  ;;  %v2659_v14 = vrot.slane %v1058_v44, 1  ;;  %v2676_v9 = vrot.slane %v13374_v52, 2 }
 0x19b   : > { %v2653_v17 = vor.u32 %v2652_v1, %v2651_v5  ;;  %v13377_v1 = vshrl.u32 %v11064_v13, 16  ;;  %v2707_v61 = vrot.slane %v13389_v2, 1  ;;  %vm8078_vm3 = vcmask 982016  }
 0x19c   : > { %v2677_v3 = vor.u32 %v2676_v9, %v2675_v47  ;;  %v2704_v47 = vrot.slane %v13388_v56, 2 }
 0x19d   : > { %v2654_v31 = vsel %vm2630_vm4, %v2649_v49, %v2653_v17  ;;  %v2658_v42 = vsel %vm2630_vm4, %v2653_v17, %v2657_v24  ;;  %v2683_v59 = vrot.slane %v13377_v1, 1  ;;  %v13380_v17 = vshll.u32 %v11074_v23, 16 }
 0x19e   : > { %v2678_v5 = vsel %vm2630_vm4, %v2673_v53, %v2677_v3 }
 0x1a0   : > { %9465 = vmatmul.mubr.msk.bf16.gmra.mrb[60].mxu0 %vm1282_vm2, %v2141_v0  ;;  %v2665_v0 = vor.u32 %v2664_v32, %v2663_v19  ;;  %v13382_v19 = vshll.u32 %v11086_v36, 16 }
 0x1a1   : > { %9468 = vmatprep.mubr.msk.bf16.mxu0 %vm1282_vm2, %v2143_v7 }
 0x1a2   : > { %v2670_v10 = vsel %vm2630_vm4, %v2665_v0, %v2669_v43  ;;  %v2692_v32 = vrot.slane %v13382_v19, 2 }
 0x1a8   : > { %9469 = vmatmul.mubr.msk.bf16.gmra.mrb[64].mxu0 %vm1282_vm2, %v2145_v62  ;;  %v2674_v62 = vsel %vm2630_vm4, %v2669_v43, %v2673_v53  ;;  %v2700_v43 = vrot.slane %v13386_v54, 2 }
 0x1a9   : > { %9474 = vmatprep.mubr.msk.bf16.mxu0 %vm1282_vm2, %v2642_v38  ;;  %v13376_v38 = vshll.u32 %v11052_v63, 16  ;;  %v2687_v63 = vrot.slane %v13379_v22, 1  ;;  %v13394_v22 = vshll.u32 %v11157_v29, 16 }
 0x1ab   : > { %v2680_v8 = vrot.slane %v13376_v38, 2 }
 0x1ad   : > { %v2681_v49 = vor.u32 %v2680_v8, %v2679_v51  ;;  %v13390_v51 = vshll.u32 %v11135_v41, 16 }
 0x1af   : > { %v2682_v15 = vsel %vm2630_vm4, %v2677_v3, %v2681_v49  ;;  %v2708_v38 = vrot.slane %v13390_v51, 2  ;;  %v13391_v3 = vshrl.u32 %v11145_v60, 16 }
 0x1b0   : > { %9475 = vmatmul.mubr.msk.bf16.vlgmr.msra.gmra.mrb[0].mxu0 %vm1282_vm2, %v11425_v6  ;;  %v2661_v6 = vor.u32 %v2660_v16, %v2659_v14 }
 0x1b1   : > { %9543 = vmatpush3.bf16.msra.mxu0 %v3437_v11  ;;  %9478 = vmatprep.mubr.msk.bf16.mxu0 %vm1282_vm2, %v2650_v28  ;;  %v13378_v11 = vshll.u32 %v11064_v13, 16  ;;  %v2709_v1 = vor.u32 %v2708_v38, %v2707_v61  ;;  %v13405_v38 = vshrl.u32 %v11223_v33, 16 }
 0x1b2   : > { %v2662_v7 = vsel %vm2630_vm4, %v2657_v24, %v2661_v6  ;;  %v2666_v44 = vsel %vm2630_vm4, %v2661_v6, %v2665_v0  ;;  %v2688_v24 = vrot.slane %v13380_v17, 2  ;;  %v13383_v0 = vshrl.u32 %v11099_v46, 16 }
 0x1b3   : > { %v2684_v28 = vrot.slane %v13378_v11, 2 }
 0x1b4   : > { %v2689_v14 = vor.u32 %v2688_v24, %v2687_v63  ;;  %v2695_v23 = vrot.slane %v13383_v0, 1  ;;  %v2716_v63 = vrot.slane %v13394_v22, 2  ;;  %v13395_v24 = vshrl.u32 %v11167_v58, 16 }
 0x1b5   : > { %v13398_v0 = vshll.u32 %v11179_v18, 16 }
 0x1b8   : > { %9479 = vmatmul.mubr.msk.bf16.gmra.mrb[4].mxu0 %vm1282_vm2, %v2654_v31  ;;  %v2685_v31 = vor.u32 %v2684_v28, %v2683_v59  ;;  %v13393_v28 = vshrl.u32 %v11157_v29, 16 }
 0x1b9   : > { %9482 = vmatprep.mubr.msk.bf16.mxu0 %vm1282_vm2, %v2658_v42  ;;  %v13381_v42 = vshrl.u32 %v11086_v36, 16  ;;  %v2699_v36 = vrot.slane %v13385_v45, 1 }
 0x1ba   : > { %v2686_v16 = vsel %vm2630_vm4, %v2681_v49, %v2685_v31  ;;  %v2690_v6 = vsel %vm2630_vm4, %v2685_v31, %v2689_v14  ;;  %v13392_v49 = vshll.u32 %v11145_v60, 16  ;;  %v2719_v31 = vrot.slane %v13395_v24, 1 }
 0x1bb   : > { %v2691_v13 = vrot.slane %v13381_v42, 1  ;;  %v2701_v52 = vor.u32 %v2700_v43, %v2699_v36  ;;  %v13401_v43 = vshrl.u32 %v11201_v48, 16  ;;  %v13410_v24 = vshll.u32 %v11245_v25, 16 }
 0x1bd   : > { %v2693_v40 = vor.u32 %v2692_v32, %v2691_v13  ;;  %v13397_v32 = vshrl.u32 %v11179_v18, 16 }
 0x1bf   : > { %v2694_v39 = vsel %vm2630_vm4, %v2689_v14, %v2693_v40  ;;  %v13396_v14 = vshll.u32 %v11167_v58, 16 }
 0x1c0   : > { %9483 = vmatmul.mubr.msk.bf16.gmra.mrb[8].mxu0 %vm1282_vm2, %v2662_v7  ;;  %v13384_v7 = vshll.u32 %v11099_v46, 16 }
 0x1c1   : > { %9486 = vmatprep.mubr.msk.bf16.mxu0 %vm1282_vm2, %v2666_v44 }
 0x1c2   : > { %v2696_v35 = vrot.slane %v13384_v7, 2 }
 0x1c4   : > { %v2697_v44 = vor.u32 %v2696_v35, %v2695_v23  ;;  %v2724_v23 = vrot.slane %v13398_v0, 2  ;;  %v13399_v35 = vshrl.u32 %v11189_v20, 16  ;;  %v13412_v0 = vshrl.u32 %v11267_v37, 16 }
 0x1c6   : > { %v2698_v53 = vsel %vm2630_vm4, %v2693_v40, %v2697_v44  ;;  %v2727_v40 = vrot.slane %v13399_v35, 1 }
 0x1c8   : > { %9487 = vmatmul.mubr.msk.bf16.gmra.mrb[12].mxu0 %vm1282_vm2, %v2670_v10  ;;  %v13387_v10 = vshrl.u32 %v11123_v12, 16  ;;  %v2711_v12 = vrot.slane %v13391_v3, 1  ;;  %v13406_v3 = vshll.u32 %v11223_v33, 16 }
 0x1c9   : > { %9490 = vmatprep.mubr.msk.bf16.mxu0 %vm1282_vm2, %v2674_v62  ;;  %v2702_v62 = vsel %vm2630_vm4, %v2697_v44, %v2701_v52  ;;  %v13400_v44 = vshll.u32 %v11189_v20, 16 }
 0x1ca   : > { %v2703_v46 = vrot.slane %v13387_v10, 1  ;;  %v13402_v10 = vshll.u32 %v11201_v48, 16 }
 0x1cc   : > { %v2705_v9 = vor.u32 %v2704_v47, %v2703_v46  ;;  %v2732_v46 = vrot.slane %v13402_v10, 2  ;;  %v13403_v47 = vshrl.u32 %v11211_v21, 16  ;;  %v1274_v10 = vshrl.u32 %v11390_v57, 16 }
 0x1ce   : > { %v2706_v8 = vsel %vm2630_vm4, %v2701_v52, %v2705_v9  ;;  %v2710_v11 = vsel %vm2630_vm4, %v2705_v9, %v2709_v1  ;;  %v2735_v52 = vrot.slane %v13403_v47, 1  ;;  %v13404_v9 = vshll.u32 %v11211_v21, 16 }
 0x1cf   : > { %v13416_v47 = vshll.u32 %v11292_v27, 16 }
 0x1d0   : > { %9491 = vmatmul.mubr.msk.bf16.gmra.mrb[16].mxu0 %vm1282_vm2, %v2678_v5  ;;  %v2712_v5 = vrot.slane %v13392_v49, 2 }
 0x1d1   : > { %9494 = vmatprep.mubr.msk.bf16.mxu0 %vm1282_vm2, %v2682_v15  ;;  %v2715_v15 = vrot.slane %v13393_v28, 1 }
 0x1d2   : > { %v2713_v59 = vor.u32 %v2712_v5, %v2711_v12  ;;  %v2740_v12 = vrot.slane %v13406_v3, 2  ;;  %v13407_v5 = vshrl.u32 %v11233_v55, 16 }
 0x1d3   : > { %v2717_v42 = vor.u32 %v2716_v63, %v2715_v15  ;;  %v13409_v63 = vshrl.u32 %v11245_v25, 16 }
 0x1d4   : > { %v2714_v17 = vsel %vm2630_vm4, %v2709_v1, %v2713_v59  ;;  %v2743_v1 = vrot.slane %v13407_v5, 1 }
 0x1d5   : > { %v2718_v19 = vsel %vm2630_vm4, %v2713_v59, %v2717_v42  ;;  %v13408_v59 = vshll.u32 %v11233_v55, 16 }
 0x1d8   : > { %9495 = vmatmul.mubr.msk.bf16.gmra.mrb[20].mxu0 %vm1282_vm2, %v2686_v16  ;;  %v2720_v16 = vrot.slane %v13396_v14, 2 }
 0x1d9   : > { %9498 = vmatprep.mubr.msk.bf16.mxu0 %vm1282_vm2, %v2690_v6  ;;  %v2723_v6 = vrot.slane %v13397_v32, 1 }
 0x1da   : > { %v2721_v13 = vor.u32 %v2720_v16, %v2719_v31  ;;  %v2748_v31 = vrot.slane %v13410_v24, 2  ;;  %v2751_v16 = vrot.slane %v1242_v4, 1 }
 0x1db   : > { %v2725_v45 = vor.u32 %v2724_v23, %v2723_v6  ;;  %v2755_v23 = vrot.slane %v13412_v0, 1 }
 0x1dc   : > { %v2722_v7 = vsel %vm2630_vm4, %v2717_v42, %v2721_v13  ;;  %v13411_v42 = vshll.u32 %v11255_v50, 16 }
 0x1dd   : > { %v2726_v54 = vsel %vm2630_vm4, %v2721_v13, %v2725_v45 }
 0x1de   : > { %v2752_v13 = vrot.slane %v13411_v42, 2  ;;  %v1278_v42 = vshll.u32 %v11515_v34, 16 }
 0x1e0   : > { %9499 = vmatmul.mubr.msk.bf16.gmra.mrb[24].mxu0 %vm1282_vm2, %v2694_v39  ;;  %v2728_v39 = vrot.slane %v13400_v44, 2  ;;  %v2753_v32 = vor.u32 %v2752_v13, %v2751_v16  ;;  %v10765_v13 = vld [vmem:[%s10939_s20 + $0x10] sm:$0xff]  }
 0x1e1   : > { %9502 = vmatprep.mubr.msk.bf16.mxu0 %vm1282_vm2, %v2698_v53  ;;  %v2731_v53 = vrot.slane %v13401_v43, 1 }
 0x1e2   : > { %v2729_v36 = vor.u32 %v2728_v39, %v2727_v40  ;;  %v13414_v40 = vshrl.u32 %v11277_v30, 16  ;;  %v13415_v39 = vshll.u32 %v11277_v30, 16 }
 0x1e3   : > { %v2733_v2 = vor.u32 %v2732_v46, %v2731_v53  ;;  %v1270_v53 = vshll.u32 %v11390_v57, 16 }
 0x1e4   : > { %v2730_v56 = vsel %vm2630_vm4, %v2725_v45, %v2729_v36  ;;  %v2759_v44 = vrot.slane %v13414_v40, 1  ;;  %v2760_v45 = vrot.slane %v13415_v39, 2 }
 0x1e5   : > { %v2734_v51 = vsel %vm2630_vm4, %v2729_v36, %v2733_v2  ;;  %v1272_v16 = vrot.slane %v1270_v53, 1 }
 0x1e6   : > { %v2761_v43 = vor.u32 %v2760_v45, %v2759_v44  ;;  %v10768_v44 = vld [vmem:[%s10939_s20 + $0x28] sm:$0xff]  }
 0x1e7   : > { %v3274_v39 = vrot.slane %v10768_v44, 2 }
 0x1e8   : > { %9503 = vmatmul.mubr.msk.bf16.gmra.mrb[28].mxu0 %vm1282_vm2, %v2702_v62  ;;  %v2736_v62 = vrot.slane %v13404_v9, 2  ;;  %v11708_v9 = vld [vmem:[%s10939_s20 + $0x110] ss:$0 sps:$4 sm:$0x33]  }
 0x1e9   : > { %9506 = vmatprep.mubr.msk.bf16.mxu0 %vm1282_vm2, %v2706_v8  ;;  %v2739_v8 = vrot.slane %v13405_v38, 1  ;;  %v2772_v38 = vshrl.u32 %v11708_v9, 16 }
 0x1ea   : > { %v2737_v61 = vor.u32 %v2736_v62, %v2735_v52  ;;  %v2764_v52 = vrot.slane %v13416_v47, 2  ;;  %v10771_v47 = vld [vmem:[%s10939_s20 + $0x40] sm:$0xff]  }
 0x1eb   : > { %v2741_v28 = vor.u32 %v2740_v12, %v2739_v8  ;;  %v2775_v8 = vshll.u32 %v11708_v9, 16  ;;  %v3258_v12 = vld [vmem:[%s10939_s20] sm:$0xc]  ;;  %v2774_v5 = vrot.slane %v2772_v38, 1  ;;  %v10773_v38 = vld [vmem:[%s10939_s20 + $0x50] sm:$0xff]  }
 0x1ec   : > { %v2738_v49 = vsel %vm2630_vm4, %v2733_v2, %v2737_v61  ;;  %v2767_v2 = vrot.slane %v1274_v10, 1 }
 0x1ed   : > { %v2742_v22 = vsel %vm2630_vm4, %v2737_v61, %v2741_v28  ;;  %v2768_v61 = vrot.slane %v1270_v53, 2  ;;  %v10770_v53 = vld [vmem:[%s10939_s20 + $0x38] sm:$0xff]  }
 0x1ef   : > { %v2769_v3 = vor.u32 %v2768_v61, %v2767_v2 }
 0x1f0   : > { %9507 = vmatmul.mubr.msk.bf16.gmra.mrb[32].mxu0 %vm1282_vm2, %v2710_v11  ;;  %v2744_v11 = vrot.slane %v13408_v59, 2 }
 0x1f1   : > { %9510 = vmatprep.mubr.msk.bf16.mxu0 %vm1282_vm2, %v2714_v17  ;;  %v2747_v17 = vrot.slane %v13409_v63, 1  ;;  %v10764_v63 = vld [vmem:[%s10939_s20 + $0x8] sm:$0xff]  }
 0x1f2   : > { %v2745_v15 = vor.u32 %v2744_v11, %v2743_v1  ;;  %v2777_v1 = vrot.slane %v2775_v8, 2  ;;  %v10763_v11 = vld [vmem:[%s10939_s20 + $0x4] sm:$0xf]  ;;  %v3284_v8 = vrot.slane %v10773_v38, 2 }
 0x1f4   : > { %v2746_v14 = vsel %vm2630_vm4, %v2741_v28, %v2745_v15  ;;  %v8570_v28 = vcombine.low %v3258_v12, %v10763_v11  ;;  %v10776_v11 = vld [vmem:[%s10939_s20 + $0x68] sm:$0xff]  }
 0x1f8   : > { %9511 = vmatmul.mubr.msk.bf16.gmra.mrb[36].mxu0 %vm1282_vm2, %v2718_v19  ;;  %v2749_v19 = vor.u32 %v2748_v31, %v2747_v17  ;;  %v3266_v17 = vrot.slane %v10764_v63, 2  ;;  %v10777_v63 = vld [vmem:[%s10939_s20 + $0x70] sm:$0xff]  }
 0x1f9   : > { %9514 = vmatprep.mubr.msk.bf16.mxu0 %vm1282_vm2, %v2722_v7  ;;  %v13413_v7 = vshll.u32 %v11267_v37, 16 }
 0x1fa   : > { %v2750_v6 = vsel %vm2630_vm4, %v2745_v15, %v2749_v19  ;;  %v2754_v4 = vsel %vm2630_vm4, %v2749_v19, %v2753_v32  ;;  %v2778_v15 = vor.u32 %v2777_v1, %v2774_v5  ;;  %v3268_v19 = vrot.slane %v10765_v13, 2  ;;  %v10775_v1 = vld [vmem:[%s10939_s20 + $0x60] sm:$0xff]  }
 0x1fb   : > { %v2756_v35 = vrot.slane %v13413_v7, 2  ;;  %v1280_v7 = vrot.slane %v1278_v42, 1  ;;  %v10779_v42 = vld [vmem:[%s10939_s20 + $0x80] sm:$0xff]  }
 0x1fc   : > { %v2779_v24 = vsel %vm2630_vm4, %v2769_v3, %v2778_v15  ;;  %v3269_v34 = vsel %vm3264_vm5, %v3266_v17, %v3268_v19  ;;  %v3296_v13 = vrot.slane %v10779_v42, 2 }
 0x1fd   : > { %v2757_v36 = vor.u32 %v2756_v35, %v2755_v23  ;;  %v1276_v23 = vor.u32 %v1274_v10, %v1272_v16  ;;  %v3278_v10 = vrot.slane %v10770_v53, 2 }
 0x1ff   : > { %v2758_v46 = vsel %vm2630_vm4, %v2753_v32, %v2757_v36  ;;  %v2762_v62 = vsel %vm2630_vm4, %v2757_v36, %v2761_v43  ;;  %v10766_v32 = vld [vmem:[%s10939_s20 + $0x18] sm:$0xff]  }
 0x200   : > { %9515 = vmatmul.mubr.msk.bf16.gmra.mrb[40].mxu0 %vm1282_vm2, %v2726_v54  ;;  %v1266_v54 = vshrl.u32 %v11292_v27, 16 }
 0x201   : > { %9518 = vmatprep.mubr.msk.bf16.mxu0 %vm1282_vm2, %v2730_v56 }
 0x202   : > { %v2763_v56 = vrot.slane %v1266_v54, 1 }
 0x208   : > { %9519 = vmatmul.mubr.msk.bf16.gmra.mrb[44].mxu0 %vm1282_vm2, %v2734_v51  ;;  %v2765_v51 = vor.u32 %v2764_v52, %v2763_v56  ;;  %v3280_v52 = vrot.slane %v10771_v47, 2 }
 0x209   : > { %9522 = vmatprep.mubr.msk.bf16.mxu0 %vm1282_vm2, %v2738_v49 }
 0x20a   : > { %v2766_v49 = vsel %vm2630_vm4, %v2761_v43, %v2765_v51  ;;  %v2770_v59 = vsel %vm2630_vm4, %v2765_v51, %v2769_v3  ;;  %v3281_v61 = vsel %vm3264_vm5, %v3278_v10, %v3280_v52  ;;  %v10774_v3 = vld [vmem:[%s10939_s20 + $0x58] sm:$0xff]   ;;  %vm8167_vm4 = vcmask (!%p8866_p5), 8192  }
 0x20b   : > { %v3286_v12 = vrot.slane %v10774_v3, 2 }
 0x20d   : > { %v3287_v5 = vsel %vm3264_vm5, %v3284_v8, %v3286_v12 }
 0x210   : > { %9523 = vmatmul.mubr.msk.bf16.gmra.mrb[48].mxu0 %vm1282_vm2, %v2742_v22  ;;  %v3265_v22 = vrot.slane %v8570_v28, 2  ;;  %v3290_v28 = vrot.slane %v10776_v11, 2 }
 0x211   : > { %9526 = vmatprep.mubr.msk.bf16.mxu0 %vm1282_vm2, %v2746_v14  ;;  %v1268_v14 = vor.u32 %v1266_v54, %v11308_v26  ;;  %v1281_v26 = vsel %vm1005_vm1, %v1276_v23, %v1280_v7  ;;  %v10769_v54 = vld [vmem:[%s10939_s20 + $0x30] sm:$0xff]   ;;  %v3300_v23 = vrot.slane %v11135_v41, 2  ;;  %v3302_v7 = vrot.slane %v11145_v60, 2 }
 0x212   : > { %v3267_v31 = vsel %vm3264_vm5, %v3265_v22, %v3266_v17  ;;  %v3276_v43 = vrot.slane %v10769_v54, 2  ;;  %v3292_v17 = vrot.slane %v10777_v63, 2  ;;  %v3308_v41 = vrot.slane %v11179_v18, 2 }
 0x213   : > { %v1273_v0 = vsel %vm1005_vm1, %v1268_v14, %v1272_v16  ;;  %v3310_v60 = vrot.slane %v11189_v20, 2  ;;  %v3316_v18 = vrot.slane %v11223_v33, 2  ;;  %v3318_v20 = vrot.slane %v11233_v55, 2  ;;  %v8606_v33 = vld [vmem:[%s11818_s29 + $0x1] sm:$0x1] }
 0x214   : > { %9328 = vmatprep.mubr.msk.bf16.mxu1 %vm1282_vm2, %v1273_v0  ;;  %v3279_v56 = vsel %vm3264_vm5, %v3276_v43, %v3278_v10  ;;  %v3293_v14 = vsel %vm3264_vm5, %v3290_v28, %v3292_v17  ;;  %v3320_v55 = vrot.slane %v11245_v25, 2  ;;  %v4253_v53 = vsel %vm4251_vm7, %v8606_v33, 0 }
 0x215   : > { %9329 = vmatmul.mubr.msk.bf16.vlgmr.msra.gmra.mrb[0].mxu1 %vm1282_vm2, %v1281_v26  ;;  %v3322_v10 = vrot.slane %v11255_v50, 2  ;;  %v3324_v25 = vrot.slane %v11267_v37, 2  ;;  %v3326_v50 = vrot.slane %v11277_v30, 2  ;;  %v3332_v30 = vrot.slane %v11708_v9, 2 }
 0x216   : > { %vm7645_vm1 = vcmask 517120  }
 0x217   : > { %v3325_v47 = vsel %vm3264_vm5, %v3322_v10, %v3324_v25 }
 0x218   : > { %9527 = vmatmul.mubr.msk.bf16.gmra.mrb[52].mxu0 %vm1282_vm2, %v2750_v6  ;;  %v3270_v6 = vrot.slane %v10766_v32, 2 }
 0x219   : > { %9530 = vmatprep.mubr.msk.bf16.mxu0 %vm1282_vm2, %v2754_v4  ;;  %v10767_v4 = vld [vmem:[%s10939_s20 + $0x20] sm:$0xff]  }
 0x21a   : > { %v3271_v35 = vsel %vm3264_vm5, %v3268_v19, %v3270_v6  ;;  %v3272_v40 = vrot.slane %v10767_v4, 2  ;;  %v10780_v19 = vld [vmem:[%s10939_s20 + $0x88] sm:$0xff]   ;;  %v3306_v4 = vrot.slane %v11167_v58, 2  ;;  %v3312_v58 = vrot.slane %v11201_v48, 2 }
 0x21b   : > { %v3298_v32 = vrot.slane %v10780_v19, 2 }
 0x21c   : > { %v3273_v45 = vsel %vm3264_vm5, %v3270_v6, %v3272_v40  ;;  %v3275_v36 = vsel %vm3264_vm5, %v3272_v40, %v3274_v39 }
 0x21d   : > { %v3299_v0 = vsel %vm3264_vm5, %v3296_v13, %v3298_v32  ;;  %v3301_v26 = vsel %vm3264_vm5, %v3298_v32, %v3300_v23 }
 0x220   : > { %9531 = vmatmul.mubr.msk.bf16.gmra.mrb[56].mxu0 %vm1282_vm2, %v2758_v46  ;;  %v3277_v46 = vsel %vm3264_vm5, %v3274_v39, %v3276_v43  ;;  %v3309_v39 = vsel %vm3264_vm5, %v3306_v4, %v3308_v41  ;;  %v10810_v43 = vmov 0.0  }
 0x221   : > { %9534 = vmatprep.mubr.msk.bf16.mxu0 %vm1282_vm2, %v2762_v62  ;;  %v10772_v62 = vld [vmem:[%s10939_s20 + $0x48] sm:$0xff]   ;;  %9612 = vmatprep.subr.bf16.mxu1 %v10810_v43  ;;  %3956 = vst.msk [vmem:[#allocation2] sm:$0xff] %vm3955_vm6, %v10810_v43 }
 0x222   : > { %v3282_v2 = vrot.slane %v10772_v62, 2  ;;  %5754 = vst.msk [vmem:[#allocation3] sm:$0xff] %vm1282_vm2, %v10810_v43  ;;  %9962 = vmatprep.subr.bf16.mxu0 %v10810_v43  ;;  %9613 = vmatpush3.bf16.msra.mxu1 %v4253_v53  ;;  %v3328_v62 = vrot.slane %v11292_v27, 2 }
 0x223   : > { %9682 = vmatprep.subr.bf16.mxu1 %v10810_v43  ;;  %9614 = vmatprep.mubr.msk.bf16.mxu1 %vm10811_vm8, %v10810_v43  ;;  %4026 = vst.msk [vmem:[#allocation2 + $0x228] sm:$0x3] %vm4025_vm9, %v10810_v43 }
 0x224   : > { %v3283_v51 = vsel %vm3264_vm5, %v3280_v52, %v3282_v2  ;;  %v3327_v52 = vsel %vm3264_vm5, %v3324_v25, %v3326_v50  ;;  %5790 = vst.msk [vmem:[#allocation3 + $0x118] sm:$0x3] %vm5789_vm10, %v10810_v43 }
 0x225   : > { %6778 = vst.msk [vmem:[#allocation4] sm:$0xff] %vm6777_vm11, %v10810_v43 }
 0x226   : > { %6797 = vst.msk [vmem:[#allocation4 + $0x90] sm:$0x3] %vm6796_vm12, %v10810_v43 }
 0x227   : > { %7285 = vst.msk [vmem:[#allocation5] sm:$0xff] %vm7284_vm13, %v10810_v43 }
 0x228   : > { %9535 = vmatmul.mubr.msk.bf16.gmra.mrb[60].mxu0 %vm1282_vm2, %v2766_v49  ;;  %v3285_v49 = vsel %vm3264_vm5, %v3282_v2, %v3284_v8  ;;  %v3330_v2 = vrot.slane %v11390_v57, 2  ;;  %v11856_v57 = vld [vmem:[%s711_s17] ss:$0 sm:$0xff]  ;;  %7294 = vst.msk [vmem:[#allocation5 + $0x36] sm:$0x3] %vm7293_vm14, %v10810_v43 }
 0x229   : > { %9538 = vmatprep.mubr.msk.bf16.mxu0 %vm1282_vm2, %v2770_v59  ;;  %v3288_v59 = vrot.slane %v10775_v1, 2  ;;  %7646 = vst.msk [vmem:[#allocation6 + $0x18] sm:$0x3] %vm7645_vm1, %v10810_v43 }
 0x22a   : > { %v3333_v37 = vsel %vm3264_vm5, %v3330_v2, %v3332_v30 }
 0x22b   : > { %v3289_v15 = vsel %vm3264_vm5, %v3286_v12, %v3288_v59  ;;  %v3291_v22 = vsel %vm3264_vm5, %v3288_v59, %v3290_v28 }
 0x230   : > { %9539 = vmatmul.mubr.msk.bf16.gmra.mrb[64].mxu0 %vm1282_vm2, %v2779_v24  ;;  %v10778_v24 = vld [vmem:[%s10939_s20 + $0x78] sm:$0xff]   ;;  %s12477_s20 = scalar_lea.vmem %s13313_s5, %s10657_s27 }
 0x231   : > { %9544 = vmatprep.mubr.msk.bf16.mxu0 %vm1282_vm2, %v3267_v31  ;;  %v3294_v31 = vrot.slane %v10778_v24, 2 }
 0x233   : > { %v3295_v16 = vsel %vm3264_vm5, %v3292_v17, %v3294_v31  ;;  %v3297_v6 = vsel %vm3264_vm5, %v3294_v31, %v3296_v13 }
 0x238   : > { %9545 = vmatmul.mubr.msk.bf16.vlgmr.msra.gmra.mrb[0].mxu0 %vm1282_vm2, %v3269_v34  ;;  %v3303_v34 = vsel %vm3264_vm5, %v3300_v23, %v3302_v7 }
 0x239   : > { %9548 = vmatprep.mubr.msk.bf16.mxu0 %vm1282_vm2, %v3271_v35  ;;  %v3304_v35 = vrot.slane %v11157_v29, 2  ;;  %v3314_v29 = vrot.slane %v11211_v21, 2  ;;  %v3319_v21 = vsel %vm3264_vm5, %v3316_v18, %v3318_v20 }
 0x23b   : > { %v3305_v40 = vsel %vm3264_vm5, %v3302_v7, %v3304_v35  ;;  %v3307_v44 = vsel %vm3264_vm5, %v3304_v35, %v3306_v4  ;;  %v3315_v54 = vsel %vm3264_vm5, %v3312_v58, %v3314_v29  ;;  %v3317_v48 = vsel %vm3264_vm5, %v3314_v29, %v3316_v18  ;;  %v4112_v7 = vld [vmem:[%s11818_s29] sm:$0x1] }
 0x240   : > { %9549 = vmatmul.mubr.msk.bf16.gmra.mrb[4].mxu0 %vm1282_vm2, %v3273_v45  ;;  %v3311_v45 = vsel %vm3264_vm5, %v3308_v41, %v3310_v60 }
 0x241   : > { %9552 = vmatprep.mubr.msk.bf16.mxu0 %vm1282_vm2, %v3275_v36  ;;  %v3313_v36 = vsel %vm3264_vm5, %v3310_v60, %v3312_v58 }
 0x248   : > { %9553 = vmatmul.mubr.msk.bf16.gmra.mrb[8].mxu0 %vm1282_vm2, %v3277_v46  ;;  %v3321_v46 = vsel %vm3264_vm5, %v3318_v20, %v3320_v55 }
 0x249   : > { %9556 = vmatprep.mubr.msk.bf16.mxu0 %vm1282_vm2, %v3279_v56  ;;  %v3323_v56 = vsel %vm3264_vm5, %v3320_v55, %v3322_v10 }
 0x250   : > { %9557 = vmatmul.mubr.msk.bf16.gmra.mrb[12].mxu0 %vm1282_vm2, %v3281_v61  ;;  %v3329_v61 = vsel %vm3264_vm5, %v3326_v50, %v3328_v62 }
 0x251   : > { %9560 = vmatprep.mubr.msk.bf16.mxu0 %vm1282_vm2, %v3283_v51  ;;  %v3331_v51 = vsel %vm3264_vm5, %v3328_v62, %v3330_v2 }
 0x258   : > { %9561 = vmatmul.mubr.msk.bf16.gmra.mrb[16].mxu0 %vm1282_vm2, %v3285_v49 }
 0x259   : > { %9564 = vmatprep.mubr.msk.bf16.mxu0 %vm1282_vm2, %v3287_v5 }
 0x260   : > { %9565 = vmatmul.mubr.msk.bf16.gmra.mrb[20].mxu0 %vm1282_vm2, %v3289_v15 }
 0x261   : > { %9568 = vmatprep.mubr.msk.bf16.mxu0 %vm1282_vm2, %v3291_v22 }
 0x268   : > { %9569 = vmatmul.mubr.msk.bf16.gmra.mrb[24].mxu0 %vm1282_vm2, %v3293_v14 }
 0x269   : > { %9572 = vmatprep.mubr.msk.bf16.mxu0 %vm1282_vm2, %v3295_v16 }
 0x270   : > { %9573 = vmatmul.mubr.msk.bf16.gmra.mrb[28].mxu0 %vm1282_vm2, %v3297_v6 }
 0x271   : > { %9576 = vmatprep.mubr.msk.bf16.mxu0 %vm1282_vm2, %v3299_v0 }
 0x278   : > { %9577 = vmatmul.mubr.msk.bf16.gmra.mrb[32].mxu0 %vm1282_vm2, %v3301_v26 }
 0x279   : > { %9580 = vmatprep.mubr.msk.bf16.mxu0 %vm1282_vm2, %v3303_v34 }
 0x280   : > { %9581 = vmatmul.mubr.msk.bf16.gmra.mrb[36].mxu0 %vm1282_vm2, %v3305_v40 }
 0x281   : > { %9584 = vmatprep.mubr.msk.bf16.mxu0 %vm1282_vm2, %v3307_v44  ;;  %v4476_v44 = vsel %vm4251_vm7, %v4112_v7, 0 }
 0x288   : > { %9585 = vmatmul.mubr.msk.bf16.gmra.mrb[40].mxu0 %vm1282_vm2, %v3309_v39 }
 0x289   : > { %9588 = vmatprep.mubr.msk.bf16.mxu0 %vm1282_vm2, %v3311_v45 }
 0x290   : > { %9589 = vmatmul.mubr.msk.bf16.gmra.mrb[44].mxu0 %vm1282_vm2, %v3313_v36 }
 0x291   : > { %9592 = vmatprep.mubr.msk.bf16.mxu0 %vm1282_vm2, %v3315_v54 }
 0x298   : > { %9593 = vmatmul.mubr.msk.bf16.gmra.mrb[48].mxu0 %vm1282_vm2, %v3317_v48 }
 0x299   : > { %9596 = vmatprep.mubr.msk.bf16.mxu0 %vm1282_vm2, %v3319_v21 }
 0x2a0   : > { %9597 = vmatmul.mubr.msk.bf16.gmra.mrb[52].mxu0 %vm1282_vm2, %v3321_v46 }
 0x2a1   : > { %9600 = vmatprep.mubr.msk.bf16.mxu0 %vm1282_vm2, %v3323_v56 }
 0x2a8   : > { %9601 = vmatmul.mubr.msk.bf16.gmra.mrb[56].mxu0 %vm1282_vm2, %v3325_v47 }
 0x2a9   : > { %9604 = vmatprep.mubr.msk.bf16.mxu0 %vm1282_vm2, %v3327_v52 }
 0x2b0   : > { %9605 = vmatmul.mubr.msk.bf16.gmra.mrb[60].mxu0 %vm1282_vm2, %v3329_v61 }
 0x2b1   : > { %9608 = vmatprep.mubr.msk.bf16.mxu0 %vm1282_vm2, %v3331_v51 }
 0x2b8   : > { %9609 = vmatmul.mubr.msk.bf16.gmra.mrb[64].mxu0 %vm1282_vm2, %v3333_v37 }
 0x2b9   : > { %9964 = vmatprep.mubr.msk.bf16.mxu0 %vm10811_vm8, %v10810_v43 }
 0x2e8   : > { %v11854_v27 = vpop.f32.mrb[0].mxu1 }
 0x2e9   : > { %v11858_v38 = vpop.f32.mrb[1].mxu1 }
 0x2ea   : > { %v11860_v8 = vpop.f32.mrb[2].mxu1 }
 0x2eb   : > { %v11862_v3 = vpop.f32.mrb[3].mxu1 }
 0x30b   : > { %v9546_v9 = vpop.f32.mrb[0].mxu0 }
 0x30c   : > { %v3821_v12 = vadd.f32 %v9546_v9, %v11856_v57  ;;  %v3473_v49 = vpop.f32.mrb[1].mxu0 }
 0x30d   : > { %v3819_v5 = vadd.f32 %v11856_v57, %v3473_v49  ;;  %v9547_v1 = vpop.f32.mrb[2].mxu0 }
 0x30e   : > { %v3889_v59 = vmax.f32 %v3821_v12, 0.0  ;;  %v3822_v11 = vadd.f32 %v9547_v1, %v11856_v57  ;;  %v3476_v28 = vpop.f32.mrb[3].mxu0 }
 0x30f   : > { %v3887_v15 = vmax.f32 %v3819_v5, 0.0  ;;  %v3820_v22 = vadd.f32 %v11856_v57, %v3476_v28 }
 0x310   : > { %3959 = vst.msk [vmem:[#allocation2 + $0x18] sm:$0xff] %vm3955_vm6, %v3889_v59  ;;  %v3890_v63 = vmax.f32 %v3822_v11, 0.0 }
 0x311   : > { %3957 = vst.msk [vmem:[#allocation2 + $0x8] sm:$0xff] %vm3955_vm6, %v3887_v15  ;;  %v3888_v17 = vmax.f32 %v3820_v22, 0.0 }
 0x312   : > { %3960 = vst.msk [vmem:[#allocation2 + $0x20] sm:$0xff] %vm3955_vm6, %v3890_v63 }
 0x313   : > { %3958 = vst.msk [vmem:[#allocation2 + $0x10] sm:$0xff] %vm3955_vm6, %v3888_v17  ;;  %v9550_v24 = vpop.f32.mrb[4].mxu0 }
 0x314   : > { %v3825_v31 = vadd.f32 %v9550_v24, %v11856_v57  ;;  %v3489_v14 = vpop.f32.mrb[5].mxu0 }
 0x315   : > { %v3823_v16 = vadd.f32 %v11856_v57, %v3489_v14  ;;  %v9551_v42 = vpop.f32.mrb[6].mxu0 }
 0x316   : > { %v3893_v13 = vmax.f32 %v3825_v31, 0.0  ;;  %v3826_v19 = vadd.f32 %v9551_v42, %v11856_v57  ;;  %v3492_v32 = vpop.f32.mrb[7].mxu0 }
 0x317   : > { %v3891_v6 = vmax.f32 %v3823_v16, 0.0  ;;  %v3824_v0 = vadd.f32 %v11856_v57, %v3492_v32 }
 0x318   : > { %3963 = vst.msk [vmem:[#allocation2 + $0x38] sm:$0xff] %vm3955_vm6, %v3893_v13  ;;  %v3894_v23 = vmax.f32 %v3826_v19, 0.0 }
 0x319   : > { %3961 = vst.msk [vmem:[#allocation2 + $0x28] sm:$0xff] %vm3955_vm6, %v3891_v6  ;;  %v3892_v26 = vmax.f32 %v3824_v0, 0.0 }
 0x31a   : > { %3964 = vst.msk [vmem:[#allocation2 + $0x40] sm:$0xff] %vm3955_vm6, %v3894_v23  ;;  %v4114_v34 = vld [vmem:[#allocation2 + $0x7] ss:$2 sm:$0xff]  ;;  %v4116_v35 = vld [vmem:[#allocation2 + $0x17] ss:$2 sm:$0xff] }
 0x31b   : > { %3962 = vst.msk [vmem:[#allocation2 + $0x30] sm:$0xff] %vm3955_vm6, %v3892_v26  ;;  %v9554_v4 = vpop.f32.mrb[8].mxu0  ;;  %v4181_v40 = vpack.c.bf16 %v4116_v35, %v4114_v34 }
 0x31c   : > { %v3829_v41 = vadd.f32 %v9554_v4, %v11856_v57  ;;  %v3505_v60 = vpop.f32.mrb[9].mxu0 }
 0x31d   : > { %v3827_v39 = vadd.f32 %v11856_v57, %v3505_v60  ;;  %v9555_v45 = vpop.f32.mrb[10].mxu0  ;;  %9615 = vmatmul.mubr.msk.bf16.vlgmr.msra.gmra.mrb[4].mxu1 %vm3955_vm6, %v4181_v40 }
 0x31e   : > { %v3897_v58 = vmax.f32 %v3829_v41, 0.0  ;;  %v3830_v29 = vadd.f32 %v9555_v45, %v11856_v57  ;;  %v3508_v36 = vpop.f32.mrb[11].mxu0  ;;  %9683 = vmatpush3.bf16.msra.mxu1 %v4476_v44  ;;  %9618 = vmatprep.mubr.msk.bf16.mxu1 %vm10811_vm8, %v10810_v43 }
 0x31f   : > { %v3895_v54 = vmax.f32 %v3827_v39, 0.0  ;;  %v3828_v18 = vadd.f32 %v11856_v57, %v3508_v36  ;;  %9752 = vmatprep.subr.bf16.mxu1 %v10810_v43 }
 0x320   : > { %3967 = vst.msk [vmem:[#allocation2 + $0x58] sm:$0xff] %vm3955_vm6, %v3897_v58  ;;  %v3898_v20 = vmax.f32 %v3830_v29, 0.0 }
 0x321   : > { %3965 = vst.msk [vmem:[#allocation2 + $0x48] sm:$0xff] %vm3955_vm6, %v3895_v54  ;;  %v3896_v48 = vmax.f32 %v3828_v18, 0.0 }
 0x322   : > { %3968 = vst.msk [vmem:[#allocation2 + $0x60] sm:$0xff] %vm3955_vm6, %v3898_v20  ;;  %v4118_v21 = vld [vmem:[#allocation2 + $0x27] ss:$2 sm:$0xff]  ;;  %v4120_v33 = vld [vmem:[#allocation2 + $0x37] ss:$2 sm:$0xff] }
 0x323   : > { %3966 = vst.msk [vmem:[#allocation2 + $0x50] sm:$0xff] %vm3955_vm6, %v3896_v48  ;;  %v9558_v55 = vpop.f32.mrb[12].mxu0  ;;  %v4182_v53 = vpack.c.bf16 %v4120_v33, %v4118_v21 }
 0x324   : > { %v3833_v10 = vadd.f32 %v9558_v55, %v11856_v57  ;;  %v3521_v46 = vpop.f32.mrb[13].mxu0 }
 0x325   : > { %v3831_v56 = vadd.f32 %v11856_v57, %v3521_v46  ;;  %v9559_v25 = vpop.f32.mrb[14].mxu0  ;;  %9619 = vmatmul.mubr.msk.bf16.gmra.mrb[8].mxu1 %vm3955_vm6, %v4182_v53 }
 0x326   : > { %v3901_v50 = vmax.f32 %v3833_v10, 0.0  ;;  %v3834_v47 = vadd.f32 %v9559_v25, %v11856_v57  ;;  %v3524_v52 = vpop.f32.mrb[15].mxu0  ;;  %9622 = vmatprep.mubr.msk.bf16.mxu1 %vm10811_vm8, %v10810_v43 }
 0x327   : > { %v3899_v62 = vmax.f32 %v3831_v56, 0.0  ;;  %v3832_v2 = vadd.f32 %v11856_v57, %v3524_v52 }
 0x328   : > { %3971 = vst.msk [vmem:[#allocation2 + $0x78] sm:$0xff] %vm3955_vm6, %v3901_v50  ;;  %v3902_v61 = vmax.f32 %v3834_v47, 0.0 }
 0x329   : > { %3969 = vst.msk [vmem:[#allocation2 + $0x68] sm:$0xff] %vm3955_vm6, %v3899_v62  ;;  %v3900_v51 = vmax.f32 %v3832_v2, 0.0 }
 0x32a   : > { %3972 = vst.msk [vmem:[#allocation2 + $0x80] sm:$0xff] %vm3955_vm6, %v3902_v61  ;;  %v4122_v30 = vld [vmem:[#allocation2 + $0x47] ss:$2 sm:$0xff]  ;;  %v4124_v37 = vld [vmem:[#allocation2 + $0x57] ss:$2 sm:$0xff] }
 0x32b   : > { %3970 = vst.msk [vmem:[#allocation2 + $0x70] sm:$0xff] %vm3955_vm6, %v3900_v51  ;;  %v9562_v9 = vpop.f32.mrb[16].mxu0  ;;  %v4183_v12 = vpack.c.bf16 %v4124_v37, %v4122_v30 }
 0x32c   : > { %v3837_v49 = vadd.f32 %v9562_v9, %v11856_v57  ;;  %v3537_v5 = vpop.f32.mrb[17].mxu0 }
 0x32d   : > { %v3835_v1 = vadd.f32 %v11856_v57, %v3537_v5  ;;  %v9563_v59 = vpop.f32.mrb[18].mxu0  ;;  %9623 = vmatmul.mubr.msk.bf16.gmra.mrb[12].mxu1 %vm3955_vm6, %v4183_v12 }
 0x32e   : > { %v3905_v11 = vmax.f32 %v3837_v49, 0.0  ;;  %v3838_v28 = vadd.f32 %v9563_v59, %v11856_v57  ;;  %v3540_v15 = vpop.f32.mrb[19].mxu0  ;;  %9626 = vmatprep.mubr.msk.bf16.mxu1 %vm10811_vm8, %v10810_v43 }
 0x32f   : > { %v3903_v22 = vmax.f32 %v3835_v1, 0.0  ;;  %v3836_v63 = vadd.f32 %v11856_v57, %v3540_v15 }
 0x330   : > { %3975 = vst.msk [vmem:[#allocation2 + $0x98] sm:$0xff] %vm3955_vm6, %v3905_v11  ;;  %v3906_v17 = vmax.f32 %v3838_v28, 0.0 }
 0x331   : > { %3973 = vst.msk [vmem:[#allocation2 + $0x88] sm:$0xff] %vm3955_vm6, %v3903_v22  ;;  %v3904_v24 = vmax.f32 %v3836_v63, 0.0 }
 0x332   : > { %3976 = vst.msk [vmem:[#allocation2 + $0xa0] sm:$0xff] %vm3955_vm6, %v3906_v17  ;;  %v4126_v31 = vld [vmem:[#allocation2 + $0x67] ss:$2 sm:$0xff]  ;;  %v4128_v14 = vld [vmem:[#allocation2 + $0x77] ss:$2 sm:$0xff] }
 0x333   : > { %3974 = vst.msk [vmem:[#allocation2 + $0x90] sm:$0xff] %vm3955_vm6, %v3904_v24  ;;  %v9566_v16 = vpop.f32.mrb[20].mxu0  ;;  %v4184_v42 = vpack.c.bf16 %v4128_v14, %v4126_v31 }
 0x334   : > { %v3841_v13 = vadd.f32 %v9566_v16, %v11856_v57  ;;  %v3553_v19 = vpop.f32.mrb[21].mxu0 }
 0x335   : > { %v3839_v32 = vadd.f32 %v11856_v57, %v3553_v19  ;;  %v9567_v6 = vpop.f32.mrb[22].mxu0  ;;  %9627 = vmatmul.mubr.msk.bf16.gmra.mrb[16].mxu1 %vm3955_vm6, %v4184_v42 }
 0x336   : > { %v3909_v0 = vmax.f32 %v3841_v13, 0.0  ;;  %v3842_v23 = vadd.f32 %v9567_v6, %v11856_v57  ;;  %v3556_v7 = vpop.f32.mrb[23].mxu0  ;;  %9630 = vmatprep.mubr.msk.bf16.mxu1 %vm10811_vm8, %v10810_v43 }
 0x337   : > { %v3907_v26 = vmax.f32 %v3839_v32, 0.0  ;;  %v3840_v34 = vadd.f32 %v11856_v57, %v3556_v7 }
 0x338   : > { %3979 = vst.msk [vmem:[#allocation2 + $0xb8] sm:$0xff] %vm3955_vm6, %v3909_v0  ;;  %v3910_v35 = vmax.f32 %v3842_v23, 0.0 }
 0x339   : > { %3977 = vst.msk [vmem:[#allocation2 + $0xa8] sm:$0xff] %vm3955_vm6, %v3907_v26  ;;  %v3908_v4 = vmax.f32 %v3840_v34, 0.0 }
 0x33a   : > { %3980 = vst.msk [vmem:[#allocation2 + $0xc0] sm:$0xff] %vm3955_vm6, %v3910_v35  ;;  %v4130_v40 = vld [vmem:[#allocation2 + $0x87] ss:$2 sm:$0xff]  ;;  %v4132_v44 = vld [vmem:[#allocation2 + $0x97] ss:$2 sm:$0xff] }
 0x33b   : > { %3978 = vst.msk [vmem:[#allocation2 + $0xb0] sm:$0xff] %vm3955_vm6, %v3908_v4  ;;  %v9570_v41 = vpop.f32.mrb[24].mxu0  ;;  %v4185_v60 = vpack.c.bf16 %v4132_v44, %v4130_v40 }
 0x33c   : > { %v3845_v39 = vadd.f32 %v9570_v41, %v11856_v57  ;;  %v3569_v45 = vpop.f32.mrb[25].mxu0 }
 0x33d   : > { %v3843_v58 = vadd.f32 %v11856_v57, %v3569_v45  ;;  %v9571_v29 = vpop.f32.mrb[26].mxu0  ;;  %9631 = vmatmul.mubr.msk.bf16.gmra.mrb[20].mxu1 %vm3955_vm6, %v4185_v60 }
 0x33e   : > { %v3913_v36 = vmax.f32 %v3845_v39, 0.0  ;;  %v3846_v54 = vadd.f32 %v9571_v29, %v11856_v57  ;;  %v3572_v18 = vpop.f32.mrb[27].mxu0  ;;  %9634 = vmatprep.mubr.msk.bf16.mxu1 %vm10811_vm8, %v10810_v43 }
 0x33f   : > { %v3911_v20 = vmax.f32 %v3843_v58, 0.0  ;;  %v3844_v48 = vadd.f32 %v11856_v57, %v3572_v18 }
 0x340   : > { %3983 = vst.msk [vmem:[#allocation2 + $0xd8] sm:$0xff] %vm3955_vm6, %v3913_v36  ;;  %v3914_v21 = vmax.f32 %v3846_v54, 0.0 }
 0x341   : > { %3981 = vst.msk [vmem:[#allocation2 + $0xc8] sm:$0xff] %vm3955_vm6, %v3911_v20  ;;  %v3912_v33 = vmax.f32 %v3844_v48, 0.0 }
 0x342   : > { %3984 = vst.msk [vmem:[#allocation2 + $0xe0] sm:$0xff] %vm3955_vm6, %v3914_v21  ;;  %v4134_v55 = vld [vmem:[#allocation2 + $0xa7] ss:$2 sm:$0xff]  ;;  %v4136_v53 = vld [vmem:[#allocation2 + $0xb7] ss:$2 sm:$0xff] }
 0x343   : > { %3982 = vst.msk [vmem:[#allocation2 + $0xd0] sm:$0xff] %vm3955_vm6, %v3912_v33  ;;  %v9574_v10 = vpop.f32.mrb[28].mxu0  ;;  %v4186_v46 = vpack.c.bf16 %v4136_v53, %v4134_v55 }
 0x344   : > { %v3849_v56 = vadd.f32 %v9574_v10, %v11856_v57  ;;  %v3585_v25 = vpop.f32.mrb[29].mxu0 }
 0x345   : > { %v3847_v50 = vadd.f32 %v11856_v57, %v3585_v25  ;;  %v9575_v47 = vpop.f32.mrb[30].mxu0  ;;  %9635 = vmatmul.mubr.msk.bf16.gmra.mrb[24].mxu1 %vm3955_vm6, %v4186_v46 }
 0x346   : > { %v3917_v52 = vmax.f32 %v3849_v56, 0.0  ;;  %v3850_v62 = vadd.f32 %v9575_v47, %v11856_v57  ;;  %v3588_v2 = vpop.f32.mrb[31].mxu0  ;;  %9638 = vmatprep.mubr.msk.bf16.mxu1 %vm10811_vm8, %v10810_v43 }
 0x347   : > { %v3915_v61 = vmax.f32 %v3847_v50, 0.0  ;;  %v3848_v51 = vadd.f32 %v11856_v57, %v3588_v2 }
 0x348   : > { %3987 = vst.msk [vmem:[#allocation2 + $0xf8] sm:$0xff] %vm3955_vm6, %v3917_v52  ;;  %v3918_v30 = vmax.f32 %v3850_v62, 0.0 }
 0x349   : > { %3985 = vst.msk [vmem:[#allocation2 + $0xe8] sm:$0xff] %vm3955_vm6, %v3915_v61  ;;  %v3916_v37 = vmax.f32 %v3848_v51, 0.0 }
 0x34a   : > { %3988 = vst.msk [vmem:[#allocation2 + $0x100] sm:$0xff] %vm3955_vm6, %v3918_v30  ;;  %v4138_v9 = vld [vmem:[#allocation2 + $0xc7] ss:$2 sm:$0xff]  ;;  %v4140_v12 = vld [vmem:[#allocation2 + $0xd7] ss:$2 sm:$0xff] }
 0x34b   : > { %3986 = vst.msk [vmem:[#allocation2 + $0xf0] sm:$0xff] %vm3955_vm6, %v3916_v37  ;;  %v9578_v49 = vpop.f32.mrb[32].mxu0  ;;  %v4187_v5 = vpack.c.bf16 %v4140_v12, %v4138_v9 }
 0x34c   : > { %v3853_v1 = vadd.f32 %v9578_v49, %v11856_v57  ;;  %v3601_v59 = vpop.f32.mrb[33].mxu0 }
 0x34d   : > { %v3851_v11 = vadd.f32 %v11856_v57, %v3601_v59  ;;  %v9579_v28 = vpop.f32.mrb[34].mxu0  ;;  %9639 = vmatmul.mubr.msk.bf16.gmra.mrb[28].mxu1 %vm3955_vm6, %v4187_v5 }
 0x34e   : > { %v3921_v15 = vmax.f32 %v3853_v1, 0.0  ;;  %v3854_v22 = vadd.f32 %v9579_v28, %v11856_v57  ;;  %v3604_v63 = vpop.f32.mrb[35].mxu0  ;;  %9642 = vmatprep.mubr.msk.bf16.mxu1 %vm10811_vm8, %v10810_v43 }
 0x34f   : > { %v3919_v17 = vmax.f32 %v3851_v11, 0.0  ;;  %v3852_v24 = vadd.f32 %v11856_v57, %v3604_v63 }
 0x350   : > { %3991 = vst.msk [vmem:[#allocation2 + $0x118] sm:$0xff] %vm3955_vm6, %v3921_v15  ;;  %v3922_v31 = vmax.f32 %v3854_v22, 0.0 }
 0x351   : > { %3989 = vst.msk [vmem:[#allocation2 + $0x108] sm:$0xff] %vm3955_vm6, %v3919_v17  ;;  %v3920_v14 = vmax.f32 %v3852_v24, 0.0 }
 0x352   : > { %3992 = vst.msk [vmem:[#allocation2 + $0x120] sm:$0xff] %vm3955_vm6, %v3922_v31  ;;  %v4142_v16 = vld [vmem:[#allocation2 + $0xe7] ss:$2 sm:$0xff]  ;;  %v4144_v42 = vld [vmem:[#allocation2 + $0xf7] ss:$2 sm:$0xff] }
 0x353   : > { %3990 = vst.msk [vmem:[#allocation2 + $0x110] sm:$0xff] %vm3955_vm6, %v3920_v14  ;;  %v9582_v13 = vpop.f32.mrb[36].mxu0  ;;  %v4188_v19 = vpack.c.bf16 %v4144_v42, %v4142_v16 }
 0x354   : > { %v3857_v32 = vadd.f32 %v9582_v13, %v11856_v57  ;;  %v3617_v6 = vpop.f32.mrb[37].mxu0 }
 0x355   : > { %v3855_v0 = vadd.f32 %v11856_v57, %v3617_v6  ;;  %v9583_v23 = vpop.f32.mrb[38].mxu0  ;;  %9643 = vmatmul.mubr.msk.bf16.gmra.mrb[32].mxu1 %vm3955_vm6, %v4188_v19 }
 0x356   : > { %v3925_v7 = vmax.f32 %v3857_v32, 0.0  ;;  %v3858_v26 = vadd.f32 %v9583_v23, %v11856_v57  ;;  %v3620_v34 = vpop.f32.mrb[39].mxu0  ;;  %9646 = vmatprep.mubr.msk.bf16.mxu1 %vm10811_vm8, %v10810_v43 }
 0x357   : > { %v3923_v35 = vmax.f32 %v3855_v0, 0.0  ;;  %v3856_v4 = vadd.f32 %v11856_v57, %v3620_v34 }
 0x358   : > { %3995 = vst.msk [vmem:[#allocation2 + $0x138] sm:$0xff] %vm3955_vm6, %v3925_v7  ;;  %v3926_v40 = vmax.f32 %v3858_v26, 0.0 }
 0x359   : > { %3993 = vst.msk [vmem:[#allocation2 + $0x128] sm:$0xff] %vm3955_vm6, %v3923_v35  ;;  %v3924_v44 = vmax.f32 %v3856_v4, 0.0 }
 0x35a   : > { %3996 = vst.msk [vmem:[#allocation2 + $0x140] sm:$0xff] %vm3955_vm6, %v3926_v40  ;;  %v4146_v41 = vld [vmem:[#allocation2 + $0x107] ss:$2 sm:$0xff]  ;;  %v4148_v60 = vld [vmem:[#allocation2 + $0x117] ss:$2 sm:$0xff] }
 0x35b   : > { %3994 = vst.msk [vmem:[#allocation2 + $0x130] sm:$0xff] %vm3955_vm6, %v3924_v44  ;;  %v9586_v39 = vpop.f32.mrb[40].mxu0  ;;  %v4189_v45 = vpack.c.bf16 %v4148_v60, %v4146_v41 }
 0x35c   : > { %v3861_v58 = vadd.f32 %v9586_v39, %v11856_v57  ;;  %v3633_v29 = vpop.f32.mrb[41].mxu0 }
 0x35d   : > { %v3859_v36 = vadd.f32 %v11856_v57, %v3633_v29  ;;  %v9587_v54 = vpop.f32.mrb[42].mxu0  ;;  %9647 = vmatmul.mubr.msk.bf16.gmra.mrb[36].mxu1 %vm3955_vm6, %v4189_v45 }
 0x35e   : > { %v3929_v18 = vmax.f32 %v3861_v58, 0.0  ;;  %v3862_v20 = vadd.f32 %v9587_v54, %v11856_v57  ;;  %v3636_v48 = vpop.f32.mrb[43].mxu0  ;;  %9650 = vmatprep.mubr.msk.bf16.mxu1 %vm10811_vm8, %v10810_v43 }
 0x35f   : > { %v3927_v21 = vmax.f32 %v3859_v36, 0.0  ;;  %v3860_v33 = vadd.f32 %v11856_v57, %v3636_v48 }
 0x360   : > { %3999 = vst.msk [vmem:[#allocation2 + $0x158] sm:$0xff] %vm3955_vm6, %v3929_v18  ;;  %v3930_v55 = vmax.f32 %v3862_v20, 0.0 }
 0x361   : > { %3997 = vst.msk [vmem:[#allocation2 + $0x148] sm:$0xff] %vm3955_vm6, %v3927_v21  ;;  %v3928_v53 = vmax.f32 %v3860_v33, 0.0 }
 0x362   : > { %4000 = vst.msk [vmem:[#allocation2 + $0x160] sm:$0xff] %vm3955_vm6, %v3930_v55  ;;  %v4150_v10 = vld [vmem:[#allocation2 + $0x127] ss:$2 sm:$0xff]  ;;  %v4152_v46 = vld [vmem:[#allocation2 + $0x137] ss:$2 sm:$0xff] }
 0x363   : > { %3998 = vst.msk [vmem:[#allocation2 + $0x150] sm:$0xff] %vm3955_vm6, %v3928_v53  ;;  %v9590_v56 = vpop.f32.mrb[44].mxu0  ;;  %v4190_v25 = vpack.c.bf16 %v4152_v46, %v4150_v10 }
 0x364   : > { %v3865_v50 = vadd.f32 %v9590_v56, %v11856_v57  ;;  %v3649_v47 = vpop.f32.mrb[45].mxu0 }
 0x365   : > { %v3863_v52 = vadd.f32 %v11856_v57, %v3649_v47  ;;  %v9591_v62 = vpop.f32.mrb[46].mxu0  ;;  %9651 = vmatmul.mubr.msk.bf16.gmra.mrb[40].mxu1 %vm3955_vm6, %v4190_v25 }
 0x366   : > { %v3933_v2 = vmax.f32 %v3865_v50, 0.0  ;;  %v3866_v61 = vadd.f32 %v9591_v62, %v11856_v57  ;;  %v3652_v51 = vpop.f32.mrb[47].mxu0  ;;  %9654 = vmatprep.mubr.msk.bf16.mxu1 %vm10811_vm8, %v10810_v43 }
 0x367   : > { %v3931_v30 = vmax.f32 %v3863_v52, 0.0  ;;  %v3864_v37 = vadd.f32 %v11856_v57, %v3652_v51 }
 0x368   : > { %4003 = vst.msk [vmem:[#allocation2 + $0x178] sm:$0xff] %vm3955_vm6, %v3933_v2  ;;  %v3934_v9 = vmax.f32 %v3866_v61, 0.0 }
 0x369   : > { %4001 = vst.msk [vmem:[#allocation2 + $0x168] sm:$0xff] %vm3955_vm6, %v3931_v30  ;;  %v3932_v12 = vmax.f32 %v3864_v37, 0.0 }
 0x36a   : > { %4004 = vst.msk [vmem:[#allocation2 + $0x180] sm:$0xff] %vm3955_vm6, %v3934_v9  ;;  %v4154_v49 = vld [vmem:[#allocation2 + $0x147] ss:$2 sm:$0xff]  ;;  %v4156_v5 = vld [vmem:[#allocation2 + $0x157] ss:$2 sm:$0xff] }
 0x36b   : > { %4002 = vst.msk [vmem:[#allocation2 + $0x170] sm:$0xff] %vm3955_vm6, %v3932_v12  ;;  %v9594_v1 = vpop.f32.mrb[48].mxu0  ;;  %v4191_v59 = vpack.c.bf16 %v4156_v5, %v4154_v49 }
 0x36c   : > { %v3869_v11 = vadd.f32 %v9594_v1, %v11856_v57  ;;  %v3665_v28 = vpop.f32.mrb[49].mxu0 }
 0x36d   : > { %v3867_v15 = vadd.f32 %v11856_v57, %v3665_v28  ;;  %v9595_v22 = vpop.f32.mrb[50].mxu0  ;;  %9655 = vmatmul.mubr.msk.bf16.gmra.mrb[44].mxu1 %vm3955_vm6, %v4191_v59 }
 0x36e   : > { %v3937_v63 = vmax.f32 %v3869_v11, 0.0  ;;  %v3870_v17 = vadd.f32 %v9595_v22, %v11856_v57  ;;  %v3668_v24 = vpop.f32.mrb[51].mxu0  ;;  %9658 = vmatprep.mubr.msk.bf16.mxu1 %vm10811_vm8, %v10810_v43 }
 0x36f   : > { %v3935_v31 = vmax.f32 %v3867_v15, 0.0  ;;  %v3868_v14 = vadd.f32 %v11856_v57, %v3668_v24 }
 0x370   : > { %4007 = vst.msk [vmem:[#allocation2 + $0x198] sm:$0xff] %vm3955_vm6, %v3937_v63  ;;  %v3938_v16 = vmax.f32 %v3870_v17, 0.0 }
 0x371   : > { %4005 = vst.msk [vmem:[#allocation2 + $0x188] sm:$0xff] %vm3955_vm6, %v3935_v31  ;;  %v3936_v42 = vmax.f32 %v3868_v14, 0.0 }
 0x372   : > { %4008 = vst.msk [vmem:[#allocation2 + $0x1a0] sm:$0xff] %vm3955_vm6, %v3938_v16  ;;  %v4158_v13 = vld [vmem:[#allocation2 + $0x167] ss:$2 sm:$0xff]  ;;  %v4160_v19 = vld [vmem:[#allocation2 + $0x177] ss:$2 sm:$0xff] }
 0x373   : > { %4006 = vst.msk [vmem:[#allocation2 + $0x190] sm:$0xff] %vm3955_vm6, %v3936_v42  ;;  %v9598_v32 = vpop.f32.mrb[52].mxu0  ;;  %v4192_v6 = vpack.c.bf16 %v4160_v19, %v4158_v13 }
 0x374   : > { %v3873_v0 = vadd.f32 %v9598_v32, %v11856_v57  ;;  %v3681_v23 = vpop.f32.mrb[53].mxu0 }
 0x375   : > { %v3871_v7 = vadd.f32 %v11856_v57, %v3681_v23  ;;  %v9599_v26 = vpop.f32.mrb[54].mxu0  ;;  %9659 = vmatmul.mubr.msk.bf16.gmra.mrb[48].mxu1 %vm3955_vm6, %v4192_v6 }
 0x376   : > { %v3941_v34 = vmax.f32 %v3873_v0, 0.0  ;;  %v3874_v35 = vadd.f32 %v9599_v26, %v11856_v57  ;;  %v3684_v4 = vpop.f32.mrb[55].mxu0  ;;  %9662 = vmatprep.mubr.msk.bf16.mxu1 %vm10811_vm8, %v10810_v43  ;;  %v4028_v26 = vld [vmem:[#allocation2 + $0x6] ss:$2 sm:$0xff] }
 0x377   : > { %v3939_v40 = vmax.f32 %v3871_v7, 0.0  ;;  %v3872_v44 = vadd.f32 %v11856_v57, %v3684_v4 }
 0x378   : > { %4011 = vst.msk [vmem:[#allocation2 + $0x1b8] sm:$0xff] %vm3955_vm6, %v3941_v34  ;;  %v3942_v41 = vmax.f32 %v3874_v35, 0.0  ;;  %v4030_v34 = vld [vmem:[#allocation2 + $0x16] ss:$2 sm:$0xff] }
 0x379   : > { %4009 = vst.msk [vmem:[#allocation2 + $0x1a8] sm:$0xff] %vm3955_vm6, %v3939_v40  ;;  %v3940_v60 = vmax.f32 %v3872_v44, 0.0  ;;  %v8641_v35 = vld [vmem:[%s11818_s29 + $0x2] sm:$0x1]  ;;  %v4095_v4 = vpack.c.bf16 %v4030_v34, %v4028_v26  ;;  %v4032_v44 = vld [vmem:[#allocation2 + $0x26] ss:$2 sm:$0xff] }
 0x37a   : > { %4012 = vst.msk [vmem:[#allocation2 + $0x1c0] sm:$0xff] %vm3955_vm6, %v3942_v41  ;;  %v4162_v39 = vld [vmem:[#allocation2 + $0x187] ss:$2 sm:$0xff]  ;;  %v4164_v45 = vld [vmem:[#allocation2 + $0x197] ss:$2 sm:$0xff]  ;;  %v4786_v40 = vsel %vm4251_vm7, %v8641_v35, 0 }
 0x37b   : > { %4010 = vst.msk [vmem:[#allocation2 + $0x1b0] sm:$0xff] %vm3955_vm6, %v3940_v60  ;;  %v9602_v58 = vpop.f32.mrb[56].mxu0  ;;  %v4193_v29 = vpack.c.bf16 %v4164_v45, %v4162_v39  ;;  %v4034_v41 = vld [vmem:[#allocation2 + $0x36] ss:$2 sm:$0xff]  ;;  %v4036_v39 = vld [vmem:[#allocation2 + $0x46] ss:$2 sm:$0xff] }
 0x37c   : > { %v3877_v36 = vadd.f32 %v9602_v58, %v11856_v57  ;;  %v3697_v54 = vpop.f32.mrb[57].mxu0  ;;  %v4096_v60 = vpack.c.bf16 %v4034_v41, %v4032_v44  ;;  %v4038_v45 = vld [vmem:[#allocation2 + $0x56] ss:$2 sm:$0xff] }
 0x37d   : > { %v3875_v18 = vadd.f32 %v11856_v57, %v3697_v54  ;;  %v9603_v20 = vpop.f32.mrb[58].mxu0  ;;  %9663 = vmatmul.mubr.msk.bf16.gmra.mrb[52].mxu1 %vm3955_vm6, %v4193_v29  ;;  %v4097_v58 = vpack.c.bf16 %v4038_v45, %v4036_v39  ;;  %v4040_v29 = vld [vmem:[#allocation2 + $0x66] ss:$2 sm:$0xff] }
 0x37e   : > { %v3945_v48 = vmax.f32 %v3877_v36, 0.0  ;;  %v3878_v21 = vadd.f32 %v9603_v20, %v11856_v57  ;;  %v3700_v33 = vpop.f32.mrb[59].mxu0  ;;  %9666 = vmatprep.mubr.msk.bf16.mxu1 %vm10811_vm8, %v10810_v43  ;;  %v4042_v36 = vld [vmem:[#allocation2 + $0x76] ss:$2 sm:$0xff] }
 0x37f   : > { %v3943_v55 = vmax.f32 %v3875_v18, 0.0  ;;  %v3876_v53 = vadd.f32 %v11856_v57, %v3700_v33  ;;  %v4098_v54 = vpack.c.bf16 %v4042_v36, %v4040_v29  ;;  %v4044_v18 = vld [vmem:[#allocation2 + $0x86] ss:$2 sm:$0xff]  ;;  %v4046_v20 = vld [vmem:[#allocation2 + $0x96] ss:$2 sm:$0xff] }
 0x380   : > { %4015 = vst.msk [vmem:[#allocation2 + $0x1d8] sm:$0xff] %vm3955_vm6, %v3945_v48  ;;  %v3946_v10 = vmax.f32 %v3878_v21, 0.0  ;;  %v4099_v48 = vpack.c.bf16 %v4046_v20, %v4044_v18  ;;  %v4048_v21 = vld [vmem:[#allocation2 + $0xa6] ss:$2 sm:$0xff]  ;;  %v4050_v33 = vld [vmem:[#allocation2 + $0xb6] ss:$2 sm:$0xff] }
 0x381   : > { %4013 = vst.msk [vmem:[#allocation2 + $0x1c8] sm:$0xff] %vm3955_vm6, %v3943_v55  ;;  %v3944_v46 = vmax.f32 %v3876_v53, 0.0  ;;  %v4100_v55 = vpack.c.bf16 %v4050_v33, %v4048_v21  ;;  %v4052_v53 = vld [vmem:[#allocation2 + $0xc6] ss:$2 sm:$0xff] }
 0x382   : > { %4016 = vst.msk [vmem:[#allocation2 + $0x1e0] sm:$0xff] %vm3955_vm6, %v3946_v10  ;;  %v4166_v56 = vld [vmem:[#allocation2 + $0x1a7] ss:$2 sm:$0xff]  ;;  %v4168_v25 = vld [vmem:[#allocation2 + $0x1b7] ss:$2 sm:$0xff] }
 0x383   : > { %4014 = vst.msk [vmem:[#allocation2 + $0x1d0] sm:$0xff] %vm3955_vm6, %v3944_v46  ;;  %v9606_v50 = vpop.f32.mrb[60].mxu0  ;;  %v4194_v47 = vpack.c.bf16 %v4168_v25, %v4166_v56  ;;  %v4054_v10 = vld [vmem:[#allocation2 + $0xd6] ss:$2 sm:$0xff]  ;;  %v4056_v56 = vld [vmem:[#allocation2 + $0xe6] ss:$2 sm:$0xff] }
 0x384   : > { %v3881_v52 = vadd.f32 %v9606_v50, %v11856_v57  ;;  %v3713_v62 = vpop.f32.mrb[61].mxu0  ;;  %v4101_v46 = vpack.c.bf16 %v4054_v10, %v4052_v53  ;;  %v4058_v25 = vld [vmem:[#allocation2 + $0xf6] ss:$2 sm:$0xff] }
 0x385   : > { %v3879_v2 = vadd.f32 %v11856_v57, %v3713_v62  ;;  %v9607_v61 = vpop.f32.mrb[62].mxu0  ;;  %9667 = vmatmul.mubr.msk.bf16.gmra.mrb[56].mxu1 %vm3955_vm6, %v4194_v47  ;;  %v4102_v50 = vpack.c.bf16 %v4058_v25, %v4056_v56  ;;  %v4060_v47 = vld [vmem:[#allocation2 + $0x106] ss:$2 sm:$0xff]  ;;  %v8659_v56 = vld [vmem:[%s11818_s29 + $0x3] sm:$0x1] }
 0x386   : > { %v3949_v51 = vmax.f32 %v3881_v52, 0.0  ;;  %v3882_v30 = vadd.f32 %v9607_v61, %v11856_v57  ;;  %v3716_v37 = vpop.f32.mrb[63].mxu0  ;;  %9670 = vmatprep.mubr.msk.bf16.mxu1 %vm10811_vm8, %v10810_v43  ;;  %v4062_v52 = vld [vmem:[#allocation2 + $0x116] ss:$2 sm:$0xff] }
 0x387   : > { %v3947_v9 = vmax.f32 %v3879_v2, 0.0  ;;  %v3880_v12 = vadd.f32 %v11856_v57, %v3716_v37  ;;  %v4103_v62 = vpack.c.bf16 %v4062_v52, %v4060_v47  ;;  %v4064_v2 = vld [vmem:[#allocation2 + $0x126] ss:$2 sm:$0xff]  ;;  %v4066_v61 = vld [vmem:[#allocation2 + $0x136] ss:$2 sm:$0xff]  ;;  %v5130_v47 = vsel %vm4251_vm7, %v8659_v56, 0 }
 0x388   : > { %4019 = vst.msk [vmem:[#allocation2 + $0x1f8] sm:$0xff] %vm3955_vm6, %v3949_v51  ;;  %v3950_v49 = vmax.f32 %v3882_v30, 0.0  ;;  %v4104_v51 = vpack.c.bf16 %v4066_v61, %v4064_v2  ;;  %v4650_v53 = vld [vmem:[#allocation2 + $0x18] ss:$2 sm:$0xff]  ;;  %v4652_v61 = vld [vmem:[#allocation2 + $0x28] ss:$2 sm:$0xff] }
 0x389   : > { %4017 = vst.msk [vmem:[#allocation2 + $0x1e8] sm:$0xff] %vm3955_vm6, %v3947_v9  ;;  %v3948_v5 = vmax.f32 %v3880_v12, 0.0  ;;  %v4068_v12 = vld [vmem:[#allocation2 + $0x146] ss:$2 sm:$0xff] }
 0x38a   : > { %4020 = vst.msk [vmem:[#allocation2 + $0x200] sm:$0xff] %vm3955_vm6, %v3950_v49  ;;  %v4170_v1 = vld [vmem:[#allocation2 + $0x1c7] ss:$2 sm:$0xff]  ;;  %v4172_v59 = vld [vmem:[#allocation2 + $0x1d7] ss:$2 sm:$0xff] }
 0x38b   : > { %4018 = vst.msk [vmem:[#allocation2 + $0x1f0] sm:$0xff] %vm3955_vm6, %v3948_v5  ;;  %v9610_v11 = vpop.f32.mrb[64].mxu0  ;;  %v4195_v28 = vpack.c.bf16 %v4172_v59, %v4170_v1  ;;  %v4070_v49 = vld [vmem:[#allocation2 + $0x156] ss:$2 sm:$0xff]  ;;  %v4084_v26 = vld [vmem:[#allocation2 + $0x1c6] ss:$2 sm:$0xff] }
 0x38c   : > { %v10378_v15 = vadd.f32 %v9610_v11, %v11854_v27  ;;  %v3729_v22 = vpop.f32.mrb[65].mxu0  ;;  %v4105_v1 = vpack.c.bf16 %v4070_v49, %v4068_v12  ;;  %v4086_v34 = vld [vmem:[#allocation2 + $0x1d6] ss:$2 sm:$0xff] }
 0x38d   : > { %v10379_v63 = vadd.f32 %v3729_v22, %v11858_v38  ;;  %v9611_v17 = vpop.f32.mrb[66].mxu0  ;;  %9671 = vmatmul.mubr.msk.bf16.gmra.mrb[60].mxu1 %vm3955_vm6, %v4195_v28  ;;  %v4074_v22 = vld [vmem:[#allocation2 + $0x176] ss:$2 sm:$0xff] }
 0x38e   : > { %v3885_v24 = vadd.f32 %v10378_v15, %v11856_v57  ;;  %v10380_v31 = vadd.f32 %v9611_v17, %v11860_v8  ;;  %v3732_v14 = vpop.f32.mrb[67].mxu0  ;;  %9674 = vmatprep.mubr.msk.bf16.mxu1 %vm10811_vm8, %v10810_v43  ;;  %v4072_v15 = vld [vmem:[#allocation2 + $0x166] ss:$2 sm:$0xff] }
 0x38f   : > { %v3883_v16 = vadd.f32 %v10379_v63, %v11856_v57  ;;  %v10381_v42 = vadd.f32 %v3732_v14, %v11862_v3  ;;  %v4106_v17 = vpack.c.bf16 %v4074_v22, %v4072_v15  ;;  %v4658_v15 = vld [vmem:[#allocation2 + $0x58] ss:$2 sm:$0xff] }
 0x390   : > { %v3953_v13 = vmax.f32 %v3885_v24, 0.0  ;;  %v3886_v27 = vadd.f32 %v10380_v31, %v11856_v57 }
 0x391   : > { %v3951_v19 = vmax.f32 %v3883_v16, 0.0  ;;  %v3884_v38 = vadd.f32 %v10381_v42, %v11856_v57  ;;  %v4076_v16 = vld [vmem:[#allocation2 + $0x186] ss:$2 sm:$0xff]  ;;  %v4078_v42 = vld [vmem:[#allocation2 + $0x196] ss:$2 sm:$0xff] }
 0x392   : > { %4023 = vst.msk [vmem:[#allocation2 + $0x218] sm:$0xff] %vm3955_vm6, %v3953_v13  ;;  %v3954_v32 = vmax.f32 %v3886_v27, 0.0  ;;  %v4174_v6 = vld [vmem:[#allocation2 + $0x1e7] ss:$2 sm:$0xff]  ;;  %v4176_v8 = vld [vmem:[#allocation2 + $0x1f7] ss:$2 sm:$0xff]  ;;  %v4107_v27 = vpack.c.bf16 %v4078_v42, %v4076_v16 }
 0x393   : > { %4021 = vst.msk [vmem:[#allocation2 + $0x208] sm:$0xff] %vm3955_vm6, %v3951_v19  ;;  %v3952_v0 = vmax.f32 %v3884_v38, 0.0  ;;  %v4196_v23 = vpack.c.bf16 %v4176_v8, %v4174_v6  ;;  %v4080_v6 = vld [vmem:[#allocation2 + $0x1a6] ss:$2 sm:$0xff]  ;;  %v4082_v8 = vld [vmem:[#allocation2 + $0x1b6] ss:$2 sm:$0xff] }
 0x394   : > { %4024 = vst.msk [vmem:[#allocation2 + $0x220] sm:$0xff] %vm3955_vm6, %v3954_v32  ;;  %v4090_v39 = vld [vmem:[#allocation2 + $0x1f6] ss:$2 sm:$0xff] }
 0x395   : > { %4022 = vst.msk [vmem:[#allocation2 + $0x210] sm:$0xff] %vm3955_vm6, %v3952_v0  ;;  %9675 = vmatmul.mubr.msk.bf16.gmra.mrb[64].mxu1 %vm3955_vm6, %v4196_v23  ;;  %v4108_v23 = vpack.c.bf16 %v4082_v8, %v4080_v6  ;;  %v4660_v42 = vld [vmem:[#allocation2 + $0x68] ss:$2 sm:$0xff] }
 0x396   : > { %9678 = vmatprep.mubr.msk.bf16.mxu1 %vm10811_vm8, %v10810_v43 }
 0x39c   : > { %v4178_v57 = vld [vmem:[#allocation2 + $0x207] ss:$2 sm:$0xff]  ;;  %v4180_v3 = vld [vmem:[#allocation2 + $0x217] ss:$2 sm:$0xff]  ;;  %v4092_v18 = vld [vmem:[#allocation2 + $0x206] ss:$2 sm:$0xff] }
 0x39d   : > { %v4197_v7 = vpack.c.bf16 %v4180_v3, %v4178_v57  ;;  %v4094_v20 = vld [vmem:[#allocation2 + $0x216] ss:$2 sm:$0xff] }
 0x39e   : > { %v4111_v21 = vpack.c.bf16 %v4094_v20, %v4092_v18 }
 0x39f   : > { %9679 = vmatmul.mubr.msk.bf16.gmra.mrb[68].mxu1 %vm3955_vm6, %v4197_v7 }
 0x3a0   : > { %9684 = vmatprep.mubr.msk.bf16.mxu1 %vm10811_vm8, %v10810_v43 }
 0x3a7   : > { %9685 = vmatmul.mubr.msk.bf16.vlgmr.msra.gmra.mrb[72].mxu1 %vm3955_vm6, %v4095_v4  ;;  %v4109_v4 = vpack.c.bf16 %v4086_v34, %v4084_v26 }
 0x3a8   : > { %9753 = vmatpush3.bf16.msra.mxu1 %v4786_v40  ;;  %9688 = vmatprep.mubr.msk.bf16.mxu1 %vm10811_vm8, %v10810_v43 }
 0x3a9   : > { %9822 = vmatprep.subr.bf16.mxu1 %v10810_v43 }
 0x3af   : > { %9689 = vmatmul.mubr.msk.bf16.gmra.mrb[76].mxu1 %vm3955_vm6, %v4096_v60  ;;  %v4088_v60 = vld [vmem:[#allocation2 + $0x1e6] ss:$2 sm:$0xff] }
 0x3b0   : > { %9692 = vmatprep.mubr.msk.bf16.mxu1 %vm10811_vm8, %v10810_v43 }
 0x3b7   : > { %9693 = vmatmul.mubr.msk.bf16.gmra.mrb[80].mxu1 %vm3955_vm6, %v4097_v58  ;;  %v4110_v58 = vpack.c.bf16 %v4090_v39, %v4088_v60  ;;  %v4668_v60 = vld [vmem:[#allocation2 + $0xa8] ss:$2 sm:$0xff]  ;;  %v4670_v39 = vld [vmem:[#allocation2 + $0xb8] ss:$2 sm:$0xff] }
 0x3b8   : > { %9696 = vmatprep.mubr.msk.bf16.mxu1 %vm10811_vm8, %v10810_v43 }
 0x3bf   : > { %9697 = vmatmul.mubr.msk.bf16.gmra.mrb[84].mxu1 %vm3955_vm6, %v4098_v54 }
 0x3c0   : > { %9700 = vmatprep.mubr.msk.bf16.mxu1 %vm10811_vm8, %v10810_v43 }
 0x3c7   : > { %9701 = vmatmul.mubr.msk.bf16.gmra.mrb[88].mxu1 %vm3955_vm6, %v4099_v48 }
 0x3c8   : > { %9704 = vmatprep.mubr.msk.bf16.mxu1 %vm10811_vm8, %v10810_v43 }
 0x3cf   : > { %9705 = vmatmul.mubr.msk.bf16.gmra.mrb[92].mxu1 %vm3955_vm6, %v4100_v55 }
 0x3d0   : > { %9708 = vmatprep.mubr.msk.bf16.mxu1 %vm10811_vm8, %v10810_v43 }
 0x3d7   : > { %9709 = vmatmul.mubr.msk.bf16.gmra.mrb[96].mxu1 %vm3955_vm6, %v4101_v46  ;;  %v4648_v46 = vld [vmem:[#allocation2 + $0x8] ss:$2 sm:$0xff] }
 0x3d8   : > { %9712 = vmatprep.mubr.msk.bf16.mxu1 %vm10811_vm8, %v10810_v43 }
 0x3df   : > { %9713 = vmatmul.mubr.msk.bf16.gmra.mrb[100].mxu1 %vm3955_vm6, %v4102_v50  ;;  %v4715_v50 = vpack.c.bf16 %v4650_v53, %v4648_v46 }
 0x3e0   : > { %9716 = vmatprep.mubr.msk.bf16.mxu1 %vm10811_vm8, %v10810_v43 }
 0x3e7   : > { %9717 = vmatmul.mubr.msk.bf16.gmra.mrb[104].mxu1 %vm3955_vm6, %v4103_v62 }
 0x3e8   : > { %9720 = vmatprep.mubr.msk.bf16.mxu1 %vm10811_vm8, %v10810_v43 }
 0x3ef   : > { %9721 = vmatmul.mubr.msk.bf16.gmra.mrb[108].mxu1 %vm3955_vm6, %v4104_v51  ;;  %v4654_v51 = vld [vmem:[#allocation2 + $0x38] ss:$2 sm:$0xff] }
 0x3f0   : > { %v12090_v30 = vpop.f32.mrb[4].mxu1  ;;  %9724 = vmatprep.mubr.msk.bf16.mxu1 %vm10811_vm8, %v10810_v43  ;;  %v4716_v12 = vpack.c.bf16 %v4654_v51, %v4652_v61 }
 0x3f1   : > { %v9616_v37 = vpop.f32.mrb[5].mxu1 }
 0x3f2   : > { %v12094_v9 = vpop.f32.mrb[6].mxu1 }
 0x3f3   : > { %v9617_v5 = vpop.f32.mrb[7].mxu1 }
 0x3f7   : > { %9725 = vmatmul.mubr.msk.bf16.gmra.mrb[112].mxu1 %vm3955_vm6, %v4105_v1 }
 0x3f8   : > { %v12097_v59 = vpop.f32.mrb[8].mxu1  ;;  %9728 = vmatprep.mubr.msk.bf16.mxu1 %vm10811_vm8, %v10810_v43 }
 0x3f9   : > { %v9620_v11 = vpop.f32.mrb[9].mxu1 }
 0x3fa   : > { %v12101_v28 = vpop.f32.mrb[10].mxu1  ;;  %v4656_v11 = vld [vmem:[#allocation2 + $0x48] ss:$2 sm:$0xff] }
 0x3fb   : > { %v9621_v63 = vpop.f32.mrb[11].mxu1 }
 0x3fc   : > { %v4717_v63 = vpack.c.bf16 %v4658_v15, %v4656_v11  ;;  %v4682_v11 = vld [vmem:[#allocation2 + $0x118] ss:$2 sm:$0xff] }
 0x3ff   : > { %9729 = vmatmul.mubr.msk.bf16.gmra.mrb[116].mxu1 %vm3955_vm6, %v4106_v17 }
 0x400   : > { %v12104_v24 = vpop.f32.mrb[12].mxu1  ;;  %9732 = vmatprep.mubr.msk.bf16.mxu1 %vm10811_vm8, %v10810_v43 }
 0x401   : > { %v9624_v31 = vpop.f32.mrb[13].mxu1 }
 0x402   : > { %v12108_v14 = vpop.f32.mrb[14].mxu1 }
 0x403   : > { %v9625_v13 = vpop.f32.mrb[15].mxu1 }
 0x404   : > { %v4662_v13 = vld [vmem:[#allocation2 + $0x78] ss:$2 sm:$0xff] }
 0x407   : > { %9733 = vmatmul.mubr.msk.bf16.gmra.mrb[120].mxu1 %vm3955_vm6, %v4107_v27 }
 0x408   : > { %v12111_v19 = vpop.f32.mrb[16].mxu1  ;;  %9736 = vmatprep.mubr.msk.bf16.mxu1 %vm10811_vm8, %v10810_v43 }
 0x409   : > { %v9628_v38 = vpop.f32.mrb[17].mxu1 }
 0x40a   : > { %v12115_v32 = vpop.f32.mrb[18].mxu1  ;;  %v4718_v38 = vpack.c.bf16 %v4662_v13, %v4660_v42  ;;  %v4686_v42 = vld [vmem:[#allocation2 + $0x138] ss:$2 sm:$0xff] }
 0x40b   : > { %v9629_v0 = vpop.f32.mrb[19].mxu1 }
 0x40f   : > { %9737 = vmatmul.mubr.msk.bf16.gmra.mrb[124].mxu1 %vm3955_vm6, %v4108_v23  ;;  %v4664_v23 = vld [vmem:[#allocation2 + $0x88] ss:$2 sm:$0xff] }
 0x410   : > { %v12118_v57 = vpop.f32.mrb[20].mxu1  ;;  %9740 = vmatprep.mubr.msk.bf16.mxu1 %vm10811_vm8, %v10810_v43 }
 0x411   : > { %v9632_v3 = vpop.f32.mrb[21].mxu1 }
 0x412   : > { %v12122_v7 = vpop.f32.mrb[22].mxu1  ;;  %v4666_v3 = vld [vmem:[#allocation2 + $0x98] ss:$2 sm:$0xff] }
 0x413   : > { %v9633_v35 = vpop.f32.mrb[23].mxu1  ;;  %v4719_v34 = vpack.c.bf16 %v4666_v3, %v4664_v23  ;;  %v4688_v3 = vld [vmem:[#allocation2 + $0x148] ss:$2 sm:$0xff] }
 0x417   : > { %9741 = vmatmul.mubr.msk.bf16.gmra.mrb[128].mxu1 %vm3955_vm6, %v4109_v4 }
 0x418   : > { %v12125_v40 = vpop.f32.mrb[24].mxu1  ;;  %9744 = vmatprep.mubr.msk.bf16.mxu1 %vm10811_vm8, %v10810_v43 }
 0x419   : > { %v9636_v44 = vpop.f32.mrb[25].mxu1 }
 0x41a   : > { %v12129_v41 = vpop.f32.mrb[26].mxu1 }
 0x41b   : > { %v9637_v45 = vpop.f32.mrb[27].mxu1 }
 0x41f   : > { %9745 = vmatmul.mubr.msk.bf16.gmra.mrb[132].mxu1 %vm3955_vm6, %v4110_v58  ;;  %v4720_v58 = vpack.c.bf16 %v4670_v39, %v4668_v60 }
 0x420   : > { %v12132_v29 = vpop.f32.mrb[28].mxu1  ;;  %9748 = vmatprep.mubr.msk.bf16.mxu1 %vm10811_vm8, %v10810_v43 }
 0x421   : > { %v9640_v36 = vpop.f32.mrb[29].mxu1 }
 0x422   : > { %v12136_v54 = vpop.f32.mrb[30].mxu1 }
 0x423   : > { %v9641_v48 = vpop.f32.mrb[31].mxu1 }
 0x424   : > { %v4672_v48 = vld [vmem:[#allocation2 + $0xc8] ss:$2 sm:$0xff] }
 0x427   : > { %9749 = vmatmul.mubr.msk.bf16.gmra.mrb[136].mxu1 %vm3955_vm6, %v4111_v21  ;;  %v4674_v21 = vld [vmem:[#allocation2 + $0xd8] ss:$2 sm:$0xff] }
 0x428   : > { %v12139_v33 = vpop.f32.mrb[32].mxu1  ;;  %9754 = vmatprep.mubr.msk.bf16.mxu1 %vm10811_vm8, %v10810_v43  ;;  %v4721_v53 = vpack.c.bf16 %v4674_v21, %v4672_v48  ;;  %v4692_v48 = vld [vmem:[#allocation2 + $0x168] ss:$2 sm:$0xff]  ;;  %v4694_v21 = vld [vmem:[#allocation2 + $0x178] ss:$2 sm:$0xff] }
 0x429   : > { %v9644_v55 = vpop.f32.mrb[33].mxu1 }
 0x42a   : > { %v12143_v10 = vpop.f32.mrb[34].mxu1 }
 0x42b   : > { %v9645_v25 = vpop.f32.mrb[35].mxu1 }
 0x42f   : > { %9755 = vmatmul.mubr.msk.bf16.vlgmr.msra.gmra.mrb[140].mxu1 %vm3955_vm6, %v4715_v50  ;;  %v4676_v50 = vld [vmem:[#allocation2 + $0xe8] ss:$2 sm:$0xff] }
 0x430   : > { %9823 = vmatpush3.bf16.msra.mxu1 %v5130_v47  ;;  %v12148_v52 = vpop.f32.mrb[36].mxu1  ;;  %9758 = vmatprep.mubr.msk.bf16.mxu1 %vm10811_vm8, %v10810_v43  ;;  %v4678_v47 = vld [vmem:[#allocation2 + $0xf8] ss:$2 sm:$0xff] }
 0x431   : > { %v9648_v62 = vpop.f32.mrb[37].mxu1  ;;  %9892 = vmatprep.subr.bf16.mxu1 %v10810_v43  ;;  %v4722_v61 = vpack.c.bf16 %v4678_v47, %v4676_v50  ;;  %v4726_v50 = vpack.c.bf16 %v4694_v21, %v4692_v48  ;;  %v4708_v21 = vld [vmem:[#allocation2 + $0x1e8] ss:$2 sm:$0xff] }
 0x432   : > { %v12153_v2 = vpop.f32.mrb[38].mxu1 }
 0x433   : > { %v9649_v37 = vpop.f32.mrb[39].mxu1 }
 0x437   : > { %9759 = vmatmul.mubr.msk.bf16.gmra.mrb[144].mxu1 %vm3955_vm6, %v4716_v12 }
 0x438   : > { %v12156_v49 = vpop.f32.mrb[40].mxu1  ;;  %9762 = vmatprep.mubr.msk.bf16.mxu1 %vm10811_vm8, %v10810_v43 }
 0x439   : > { %v9652_v5 = vpop.f32.mrb[41].mxu1 }
 0x43a   : > { %v12160_v1 = vpop.f32.mrb[42].mxu1  ;;  %v4680_v5 = vld [vmem:[#allocation2 + $0x108] ss:$2 sm:$0xff] }
 0x43b   : > { %v9653_v22 = vpop.f32.mrb[43].mxu1 }
 0x43c   : > { %v4723_v22 = vpack.c.bf16 %v4682_v11, %v4680_v5 }
 0x43f   : > { %9763 = vmatmul.mubr.msk.bf16.gmra.mrb[148].mxu1 %vm3955_vm6, %v4717_v63 }
 0x440   : > { %v12163_v17 = vpop.f32.mrb[44].mxu1  ;;  %9766 = vmatprep.mubr.msk.bf16.mxu1 %vm10811_vm8, %v10810_v43 }
 0x441   : > { %v9656_v31 = vpop.f32.mrb[45].mxu1 }
 0x442   : > { %v12167_v16 = vpop.f32.mrb[46].mxu1  ;;  %v4684_v31 = vld [vmem:[#allocation2 + $0x128] ss:$2 sm:$0xff] }
 0x443   : > { %v9657_v27 = vpop.f32.mrb[47].mxu1 }
 0x447   : > { %9767 = vmatmul.mubr.msk.bf16.gmra.mrb[152].mxu1 %vm3955_vm6, %v4718_v38 }
 0x448   : > { %v12170_v6 = vpop.f32.mrb[48].mxu1  ;;  %9770 = vmatprep.mubr.msk.bf16.mxu1 %vm10811_vm8, %v10810_v43 }
 0x449   : > { %v9660_v8 = vpop.f32.mrb[49].mxu1 }
 0x44a   : > { %v12174_v0 = vpop.f32.mrb[50].mxu1  ;;  %v4724_v8 = vpack.c.bf16 %v4686_v42, %v4684_v31  ;;  %v4700_v31 = vld [vmem:[#allocation2 + $0x1a8] ss:$2 sm:$0xff]  ;;  %v4702_v42 = vld [vmem:[#allocation2 + $0x1b8] ss:$2 sm:$0xff] }
 0x44b   : > { %v9661_v26 = vpop.f32.mrb[51].mxu1 }
 0x44c   : > { %v4690_v26 = vld [vmem:[#allocation2 + $0x158] ss:$2 sm:$0xff] }
 0x44f   : > { %9771 = vmatmul.mubr.msk.bf16.gmra.mrb[156].mxu1 %vm3955_vm6, %v4719_v34 }
 0x450   : > { %v12177_v35 = vpop.f32.mrb[52].mxu1  ;;  %9774 = vmatprep.mubr.msk.bf16.mxu1 %vm10811_vm8, %v10810_v43 }
 0x451   : > { %v9664_v4 = vpop.f32.mrb[53].mxu1 }
 0x452   : > { %v12181_v44 = vpop.f32.mrb[54].mxu1 }
 0x453   : > { %v9665_v45 = vpop.f32.mrb[55].mxu1 }
 0x457   : > { %9775 = vmatmul.mubr.msk.bf16.gmra.mrb[160].mxu1 %vm3955_vm6, %v4720_v58  ;;  %v4725_v58 = vpack.c.bf16 %v4690_v26, %v4688_v3  ;;  %v4704_v26 = vld [vmem:[#allocation2 + $0x1c8] ss:$2 sm:$0xff] }
 0x458   : > { %v12184_v36 = vpop.f32.mrb[56].mxu1  ;;  %9778 = vmatprep.mubr.msk.bf16.mxu1 %vm10811_vm8, %v10810_v43 }
 0x459   : > { %v9668_v18 = vpop.f32.mrb[57].mxu1 }
 0x45a   : > { %v12188_v20 = vpop.f32.mrb[58].mxu1 }
 0x45b   : > { %v9669_v55 = vpop.f32.mrb[59].mxu1 }
 0x45f   : > { %9779 = vmatmul.mubr.msk.bf16.gmra.mrb[164].mxu1 %vm3955_vm6, %v4721_v53 }
 0x460   : > { %v12191_v46 = vpop.f32.mrb[60].mxu1  ;;  %9782 = vmatprep.mubr.msk.bf16.mxu1 %vm10811_vm8, %v10810_v43 }
 0x461   : > { %v9672_v56 = vpop.f32.mrb[61].mxu1 }
 0x462   : > { %v12195_v25 = vpop.f32.mrb[62].mxu1 }
 0x463   : > { %v9673_v62 = vpop.f32.mrb[63].mxu1 }
 0x464   : > { %v4696_v62 = vld [vmem:[#allocation2 + $0x188] ss:$2 sm:$0xff] }
 0x467   : > { %9783 = vmatmul.mubr.msk.bf16.gmra.mrb[168].mxu1 %vm3955_vm6, %v4722_v61  ;;  %v4698_v61 = vld [vmem:[#allocation2 + $0x198] ss:$2 sm:$0xff] }
 0x468   : > { %v12198_v51 = vpop.f32.mrb[64].mxu1  ;;  %9786 = vmatprep.mubr.msk.bf16.mxu1 %vm10811_vm8, %v10810_v43 }
 0x469   : > { %v9676_v37 = vpop.f32.mrb[65].mxu1 }
 0x46a   : > { %v12202_v12 = vpop.f32.mrb[66].mxu1 }
 0x46b   : > { %v9677_v15 = vpop.f32.mrb[67].mxu1 }
 0x46c   : > { %v4727_v15 = vpack.c.bf16 %v4698_v61, %v4696_v62  ;;  %v4712_v61 = vld [vmem:[#allocation2 + $0x208] ss:$2 sm:$0xff] }
 0x46f   : > { %9787 = vmatmul.mubr.msk.bf16.gmra.mrb[172].mxu1 %vm3955_vm6, %v4723_v22 }
 0x470   : > { %9790 = vmatprep.mubr.msk.bf16.mxu1 %vm10811_vm8, %v10810_v43 }
 0x472   : > { %v12207_v63 = vpop.f32.mrb[68].mxu1 }
 0x473   : > { %v9680_v13 = vpop.f32.mrb[69].mxu1 }
 0x474   : > { %v12209_v27 = vpop.f32.mrb[70].mxu1 }
 0x475   : > { %v9681_v38 = vpop.f32.mrb[71].mxu1 }
 0x477   : > { %9791 = vmatmul.mubr.msk.bf16.gmra.mrb[176].mxu1 %vm3955_vm6, %v4724_v8 }
 0x478   : > { %9794 = vmatprep.mubr.msk.bf16.mxu1 %vm10811_vm8, %v10810_v43 }
 0x47a   : > { %v4512_v23 = vpop.f32.mrb[72].mxu1 }
 0x47b   : > { %v12215_v34 = vadd.f32 %v4512_v23, %v12090_v30  ;;  %v9686_v4 = vpop.f32.mrb[73].mxu1  ;;  %v4728_v23 = vpack.c.bf16 %v4702_v42, %v4700_v31  ;;  %v4994_v31 = vld [vmem:[#allocation2 + $0x19] ss:$2 sm:$0xff] }
 0x47c   : > { %v4515_v60 = vpop.f32.mrb[74].mxu1  ;;  %v4706_v4 = vld [vmem:[#allocation2 + $0x1d8] ss:$2 sm:$0xff] }
 0x47d   : > { %v12218_v39 = vadd.f32 %v4515_v60, %v12094_v9  ;;  %v9687_v45 = vpop.f32.mrb[75].mxu1 }
 0x47f   : > { %9795 = vmatmul.mubr.msk.bf16.gmra.mrb[180].mxu1 %vm3955_vm6, %v4725_v58 }
 0x480   : > { %9798 = vmatprep.mubr.msk.bf16.mxu1 %vm10811_vm8, %v10810_v43 }
 0x482   : > { %v4520_v18 = vpop.f32.mrb[76].mxu1 }
 0x483   : > { %v12224_v55 = vadd.f32 %v4520_v18, %v12097_v59  ;;  %v9690_v30 = vpop.f32.mrb[77].mxu1  ;;  %v4729_v18 = vpack.c.bf16 %v4706_v4, %v4704_v26 }
 0x484   : > { %v4523_v53 = vpop.f32.mrb[78].mxu1  ;;  %v4710_v30 = vld [vmem:[#allocation2 + $0x1f8] ss:$2 sm:$0xff] }
 0x485   : > { %v12227_v56 = vadd.f32 %v4523_v53, %v12101_v28  ;;  %v9691_v9 = vpop.f32.mrb[79].mxu1 }
 0x487   : > { %9799 = vmatmul.mubr.msk.bf16.gmra.mrb[184].mxu1 %vm3955_vm6, %v4726_v50 }
 0x488   : > { %9802 = vmatprep.mubr.msk.bf16.mxu1 %vm10811_vm8, %v10810_v43 }
 0x48a   : > { %v4528_v47 = vpop.f32.mrb[80].mxu1 }
 0x48b   : > { %v12233_v37 = vadd.f32 %v4528_v47, %v12104_v24  ;;  %v9694_v59 = vpop.f32.mrb[81].mxu1  ;;  %v4730_v47 = vpack.c.bf16 %v4710_v30, %v4708_v21 }
 0x48c   : > { %v4531_v5 = vpop.f32.mrb[82].mxu1  ;;  %v4714_v59 = vld [vmem:[#allocation2 + $0x218] ss:$2 sm:$0xff] }
 0x48d   : > { %v12236_v11 = vadd.f32 %v4531_v5, %v12108_v14  ;;  %v9695_v28 = vpop.f32.mrb[83].mxu1 }
 0x48f   : > { %9803 = vmatmul.mubr.msk.bf16.gmra.mrb[188].mxu1 %vm3955_vm6, %v4727_v15 }
 0x490   : > { %9806 = vmatprep.mubr.msk.bf16.mxu1 %vm10811_vm8, %v10810_v43 }
 0x492   : > { %v4536_v22 = vpop.f32.mrb[84].mxu1 }
 0x493   : > { %v12242_v13 = vadd.f32 %v4536_v22, %v12111_v19  ;;  %v9698_v24 = vpop.f32.mrb[85].mxu1  ;;  %v4731_v22 = vpack.c.bf16 %v4714_v59, %v4712_v61 }
 0x494   : > { %v4539_v38 = vpop.f32.mrb[86].mxu1  ;;  %v4992_v24 = vld [vmem:[#allocation2 + $0x9] ss:$2 sm:$0xff] }
 0x495   : > { %v12245_v8 = vadd.f32 %v4539_v38, %v12115_v32  ;;  %v9699_v14 = vpop.f32.mrb[87].mxu1  ;;  %v8677_v38 = vld [vmem:[%s11818_s29 + $0x4] sm:$0x1]  ;;  %v5059_v26 = vpack.c.bf16 %v4994_v31, %v4992_v24 }
 0x496   : > { %v5474_v4 = vsel %vm4251_vm7, %v8677_v38, 0 }
 0x497   : > { %9807 = vmatmul.mubr.msk.bf16.gmra.mrb[192].mxu1 %vm3955_vm6, %v4728_v23 }
 0x498   : > { %9810 = vmatprep.mubr.msk.bf16.mxu1 %vm10811_vm8, %v10810_v43 }
 0x49a   : > { %v4544_v3 = vpop.f32.mrb[88].mxu1 }
 0x49b   : > { %v12251_v60 = vadd.f32 %v4544_v3, %v12118_v57  ;;  %v9702_v19 = vpop.f32.mrb[89].mxu1 }
 0x49c   : > { %v4547_v45 = vpop.f32.mrb[90].mxu1 }
 0x49d   : > { %v12254_v58 = vadd.f32 %v4547_v45, %v12122_v7  ;;  %v9703_v32 = vpop.f32.mrb[91].mxu1  ;;  %v4998_v45 = vld [vmem:[#allocation2 + $0x39] ss:$2 sm:$0xff] }
 0x49f   : > { %9811 = vmatmul.mubr.msk.bf16.gmra.mrb[196].mxu1 %vm3955_vm6, %v4729_v18 }
 0x4a0   : > { %9814 = vmatprep.mubr.msk.bf16.mxu1 %vm10811_vm8, %v10810_v43 }
 0x4a2   : > { %v4552_v48 = vpop.f32.mrb[92].mxu1 }
 0x4a3   : > { %v12260_v53 = vadd.f32 %v4552_v48, %v12125_v40  ;;  %v9706_v57 = vpop.f32.mrb[93].mxu1 }
 0x4a4   : > { %v4555_v9 = vpop.f32.mrb[94].mxu1 }
 0x4a5   : > { %v12263_v50 = vadd.f32 %v4555_v9, %v12129_v41  ;;  %v9707_v7 = vpop.f32.mrb[95].mxu1  ;;  %v5000_v9 = vld [vmem:[#allocation2 + $0x49] ss:$2 sm:$0xff] }
 0x4a6   : > { %v5002_v7 = vld [vmem:[#allocation2 + $0x59] ss:$2 sm:$0xff] }
 0x4a7   : > { %9815 = vmatmul.mubr.msk.bf16.gmra.mrb[200].mxu1 %vm3955_vm6, %v4730_v47  ;;  %v5061_v59 = vpack.c.bf16 %v5002_v7, %v5000_v9  ;;  %v5016_v7 = vld [vmem:[#allocation2 + $0xc9] ss:$2 sm:$0xff] }
 0x4a8   : > { %9818 = vmatprep.mubr.msk.bf16.mxu1 %vm10811_vm8, %v10810_v43 }
 0x4aa   : > { %v4560_v62 = vpop.f32.mrb[96].mxu1 }
 0x4ab   : > { %v12269_v5 = vadd.f32 %v4560_v62, %v12132_v29  ;;  %v9710_v40 = vpop.f32.mrb[97].mxu1 }
 0x4ac   : > { %v4563_v28 = vpop.f32.mrb[98].mxu1 }
 0x4ad   : > { %v12272_v15 = vadd.f32 %v4563_v28, %v12136_v54  ;;  %v9711_v41 = vpop.f32.mrb[99].mxu1  ;;  %v5004_v28 = vld [vmem:[#allocation2 + $0x69] ss:$2 sm:$0xff] }
 0x4ae   : > { %v5006_v41 = vld [vmem:[#allocation2 + $0x79] ss:$2 sm:$0xff] }
 0x4af   : > { %9819 = vmatmul.mubr.msk.bf16.gmra.mrb[204].mxu1 %vm3955_vm6, %v4731_v22  ;;  %v5062_v24 = vpack.c.bf16 %v5006_v41, %v5004_v28  ;;  %v5020_v41 = vld [vmem:[#allocation2 + $0xe9] ss:$2 sm:$0xff] }
 0x4b0   : > { %9824 = vmatprep.mubr.msk.bf16.mxu1 %vm10811_vm8, %v10810_v43 }
 0x4b2   : > { %v4568_v42 = vpop.f32.mrb[100].mxu1 }
 0x4b3   : > { %v12279_v14 = vadd.f32 %v4568_v42, %v12139_v33  ;;  %v9714_v29 = vpop.f32.mrb[101].mxu1  ;;  %v4996_v33 = vld [vmem:[#allocation2 + $0x29] ss:$2 sm:$0xff] }
 0x4b4   : > { %v4571_v23 = vpop.f32.mrb[102].mxu1  ;;  %v5060_v30 = vpack.c.bf16 %v4998_v45, %v4996_v33  ;;  %v5008_v29 = vld [vmem:[#allocation2 + $0x89] ss:$2 sm:$0xff] }
 0x4b5   : > { %v12282_v3 = vadd.f32 %v4571_v23, %v12143_v10  ;;  %v9715_v54 = vpop.f32.mrb[103].mxu1  ;;  %v5010_v23 = vld [vmem:[#allocation2 + $0x99] ss:$2 sm:$0xff]  ;;  %v5012_v45 = vld [vmem:[#allocation2 + $0xa9] ss:$2 sm:$0xff] }
 0x4b7   : > { %9825 = vmatmul.mubr.msk.bf16.vlgmr.msra.gmra.mrb[208].mxu1 %vm3955_vm6, %v5059_v26 }
 0x4b8   : > { %9893 = vmatpush3.bf16.msra.mxu1 %v5474_v4  ;;  %9828 = vmatprep.mubr.msk.bf16.mxu1 %vm10811_vm8, %v10810_v43 }
 0x4b9   : > { %10000 = vmatprep.subr.bf16.mxu1 %v10810_v43 }
 0x4ba   : > { %v4576_v19 = vpop.f32.mrb[104].mxu1 }
 0x4bb   : > { %v12290_v32 = vadd.f32 %v4576_v19, %v12148_v52  ;;  %v9718_v10 = vpop.f32.mrb[105].mxu1  ;;  %v5063_v19 = vpack.c.bf16 %v5010_v23, %v5008_v29  ;;  %v5024_v23 = vld [vmem:[#allocation2 + $0x109] ss:$2 sm:$0xff] }
 0x4bc   : > { %v4579_v18 = vpop.f32.mrb[106].mxu1  ;;  %v5014_v10 = vld [vmem:[#allocation2 + $0xb9] ss:$2 sm:$0xff] }
 0x4bd   : > { %v12293_v48 = vadd.f32 %v4579_v18, %v12153_v2  ;;  %v9719_v21 = vpop.f32.mrb[107].mxu1 }
 0x4bf   : > { %9829 = vmatmul.mubr.msk.bf16.gmra.mrb[212].mxu1 %vm3955_vm6, %v5060_v30 }
 0x4c0   : > { %9832 = vmatprep.mubr.msk.bf16.mxu1 %vm10811_vm8, %v10810_v43 }
 0x4c2   : > { %v4584_v57 = vpop.f32.mrb[108].mxu1 }
 0x4c3   : > { %v12299_v47 = vadd.f32 %v4584_v57, %v12156_v49  ;;  %v9722_v52 = vpop.f32.mrb[109].mxu1  ;;  %v5064_v57 = vpack.c.bf16 %v5014_v10, %v5012_v45  ;;  %v5028_v10 = vld [vmem:[#allocation2 + $0x129] ss:$2 sm:$0xff] }
 0x4c4   : > { %v4587_v62 = vpop.f32.mrb[110].mxu1  ;;  %v5018_v52 = vld [vmem:[#allocation2 + $0xd9] ss:$2 sm:$0xff] }
 0x4c5   : > { %v12302_v61 = vadd.f32 %v4587_v62, %v12160_v1  ;;  %v9723_v2 = vpop.f32.mrb[111].mxu1 }
 0x4c7   : > { %9833 = vmatmul.mubr.msk.bf16.gmra.mrb[216].mxu1 %vm3955_vm6, %v5061_v59 }
 0x4c8   : > { %9836 = vmatprep.mubr.msk.bf16.mxu1 %vm10811_vm8, %v10810_v43 }
 0x4ca   : > { %v4592_v40 = vpop.f32.mrb[112].mxu1 }
 0x4cb   : > { %v12308_v22 = vadd.f32 %v4592_v40, %v12163_v17  ;;  %v9726_v49 = vpop.f32.mrb[113].mxu1  ;;  %v5065_v40 = vpack.c.bf16 %v5018_v52, %v5016_v7  ;;  %v5032_v52 = vld [vmem:[#allocation2 + $0x149] ss:$2 sm:$0xff] }
 0x4cc   : > { %v4595_v31 = vpop.f32.mrb[114].mxu1  ;;  %v5022_v49 = vld [vmem:[#allocation2 + $0xf9] ss:$2 sm:$0xff] }
 0x4cd   : > { %v12311_v42 = vadd.f32 %v4595_v31, %v12167_v16  ;;  %v9727_v1 = vpop.f32.mrb[115].mxu1 }
 0x4cf   : > { %9837 = vmatmul.mubr.msk.bf16.gmra.mrb[220].mxu1 %vm3955_vm6, %v5062_v24 }
 0x4d0   : > { %9840 = vmatprep.mubr.msk.bf16.mxu1 %vm10811_vm8, %v10810_v43 }
 0x4d2   : > { %v4600_v38 = vpop.f32.mrb[116].mxu1 }
 0x4d3   : > { %v12317_v54 = vadd.f32 %v4600_v38, %v12170_v6  ;;  %v9730_v17 = vpop.f32.mrb[117].mxu1  ;;  %v5066_v38 = vpack.c.bf16 %v5022_v49, %v5020_v41  ;;  %v5036_v49 = vld [vmem:[#allocation2 + $0x169] ss:$2 sm:$0xff] }
 0x4d4   : > { %v4603_v26 = vpop.f32.mrb[118].mxu1  ;;  %v5026_v17 = vld [vmem:[#allocation2 + $0x119] ss:$2 sm:$0xff] }
 0x4d5   : > { %v12320_v4 = vadd.f32 %v4603_v26, %v12174_v0  ;;  %v9731_v16 = vpop.f32.mrb[119].mxu1 }
 0x4d7   : > { %9841 = vmatmul.mubr.msk.bf16.gmra.mrb[224].mxu1 %vm3955_vm6, %v5063_v19 }
 0x4d8   : > { %9844 = vmatprep.mubr.msk.bf16.mxu1 %vm10811_vm8, %v10810_v43 }
 0x4da   : > { %v4608_v33 = vpop.f32.mrb[120].mxu1 }
 0x4db   : > { %v12326_v18 = vadd.f32 %v4608_v33, %v12177_v35  ;;  %v9734_v6 = vpop.f32.mrb[121].mxu1  ;;  %v5067_v33 = vpack.c.bf16 %v5026_v17, %v5024_v23  ;;  %v5040_v17 = vld [vmem:[#allocation2 + $0x189] ss:$2 sm:$0xff] }
 0x4dc   : > { %v4611_v21 = vpop.f32.mrb[122].mxu1  ;;  %v5030_v6 = vld [vmem:[#allocation2 + $0x139] ss:$2 sm:$0xff] }
 0x4dd   : > { %v12329_v30 = vadd.f32 %v4611_v21, %v12181_v44  ;;  %v9735_v0 = vpop.f32.mrb[123].mxu1 }
 0x4df   : > { %9845 = vmatmul.mubr.msk.bf16.gmra.mrb[228].mxu1 %vm3955_vm6, %v5064_v57 }
 0x4e0   : > { %9848 = vmatprep.mubr.msk.bf16.mxu1 %vm10811_vm8, %v10810_v43 }
 0x4e2   : > { %v4616_v9 = vpop.f32.mrb[124].mxu1 }
 0x4e3   : > { %v12335_v62 = vadd.f32 %v4616_v9, %v12184_v36  ;;  %v9738_v35 = vpop.f32.mrb[125].mxu1  ;;  %v5068_v9 = vpack.c.bf16 %v5030_v6, %v5028_v10  ;;  %v5044_v6 = vld [vmem:[#allocation2 + $0x1a9] ss:$2 sm:$0xff] }
 0x4e4   : > { %v4619_v2 = vpop.f32.mrb[126].mxu1  ;;  %v5034_v35 = vld [vmem:[#allocation2 + $0x159] ss:$2 sm:$0xff] }
 0x4e5   : > { %v12338_v59 = vadd.f32 %v4619_v2, %v12188_v20  ;;  %v9739_v44 = vpop.f32.mrb[127].mxu1 }
 0x4e7   : > { %9849 = vmatmul.mubr.msk.bf16.gmra.mrb[232].mxu1 %vm3955_vm6, %v5065_v40 }
 0x4e8   : > { %9852 = vmatprep.mubr.msk.bf16.mxu1 %vm10811_vm8, %v10810_v43 }
 0x4ea   : > { %v4624_v28 = vpop.f32.mrb[128].mxu1 }
 0x4eb   : > { %v12344_v31 = vadd.f32 %v4624_v28, %v12191_v46  ;;  %v9742_v36 = vpop.f32.mrb[129].mxu1  ;;  %v5069_v28 = vpack.c.bf16 %v5034_v35, %v5032_v52  ;;  %v5048_v35 = vld [vmem:[#allocation2 + $0x1c9] ss:$2 sm:$0xff] }
 0x4ec   : > { %v4627_v1 = vpop.f32.mrb[130].mxu1  ;;  %v5038_v36 = vld [vmem:[#allocation2 + $0x179] ss:$2 sm:$0xff] }
 0x4ed   : > { %v12347_v24 = vadd.f32 %v4627_v1, %v12195_v25  ;;  %v9743_v20 = vpop.f32.mrb[131].mxu1 }
 0x4ef   : > { %9853 = vmatmul.mubr.msk.bf16.gmra.mrb[236].mxu1 %vm3955_vm6, %v5066_v38 }
 0x4f0   : > { %9856 = vmatprep.mubr.msk.bf16.mxu1 %vm10811_vm8, %v10810_v43 }
 0x4f2   : > { %v4632_v29 = vpop.f32.mrb[132].mxu1 }
 0x4f3   : > { %v12353_v26 = vadd.f32 %v4632_v29, %v12198_v51  ;;  %v9746_v46 = vpop.f32.mrb[133].mxu1  ;;  %v5070_v29 = vpack.c.bf16 %v5038_v36, %v5036_v49  ;;  %v5052_v36 = vld [vmem:[#allocation2 + $0x1e9] ss:$2 sm:$0xff] }
 0x4f4   : > { %v4635_v16 = vpop.f32.mrb[134].mxu1  ;;  %v5042_v46 = vld [vmem:[#allocation2 + $0x199] ss:$2 sm:$0xff] }
 0x4f5   : > { %v12356_v19 = vadd.f32 %v4635_v16, %v12202_v12  ;;  %v9747_v25 = vpop.f32.mrb[135].mxu1 }
 0x4f7   : > { %9857 = vmatmul.mubr.msk.bf16.gmra.mrb[240].mxu1 %vm3955_vm6, %v5067_v33 }
 0x4f8   : > { %9860 = vmatprep.mubr.msk.bf16.mxu1 %vm10811_vm8, %v10810_v43 }
 0x4fa   : > { %v4640_v45 = vpop.f32.mrb[136].mxu1 }
 0x4fb   : > { %v12362_v21 = vadd.f32 %v4640_v45, %v12207_v63  ;;  %v9750_v51 = vpop.f32.mrb[137].mxu1  ;;  %v5071_v45 = vpack.c.bf16 %v5042_v46, %v5040_v17  ;;  %v5056_v46 = vld [vmem:[#allocation2 + $0x209] ss:$2 sm:$0xff] }
 0x4fc   : > { %v4643_v0 = vpop.f32.mrb[138].mxu1  ;;  %v5046_v51 = vld [vmem:[#allocation2 + $0x1b9] ss:$2 sm:$0xff] }
 0x4fd   : > { %v12365_v57 = vadd.f32 %v4643_v0, %v12209_v27  ;;  %v9751_v12 = vpop.f32.mrb[139].mxu1 }
 0x4ff   : > { %9861 = vmatmul.mubr.msk.bf16.gmra.mrb[244].mxu1 %vm3955_vm6, %v5068_v9 }
 0x500   : > { %9864 = vmatprep.mubr.msk.bf16.mxu1 %vm10811_vm8, %v10810_v43 }
 0x502   : > { %v4822_v7 = vpop.f32.mrb[140].mxu1 }
 0x503   : > { %v12371_v2 = vadd.f32 %v4822_v7, %v12215_v34  ;;  %v9756_v63 = vpop.f32.mrb[141].mxu1  ;;  %v5072_v7 = vpack.c.bf16 %v5046_v51, %v5044_v6 }
 0x504   : > { %v4825_v44 = vpop.f32.mrb[142].mxu1  ;;  %v5050_v63 = vld [vmem:[#allocation2 + $0x1d9] ss:$2 sm:$0xff] }
 0x505   : > { %v12374_v40 = vadd.f32 %v4825_v44, %v12218_v39  ;;  %v9757_v27 = vpop.f32.mrb[143].mxu1 }
 0x507   : > { %9865 = vmatmul.mubr.msk.bf16.gmra.mrb[248].mxu1 %vm3955_vm6, %v5069_v28 }
 0x508   : > { %9868 = vmatprep.mubr.msk.bf16.mxu1 %vm10811_vm8, %v10810_v43 }
 0x50a   : > { %v4830_v41 = vpop.f32.mrb[144].mxu1 }
 0x50b   : > { %v12380_v1 = vadd.f32 %v4830_v41, %v12224_v55  ;;  %v9760_v34 = vpop.f32.mrb[145].mxu1  ;;  %v5073_v41 = vpack.c.bf16 %v5050_v63, %v5048_v35  ;;  %v5342_v63 = vld [vmem:[#allocation2 + $0x3a] ss:$2 sm:$0xff] }
 0x50c   : > { %v4833_v20 = vpop.f32.mrb[146].mxu1  ;;  %v5054_v34 = vld [vmem:[#allocation2 + $0x1f9] ss:$2 sm:$0xff] }
 0x50d   : > { %v12383_v38 = vadd.f32 %v4833_v20, %v12227_v56  ;;  %v9761_v39 = vpop.f32.mrb[147].mxu1 }
 0x50f   : > { %9869 = vmatmul.mubr.msk.bf16.gmra.mrb[252].mxu1 %vm3955_vm6, %v5070_v29 }
 0x510   : > { %9872 = vmatprep.mubr.msk.bf16.mxu1 %vm10811_vm8, %v10810_v43 }
 0x512   : > { %v4838_v23 = vpop.f32.mrb[148].mxu1 }
 0x513   : > { %v12389_v16 = vadd.f32 %v4838_v23, %v12233_v37  ;;  %v9764_v55 = vpop.f32.mrb[149].mxu1  ;;  %v5074_v23 = vpack.c.bf16 %v5054_v34, %v5052_v36  ;;  %v5346_v34 = vld [vmem:[#allocation2 + $0x5a] ss:$2 sm:$0xff] }
 0x514   : > { %v4841_v25 = vpop.f32.mrb[150].mxu1  ;;  %v5058_v55 = vld [vmem:[#allocation2 + $0x219] ss:$2 sm:$0xff] }
 0x515   : > { %v12392_v33 = vadd.f32 %v4841_v25, %v12236_v11  ;;  %v9765_v56 = vpop.f32.mrb[151].mxu1 }
 0x517   : > { %9873 = vmatmul.mubr.msk.bf16.gmra.mrb[0].mxu1 %vm3955_vm6, %v5071_v45 }
 0x518   : > { %9876 = vmatprep.mubr.msk.bf16.mxu1 %vm10811_vm8, %v10810_v43 }
 0x51a   : > { %v4846_v10 = vpop.f32.mrb[152].mxu1 }
 0x51b   : > { %v12398_v0 = vadd.f32 %v4846_v10, %v12242_v13  ;;  %v9768_v37 = vpop.f32.mrb[153].mxu1  ;;  %v5075_v10 = vpack.c.bf16 %v5058_v55, %v5056_v46  ;;  %v5350_v55 = vld [vmem:[#allocation2 + $0x7a] ss:$2 sm:$0xff] }
 0x51c   : > { %v4849_v12 = vpop.f32.mrb[154].mxu1 }
 0x51d   : > { %v12401_v9 = vadd.f32 %v4849_v12, %v12245_v8  ;;  %v9769_v11 = vpop.f32.mrb[155].mxu1 }
 0x51e   : > { %v5336_v11 = vld [vmem:[#allocation2 + $0xa] ss:$2 sm:$0xff] }
 0x51f   : > { %9877 = vmatmul.mubr.msk.bf16.gmra.mrb[4].mxu1 %vm3955_vm6, %v5072_v7 }
 0x520   : > { %9880 = vmatprep.mubr.msk.bf16.mxu1 %vm10811_vm8, %v10810_v43 }
 0x522   : > { %v4854_v52 = vpop.f32.mrb[156].mxu1 }
 0x523   : > { %v12407_v44 = vadd.f32 %v4854_v52, %v12251_v60  ;;  %v9772_v13 = vpop.f32.mrb[157].mxu1 }
 0x524   : > { %v4857_v27 = vpop.f32.mrb[158].mxu1 }
 0x525   : > { %v12410_v28 = vadd.f32 %v4857_v27, %v12254_v58  ;;  %v9773_v8 = vpop.f32.mrb[159].mxu1 }
 0x526   : > { %v5340_v8 = vld [vmem:[#allocation2 + $0x2a] ss:$2 sm:$0xff] }
 0x527   : > { %9881 = vmatmul.mubr.msk.bf16.gmra.mrb[8].mxu1 %vm3955_vm6, %v5073_v41 }
 0x528   : > { %9884 = vmatprep.mubr.msk.bf16.mxu1 %vm10811_vm8, %v10810_v43 }
 0x52a   : > { %v4862_v49 = vpop.f32.mrb[160].mxu1 }
 0x52b   : > { %v9776_v20 = vpop.f32.mrb[161].mxu1  ;;  %v12416_v39 = vadd.f32 %v4862_v49, %v12260_v53  ;;  %v5404_v49 = vpack.c.bf16 %v5342_v63, %v5340_v8  ;;  %v8696_v63 = vld [vmem:[%s12477_s20 + $0x4] sm:$0xf] }
 0x52c   : > { %v4865_v60 = vpop.f32.mrb[162].mxu1 }
 0x52d   : > { %v9777_v29 = vpop.f32.mrb[163].mxu1  ;;  %v12419_v58 = vadd.f32 %v4865_v60, %v12263_v50  ;;  %v5338_v50 = vld [vmem:[#allocation2 + $0x1a] ss:$2 sm:$0xff] }
 0x52e   : > { %v5403_v7 = vpack.c.bf16 %v5338_v50, %v5336_v11  ;;  %v5344_v29 = vld [vmem:[#allocation2 + $0x4a] ss:$2 sm:$0xff] }
 0x52f   : > { %9885 = vmatmul.mubr.msk.bf16.gmra.mrb[12].mxu1 %vm3955_vm6, %v5074_v23 }
 0x530   : > { %9888 = vmatprep.mubr.msk.bf16.mxu1 %vm10811_vm8, %v10810_v43 }
 0x532   : > { %v4870_v17 = vpop.f32.mrb[164].mxu1 }
 0x533   : > { %v9780_v25 = vpop.f32.mrb[165].mxu1  ;;  %v12425_v56 = vadd.f32 %v4870_v17, %v12269_v5  ;;  %v5405_v17 = vpack.c.bf16 %v5346_v34, %v5344_v29  ;;  %v5362_v29 = vld [vmem:[#allocation2 + $0xda] ss:$2 sm:$0xff] }
 0x534   : > { %v4873_v53 = vpop.f32.mrb[166].mxu1 }
 0x535   : > { %v9781_v45 = vpop.f32.mrb[167].mxu1  ;;  %v12428_v6 = vadd.f32 %v4873_v53, %v12272_v15 }
 0x536   : > { %v5348_v45 = vld [vmem:[#allocation2 + $0x6a] ss:$2 sm:$0xff] }
 0x537   : > { %9889 = vmatmul.mubr.msk.bf16.gmra.mrb[16].mxu1 %vm3955_vm6, %v5075_v10  ;;  %v5406_v50 = vpack.c.bf16 %v5350_v55, %v5348_v45  ;;  %v5366_v45 = vld [vmem:[#allocation2 + $0xfa] ss:$2 sm:$0xff] }
 0x538   : > { %9894 = vmatprep.mubr.msk.bf16.mxu1 %vm10811_vm8, %v10810_v43 }
 0x53a   : > { %v4878_v51 = vpop.f32.mrb[168].mxu1 }
 0x53b   : > { %v9784_v37 = vpop.f32.mrb[169].mxu1  ;;  %v12434_v12 = vadd.f32 %v4878_v51, %v12279_v14 }
 0x53c   : > { %v4881_v5 = vpop.f32.mrb[170].mxu1  ;;  %v5354_v37 = vld [vmem:[#allocation2 + $0x9a] ss:$2 sm:$0xff] }
 0x53d   : > { %v9785_v52 = vpop.f32.mrb[171].mxu1  ;;  %v12437_v35 = vadd.f32 %v4881_v5, %v12282_v3 }
 0x53f   : > { %9895 = vmatmul.mubr.msk.bf16.vlgmr.msra.gmra.mrb[20].mxu1 %vm3955_vm6, %v5403_v7  ;;  %v5352_v7 = vld [vmem:[#allocation2 + $0x8a] ss:$2 sm:$0xff] }
 0x540   : > { %9898 = vmatprep.mubr.msk.bf16.mxu1 %vm10811_vm8, %v10810_v43 }
 0x542   : > { %v4886_v15 = vpop.f32.mrb[172].mxu1 }
 0x543   : > { %v9788_v13 = vpop.f32.mrb[173].mxu1  ;;  %v12443_v27 = vadd.f32 %v4886_v15, %v12290_v32  ;;  %v5407_v15 = vpack.c.bf16 %v5354_v37, %v5352_v7  ;;  %v5370_v7 = vld [vmem:[#allocation2 + $0x11a] ss:$2 sm:$0xff] }
 0x544   : > { %v4889_v14 = vpop.f32.mrb[174].mxu1 }
 0x545   : > { %v9789_v41 = vpop.f32.mrb[175].mxu1  ;;  %v12446_v36 = vadd.f32 %v4889_v14, %v12293_v48  ;;  %v5358_v14 = vld [vmem:[#allocation2 + $0xba] ss:$2 sm:$0xff] }
 0x547   : > { %9899 = vmatmul.mubr.msk.bf16.gmra.mrb[24].mxu1 %vm3955_vm6, %v5404_v49 }
 0x548   : > { %9902 = vmatprep.mubr.msk.bf16.mxu1 %vm10811_vm8, %v10810_v43 }
 0x54a   : > { %v4894_v3 = vpop.f32.mrb[176].mxu1 }
 0x54b   : > { %v9792_v20 = vpop.f32.mrb[177].mxu1  ;;  %v12452_v60 = vadd.f32 %v4894_v3, %v12299_v47 }
 0x54c   : > { %v4897_v32 = vpop.f32.mrb[178].mxu1 }
 0x54d   : > { %v9793_v23 = vpop.f32.mrb[179].mxu1  ;;  %v12455_v46 = vadd.f32 %v4897_v32, %v12302_v61 }
 0x54f   : > { %9903 = vmatmul.mubr.msk.bf16.gmra.mrb[28].mxu1 %vm3955_vm6, %v5405_v17 }
 0x550   : > { %9906 = vmatprep.mubr.msk.bf16.mxu1 %vm10811_vm8, %v10810_v43 }
 0x552   : > { %v4902_v48 = vpop.f32.mrb[180].mxu1 }
 0x553   : > { %v9796_v25 = vpop.f32.mrb[181].mxu1  ;;  %v12461_v53 = vadd.f32 %v4902_v48, %v12308_v22  ;;  %v5360_v48 = vld [vmem:[#allocation2 + $0xca] ss:$2 sm:$0xff] }
 0x554   : > { %v4905_v47 = vpop.f32.mrb[182].mxu1  ;;  %v5409_v25 = vpack.c.bf16 %v5362_v29, %v5360_v48 }
 0x555   : > { %v9797_v10 = vpop.f32.mrb[183].mxu1  ;;  %v12464_v51 = vadd.f32 %v4905_v47, %v12311_v42 }
 0x557   : > { %9907 = vmatmul.mubr.msk.bf16.gmra.mrb[32].mxu1 %vm3955_vm6, %v5406_v50 }
 0x558   : > { %9910 = vmatprep.mubr.msk.bf16.mxu1 %vm10811_vm8, %v10810_v43 }
 0x55a   : > { %v4910_v61 = vpop.f32.mrb[184].mxu1 }
 0x55b   : > { %v9800_v11 = vpop.f32.mrb[185].mxu1  ;;  %v12470_v5 = vadd.f32 %v4910_v61, %v12317_v54  ;;  %v5908_v54 = vsel %vm1385_vm0, %v8696_v63, 0  ;;  %v5364_v61 = vld [vmem:[#allocation2 + $0xea] ss:$2 sm:$0xff] }
 0x55c   : > { %v4913_v22 = vpop.f32.mrb[186].mxu1  ;;  %9963 = vmatpush3.bf16.msra.mxu0 %v5908_v54  ;;  %v5410_v11 = vpack.c.bf16 %v5366_v45, %v5364_v61  ;;  %v5368_v63 = vld [vmem:[#allocation2 + $0x10a] ss:$2 sm:$0xff] }
 0x55d   : > { %v9801_v52 = vpop.f32.mrb[187].mxu1  ;;  %v12480_v42 = vadd.f32 %v4913_v22, %v12320_v4  ;;  %10038 = vmatprep.subr.bf16.mxu0 %v10810_v43  ;;  %v5356_v4 = vld [vmem:[#allocation2 + $0xaa] ss:$2 sm:$0xff] }
 0x55e   : > { %v5408_v34 = vpack.c.bf16 %v5358_v14, %v5356_v4 }
 0x55f   : > { %9911 = vmatmul.mubr.msk.bf16.gmra.mrb[36].mxu1 %vm3955_vm6, %v5407_v15 }
 0x560   : > { %9914 = vmatprep.mubr.msk.bf16.mxu1 %vm10811_vm8, %v10810_v43 }
 0x562   : > { %v4918_v13 = vpop.f32.mrb[188].mxu1 }
 0x563   : > { %v9804_v8 = vpop.f32.mrb[189].mxu1  ;;  %v12489_v41 = vadd.f32 %v4918_v13, %v12326_v18  ;;  %v5411_v13 = vpack.c.bf16 %v5370_v7, %v5368_v63 }
 0x564   : > { %v4921_v49 = vpop.f32.mrb[190].mxu1  ;;  %v5374_v8 = vld [vmem:[#allocation2 + $0x13a] ss:$2 sm:$0xff] }
 0x565   : > { %v9805_v3 = vpop.f32.mrb[191].mxu1  ;;  %v12492_v20 = vadd.f32 %v4921_v49, %v12329_v30 }
 0x566   : > { %v5372_v3 = vld [vmem:[#allocation2 + $0x12a] ss:$2 sm:$0xff] }
 0x567   : > { %9915 = vmatmul.mubr.msk.bf16.gmra.mrb[40].mxu1 %vm3955_vm6, %v5408_v34 }
 0x568   : > { %9918 = vmatprep.mubr.msk.bf16.mxu1 %vm10811_vm8, %v10810_v43 }
 0x56a   : > { %v4926_v32 = vpop.f32.mrb[192].mxu1 }
 0x56b   : > { %v9808_v23 = vpop.f32.mrb[193].mxu1  ;;  %v12498_v17 = vadd.f32 %v4926_v32, %v12335_v62  ;;  %v5412_v32 = vpack.c.bf16 %v5374_v8, %v5372_v3 }
 0x56c   : > { %v4929_v18 = vpop.f32.mrb[194].mxu1  ;;  %v5378_v23 = vld [vmem:[#allocation2 + $0x15a] ss:$2 sm:$0xff] }
 0x56d   : > { %v9809_v55 = vpop.f32.mrb[195].mxu1  ;;  %v12501_v47 = vadd.f32 %v4929_v18, %v12338_v59 }
 0x56e   : > { %v5376_v55 = vld [vmem:[#allocation2 + $0x14a] ss:$2 sm:$0xff] }
 0x56f   : > { %9919 = vmatmul.mubr.msk.bf16.gmra.mrb[44].mxu1 %vm3955_vm6, %v5409_v25 }
 0x570   : > { %9922 = vmatprep.mubr.msk.bf16.mxu1 %vm10811_vm8, %v10810_v43 }
 0x572   : > { %v4934_v30 = vpop.f32.mrb[196].mxu1 }
 0x573   : > { %v9812_v10 = vpop.f32.mrb[197].mxu1  ;;  %v12507_v50 = vadd.f32 %v4934_v30, %v12344_v31  ;;  %v5413_v30 = vpack.c.bf16 %v5378_v23, %v5376_v55 }
 0x574   : > { %v4937_v62 = vpop.f32.mrb[198].mxu1  ;;  %v5382_v10 = vld [vmem:[#allocation2 + $0x17a] ss:$2 sm:$0xff] }
 0x575   : > { %v9813_v37 = vpop.f32.mrb[199].mxu1  ;;  %v12510_v22 = vadd.f32 %v4937_v62, %v12347_v24 }
 0x576   : > { %v5380_v37 = vld [vmem:[#allocation2 + $0x16a] ss:$2 sm:$0xff] }
 0x577   : > { %9923 = vmatmul.mubr.msk.bf16.gmra.mrb[48].mxu1 %vm3955_vm6, %v5410_v11 }
 0x578   : > { %9926 = vmatprep.mubr.msk.bf16.mxu1 %vm10811_vm8, %v10810_v43 }
 0x57a   : > { %v4942_v59 = vpop.f32.mrb[200].mxu1 }
 0x57b   : > { %v9816_v52 = vpop.f32.mrb[201].mxu1  ;;  %v12516_v15 = vadd.f32 %v4942_v59, %v12353_v26  ;;  %v5414_v59 = vpack.c.bf16 %v5382_v10, %v5380_v37  ;;  %v5398_v37 = vld [vmem:[#allocation2 + $0x1fa] ss:$2 sm:$0xff] }
 0x57c   : > { %v4945_v31 = vpop.f32.mrb[202].mxu1  ;;  %v5386_v52 = vld [vmem:[#allocation2 + $0x19a] ss:$2 sm:$0xff] }
 0x57d   : > { %v9817_v54 = vpop.f32.mrb[203].mxu1  ;;  %v12519_v14 = vadd.f32 %v4945_v31, %v12356_v19 }
 0x57e   : > { %v5384_v54 = vld [vmem:[#allocation2 + $0x18a] ss:$2 sm:$0xff] }
 0x57f   : > { %9927 = vmatmul.mubr.msk.bf16.gmra.mrb[52].mxu1 %vm3955_vm6, %v5411_v13 }
 0x580   : > { %9930 = vmatprep.mubr.msk.bf16.mxu1 %vm10811_vm8, %v10810_v43 }
 0x582   : > { %v4950_v24 = vpop.f32.mrb[204].mxu1 }
 0x583   : > { %v9820_v49 = vpop.f32.mrb[205].mxu1  ;;  %v12525_v4 = vadd.f32 %v4950_v24, %v12362_v21  ;;  %v5415_v24 = vpack.c.bf16 %v5386_v52, %v5384_v54  ;;  %v5400_v54 = vld [vmem:[#allocation2 + $0x20a] ss:$2 sm:$0xff] }
 0x584   : > { %v4953_v26 = vpop.f32.mrb[206].mxu1  ;;  %v5390_v49 = vld [vmem:[#allocation2 + $0x1ba] ss:$2 sm:$0xff] }
 0x585   : > { %v9821_v34 = vpop.f32.mrb[207].mxu1  ;;  %v12528_v29 = vadd.f32 %v4953_v26, %v12365_v57 }
 0x586   : > { %v5388_v34 = vld [vmem:[#allocation2 + $0x1aa] ss:$2 sm:$0xff] }
 0x587   : > { %9931 = vmatmul.mubr.msk.bf16.gmra.mrb[56].mxu1 %vm3955_vm6, %v5412_v32 }
 0x588   : > { %9934 = vmatprep.mubr.msk.bf16.mxu1 %vm10811_vm8, %v10810_v43 }
 0x58a   : > { %v5166_v19 = vpop.f32.mrb[208].mxu1 }
 0x58b   : > { %v9826_v18 = vpop.f32.mrb[209].mxu1  ;;  %v12534_v48 = vadd.f32 %v5166_v19, %v12371_v2  ;;  %v5416_v19 = vpack.c.bf16 %v5390_v49, %v5388_v34 }
 0x58c   : > { %v5169_v21 = vpop.f32.mrb[210].mxu1  ;;  %v5394_v18 = vld [vmem:[#allocation2 + $0x1da] ss:$2 sm:$0xff] }
 0x58d   : > { %v9827_v25 = vpop.f32.mrb[211].mxu1  ;;  %v12537_v45 = vadd.f32 %v5169_v21, %v12374_v40  ;;  %v5834_v21 = vld [vmem:[%s12477_s20] sm:$0xf] }
 0x58e   : > { %v6042_v25 = vsel %vm1385_vm0, %v5834_v21, 0 }
 0x58f   : > { %9935 = vmatmul.mubr.msk.bf16.gmra.mrb[60].mxu1 %vm3955_vm6, %v5413_v30 }
 0x590   : > { %9938 = vmatprep.mubr.msk.bf16.mxu1 %vm10811_vm8, %v10810_v43  ;;  %10001 = vmatpush3.bf16.msra.mxu1 %v6042_v25 }
 0x591   : > { %10076 = vmatprep.subr.bf16.mxu1 %v10810_v43 }
 0x592   : > { %v5174_v57 = vpop.f32.mrb[212].mxu1 }
 0x593   : > { %v9830_v62 = vpop.f32.mrb[213].mxu1  ;;  %v12543_v61 = vadd.f32 %v5174_v57, %v12380_v1  ;;  %v5392_v57 = vld [vmem:[#allocation2 + $0x1ca] ss:$2 sm:$0xff] }
 0x594   : > { %v5177_v2 = vpop.f32.mrb[214].mxu1 }
 0x595   : > { %v9831_v11 = vpop.f32.mrb[215].mxu1  ;;  %v12546_v7 = vadd.f32 %v5177_v2, %v12383_v38 }
 0x597   : > { %9939 = vmatmul.mubr.msk.bf16.gmra.mrb[64].mxu1 %vm3955_vm6, %v5414_v59 }
 0x598   : > { %9942 = vmatprep.mubr.msk.bf16.mxu1 %vm10811_vm8, %v10810_v43 }
 0x59a   : > { %v5182_v40 = vpop.f32.mrb[216].mxu1 }
 0x59b   : > { %v9834_v31 = vpop.f32.mrb[217].mxu1  ;;  %v12552_v63 = vadd.f32 %v5182_v40, %v12389_v16  ;;  %v5396_v40 = vld [vmem:[#allocation2 + $0x1ea] ss:$2 sm:$0xff] }
 0x59c   : > { %v5185_v1 = vpop.f32.mrb[218].mxu1  ;;  %v5418_v31 = vpack.c.bf16 %v5398_v37, %v5396_v40 }
 0x59d   : > { %v9835_v13 = vpop.f32.mrb[219].mxu1  ;;  %v12555_v8 = vadd.f32 %v5185_v1, %v12392_v33 }
 0x59e   : > { %v5402_v13 = vld [vmem:[#allocation2 + $0x21a] ss:$2 sm:$0xff] }
 0x59f   : > { %9943 = vmatmul.mubr.msk.bf16.gmra.mrb[68].mxu1 %vm3955_vm6, %v5415_v24 }
 0x5a0   : > { %9946 = vmatprep.mubr.msk.bf16.mxu1 %vm10811_vm8, %v10810_v43 }
 0x5a2   : > { %v5190_v38 = vpop.f32.mrb[220].mxu1 }
 0x5a3   : > { %v9838_v26 = vpop.f32.mrb[221].mxu1  ;;  %v12561_v3 = vadd.f32 %v5190_v38, %v12398_v0 }
 0x5a4   : > { %v5193_v16 = vpop.f32.mrb[222].mxu1  ;;  %v5419_v26 = vpack.c.bf16 %v5402_v13, %v5400_v54 }
 0x5a5   : > { %v9839_v32 = vpop.f32.mrb[223].mxu1  ;;  %v12564_v23 = vadd.f32 %v5193_v16, %v12401_v9  ;;  %v5417_v9 = vpack.c.bf16 %v5394_v18, %v5392_v57 }
 0x5a7   : > { %9947 = vmatmul.mubr.msk.bf16.gmra.mrb[72].mxu1 %vm3955_vm6, %v5416_v19 }
 0x5a8   : > { %9950 = vmatprep.mubr.msk.bf16.mxu1 %vm10811_vm8, %v10810_v43 }
 0x5aa   : > { %v5198_v33 = vpop.f32.mrb[224].mxu1 }
 0x5ab   : > { %v9842_v55 = vpop.f32.mrb[225].mxu1  ;;  %v12572_v0 = vadd.f32 %v5198_v33, %v12407_v44 }
 0x5ac   : > { %v5201_v30 = vpop.f32.mrb[226].mxu1 }
 0x5ad   : > { %v9843_v10 = vpop.f32.mrb[227].mxu1  ;;  %v12575_v62 = vadd.f32 %v5201_v30, %v12410_v28 }
 0x5af   : > { %9951 = vmatmul.mubr.msk.bf16.gmra.mrb[76].mxu1 %vm3955_vm6, %v5417_v9 }
 0x5b0   : > { %9954 = vmatprep.mubr.msk.bf16.mxu1 %vm10811_vm8, %v10810_v43 }
 0x5b2   : > { %v5206_v2 = vpop.f32.mrb[228].mxu1 }
 0x5b3   : > { %v12582_v44 = vadd.f32 %v5206_v2, %v12416_v39  ;;  %v9846_v11 = vpop.f32.mrb[229].mxu1 }
 0x5b4   : > { %v5209_v59 = vpop.f32.mrb[230].mxu1 }
 0x5b5   : > { %v12585_v52 = vadd.f32 %v5209_v59, %v12419_v58  ;;  %v9847_v28 = vpop.f32.mrb[231].mxu1 }
 0x5b7   : > { %9955 = vmatmul.mubr.msk.bf16.gmra.mrb[80].mxu1 %vm3955_vm6, %v5418_v31 }
 0x5b8   : > { %9958 = vmatprep.mubr.msk.bf16.mxu1 %vm10811_vm8, %v10810_v43 }
 0x5ba   : > { %v5214_v1 = vpop.f32.mrb[232].mxu1 }
 0x5bb   : > { %v12591_v24 = vadd.f32 %v5214_v1, %v12425_v56  ;;  %v9850_v39 = vpop.f32.mrb[233].mxu1 }
 0x5bc   : > { %v5217_v38 = vpop.f32.mrb[234].mxu1 }
 0x5bd   : > { %v12594_v49 = vadd.f32 %v5217_v38, %v12428_v6  ;;  %v9851_v58 = vpop.f32.mrb[235].mxu1 }
 0x5bf   : > { %9959 = vmatmul.mubr.msk.bf16.gmra.mrb[84].mxu1 %vm3955_vm6, %v5419_v26 }
 0x5c0   : > { %10002 = vmatprep.mubr.msk.bf16.mxu1 %vm10811_vm8, %v10810_v43 }
 0x5c2   : > { %v5222_v16 = vpop.f32.mrb[236].mxu1 }
 0x5c3   : > { %v12600_v34 = vadd.f32 %v5222_v16, %v12434_v12  ;;  %v9854_v32 = vpop.f32.mrb[237].mxu1 }
 0x5c4   : > { %v5225_v19 = vpop.f32.mrb[238].mxu1 }
 0x5c5   : > { %v12603_v56 = vadd.f32 %v5225_v19, %v12437_v35  ;;  %v9855_v33 = vpop.f32.mrb[239].mxu1 }
 0x5ca   : > { %v5230_v18 = vpop.f32.mrb[240].mxu1 }
 0x5cb   : > { %v12606_v6 = vadd.f32 %v5230_v18, %v12443_v27  ;;  %v9858_v21 = vpop.f32.mrb[241].mxu1 }
 0x5cc   : > { %v5233_v55 = vpop.f32.mrb[242].mxu1 }
 0x5cd   : > { %v12609_v25 = vadd.f32 %v5233_v55, %v12446_v36  ;;  %v9859_v30 = vpop.f32.mrb[243].mxu1 }
 0x5d2   : > { %v5238_v57 = vpop.f32.mrb[244].mxu1 }
 0x5d3   : > { %v12612_v12 = vadd.f32 %v5238_v57, %v12452_v60  ;;  %v9862_v10 = vpop.f32.mrb[245].mxu1 }
 0x5d4   : > { %v5241_v9 = vpop.f32.mrb[246].mxu1 }
 0x5d5   : > { %v12615_v35 = vadd.f32 %v5241_v9, %v12455_v46  ;;  %v9863_v2 = vpop.f32.mrb[247].mxu1 }
 0x5da   : > { %v5246_v37 = vpop.f32.mrb[248].mxu1 }
 0x5db   : > { %v12618_v27 = vadd.f32 %v5246_v37, %v12461_v53  ;;  %v9866_v11 = vpop.f32.mrb[249].mxu1 }
 0x5dc   : > { %v5249_v59 = vpop.f32.mrb[250].mxu1 }
 0x5dd   : > { %v12621_v36 = vadd.f32 %v5249_v59, %v12464_v51  ;;  %v9867_v40 = vpop.f32.mrb[251].mxu1 }
 0x5de   : > { %v12663_v40 = vld [vmem:[%s718_s22] ss:$0 sm:$0xff] }
 0x5e2   : > { %v5254_v28 = vpop.f32.mrb[252].mxu1 }
 0x5e3   : > { %v12624_v60 = vadd.f32 %v5254_v28, %v12470_v5  ;;  %v9870_v31 = vpop.f32.mrb[253].mxu1 }
 0x5e4   : > { %v5257_v1 = vpop.f32.mrb[254].mxu1 }
 0x5e5   : > { %v12627_v46 = vadd.f32 %v5257_v1, %v12480_v42  ;;  %v9871_v54 = vpop.f32.mrb[255].mxu1 }
 0x5ea   : > { %v5262_v13 = vpop.f32.mrb[0].mxu1 }
 0x5eb   : > { %v12630_v53 = vadd.f32 %v5262_v13, %v12489_v41  ;;  %v9874_v39 = vpop.f32.mrb[1].mxu1 }
 0x5ec   : > { %v5265_v38 = vpop.f32.mrb[2].mxu1 }
 0x5ed   : > { %v12633_v51 = vadd.f32 %v5265_v38, %v12492_v20  ;;  %v9875_v58 = vpop.f32.mrb[3].mxu1 }
 0x5f2   : > { %v5270_v26 = vpop.f32.mrb[4].mxu1 }
 0x5f3   : > { %v12636_v5 = vadd.f32 %v5270_v26, %v12498_v17  ;;  %v9878_v16 = vpop.f32.mrb[5].mxu1 }
 0x5f4   : > { %v5273_v32 = vpop.f32.mrb[6].mxu1 }
 0x5f5   : > { %v12639_v42 = vadd.f32 %v5273_v32, %v12501_v47  ;;  %v9879_v19 = vpop.f32.mrb[7].mxu1 }
 0x5fa   : > { %v5278_v33 = vpop.f32.mrb[8].mxu1 }
 0x5fb   : > { %v12642_v41 = vadd.f32 %v5278_v33, %v12507_v50  ;;  %v9882_v18 = vpop.f32.mrb[9].mxu1 }
 0x5fc   : > { %v5281_v21 = vpop.f32.mrb[10].mxu1 }
 0x5fd   : > { %v12645_v20 = vadd.f32 %v5281_v21, %v12510_v22  ;;  %v9883_v55 = vpop.f32.mrb[11].mxu1 }
 0x602   : > { %v5286_v30 = vpop.f32.mrb[12].mxu1 }
 0x603   : > { %v12648_v17 = vadd.f32 %v5286_v30, %v12516_v15  ;;  %v9886_v57 = vpop.f32.mrb[13].mxu1 }
 0x604   : > { %v5289_v10 = vpop.f32.mrb[14].mxu1 }
 0x605   : > { %v12651_v47 = vadd.f32 %v5289_v10, %v12519_v14  ;;  %v9887_v9 = vpop.f32.mrb[15].mxu1 }
 0x60a   : > { %v5294_v2 = vpop.f32.mrb[16].mxu1 }
 0x60b   : > { %v12654_v50 = vadd.f32 %v5294_v2, %v12525_v4  ;;  %v9890_v37 = vpop.f32.mrb[17].mxu1 }
 0x60c   : > { %v5297_v11 = vpop.f32.mrb[18].mxu1 }
 0x60d   : > { %v12657_v22 = vadd.f32 %v5297_v11, %v12528_v29  ;;  %v9891_v59 = vpop.f32.mrb[19].mxu1 }
 0x60e   : > { %v8715_v59 = vld [vmem:[%s12477_s20 + $0x8] sm:$0xf] }
 0x612   : > { %v5510_v15 = vpop.f32.mrb[20].mxu1 }
 0x613   : > { %v5645_v14 = vadd.f32 %v5510_v15, %v12534_v48  ;;  %v9896_v28 = vpop.f32.mrb[21].mxu1 }
 0x614   : > { %v5513_v31 = vpop.f32.mrb[22].mxu1  ;;  %v8725_v28 = vld [vmem:[%s12477_s20 + $0xc] sm:$0xf] }
 0x615   : > { %v5686_v4 = vadd.f32 %v12663_v40, %v5645_v14  ;;  %v5646_v1 = vadd.f32 %v5513_v31, %v12537_v45  ;;  %v9897_v54 = vpop.f32.mrb[23].mxu1 }
 0x617   : > { %v5720_v13 = vmax.f32 %v5686_v4, 0.0  ;;  %v5687_v29 = vadd.f32 %v12663_v40, %v5646_v1 }
 0x619   : > { %5755 = vst.msk [vmem:[#allocation3 + $0x8] sm:$0xff] %vm1282_vm2, %v5720_v13  ;;  %v5721_v39 = vmax.f32 %v5687_v29, 0.0  ;;  %v6221_v29 = vsel %vm1385_vm0, %v8715_v59, 0 }
 0x61a   : > { %v5518_v38 = vpop.f32.mrb[24].mxu1 }
 0x61b   : > { %5756 = vst.msk [vmem:[#allocation3 + $0x10] sm:$0xff] %vm1282_vm2, %v5721_v39  ;;  %v5647_v58 = vadd.f32 %v5518_v38, %v12543_v61  ;;  %v9900_v26 = vpop.f32.mrb[25].mxu1 }
 0x61c   : > { %v5521_v48 = vpop.f32.mrb[26].mxu1  ;;  %v6417_v26 = vsel %vm1385_vm0, %v8725_v28, 0 }
 0x61d   : > { %v5688_v16 = vadd.f32 %v12663_v40, %v5647_v58  ;;  %v5648_v32 = vadd.f32 %v5521_v48, %v12546_v7  ;;  %v9901_v45 = vpop.f32.mrb[27].mxu1 }
 0x61f   : > { %v5722_v19 = vmax.f32 %v5688_v16, 0.0  ;;  %v5689_v33 = vadd.f32 %v12663_v40, %v5648_v32 }
 0x621   : > { %5757 = vst.msk [vmem:[#allocation3 + $0x18] sm:$0xff] %vm1282_vm2, %v5722_v19  ;;  %v5723_v18 = vmax.f32 %v5689_v33, 0.0 }
 0x622   : > { %v5526_v21 = vpop.f32.mrb[28].mxu1  ;;  %v5792_v37 = vld [vmem:[#allocation3 + $0x6] ss:$2 sm:$0xff]  ;;  %v5836_v1 = vld [vmem:[#allocation3 + $0x7] ss:$2 sm:$0xff] }
 0x623   : > { %5758 = vst.msk [vmem:[#allocation3 + $0x20] sm:$0xff] %vm1282_vm2, %v5723_v18  ;;  %v5649_v61 = vadd.f32 %v5526_v21, %v12552_v63  ;;  %v9904_v55 = vpop.f32.mrb[29].mxu1 }
 0x624   : > { %v5529_v30 = vpop.f32.mrb[30].mxu1 }
 0x625   : > { %v5690_v7 = vadd.f32 %v12663_v40, %v5649_v61  ;;  %v5650_v57 = vadd.f32 %v5529_v30, %v12555_v8  ;;  %v9905_v10 = vpop.f32.mrb[31].mxu1 }
 0x627   : > { %v5724_v9 = vmax.f32 %v5690_v7, 0.0  ;;  %v5691_v2 = vadd.f32 %v12663_v40, %v5650_v57 }
 0x629   : > { %5759 = vst.msk [vmem:[#allocation3 + $0x28] sm:$0xff] %vm1282_vm2, %v5724_v9  ;;  %v5725_v11 = vmax.f32 %v5691_v2, 0.0 }
 0x62a   : > { %v5794_v15 = vld [vmem:[#allocation3 + $0x16] ss:$2 sm:$0xff]  ;;  %v5534_v14 = vpop.f32.mrb[32].mxu1  ;;  %v5838_v8 = vld [vmem:[#allocation3 + $0x17] ss:$2 sm:$0xff] }
 0x62b   : > { %v5825_v31 = vpack.c.bf16 %v5794_v15, %v5792_v37  ;;  %5760 = vst.msk [vmem:[#allocation3 + $0x30] sm:$0xff] %vm1282_vm2, %v5725_v11  ;;  %v5651_v63 = vadd.f32 %v5534_v14, %v12561_v3  ;;  %v9908_v4 = vpop.f32.mrb[33].mxu1  ;;  %v5869_v13 = vpack.c.bf16 %v5838_v8, %v5836_v1 }
 0x62c   : > { %v5537_v54 = vpop.f32.mrb[34].mxu1 }
 0x62d   : > { %v5692_v39 = vadd.f32 %v12663_v40, %v5651_v63  ;;  %v5652_v38 = vadd.f32 %v5537_v54, %v12564_v23  ;;  %v9909_v58 = vpop.f32.mrb[35].mxu1  ;;  %10003 = vmatmul.mubr.msk.bf16.vlgmr.msra.gmra.mrb[88].mxu1 %vm1282_vm2, %v5825_v31  ;;  %9965 = vmatmul.mubr.msk.bf16.vlgmr.msra.gmra.mrb[68].mxu0 %vm1282_vm2, %v5869_v13 }
 0x62e   : > { %10006 = vmatprep.mubr.msk.bf16.mxu1 %vm10811_vm8, %v10810_v43  ;;  %9968 = vmatprep.mubr.msk.bf16.mxu0 %vm10811_vm8, %v10810_v43 }
 0x62f   : > { %v5726_v3 = vmax.f32 %v5692_v39, 0.0  ;;  %v5693_v48 = vadd.f32 %v12663_v40, %v5652_v38  ;;  %10039 = vmatpush3.bf16.msra.mxu0 %v6221_v29  ;;  %10077 = vmatpush3.bf16.msra.mxu1 %v6417_v26 }
 0x630   : > { %10114 = vmatprep.subr.bf16.mxu0 %v10810_v43  ;;  %10152 = vmatprep.subr.bf16.mxu1 %v10810_v43 }
 0x631   : > { %5761 = vst.msk [vmem:[#allocation3 + $0x38] sm:$0xff] %vm1282_vm2, %v5726_v3  ;;  %v5727_v23 = vmax.f32 %v5693_v48, 0.0 }
 0x632   : > { %v5542_v16 = vpop.f32.mrb[36].mxu1  ;;  %v5840_v7 = vld [vmem:[#allocation3 + $0x27] ss:$2 sm:$0xff]  ;;  %v5796_v57 = vld [vmem:[#allocation3 + $0x26] ss:$2 sm:$0xff] }
 0x633   : > { %5762 = vst.msk [vmem:[#allocation3 + $0x40] sm:$0xff] %vm1282_vm2, %v5727_v23  ;;  %v5653_v32 = vadd.f32 %v5542_v16, %v12572_v0  ;;  %v9912_v45 = vpop.f32.mrb[37].mxu1 }
 0x634   : > { %v5545_v19 = vpop.f32.mrb[38].mxu1 }
 0x635   : > { %v5694_v33 = vadd.f32 %v12663_v40, %v5653_v32  ;;  %v5654_v18 = vadd.f32 %v5545_v19, %v12575_v62  ;;  %v9913_v21 = vpop.f32.mrb[39].mxu1 }
 0x637   : > { %v5728_v61 = vmax.f32 %v5694_v33, 0.0  ;;  %v5695_v55 = vadd.f32 %v12663_v40, %v5654_v18 }
 0x639   : > { %5763 = vst.msk [vmem:[#allocation3 + $0x48] sm:$0xff] %vm1282_vm2, %v5728_v61  ;;  %v5729_v30 = vmax.f32 %v5695_v55, 0.0 }
 0x63a   : > { %v5550_v10 = vpop.f32.mrb[40].mxu1  ;;  %v5842_v9 = vld [vmem:[#allocation3 + $0x37] ss:$2 sm:$0xff]  ;;  %v5798_v2 = vld [vmem:[#allocation3 + $0x36] ss:$2 sm:$0xff] }
 0x63b   : > { %5764 = vst.msk [vmem:[#allocation3 + $0x50] sm:$0xff] %vm1282_vm2, %v5729_v30  ;;  %v5655_v0 = vadd.f32 %v5550_v10, %v12582_v44  ;;  %v9916_v37 = vpop.f32.mrb[41].mxu1  ;;  %v5870_v11 = vpack.c.bf16 %v5842_v9, %v5840_v7  ;;  %v5826_v59 = vpack.c.bf16 %v5798_v2, %v5796_v57 }
 0x63c   : > { %v5553_v62 = vpop.f32.mrb[42].mxu1 }
 0x63d   : > { %v5696_v15 = vadd.f32 %v12663_v40, %v5655_v0  ;;  %v5656_v14 = vadd.f32 %v5553_v62, %v12585_v52  ;;  %v9917_v28 = vpop.f32.mrb[43].mxu1  ;;  %9969 = vmatmul.mubr.msk.bf16.gmra.mrb[72].mxu0 %vm1282_vm2, %v5870_v11  ;;  %10007 = vmatmul.mubr.msk.bf16.gmra.mrb[92].mxu1 %vm1282_vm2, %v5826_v59 }
 0x63e   : > { %9972 = vmatprep.mubr.msk.bf16.mxu0 %vm10811_vm8, %v10810_v43  ;;  %10010 = vmatprep.mubr.msk.bf16.mxu1 %vm10811_vm8, %v10810_v43 }
 0x63f   : > { %v5730_v44 = vmax.f32 %v5696_v15, 0.0  ;;  %v5697_v31 = vadd.f32 %v12663_v40, %v5656_v14 }
 0x641   : > { %5765 = vst.msk [vmem:[#allocation3 + $0x58] sm:$0xff] %vm1282_vm2, %v5730_v44  ;;  %v5731_v63 = vmax.f32 %v5697_v31, 0.0 }
 0x642   : > { %v5558_v4 = vpop.f32.mrb[44].mxu1  ;;  %v5844_v26 = vld [vmem:[#allocation3 + $0x47] ss:$2 sm:$0xff]  ;;  %v5800_v3 = vld [vmem:[#allocation3 + $0x46] ss:$2 sm:$0xff] }
 0x643   : > { %5766 = vst.msk [vmem:[#allocation3 + $0x60] sm:$0xff] %vm1282_vm2, %v5731_v63  ;;  %v5657_v52 = vadd.f32 %v5558_v4, %v12591_v24  ;;  %v9920_v1 = vpop.f32.mrb[45].mxu1 }
 0x644   : > { %v5561_v8 = vpop.f32.mrb[46].mxu1 }
 0x645   : > { %v5698_v54 = vadd.f32 %v12663_v40, %v5657_v52  ;;  %v5658_v13 = vadd.f32 %v5561_v8, %v12594_v49  ;;  %v9921_v29 = vpop.f32.mrb[47].mxu1 }
 0x647   : > { %v5732_v39 = vmax.f32 %v5698_v54, 0.0  ;;  %v5699_v38 = vadd.f32 %v12663_v40, %v5658_v13 }
 0x649   : > { %5767 = vst.msk [vmem:[#allocation3 + $0x68] sm:$0xff] %vm1282_vm2, %v5732_v39  ;;  %v5733_v58 = vmax.f32 %v5699_v38, 0.0 }
 0x64a   : > { %v5566_v48 = vpop.f32.mrb[48].mxu1  ;;  %v5846_v23 = vld [vmem:[#allocation3 + $0x57] ss:$2 sm:$0xff]  ;;  %v5802_v16 = vld [vmem:[#allocation3 + $0x56] ss:$2 sm:$0xff] }
 0x64b   : > { %5768 = vst.msk [vmem:[#allocation3 + $0x70] sm:$0xff] %vm1282_vm2, %v5733_v58  ;;  %v5659_v24 = vadd.f32 %v5566_v48, %v12600_v34  ;;  %v9924_v32 = vpop.f32.mrb[49].mxu1  ;;  %v5871_v45 = vpack.c.bf16 %v5846_v23, %v5844_v26  ;;  %v5827_v19 = vpack.c.bf16 %v5802_v16, %v5800_v3 }
 0x64c   : > { %v5569_v49 = vpop.f32.mrb[50].mxu1 }
 0x64d   : > { %v5700_v33 = vadd.f32 %v12663_v40, %v5659_v24  ;;  %v5660_v18 = vadd.f32 %v5569_v49, %v12603_v56  ;;  %v9925_v21 = vpop.f32.mrb[51].mxu1  ;;  %9973 = vmatmul.mubr.msk.bf16.gmra.mrb[76].mxu0 %vm1282_vm2, %v5871_v45  ;;  %10011 = vmatmul.mubr.msk.bf16.gmra.mrb[96].mxu1 %vm1282_vm2, %v5827_v19 }
 0x64e   : > { %9976 = vmatprep.mubr.msk.bf16.mxu0 %vm10811_vm8, %v10810_v43  ;;  %10014 = vmatprep.mubr.msk.bf16.mxu1 %vm10811_vm8, %v10810_v43 }
 0x64f   : > { %v5734_v34 = vmax.f32 %v5700_v33, 0.0  ;;  %v5701_v61 = vadd.f32 %v12663_v40, %v5660_v18 }
 0x651   : > { %5769 = vst.msk [vmem:[#allocation3 + $0x78] sm:$0xff] %vm1282_vm2, %v5734_v34  ;;  %v5735_v55 = vmax.f32 %v5701_v61, 0.0 }
 0x652   : > { %v5574_v30 = vpop.f32.mrb[52].mxu1  ;;  %v5848_v59 = vld [vmem:[#allocation3 + $0x67] ss:$2 sm:$0xff]  ;;  %v5804_v62 = vld [vmem:[#allocation3 + $0x66] ss:$2 sm:$0xff] }
 0x653   : > { %5770 = vst.msk [vmem:[#allocation3 + $0x80] sm:$0xff] %vm1282_vm2, %v5735_v55  ;;  %v5661_v56 = vadd.f32 %v5574_v30, %v12606_v6  ;;  %v9928_v7 = vpop.f32.mrb[53].mxu1 }
 0x654   : > { %v5577_v57 = vpop.f32.mrb[54].mxu1 }
 0x655   : > { %v5702_v10 = vadd.f32 %v12663_v40, %v5661_v56  ;;  %v5662_v9 = vadd.f32 %v5577_v57, %v12609_v25  ;;  %v9929_v2 = vpop.f32.mrb[55].mxu1 }
 0x657   : > { %v5736_v0 = vmax.f32 %v5702_v10, 0.0  ;;  %v5703_v37 = vadd.f32 %v12663_v40, %v5662_v9 }
 0x659   : > { %5771 = vst.msk [vmem:[#allocation3 + $0x88] sm:$0xff] %vm1282_vm2, %v5736_v0  ;;  %v5737_v11 = vmax.f32 %v5703_v37, 0.0 }
 0x65a   : > { %v5582_v15 = vpop.f32.mrb[56].mxu1  ;;  %v5850_v14 = vld [vmem:[#allocation3 + $0x77] ss:$2 sm:$0xff]  ;;  %v5806_v28 = vld [vmem:[#allocation3 + $0x76] ss:$2 sm:$0xff] }
 0x65b   : > { %5772 = vst.msk [vmem:[#allocation3 + $0x90] sm:$0xff] %vm1282_vm2, %v5737_v11  ;;  %v5663_v6 = vadd.f32 %v5582_v15, %v12612_v12  ;;  %v9932_v44 = vpop.f32.mrb[57].mxu1  ;;  %v5872_v31 = vpack.c.bf16 %v5850_v14, %v5848_v59  ;;  %v5828_v63 = vpack.c.bf16 %v5806_v28, %v5804_v62 }
 0x65c   : > { %v5585_v25 = vpop.f32.mrb[58].mxu1 }
 0x65d   : > { %v5704_v4 = vadd.f32 %v12663_v40, %v5663_v6  ;;  %v5664_v52 = vadd.f32 %v5585_v25, %v12615_v35  ;;  %v9933_v1 = vpop.f32.mrb[59].mxu1  ;;  %9977 = vmatmul.mubr.msk.bf16.gmra.mrb[80].mxu0 %vm1282_vm2, %v5872_v31  ;;  %10015 = vmatmul.mubr.msk.bf16.gmra.mrb[100].mxu1 %vm1282_vm2, %v5828_v63 }
 0x65e   : > { %9980 = vmatprep.mubr.msk.bf16.mxu0 %vm10811_vm8, %v10810_v43  ;;  %10018 = vmatprep.mubr.msk.bf16.mxu1 %vm10811_vm8, %v10810_v43 }
 0x65f   : > { %v5738_v12 = vmax.f32 %v5704_v4, 0.0  ;;  %v5705_v8 = vadd.f32 %v12663_v40, %v5664_v52 }
 0x661   : > { %5773 = vst.msk [vmem:[#allocation3 + $0x98] sm:$0xff] %vm1282_vm2, %v5738_v12  ;;  %v5739_v54 = vmax.f32 %v5705_v8, 0.0 }
 0x662   : > { %v5590_v13 = vpop.f32.mrb[60].mxu1  ;;  %v5852_v16 = vld [vmem:[#allocation3 + $0x87] ss:$2 sm:$0xff]  ;;  %v5808_v24 = vld [vmem:[#allocation3 + $0x86] ss:$2 sm:$0xff] }
 0x663   : > { %5774 = vst.msk [vmem:[#allocation3 + $0xa0] sm:$0xff] %vm1282_vm2, %v5739_v54  ;;  %v5665_v35 = vadd.f32 %v5590_v13, %v12618_v27  ;;  %v9936_v29 = vpop.f32.mrb[61].mxu1 }
 0x664   : > { %v5593_v39 = vpop.f32.mrb[62].mxu1 }
 0x665   : > { %v5706_v38 = vadd.f32 %v12663_v40, %v5665_v35  ;;  %v5666_v58 = vadd.f32 %v5593_v39, %v12621_v36  ;;  %v9937_v26 = vpop.f32.mrb[63].mxu1 }
 0x667   : > { %v5740_v3 = vmax.f32 %v5706_v38, 0.0  ;;  %v5707_v48 = vadd.f32 %v12663_v40, %v5666_v58 }
 0x669   : > { %5775 = vst.msk [vmem:[#allocation3 + $0xa8] sm:$0xff] %vm1282_vm2, %v5740_v3  ;;  %v5741_v23 = vmax.f32 %v5707_v48, 0.0 }
 0x66a   : > { %v5598_v32 = vpop.f32.mrb[64].mxu1  ;;  %v5854_v45 = vld [vmem:[#allocation3 + $0x97] ss:$2 sm:$0xff]  ;;  %v5810_v19 = vld [vmem:[#allocation3 + $0x96] ss:$2 sm:$0xff] }
 0x66b   : > { %5776 = vst.msk [vmem:[#allocation3 + $0xb0] sm:$0xff] %vm1282_vm2, %v5741_v23  ;;  %v5667_v27 = vadd.f32 %v5598_v32, %v12624_v60  ;;  %v9940_v49 = vpop.f32.mrb[65].mxu1  ;;  %v5873_v33 = vpack.c.bf16 %v5854_v45, %v5852_v16  ;;  %v5829_v18 = vpack.c.bf16 %v5810_v19, %v5808_v24 }
 0x66c   : > { %v5601_v36 = vpop.f32.mrb[66].mxu1 }
 0x66d   : > { %v5708_v21 = vadd.f32 %v12663_v40, %v5667_v27  ;;  %v5668_v34 = vadd.f32 %v5601_v36, %v12627_v46  ;;  %v9941_v61 = vpop.f32.mrb[67].mxu1  ;;  %9981 = vmatmul.mubr.msk.bf16.gmra.mrb[84].mxu0 %vm1282_vm2, %v5873_v33  ;;  %10019 = vmatmul.mubr.msk.bf16.gmra.mrb[104].mxu1 %vm1282_vm2, %v5829_v18 }
 0x66e   : > { %9984 = vmatprep.mubr.msk.bf16.mxu0 %vm10811_vm8, %v10810_v43  ;;  %10022 = vmatprep.mubr.msk.bf16.mxu1 %vm10811_vm8, %v10810_v43 }
 0x66f   : > { %v5742_v60 = vmax.f32 %v5708_v21, 0.0  ;;  %v5709_v55 = vadd.f32 %v12663_v40, %v5668_v34 }
 0x671   : > { %5777 = vst.msk [vmem:[#allocation3 + $0xb8] sm:$0xff] %vm1282_vm2, %v5742_v60  ;;  %v5743_v30 = vmax.f32 %v5709_v55, 0.0 }
 0x672   : > { %v5606_v56 = vpop.f32.mrb[68].mxu1  ;;  %v5856_v59 = vld [vmem:[#allocation3 + $0xa7] ss:$2 sm:$0xff]  ;;  %v5812_v62 = vld [vmem:[#allocation3 + $0xa6] ss:$2 sm:$0xff] }
 0x673   : > { %5778 = vst.msk [vmem:[#allocation3 + $0xc0] sm:$0xff] %vm1282_vm2, %v5743_v30  ;;  %v5669_v46 = vadd.f32 %v5606_v56, %v12630_v53  ;;  %v9944_v7 = vpop.f32.mrb[69].mxu1 }
 0x674   : > { %v5609_v57 = vpop.f32.mrb[70].mxu1 }
 0x675   : > { %v5710_v10 = vadd.f32 %v12663_v40, %v5669_v46  ;;  %v5670_v9 = vadd.f32 %v5609_v57, %v12633_v51  ;;  %v9945_v2 = vpop.f32.mrb[71].mxu1 }
 0x677   : > { %v5744_v0 = vmax.f32 %v5710_v10, 0.0  ;;  %v5711_v37 = vadd.f32 %v12663_v40, %v5670_v9 }
 0x679   : > { %5779 = vst.msk [vmem:[#allocation3 + $0xc8] sm:$0xff] %vm1282_vm2, %v5744_v0  ;;  %v5745_v11 = vmax.f32 %v5711_v37, 0.0 }
 0x67a   : > { %v5614_v15 = vpop.f32.mrb[72].mxu1  ;;  %v5858_v14 = vld [vmem:[#allocation3 + $0xb7] ss:$2 sm:$0xff]  ;;  %v5814_v28 = vld [vmem:[#allocation3 + $0xb6] ss:$2 sm:$0xff] }
 0x67b   : > { %5780 = vst.msk [vmem:[#allocation3 + $0xd0] sm:$0xff] %vm1282_vm2, %v5745_v11  ;;  %v5671_v53 = vadd.f32 %v5614_v15, %v12636_v5  ;;  %v9948_v6 = vpop.f32.mrb[73].mxu1  ;;  %v5874_v44 = vpack.c.bf16 %v5858_v14, %v5856_v59  ;;  %v5830_v31 = vpack.c.bf16 %v5814_v28, %v5812_v62  ;;  %v6347_v11 = vld [vmem:[#allocation3 + $0x19] ss:$2 sm:$0xff]  ;;  %v6151_v59 = vld [vmem:[#allocation3 + $0x18] ss:$2 sm:$0xff] }
 0x67c   : > { %v5617_v51 = vpop.f32.mrb[74].mxu1  ;;  %v8735_v62 = vld [vmem:[%s12477_s20 + $0x10] sm:$0xf]  ;;  %v6345_v15 = vld [vmem:[#allocation3 + $0x9] ss:$2 sm:$0xff]  ;;  %s10660_s20 = smul.u32 80, %s10924_s26 }
 0x67d   : > { %v5712_v63 = vadd.f32 %v12663_v40, %v5671_v53  ;;  %v5672_v25 = vadd.f32 %v5617_v51, %v12639_v42  ;;  %v9949_v4 = vpop.f32.mrb[75].mxu1  ;;  %9985 = vmatmul.mubr.msk.bf16.gmra.mrb[88].mxu0 %vm1282_vm2, %v5874_v44  ;;  %10023 = vmatmul.mubr.msk.bf16.gmra.mrb[108].mxu1 %vm1282_vm2, %v5830_v31  ;;  %v6149_v14 = vld [vmem:[#allocation3 + $0x8] ss:$2 sm:$0xff]  ;;  %v6378_v28 = vpack.c.bf16 %v6347_v11, %v6345_v15  ;;  %v6613_v6 = vsel %vm1385_vm0, %v8735_v62, 0  ;;  %v6155_v44 = vld [vmem:[#allocation3 + $0x38] ss:$2 sm:$0xff] }
 0x67e   : > { %9988 = vmatprep.mubr.msk.bf16.mxu0 %vm10811_vm8, %v10810_v43  ;;  %10026 = vmatprep.mubr.msk.bf16.mxu1 %vm10811_vm8, %v10810_v43  ;;  %v6182_v53 = vpack.c.bf16 %v6151_v59, %v6149_v14  ;;  %v6351_v31 = vld [vmem:[#allocation3 + $0x39] ss:$2 sm:$0xff]  ;;  %v6153_v51 = vld [vmem:[#allocation3 + $0x28] ss:$2 sm:$0xff]  ;;  %s13124_s22 = scalar_lea.vmem %s13317_s9, %s10660_s20  ;;  %vm7641_vm0 = vcmask 523264  }
 0x67f   : > { %v5746_v5 = vmax.f32 %v5712_v63, 0.0  ;;  %v5713_v52 = vadd.f32 %v12663_v40, %v5672_v25  ;;  %v6349_v63 = vld [vmem:[#allocation3 + $0x29] ss:$2 sm:$0xff]  ;;  %v6183_v25 = vpack.c.bf16 %v6155_v44, %v6153_v51  ;;  %v6549_v14 = vld [vmem:[#allocation3 + $0x4a] ss:$2 sm:$0xff]  ;;  %7642 = vst.msk [vmem:[#allocation6] sm:$0xff] %vm7641_vm0, %v10810_v43 }
 0x680   : > { %v6379_v4 = vpack.c.bf16 %v6351_v31, %v6349_v63  ;;  %v6555_v51 = vld [vmem:[#allocation3 + $0x7a] ss:$2 sm:$0xff]  ;;  %v6553_v63 = vld [vmem:[#allocation3 + $0x6a] ss:$2 sm:$0xff] }
 0x681   : > { %5781 = vst.msk [vmem:[#allocation3 + $0xd8] sm:$0xff] %vm1282_vm2, %v5746_v5  ;;  %v5747_v1 = vmax.f32 %v5713_v52, 0.0  ;;  %v6159_v5 = vld [vmem:[#allocation3 + $0x58] ss:$2 sm:$0xff]  ;;  %v6355_v52 = vld [vmem:[#allocation3 + $0x59] ss:$2 sm:$0xff] }
 0x682   : > { %v5622_v12 = vpop.f32.mrb[76].mxu1  ;;  %v5860_v26 = vld [vmem:[#allocation3 + $0xc7] ss:$2 sm:$0xff]  ;;  %v5816_v3 = vld [vmem:[#allocation3 + $0xc6] ss:$2 sm:$0xff] }
 0x683   : > { %5782 = vst.msk [vmem:[#allocation3 + $0xe0] sm:$0xff] %vm1282_vm2, %v5747_v1  ;;  %v5673_v42 = vadd.f32 %v5622_v12, %v12642_v41  ;;  %v9952_v8 = vpop.f32.mrb[77].mxu1  ;;  %v6157_v1 = vld [vmem:[#allocation3 + $0x48] ss:$2 sm:$0xff]  ;;  %v6353_v12 = vld [vmem:[#allocation3 + $0x49] ss:$2 sm:$0xff] }
 0x684   : > { %v5625_v54 = vpop.f32.mrb[78].mxu1  ;;  %v6380_v8 = vpack.c.bf16 %v6355_v52, %v6353_v12  ;;  %v6559_v52 = vld [vmem:[#allocation3 + $0x9a] ss:$2 sm:$0xff] }
 0x685   : > { %v5714_v13 = vadd.f32 %v12663_v40, %v5673_v42  ;;  %v5674_v35 = vadd.f32 %v5625_v54, %v12645_v20  ;;  %v9953_v29 = vpop.f32.mrb[79].mxu1  ;;  %v6184_v42 = vpack.c.bf16 %v6159_v5, %v6157_v1  ;;  %v6163_v54 = vld [vmem:[#allocation3 + $0x78] ss:$2 sm:$0xff] }
 0x686   : > { %v6357_v29 = vld [vmem:[#allocation3 + $0x69] ss:$2 sm:$0xff] }
 0x687   : > { %v5748_v39 = vmax.f32 %v5714_v13, 0.0  ;;  %v5715_v38 = vadd.f32 %v12663_v40, %v5674_v35  ;;  %v6359_v13 = vld [vmem:[#allocation3 + $0x79] ss:$2 sm:$0xff]  ;;  %v6161_v35 = vld [vmem:[#allocation3 + $0x68] ss:$2 sm:$0xff] }
 0x689   : > { %5783 = vst.msk [vmem:[#allocation3 + $0xe8] sm:$0xff] %vm1282_vm2, %v5748_v39  ;;  %v5749_v58 = vmax.f32 %v5715_v38, 0.0  ;;  %v6185_v39 = vpack.c.bf16 %v6163_v54, %v6161_v35  ;;  %v6381_v38 = vpack.c.bf16 %v6359_v13, %v6357_v29  ;;  %v6557_v13 = vld [vmem:[#allocation3 + $0x8a] ss:$2 sm:$0xff] }
 0x68a   : > { %v5630_v48 = vpop.f32.mrb[80].mxu1  ;;  %v5862_v23 = vld [vmem:[#allocation3 + $0xd7] ss:$2 sm:$0xff]  ;;  %v5818_v16 = vld [vmem:[#allocation3 + $0xd6] ss:$2 sm:$0xff] }
 0x68b   : > { %5784 = vst.msk [vmem:[#allocation3 + $0xf0] sm:$0xff] %vm1282_vm2, %v5749_v58  ;;  %v5675_v41 = vadd.f32 %v5630_v48, %v12648_v17  ;;  %v9956_v24 = vpop.f32.mrb[81].mxu1  ;;  %v5875_v32 = vpack.c.bf16 %v5862_v23, %v5860_v26  ;;  %v5831_v45 = vpack.c.bf16 %v5818_v16, %v5816_v3  ;;  %v6167_v58 = vld [vmem:[#allocation3 + $0x98] ss:$2 sm:$0xff]  ;;  %v6363_v26 = vld [vmem:[#allocation3 + $0x99] ss:$2 sm:$0xff] }
 0x68c   : > { %v5633_v20 = vpop.f32.mrb[82].mxu1  ;;  %v6165_v3 = vld [vmem:[#allocation3 + $0x88] ss:$2 sm:$0xff]  ;;  %v6361_v48 = vld [vmem:[#allocation3 + $0x89] ss:$2 sm:$0xff] }
 0x68d   : > { %v5716_v19 = vadd.f32 %v12663_v40, %v5675_v41  ;;  %v5676_v27 = vadd.f32 %v5633_v20, %v12651_v47  ;;  %v9957_v49 = vpop.f32.mrb[83].mxu1  ;;  %9989 = vmatmul.mubr.msk.bf16.gmra.mrb[92].mxu0 %vm1282_vm2, %v5875_v32  ;;  %10027 = vmatmul.mubr.msk.bf16.gmra.mrb[112].mxu1 %vm1282_vm2, %v5831_v45  ;;  %v6186_v23 = vpack.c.bf16 %v6167_v58, %v6165_v3  ;;  %v6171_v41 = vld [vmem:[#allocation3 + $0xb8] ss:$2 sm:$0xff]  ;;  %v6367_v24 = vld [vmem:[#allocation3 + $0xb9] ss:$2 sm:$0xff] }
 0x68e   : > { %9992 = vmatprep.mubr.msk.bf16.mxu0 %vm10811_vm8, %v10810_v43  ;;  %10030 = vmatprep.mubr.msk.bf16.mxu1 %vm10811_vm8, %v10810_v43  ;;  %v6382_v16 = vpack.c.bf16 %v6363_v26, %v6361_v48  ;;  %v6169_v32 = vld [vmem:[#allocation3 + $0xa8] ss:$2 sm:$0xff]  ;;  %v6365_v45 = vld [vmem:[#allocation3 + $0xa9] ss:$2 sm:$0xff]  ;;  %v6371_v49 = vld [vmem:[#allocation3 + $0xd9] ss:$2 sm:$0xff] }
 0x68f   : > { %v5750_v17 = vmax.f32 %v5716_v19, 0.0  ;;  %v5717_v33 = vadd.f32 %v12663_v40, %v5676_v27  ;;  %v6187_v20 = vpack.c.bf16 %v6171_v41, %v6169_v32  ;;  %v6383_v19 = vpack.c.bf16 %v6367_v24, %v6365_v45  ;;  %v6175_v27 = vld [vmem:[#allocation3 + $0xd8] ss:$2 sm:$0xff] }
 0x690   : > { %v6563_v58 = vld [vmem:[#allocation3 + $0xba] ss:$2 sm:$0xff]  ;;  %v6561_v26 = vld [vmem:[#allocation3 + $0xaa] ss:$2 sm:$0xff] }
 0x691   : > { %5785 = vst.msk [vmem:[#allocation3 + $0xf8] sm:$0xff] %vm1282_vm2, %v5750_v17  ;;  %v5751_v18 = vmax.f32 %v5717_v33, 0.0  ;;  %v6173_v17 = vld [vmem:[#allocation3 + $0xc8] ss:$2 sm:$0xff]  ;;  %v6369_v33 = vld [vmem:[#allocation3 + $0xc9] ss:$2 sm:$0xff]  ;;  %v6579_v3 = vpack.c.bf16 %v6563_v58, %v6561_v26 }
 0x692   : > { %v5638_v36 = vpop.f32.mrb[84].mxu1  ;;  %v5864_v7 = vld [vmem:[#allocation3 + $0xe7] ss:$2 sm:$0xff]  ;;  %v5820_v10 = vld [vmem:[#allocation3 + $0xe6] ss:$2 sm:$0xff] }
 0x693   : > { %5786 = vst.msk [vmem:[#allocation3 + $0x100] sm:$0xff] %vm1282_vm2, %v5751_v18  ;;  %v5677_v47 = vadd.f32 %v5638_v36, %v12654_v50  ;;  %v9960_v21 = vpop.f32.mrb[85].mxu1  ;;  %v6188_v18 = vpack.c.bf16 %v6175_v27, %v6173_v17  ;;  %v6384_v36 = vpack.c.bf16 %v6371_v49, %v6369_v33 }
 0x694   : > { %v5641_v34 = vpop.f32.mrb[86].mxu1 }
 0x695   : > { %v5718_v61 = vadd.f32 %v12663_v40, %v5677_v47  ;;  %v5678_v60 = vadd.f32 %v5641_v34, %v12657_v22  ;;  %v9961_v55 = vpop.f32.mrb[87].mxu1  ;;  %v6177_v34 = vld [vmem:[#allocation3 + $0xe8] ss:$2 sm:$0xff] }
 0x697   : > { %v5752_v30 = vmax.f32 %v5718_v61, 0.0  ;;  %v5719_v56 = vadd.f32 %v12663_v40, %v5678_v60  ;;  %v6373_v61 = vld [vmem:[#allocation3 + $0xe9] ss:$2 sm:$0xff] }
 0x699   : > { %5787 = vst.msk [vmem:[#allocation3 + $0x108] sm:$0xff] %vm1282_vm2, %v5752_v30  ;;  %v5753_v46 = vmax.f32 %v5719_v56, 0.0 }
 0x69a   : > { %v5866_v57 = vld [vmem:[#allocation3 + $0xf7] ss:$2 sm:$0xff]  ;;  %v5822_v9 = vld [vmem:[#allocation3 + $0xf6] ss:$2 sm:$0xff] }
 0x69b   : > { %5788 = vst.msk [vmem:[#allocation3 + $0x110] sm:$0xff] %vm1282_vm2, %v5753_v46  ;;  %v5876_v50 = vpack.c.bf16 %v5866_v57, %v5864_v7  ;;  %v5832_v2 = vpack.c.bf16 %v5822_v9, %v5820_v10  ;;  %v6179_v47 = vld [vmem:[#allocation3 + $0xf8] ss:$2 sm:$0xff]  ;;  %v6375_v21 = vld [vmem:[#allocation3 + $0xf9] ss:$2 sm:$0xff] }
 0x69c   : > { %v6189_v60 = vpack.c.bf16 %v6179_v47, %v6177_v34  ;;  %v6385_v55 = vpack.c.bf16 %v6375_v21, %v6373_v61  ;;  %v6543_v57 = vld [vmem:[#allocation3 + $0x1a] ss:$2 sm:$0xff]  ;;  %v6541_v10 = vld [vmem:[#allocation3 + $0xa] ss:$2 sm:$0xff] }
 0x69d   : > { %9993 = vmatmul.mubr.msk.bf16.gmra.mrb[96].mxu0 %vm1282_vm2, %v5876_v50  ;;  %10031 = vmatmul.mubr.msk.bf16.gmra.mrb[116].mxu1 %vm1282_vm2, %v5832_v2  ;;  %v6574_v9 = vpack.c.bf16 %v6543_v57, %v6541_v10  ;;  %v6547_v50 = vld [vmem:[#allocation3 + $0x3a] ss:$2 sm:$0xff]  ;;  %v6545_v2 = vld [vmem:[#allocation3 + $0x2a] ss:$2 sm:$0xff] }
 0x69e   : > { %9996 = vmatprep.mubr.msk.bf16.mxu0 %vm10811_vm8, %v10810_v43  ;;  %10034 = vmatprep.mubr.msk.bf16.mxu1 %vm10811_vm8, %v10810_v43 }
 0x6a2   : > { %v5868_v22 = vld [vmem:[#allocation3 + $0x107] ss:$2 sm:$0xff]  ;;  %v5824_v40 = vld [vmem:[#allocation3 + $0x106] ss:$2 sm:$0xff] }
 0x6a3   : > { %v5877_v0 = vpack.c.bf16 %v5868_v22, %v5868_v22  ;;  %v5833_v37 = vpack.c.bf16 %v5824_v40, %v5824_v40  ;;  %v6181_v30 = vld [vmem:[#allocation3 + $0x108] ss:$2 sm:$0xff]  ;;  %v6377_v56 = vld [vmem:[#allocation3 + $0x109] ss:$2 sm:$0xff]  ;;  %v6575_v22 = vpack.c.bf16 %v6547_v50, %v6545_v2 }
 0x6a4   : > { %v6190_v46 = vpack.c.bf16 %v6181_v30, %v6181_v30  ;;  %v6386_v7 = vpack.c.bf16 %v6377_v56, %v6377_v56  ;;  %v6573_v61 = vld [vmem:[#allocation3 + $0x10a] ss:$2 sm:$0xff] }
 0x6a5   : > { %9997 = vmatmul.mubr.msk.bf16.gmra.mrb[100].mxu0 %vm1282_vm2, %v5877_v0  ;;  %10035 = vmatmul.mubr.msk.bf16.gmra.mrb[120].mxu1 %vm1282_vm2, %v5833_v37  ;;  %v6551_v0 = vld [vmem:[#allocation3 + $0x5a] ss:$2 sm:$0xff] }
 0x6a6   : > { %10040 = vmatprep.mubr.msk.bf16.mxu0 %vm10811_vm8, %v10810_v43  ;;  %10078 = vmatprep.mubr.msk.bf16.mxu1 %vm10811_vm8, %v10810_v43 }
 0x6ad   : > { %10041 = vmatmul.mubr.msk.bf16.vlgmr.msra.gmra.mrb[104].mxu0 %vm1282_vm2, %v6182_v53  ;;  %10079 = vmatmul.mubr.msk.bf16.vlgmr.msra.gmra.mrb[124].mxu1 %vm1282_vm2, %v6378_v28 }
 0x6ae   : > { %10115 = vmatpush3.bf16.msra.mxu0 %v6613_v6  ;;  %10044 = vmatprep.mubr.msk.bf16.mxu0 %vm10811_vm8, %v10810_v43  ;;  %v6576_v6 = vpack.c.bf16 %v6551_v0, %v6549_v14 }
 0x6af   : > { %10082 = vmatprep.mubr.msk.bf16.mxu1 %vm10811_vm8, %v10810_v43  ;;  %10194 = vmatprep.subr.bf16.mxu0 %v10810_v43 }
 0x6b5   : > { %10045 = vmatmul.mubr.msk.bf16.gmra.mrb[108].mxu0 %vm1282_vm2, %v6183_v25  ;;  %10083 = vmatmul.mubr.msk.bf16.gmra.mrb[128].mxu1 %vm1282_vm2, %v6379_v4  ;;  %v6577_v25 = vpack.c.bf16 %v6555_v51, %v6553_v63 }
 0x6b6   : > { %10048 = vmatprep.mubr.msk.bf16.mxu0 %vm10811_vm8, %v10810_v43  ;;  %10086 = vmatprep.mubr.msk.bf16.mxu1 %vm10811_vm8, %v10810_v43 }
 0x6bd   : > { %10049 = vmatmul.mubr.msk.bf16.gmra.mrb[112].mxu0 %vm1282_vm2, %v6184_v42  ;;  %10087 = vmatmul.mubr.msk.bf16.gmra.mrb[132].mxu1 %vm1282_vm2, %v6380_v8 }
 0x6be   : > { %10052 = vmatprep.mubr.msk.bf16.mxu0 %vm10811_vm8, %v10810_v43  ;;  %10090 = vmatprep.mubr.msk.bf16.mxu1 %vm10811_vm8, %v10810_v43 }
 0x6c5   : > { %10053 = vmatmul.mubr.msk.bf16.gmra.mrb[116].mxu0 %vm1282_vm2, %v6185_v39  ;;  %10091 = vmatmul.mubr.msk.bf16.gmra.mrb[136].mxu1 %vm1282_vm2, %v6381_v38  ;;  %v6578_v38 = vpack.c.bf16 %v6559_v52, %v6557_v13 }
 0x6c6   : > { %10056 = vmatprep.mubr.msk.bf16.mxu0 %vm10811_vm8, %v10810_v43  ;;  %10094 = vmatprep.mubr.msk.bf16.mxu1 %vm10811_vm8, %v10810_v43 }
 0x6cd   : > { %10057 = vmatmul.mubr.msk.bf16.gmra.mrb[120].mxu0 %vm1282_vm2, %v6186_v23  ;;  %10095 = vmatmul.mubr.msk.bf16.gmra.mrb[140].mxu1 %vm1282_vm2, %v6382_v16  ;;  %v6567_v16 = vld [vmem:[#allocation3 + $0xda] ss:$2 sm:$0xff] }
 0x6ce   : > { %10060 = vmatprep.mubr.msk.bf16.mxu0 %vm10811_vm8, %v10810_v43  ;;  %10098 = vmatprep.mubr.msk.bf16.mxu1 %vm10811_vm8, %v10810_v43 }
 0x6d5   : > { %10061 = vmatmul.mubr.msk.bf16.gmra.mrb[124].mxu0 %vm1282_vm2, %v6187_v20  ;;  %10099 = vmatmul.mubr.msk.bf16.gmra.mrb[144].mxu1 %vm1282_vm2, %v6383_v19  ;;  %v6565_v19 = vld [vmem:[#allocation3 + $0xca] ss:$2 sm:$0xff] }
 0x6d6   : > { %10064 = vmatprep.mubr.msk.bf16.mxu0 %vm10811_vm8, %v10810_v43  ;;  %10102 = vmatprep.mubr.msk.bf16.mxu1 %vm10811_vm8, %v10810_v43  ;;  %v6580_v33 = vpack.c.bf16 %v6567_v16, %v6565_v19 }
 0x6dd   : > { %10065 = vmatmul.mubr.msk.bf16.gmra.mrb[128].mxu0 %vm1282_vm2, %v6188_v18  ;;  %10103 = vmatmul.mubr.msk.bf16.gmra.mrb[148].mxu1 %vm1282_vm2, %v6384_v36  ;;  %v6571_v18 = vld [vmem:[#allocation3 + $0xfa] ss:$2 sm:$0xff]  ;;  %v6569_v36 = vld [vmem:[#allocation3 + $0xea] ss:$2 sm:$0xff] }
 0x6de   : > { %10068 = vmatprep.mubr.msk.bf16.mxu0 %vm10811_vm8, %v10810_v43  ;;  %10106 = vmatprep.mubr.msk.bf16.mxu1 %vm10811_vm8, %v10810_v43  ;;  %v6581_v47 = vpack.c.bf16 %v6571_v18, %v6569_v36 }
 0x6e5   : > { %10069 = vmatmul.mubr.msk.bf16.gmra.mrb[132].mxu0 %vm1282_vm2, %v6189_v60  ;;  %10107 = vmatmul.mubr.msk.bf16.gmra.mrb[152].mxu1 %vm1282_vm2, %v6385_v55 }
 0x6e6   : > { %10072 = vmatprep.mubr.msk.bf16.mxu0 %vm10811_vm8, %v10810_v43  ;;  %10110 = vmatprep.mubr.msk.bf16.mxu1 %vm10811_vm8, %v10810_v43 }
 0x6ed   : > { %10073 = vmatmul.mubr.msk.bf16.gmra.mrb[136].mxu0 %vm1282_vm2, %v6190_v46  ;;  %10111 = vmatmul.mubr.msk.bf16.gmra.mrb[156].mxu1 %vm1282_vm2, %v6386_v7 }
 0x6ee   : > { %10116 = vmatprep.mubr.msk.bf16.mxu0 %vm10811_vm8, %v10810_v43  ;;  %10154 = vmatprep.mubr.msk.bf16.mxu1 %vm10811_vm8, %v10810_v43 }
 0x6f5   : > { %10117 = vmatmul.mubr.msk.bf16.vlgmr.msra.gmra.mrb[140].mxu0 %vm1282_vm2, %v6574_v9  ;;  %v6582_v9 = vpack.c.bf16 %v6573_v61, %v6573_v61 }
 0x6f6   : > { %10120 = vmatprep.mubr.msk.bf16.mxu0 %vm10811_vm8, %v10810_v43 }
 0x6fd   : > { %10121 = vmatmul.mubr.msk.bf16.gmra.mrb[144].mxu0 %vm1282_vm2, %v6575_v22 }
 0x6fe   : > { %10124 = vmatprep.mubr.msk.bf16.mxu0 %vm10811_vm8, %v10810_v43 }
 0x700   : > { %v6078_v40 = vpop.f32.mrb[88].mxu1  ;;  %v5944_v37 = vpop.f32.mrb[68].mxu0 }
 0x701   : > { %v10004_v11 = vpop.f32.mrb[89].mxu1  ;;  %v12891_v59 = vadd.f32 %v6078_v40, %v5944_v37  ;;  %v9966_v62 = vpop.f32.mrb[69].mxu0 }
 0x702   : > { %v6081_v15 = vpop.f32.mrb[90].mxu1  ;;  %v5947_v28 = vpop.f32.mrb[70].mxu0 }
 0x703   : > { %v10005_v53 = vpop.f32.mrb[91].mxu1  ;;  %v12893_v44 = vadd.f32 %v6081_v15, %v5947_v28  ;;  %v9967_v31 = vpop.f32.mrb[71].mxu0  ;;  %v10728_v28 = vld [vmem:[%s12936_s0 + $0x8] sm:$0xff]  }
 0x704   : > { %10153 = vmatpush3.bf16.msra.mxu1 %v10728_v28 }
 0x705   : > { %10125 = vmatmul.mubr.msk.bf16.gmra.mrb[148].mxu0 %vm1282_vm2, %v6576_v6  ;;  %10166 = vmatprep.subr.bf16.mxu1 %v10810_v43 }
 0x706   : > { %10128 = vmatprep.mubr.msk.bf16.mxu0 %vm10811_vm8, %v10810_v43 }
 0x70d   : > { %10129 = vmatmul.mubr.msk.bf16.gmra.mrb[152].mxu0 %vm1282_vm2, %v6577_v25 }
 0x70e   : > { %10132 = vmatprep.mubr.msk.bf16.mxu0 %vm10811_vm8, %v10810_v43 }
 0x710   : > { %v5952_v4 = vpop.f32.mrb[72].mxu0  ;;  %v6086_v5 = vpop.f32.mrb[92].mxu1 }
 0x711   : > { %v12901_v1 = vadd.f32 %v6086_v5, %v5952_v4  ;;  %v9970_v12 = vpop.f32.mrb[73].mxu0  ;;  %v10008_v42 = vpop.f32.mrb[93].mxu1 }
 0x712   : > { %v5955_v8 = vpop.f32.mrb[74].mxu0  ;;  %v6089_v54 = vpop.f32.mrb[94].mxu1 }
 0x713   : > { %v12903_v35 = vadd.f32 %v6089_v54, %v5955_v8  ;;  %v9971_v29 = vpop.f32.mrb[75].mxu0  ;;  %v10009_v39 = vpop.f32.mrb[95].mxu1 }
 0x715   : > { %10133 = vmatmul.mubr.msk.bf16.gmra.mrb[156].mxu0 %vm1282_vm2, %v6578_v38 }
 0x716   : > { %10136 = vmatprep.mubr.msk.bf16.mxu0 %vm10811_vm8, %v10810_v43 }
 0x71d   : > { %10137 = vmatmul.mubr.msk.bf16.gmra.mrb[160].mxu0 %vm1282_vm2, %v6579_v3 }
 0x71e   : > { %10140 = vmatprep.mubr.msk.bf16.mxu0 %vm10811_vm8, %v10810_v43 }
 0x720   : > { %v5960_v48 = vpop.f32.mrb[76].mxu0  ;;  %v6094_v23 = vpop.f32.mrb[96].mxu1 }
 0x721   : > { %v12911_v41 = vadd.f32 %v6094_v23, %v5960_v48  ;;  %v9974_v24 = vpop.f32.mrb[77].mxu0  ;;  %v10012_v32 = vpop.f32.mrb[97].mxu1  ;;  %v10729_v48 = vld [vmem:[%s12936_s0 + $0x18] sm:$0xff]  }
 0x722   : > { %v5963_v45 = vpop.f32.mrb[78].mxu0  ;;  %v6097_v20 = vpop.f32.mrb[98].mxu1  ;;  %10195 = vmatpush3.bf16.msra.mxu0 %v10729_v48 }
 0x723   : > { %v12913_v27 = vadd.f32 %v6097_v20, %v5963_v45  ;;  %v9975_v49 = vpop.f32.mrb[79].mxu0  ;;  %v10013_v17 = vpop.f32.mrb[99].mxu1  ;;  %10222 = vmatprep.subr.bf16.mxu0 %v10810_v43 }
 0x725   : > { %10141 = vmatmul.mubr.msk.bf16.gmra.mrb[164].mxu0 %vm1282_vm2, %v6580_v33 }
 0x726   : > { %10144 = vmatprep.mubr.msk.bf16.mxu0 %vm10811_vm8, %v10810_v43 }
 0x72d   : > { %10145 = vmatmul.mubr.msk.bf16.gmra.mrb[168].mxu0 %vm1282_vm2, %v6581_v47 }
 0x72e   : > { %10148 = vmatprep.mubr.msk.bf16.mxu0 %vm10811_vm8, %v10810_v43 }
 0x730   : > { %v5968_v21 = vpop.f32.mrb[80].mxu0  ;;  %v6102_v34 = vpop.f32.mrb[100].mxu1 }
 0x731   : > { %v12921_v60 = vadd.f32 %v6102_v34, %v5968_v21  ;;  %v9978_v55 = vpop.f32.mrb[81].mxu0  ;;  %v10016_v30 = vpop.f32.mrb[101].mxu1 }
 0x732   : > { %v5971_v56 = vpop.f32.mrb[82].mxu0  ;;  %v6105_v46 = vpop.f32.mrb[102].mxu1 }
 0x733   : > { %v12923_v7 = vadd.f32 %v6105_v46, %v5971_v56  ;;  %v9979_v57 = vpop.f32.mrb[83].mxu0  ;;  %v10017_v10 = vpop.f32.mrb[103].mxu1 }
 0x735   : > { %10149 = vmatmul.mubr.msk.bf16.gmra.mrb[172].mxu0 %vm1282_vm2, %v6582_v9  ;;  %vm8055_vm2 = vcmask 979968  }
 0x736   : > { %10196 = vmatprep.mubr.msk.bf16.mxu0 %vm10811_vm8, %v10810_v43 }
 0x740   : > { %v5976_v50 = vpop.f32.mrb[84].mxu0  ;;  %v6110_v2 = vpop.f32.mrb[104].mxu1 }
 0x741   : > { %v12928_v22 = vadd.f32 %v6110_v2, %v5976_v50  ;;  %v9982_v40 = vpop.f32.mrb[85].mxu0  ;;  %v10020_v0 = vpop.f32.mrb[105].mxu1 }
 0x742   : > { %v5979_v37 = vpop.f32.mrb[86].mxu0  ;;  %v6113_v11 = vpop.f32.mrb[106].mxu1 }
 0x743   : > { %v12930_v62 = vadd.f32 %v6113_v11, %v5979_v37  ;;  %v9983_v15 = vpop.f32.mrb[87].mxu0  ;;  %v10021_v14 = vpop.f32.mrb[107].mxu1 }
 0x750   : > { %v5984_v53 = vpop.f32.mrb[88].mxu0  ;;  %v6118_v6 = vpop.f32.mrb[108].mxu1 }
 0x751   : > { %v12942_v31 = vadd.f32 %v6118_v6, %v5984_v53  ;;  %v9986_v51 = vpop.f32.mrb[89].mxu0  ;;  %v10024_v63 = vpop.f32.mrb[109].mxu1 }
 0x752   : > { %v5987_v25 = vpop.f32.mrb[90].mxu0  ;;  %v6121_v4 = vpop.f32.mrb[110].mxu1 }
 0x753   : > { %v12944_v5 = vadd.f32 %v6121_v4, %v5987_v25  ;;  %v9987_v52 = vpop.f32.mrb[91].mxu0  ;;  %v10025_v12 = vpop.f32.mrb[111].mxu1 }
 0x760   : > { %v5992_v42 = vpop.f32.mrb[92].mxu0  ;;  %v6126_v8 = vpop.f32.mrb[112].mxu1 }
 0x761   : > { %v12946_v54 = vadd.f32 %v6126_v8, %v5992_v42  ;;  %v9990_v13 = vpop.f32.mrb[93].mxu0  ;;  %v10028_v29 = vpop.f32.mrb[113].mxu1 }
 0x762   : > { %v5995_v39 = vpop.f32.mrb[94].mxu0  ;;  %v6129_v38 = vpop.f32.mrb[114].mxu1 }
 0x763   : > { %v12948_v58 = vadd.f32 %v6129_v38, %v5995_v39  ;;  %v9991_v26 = vpop.f32.mrb[95].mxu0  ;;  %v10029_v3 = vpop.f32.mrb[115].mxu1 }
 0x770   : > { %v6000_v23 = vpop.f32.mrb[96].mxu0  ;;  %v6134_v16 = vpop.f32.mrb[116].mxu1 }
 0x771   : > { %v12952_v24 = vadd.f32 %v6134_v16, %v6000_v23  ;;  %v9994_v32 = vpop.f32.mrb[97].mxu0  ;;  %v10032_v45 = vpop.f32.mrb[117].mxu1 }
 0x772   : > { %v6003_v20 = vpop.f32.mrb[98].mxu0  ;;  %v6137_v19 = vpop.f32.mrb[118].mxu1 }
 0x773   : > { %v12954_v49 = vadd.f32 %v6137_v19, %v6003_v20  ;;  %v9995_v17 = vpop.f32.mrb[99].mxu0  ;;  %v10033_v33 = vpop.f32.mrb[119].mxu1 }
 0x778   : > { %v6008_v18 = vpop.f32.mrb[100].mxu0  ;;  %v6142_v36 = vpop.f32.mrb[120].mxu1 }
 0x779   : > { %v12956_v47 = vadd.f32 %v6142_v36, %v6008_v18  ;;  %v9998_v21 = vpop.f32.mrb[101].mxu0  ;;  %v10036_v34 = vpop.f32.mrb[121].mxu1 }
 0x77a   : > { %v6011_v61 = vpop.f32.mrb[102].mxu0  ;;  %v6145_v55 = vpop.f32.mrb[122].mxu1 }
 0x77b   : > { %v9999_v30 = vpop.f32.mrb[103].mxu0  ;;  %v10037_v56 = vpop.f32.mrb[123].mxu1 }
 0x780   : > { %v6257_v46 = vpop.f32.mrb[104].mxu0  ;;  %v6453_v57 = vpop.f32.mrb[124].mxu1 }
 0x781   : > { %v6327_v10 = vadd.f32 %v6257_v46, %v12891_v59  ;;  %v10042_v9 = vpop.f32.mrb[105].mxu0  ;;  %v10080_v50 = vpop.f32.mrb[125].mxu1 }
 0x782   : > { %v6260_v2 = vpop.f32.mrb[106].mxu0  ;;  %v6456_v40 = vpop.f32.mrb[126].mxu1 }
 0x783   : > { %v12959_v0 = vadd.f32 %v6453_v57, %v6327_v10  ;;  %v6328_v37 = vadd.f32 %v6260_v2, %v12893_v44  ;;  %v10043_v11 = vpop.f32.mrb[107].mxu0  ;;  %v10081_v15 = vpop.f32.mrb[127].mxu1 }
 0x785   : > { %v12962_v14 = vadd.f32 %v6456_v40, %v6328_v37 }
 0x788   : > { %v6265_v28 = vpop.f32.mrb[108].mxu0  ;;  %v6461_v53 = vpop.f32.mrb[128].mxu1 }
 0x789   : > { %v6329_v6 = vadd.f32 %v6265_v28, %v12901_v1  ;;  %v10046_v51 = vpop.f32.mrb[109].mxu0  ;;  %v10084_v63 = vpop.f32.mrb[129].mxu1 }
 0x78a   : > { %v6268_v25 = vpop.f32.mrb[110].mxu0  ;;  %v6464_v59 = vpop.f32.mrb[130].mxu1 }
 0x78b   : > { %v12965_v4 = vadd.f32 %v6461_v53, %v6329_v6  ;;  %v6330_v52 = vadd.f32 %v6268_v25, %v12903_v35  ;;  %v10047_v12 = vpop.f32.mrb[111].mxu0  ;;  %v10085_v42 = vpop.f32.mrb[131].mxu1 }
 0x78d   : > { %v12968_v8 = vadd.f32 %v6464_v59, %v6330_v52 }
 0x790   : > { %v6273_v44 = vpop.f32.mrb[112].mxu0  ;;  %v6469_v13 = vpop.f32.mrb[132].mxu1 }
 0x791   : > { %v6331_v29 = vadd.f32 %v6273_v44, %v12911_v41  ;;  %v10050_v39 = vpop.f32.mrb[113].mxu0  ;;  %v10088_v38 = vpop.f32.mrb[133].mxu1 }
 0x792   : > { %v6276_v1 = vpop.f32.mrb[114].mxu0  ;;  %v6472_v26 = vpop.f32.mrb[134].mxu1 }
 0x793   : > { %v12972_v3 = vadd.f32 %v6469_v13, %v6331_v29  ;;  %v6332_v48 = vadd.f32 %v6276_v1, %v12913_v27  ;;  %v10051_v35 = vpop.f32.mrb[115].mxu0  ;;  %v10089_v23 = vpop.f32.mrb[135].mxu1 }
 0x795   : > { %v12975_v16 = vadd.f32 %v6472_v26, %v6332_v48 }
 0x798   : > { %v6281_v32 = vpop.f32.mrb[116].mxu0  ;;  %v6477_v45 = vpop.f32.mrb[136].mxu1 }
 0x799   : > { %v6333_v20 = vadd.f32 %v6281_v32, %v12921_v60  ;;  %v10054_v19 = vpop.f32.mrb[117].mxu0  ;;  %v10092_v41 = vpop.f32.mrb[137].mxu1 }
 0x79a   : > { %v6284_v17 = vpop.f32.mrb[118].mxu0  ;;  %v6480_v33 = vpop.f32.mrb[138].mxu1 }
 0x79b   : > { %v12978_v18 = vadd.f32 %v6477_v45, %v6333_v20  ;;  %v6334_v36 = vadd.f32 %v6284_v17, %v12923_v7  ;;  %v10055_v21 = vpop.f32.mrb[119].mxu0  ;;  %v10093_v34 = vpop.f32.mrb[139].mxu1 }
 0x79d   : > { %v12981_v61 = vadd.f32 %v6480_v33, %v6334_v36 }
 0x7a0   : > { %v6289_v27 = vpop.f32.mrb[120].mxu0  ;;  %v6485_v55 = vpop.f32.mrb[140].mxu1 }
 0x7a1   : > { %v6335_v30 = vadd.f32 %v6289_v27, %v12928_v22  ;;  %v10058_v56 = vpop.f32.mrb[121].mxu0  ;;  %v10096_v46 = vpop.f32.mrb[141].mxu1 }
 0x7a2   : > { %v6292_v57 = vpop.f32.mrb[122].mxu0  ;;  %v6488_v60 = vpop.f32.mrb[142].mxu1 }
 0x7a3   : > { %v12984_v10 = vadd.f32 %v6485_v55, %v6335_v30  ;;  %v6336_v9 = vadd.f32 %v6292_v57, %v12930_v62  ;;  %v10059_v50 = vpop.f32.mrb[123].mxu0  ;;  %v10097_v2 = vpop.f32.mrb[143].mxu1  ;;  %v13014_v57 = vld [vmem:[%s726_s19] ss:$0 sm:$0xff] }
 0x7a5   : > { %v12987_v40 = vadd.f32 %v6488_v60, %v6336_v9 }
 0x7a8   : > { %v6297_v7 = vpop.f32.mrb[124].mxu0  ;;  %v6493_v37 = vpop.f32.mrb[144].mxu1 }
 0x7a9   : > { %v6337_v11 = vadd.f32 %v6297_v7, %v12942_v31  ;;  %v10062_v15 = vpop.f32.mrb[125].mxu0  ;;  %v10100_v28 = vpop.f32.mrb[145].mxu1 }
 0x7aa   : > { %v6300_v53 = vpop.f32.mrb[126].mxu0  ;;  %v6496_v22 = vpop.f32.mrb[146].mxu1 }
 0x7ab   : > { %v12990_v6 = vadd.f32 %v6493_v37, %v6337_v11  ;;  %v6338_v51 = vadd.f32 %v6300_v53, %v12944_v5  ;;  %v10063_v63 = vpop.f32.mrb[127].mxu0  ;;  %v10101_v25 = vpop.f32.mrb[147].mxu1 }
 0x7ad   : > { %v12993_v59 = vadd.f32 %v6496_v22, %v6338_v51 }
 0x7b0   : > { %v6305_v62 = vpop.f32.mrb[128].mxu0  ;;  %v6501_v52 = vpop.f32.mrb[148].mxu1 }
 0x7b1   : > { %v6339_v12 = vadd.f32 %v6305_v62, %v12946_v54  ;;  %v10066_v42 = vpop.f32.mrb[129].mxu0  ;;  %v10104_v44 = vpop.f32.mrb[149].mxu1 }
 0x7b2   : > { %v6308_v13 = vpop.f32.mrb[130].mxu0  ;;  %v6504_v31 = vpop.f32.mrb[150].mxu1 }
 0x7b3   : > { %v12996_v29 = vadd.f32 %v6501_v52, %v6339_v12  ;;  %v6340_v39 = vadd.f32 %v6308_v13, %v12948_v58  ;;  %v10067_v38 = vpop.f32.mrb[131].mxu0  ;;  %v10105_v1 = vpop.f32.mrb[151].mxu1 }
 0x7b5   : > { %v12999_v26 = vadd.f32 %v6504_v31, %v6340_v39 }
 0x7b8   : > { %v6313_v5 = vpop.f32.mrb[132].mxu0  ;;  %v6509_v48 = vpop.f32.mrb[152].mxu1 }
 0x7b9   : > { %v6341_v35 = vadd.f32 %v6313_v5, %v12952_v24  ;;  %v10070_v23 = vpop.f32.mrb[133].mxu0  ;;  %v10108_v32 = vpop.f32.mrb[153].mxu1 }
 0x7ba   : > { %v6316_v45 = vpop.f32.mrb[134].mxu0  ;;  %v6512_v54 = vpop.f32.mrb[154].mxu1 }
 0x7bb   : > { %v13002_v20 = vadd.f32 %v6509_v48, %v6341_v35  ;;  %v6342_v19 = vadd.f32 %v6316_v45, %v12954_v49  ;;  %v10071_v41 = vpop.f32.mrb[135].mxu0  ;;  %v10109_v17 = vpop.f32.mrb[155].mxu1 }
 0x7bd   : > { %v13005_v58 = vadd.f32 %v6512_v54, %v6342_v19 }
 0x7c0   : > { %v6321_v33 = vpop.f32.mrb[136].mxu0  ;;  %v6517_v36 = vpop.f32.mrb[156].mxu1 }
 0x7c1   : > { %v6343_v21 = vadd.f32 %v6321_v33, %v12956_v47  ;;  %v10074_v34 = vpop.f32.mrb[137].mxu0  ;;  %v10112_v27 = vpop.f32.mrb[157].mxu1 }
 0x7c2   : > { %v6324_v24 = vpop.f32.mrb[138].mxu0  ;;  %v6520_v55 = vpop.f32.mrb[158].mxu1  ;;  %v10730_v34 = vld [vmem:[%s12936_s0] sm:$0xff]  }
 0x7c3   : > { %v13008_v30 = vadd.f32 %v6517_v36, %v6343_v21  ;;  %v10075_v56 = vpop.f32.mrb[139].mxu0  ;;  %v10113_v46 = vpop.f32.mrb[159].mxu1 }
 0x7c8   : > { %v6649_v49 = vpop.f32.mrb[140].mxu0 }
 0x7c9   : > { %v6719_v60 = vadd.f32 %v6649_v49, %v12959_v0  ;;  %v10118_v9 = vpop.f32.mrb[141].mxu0 }
 0x7ca   : > { %v6652_v50 = vpop.f32.mrb[142].mxu0 }
 0x7cb   : > { %v6743_v47 = vadd.f32 %v13014_v57, %v6719_v60  ;;  %v6720_v2 = vadd.f32 %v6652_v50, %v12962_v14  ;;  %v10119_v7 = vpop.f32.mrb[143].mxu0 }
 0x7cd   : > { %v6760_v37 = vmax.f32 %v6743_v47, 0.0  ;;  %v6744_v11 = vadd.f32 %v13014_v57, %v6720_v2 }
 0x7cf   : > { %6779 = vst.msk [vmem:[#allocation4 + $0x8] sm:$0xff] %vm6777_vm11, %v6760_v37  ;;  %v6761_v15 = vmax.f32 %v6744_v11, 0.0 }
 0x7d0   : > { %v6657_v28 = vpop.f32.mrb[144].mxu0 }
 0x7d1   : > { %6780 = vst.msk [vmem:[#allocation4 + $0x10] sm:$0xff] %vm6777_vm11, %v6761_v15  ;;  %v6721_v53 = vadd.f32 %v6657_v28, %v12965_v4  ;;  %v10122_v22 = vpop.f32.mrb[145].mxu0 }
 0x7d2   : > { %v6660_v0 = vpop.f32.mrb[146].mxu0 }
 0x7d3   : > { %v6745_v51 = vadd.f32 %v13014_v57, %v6721_v53  ;;  %v6722_v63 = vadd.f32 %v6660_v0, %v12968_v8  ;;  %v10123_v25 = vpop.f32.mrb[147].mxu0 }
 0x7d5   : > { %v6762_v14 = vmax.f32 %v6745_v51, 0.0  ;;  %v6746_v62 = vadd.f32 %v13014_v57, %v6722_v63 }
 0x7d7   : > { %6781 = vst.msk [vmem:[#allocation4 + $0x18] sm:$0xff] %vm6777_vm11, %v6762_v14  ;;  %v6763_v52 = vmax.f32 %v6746_v62, 0.0 }
 0x7d8   : > { %v6665_v12 = vpop.f32.mrb[148].mxu0 }
 0x7d9   : > { %6782 = vst.msk [vmem:[#allocation4 + $0x20] sm:$0xff] %vm6777_vm11, %v6763_v52  ;;  %v6723_v42 = vadd.f32 %v6665_v12, %v12972_v3  ;;  %v10126_v44 = vpop.f32.mrb[149].mxu0 }
 0x7da   : > { %v6668_v4 = vpop.f32.mrb[150].mxu0 }
 0x7db   : > { %v6747_v13 = vadd.f32 %v13014_v57, %v6723_v42  ;;  %v6724_v31 = vadd.f32 %v6668_v4, %v12975_v16  ;;  %v10127_v39 = vpop.f32.mrb[151].mxu0 }
 0x7dd   : > { %v6764_v8 = vmax.f32 %v6747_v13, 0.0  ;;  %v6748_v38 = vadd.f32 %v13014_v57, %v6724_v31 }
 0x7de   : > { %v6816_v41 = vld [vmem:[#allocation4 + $0x7] ss:$3 sm:$0xff]  ;;  %v7074_v36 = vld [vmem:[#allocation4 + $0x9] ss:$3 sm:$0xff] }
 0x7df   : > { %6783 = vst.msk [vmem:[#allocation4 + $0x28] sm:$0xff] %vm6777_vm11, %v6764_v8  ;;  %v6765_v1 = vmax.f32 %v6748_v38, 0.0 }
 0x7e0   : > { %v6673_v5 = vpop.f32.mrb[152].mxu0 }
 0x7e1   : > { %6784 = vst.msk [vmem:[#allocation4 + $0x30] sm:$0xff] %vm6777_vm11, %v6765_v1  ;;  %v6725_v48 = vadd.f32 %v6673_v5, %v12978_v18  ;;  %v10130_v35 = vpop.f32.mrb[153].mxu0 }
 0x7e2   : > { %v6676_v3 = vpop.f32.mrb[154].mxu0 }
 0x7e3   : > { %v6749_v23 = vadd.f32 %v13014_v57, %v6725_v48  ;;  %v6726_v32 = vadd.f32 %v6676_v3, %v12981_v61  ;;  %v10131_v16 = vpop.f32.mrb[155].mxu0 }
 0x7e5   : > { %v6766_v45 = vmax.f32 %v6749_v23, 0.0  ;;  %v6750_v54 = vadd.f32 %v13014_v57, %v6726_v32 }
 0x7e7   : > { %6785 = vst.msk [vmem:[#allocation4 + $0x38] sm:$0xff] %vm6777_vm11, %v6766_v45  ;;  %v6767_v19 = vmax.f32 %v6750_v54, 0.0 }
 0x7e8   : > { %v6818_v17 = vld [vmem:[#allocation4 + $0x1f] ss:$3 sm:$0xff]  ;;  %v6681_v18 = vpop.f32.mrb[156].mxu0  ;;  %v7076_v21 = vld [vmem:[#allocation4 + $0x21] ss:$3 sm:$0xff] }
 0x7e9   : > { %v6827_v33 = vpack.c.bf16 %v6818_v17, %v6816_v41  ;;  %6786 = vst.msk [vmem:[#allocation4 + $0x40] sm:$0xff] %vm6777_vm11, %v6767_v19  ;;  %v6727_v27 = vadd.f32 %v6681_v18, %v12984_v10  ;;  %v10134_v24 = vpop.f32.mrb[157].mxu0  ;;  %v7085_v61 = vpack.c.bf16 %v7076_v21, %v7074_v36  ;;  %v10731_v21 = vld [vmem:[%s12936_s0 + $0x10] sm:$0xff]  }
 0x7ea   : > { %v6684_v55 = vpop.f32.mrb[158].mxu0 }
 0x7eb   : > { %10155 = vmatmul.mubr.msk.bf16.vlgmr.msra.gmra.mrb[160].mxu1 %vm6777_vm11, %v6827_v33  ;;  %v6751_v56 = vadd.f32 %v13014_v57, %v6727_v27  ;;  %v6728_v46 = vadd.f32 %v6684_v55, %v12987_v40  ;;  %v10135_v49 = vpop.f32.mrb[159].mxu0  ;;  %10197 = vmatmul.mubr.msk.bf16.vlgmr.msra.gmra.mrb[176].mxu0 %vm6777_vm11, %v7085_v61 }
 0x7ec   : > { %10158 = vmatprep.mubr.msk.bf16.mxu1 %vm10811_vm8, %v10810_v43  ;;  %10200 = vmatprep.mubr.msk.bf16.mxu0 %vm10811_vm8, %v10810_v43  ;;  %v6980_v49 = vld [vmem:[#allocation4 + $0x20] ss:$3 sm:$0xff] }
 0x7ed   : > { %10167 = vmatpush3.bf16.msra.mxu1 %v10730_v34  ;;  %v6768_v10 = vmax.f32 %v6751_v56, 0.0  ;;  %v6752_v60 = vadd.f32 %v13014_v57, %v6728_v46 }
 0x7ee   : > { %10180 = vmatprep.subr.bf16.mxu1 %v10810_v43 }
 0x7ef   : > { %6787 = vst.msk [vmem:[#allocation4 + $0x48] sm:$0xff] %vm6777_vm11, %v6768_v10  ;;  %v6769_v9 = vmax.f32 %v6752_v60, 0.0  ;;  %v6978_v10 = vld [vmem:[#allocation4 + $0x8] ss:$3 sm:$0xff] }
 0x7f0   : > { %v6689_v50 = vpop.f32.mrb[160].mxu0  ;;  %v10732_v60 = vld [vmem:[%s12936_s0 + $0x20] sm:$0xff]   ;;  %s10661_s0 = smul.u32 160, %s10924_s26 }
 0x7f1   : > { %v6729_v40 = vadd.f32 %v6689_v50, %v12990_v6  ;;  %v10138_v47 = vpop.f32.mrb[161].mxu0  ;;  %6788 = vst.msk [vmem:[#allocation4 + $0x50] sm:$0xff] %vm6777_vm11, %v6769_v9  ;;  %v6989_v9 = vpack.c.bf16 %v6980_v49, %v6978_v10 }
 0x7f2   : > { %v6692_v2 = vpop.f32.mrb[162].mxu0  ;;  %s13175_s19 = scalar_lea.vmem %s13319_s11, %s10661_s0 }
 0x7f3   : > { %v6753_v7 = vadd.f32 %v13014_v57, %v6729_v40  ;;  %v6730_v37 = vadd.f32 %v6692_v2, %v12993_v59  ;;  %v10139_v11 = vpop.f32.mrb[163].mxu0 }
 0x7f4   : > { %v7172_v11 = vld [vmem:[#allocation4 + $0x22] ss:$3 sm:$0xff] }
 0x7f5   : > { %v6770_v15 = vmax.f32 %v6753_v7, 0.0  ;;  %v6754_v28 = vadd.f32 %v13014_v57, %v6730_v37 }
 0x7f6   : > { %v6820_v12 = vld [vmem:[#allocation4 + $0x37] ss:$3 sm:$0xff]  ;;  %v7078_v42 = vld [vmem:[#allocation4 + $0x39] ss:$3 sm:$0xff]  ;;  %v6982_v40 = vld [vmem:[#allocation4 + $0x38] ss:$3 sm:$0xff] }
 0x7f7   : > { %6789 = vst.msk [vmem:[#allocation4 + $0x58] sm:$0xff] %vm6777_vm11, %v6770_v15  ;;  %v6771_v53 = vmax.f32 %v6754_v28, 0.0  ;;  %v6803_v24 = vld [vmem:[#allocation4 + $0x36] ss:$3 sm:$0xff] }
 0x7f8   : > { %v6697_v22 = vpop.f32.mrb[164].mxu0  ;;  %v7170_v15 = vld [vmem:[#allocation4 + $0xa] ss:$3 sm:$0xff] }
 0x7f9   : > { %6790 = vst.msk [vmem:[#allocation4 + $0x60] sm:$0xff] %vm6777_vm11, %v6771_v53  ;;  %v6731_v6 = vadd.f32 %v6697_v22, %v12996_v29  ;;  %v10142_v0 = vpop.f32.mrb[165].mxu0  ;;  %v7181_v28 = vpack.c.bf16 %v7172_v11, %v7170_v15  ;;  %v7174_v22 = vld [vmem:[#allocation4 + $0x3a] ss:$3 sm:$0xff] }
 0x7fa   : > { %v6700_v51 = vpop.f32.mrb[166].mxu0 }
 0x7fb   : > { %v6755_v63 = vadd.f32 %v13014_v57, %v6731_v6  ;;  %v6732_v25 = vadd.f32 %v6700_v51, %v12999_v26  ;;  %v10143_v14 = vpop.f32.mrb[167].mxu0 }
 0x7fd   : > { %v6772_v59 = vmax.f32 %v6755_v63, 0.0  ;;  %v6756_v62 = vadd.f32 %v13014_v57, %v6732_v25  ;;  %v10733_v25 = vld [vmem:[%s13124_s22 + $0x10] sm:$0xff]  }
 0x7fe   : > { %10223 = vmatpush3.bf16.msra.mxu0 %v10733_v25 }
 0x7ff   : > { %6791 = vst.msk [vmem:[#allocation4 + $0x68] sm:$0xff] %vm6777_vm11, %v6772_v59  ;;  %v6773_v52 = vmax.f32 %v6756_v62, 0.0  ;;  %v10734_v59 = vld [vmem:[%s13124_s22] sm:$0xff]   ;;  %10224 = vmatprep.subr.bf16.mxu0 %v10810_v43 }
 0x800   : > { %v6705_v44 = vpop.f32.mrb[168].mxu0  ;;  %v6822_v4 = vld [vmem:[#allocation4 + $0x4f] ss:$3 sm:$0xff]  ;;  %v7080_v13 = vld [vmem:[#allocation4 + $0x51] ss:$3 sm:$0xff] }
 0x801   : > { %6792 = vst.msk [vmem:[#allocation4 + $0x70] sm:$0xff] %vm6777_vm11, %v6773_v52  ;;  %v6733_v29 = vadd.f32 %v6705_v44, %v13002_v20  ;;  %v10146_v31 = vpop.f32.mrb[169].mxu0  ;;  %v6828_v39 = vpack.c.bf16 %v6822_v4, %v6820_v12  ;;  %v7086_v8 = vpack.c.bf16 %v7080_v13, %v7078_v42  ;;  %v6805_v27 = vld [vmem:[#allocation4 + $0x4e] ss:$3 sm:$0xff]  ;;  %v6984_v50 = vld [vmem:[#allocation4 + $0x50] ss:$3 sm:$0xff] }
 0x802   : > { %v6708_v26 = vpop.f32.mrb[170].mxu0  ;;  %v6811_v61 = vpack.c.bf16 %v6805_v27, %v6803_v24  ;;  %v6990_v47 = vpack.c.bf16 %v6984_v50, %v6982_v40  ;;  %v7176_v53 = vld [vmem:[#allocation4 + $0x52] ss:$3 sm:$0xff] }
 0x803   : > { %v6757_v38 = vadd.f32 %v13014_v57, %v6733_v29  ;;  %v6734_v1 = vadd.f32 %v6708_v26, %v13005_v58  ;;  %v10147_v5 = vpop.f32.mrb[171].mxu0  ;;  %10159 = vmatmul.mubr.msk.bf16.gmra.mrb[164].mxu1 %vm6777_vm11, %v6828_v39  ;;  %10201 = vmatmul.mubr.msk.bf16.gmra.mrb[180].mxu0 %vm6777_vm11, %v7086_v8  ;;  %v7182_v6 = vpack.c.bf16 %v7176_v53, %v7174_v22  ;;  %v10735_v29 = vld [vmem:[%s13124_s22 + $0x18] sm:$0xff]   ;;  %v10736_v31 = vld [vmem:[%s13124_s22 + $0x8] sm:$0xff]  }
 0x804   : > { %10162 = vmatprep.mubr.msk.bf16.mxu1 %vm10811_vm8, %v10810_v43  ;;  %10204 = vmatprep.mubr.msk.bf16.mxu0 %vm10811_vm8, %v10810_v43 }
 0x805   : > { %v6774_v20 = vmax.f32 %v6757_v38, 0.0  ;;  %v6758_v48 = vadd.f32 %v13014_v57, %v6734_v1  ;;  %10225 = vmatpush3.bf16.msra.mxu0 %v10735_v29 }
 0x806   : > { %10238 = vmatprep.subr.bf16.mxu0 %v10810_v43 }
 0x807   : > { %6793 = vst.msk [vmem:[#allocation4 + $0x78] sm:$0xff] %vm6777_vm11, %v6774_v20  ;;  %v6775_v35 = vmax.f32 %v6758_v48, 0.0 }
 0x808   : > { %v6713_v3 = vpop.f32.mrb[172].mxu0 }
 0x809   : > { %6794 = vst.msk [vmem:[#allocation4 + $0x80] sm:$0xff] %vm6777_vm11, %v6775_v35  ;;  %v6735_v58 = vadd.f32 %v6713_v3, %v13008_v30  ;;  %v10150_v23 = vpop.f32.mrb[173].mxu0  ;;  %v6801_v30 = vld [vmem:[#allocation4 + $0x1e] ss:$3 sm:$0xff] }
 0x80a   : > { %v6716_v32 = vpop.f32.mrb[174].mxu0 }
 0x80b   : > { %v6759_v16 = vadd.f32 %v13014_v57, %v6735_v58  ;;  %v10151_v45 = vpop.f32.mrb[175].mxu0  ;;  %v6799_v57 = vld [vmem:[#allocation4 + $0x6] ss:$3 sm:$0xff] }
 0x80c   : > { %v6810_v34 = vpack.c.bf16 %v6801_v30, %v6799_v57 }
 0x80d   : > { %v6776_v54 = vmax.f32 %v6759_v16, 0.0 }
 0x80e   : > { %v6824_v19 = vld [vmem:[#allocation4 + $0x67] ss:$3 sm:$0xff]  ;;  %v7082_v41 = vld [vmem:[#allocation4 + $0x69] ss:$3 sm:$0xff]  ;;  %v6986_v7 = vld [vmem:[#allocation4 + $0x68] ss:$3 sm:$0xff] }
 0x80f   : > { %6795 = vst.msk [vmem:[#allocation4 + $0x88] sm:$0xff] %vm6777_vm11, %v6776_v54  ;;  %v6807_v56 = vld [vmem:[#allocation4 + $0x66] ss:$3 sm:$0xff]  ;;  %v7178_v51 = vld [vmem:[#allocation4 + $0x6a] ss:$3 sm:$0xff] }
 0x816   : > { %v6826_v17 = vld [vmem:[#allocation4 + $0x7f] ss:$3 sm:$0x3f]  ;;  %v7084_v33 = vld [vmem:[#allocation4 + $0x81] ss:$3 sm:$0x3f] }
 0x817   : > { %v6829_v18 = vpack.c.bf16 %v6826_v17, %v6824_v19  ;;  %v7087_v36 = vpack.c.bf16 %v7084_v33, %v7082_v41  ;;  %v6809_v55 = vld [vmem:[#allocation4 + $0x7e] ss:$3 sm:$0x3f]  ;;  %v6988_v2 = vld [vmem:[#allocation4 + $0x80] ss:$3 sm:$0x3f] }
 0x818   : > { %v6812_v46 = vpack.c.bf16 %v6809_v55, %v6807_v56  ;;  %v6991_v37 = vpack.c.bf16 %v6988_v2, %v6986_v7  ;;  %v7180_v0 = vld [vmem:[#allocation4 + $0x82] ss:$3 sm:$0x3f] }
 0x819   : > { %10163 = vmatmul.mubr.msk.bf16.gmra.mrb[168].mxu1 %vm6777_vm11, %v6829_v18  ;;  %10205 = vmatmul.mubr.msk.bf16.gmra.mrb[184].mxu0 %vm6777_vm11, %v7087_v36  ;;  %v7183_v63 = vpack.c.bf16 %v7180_v0, %v7178_v51 }
 0x81a   : > { %10168 = vmatprep.mubr.msk.bf16.mxu1 %vm10811_vm8, %v10810_v43  ;;  %10226 = vmatprep.mubr.msk.bf16.mxu0 %vm10811_vm8, %v10810_v43 }
 0x821   : > { %10169 = vmatmul.mubr.msk.bf16.vlgmr.msra.gmra.mrb[172].mxu1 %vm6777_vm11, %v6810_v34 }
 0x822   : > { %10181 = vmatpush3.bf16.msra.mxu1 %v10731_v21  ;;  %10172 = vmatprep.mubr.msk.bf16.mxu1 %vm10811_vm8, %v10810_v43 }
 0x823   : > { %10208 = vmatprep.subr.bf16.mxu1 %v10810_v43 }
 0x829   : > { %10173 = vmatmul.mubr.msk.bf16.gmra.mrb[176].mxu1 %vm6777_vm11, %v6811_v61 }
 0x82a   : > { %10176 = vmatprep.mubr.msk.bf16.mxu1 %vm10811_vm8, %v10810_v43 }
 0x831   : > { %10177 = vmatmul.mubr.msk.bf16.gmra.mrb[180].mxu1 %vm6777_vm11, %v6812_v46 }
 0x832   : > { %10182 = vmatprep.mubr.msk.bf16.mxu1 %vm10811_vm8, %v10810_v43 }
 0x839   : > { %10183 = vmatmul.mubr.msk.bf16.vlgmr.msra.gmra.mrb[184].mxu1 %vm6777_vm11, %v6989_v9 }
 0x83a   : > { %10209 = vmatpush3.bf16.msra.mxu1 %v10732_v60  ;;  %10186 = vmatprep.mubr.msk.bf16.mxu1 %vm10811_vm8, %v10810_v43 }
 0x83b   : > { %10230 = vmatprep.subr.bf16.mxu1 %v10810_v43 }
 0x841   : > { %10187 = vmatmul.mubr.msk.bf16.gmra.mrb[188].mxu1 %vm6777_vm11, %v6990_v47 }
 0x842   : > { %10190 = vmatprep.mubr.msk.bf16.mxu1 %vm10811_vm8, %v10810_v43 }
 0x849   : > { %10191 = vmatmul.mubr.msk.bf16.gmra.mrb[192].mxu1 %vm6777_vm11, %v6991_v37 }
 0x84a   : > { %10210 = vmatprep.mubr.msk.bf16.mxu1 %vm10811_vm8, %v10810_v43 }
 0x851   : > { %10211 = vmatmul.mubr.msk.bf16.vlgmr.msra.gmra.mrb[196].mxu1 %vm6777_vm11, %v7181_v28 }
 0x852   : > { %10214 = vmatprep.mubr.msk.bf16.mxu1 %vm10811_vm8, %v10810_v43  ;;  %10231 = vmatpush3.bf16.msra.mxu1 %v10734_v59 }
 0x853   : > { %10232 = vmatprep.subr.bf16.mxu1 %v10810_v43 }
 0x856   : > { %10233 = vmatpush3.bf16.msra.mxu1 %v10736_v31 }
 0x857   : > { %10246 = vmatprep.subr.bf16.mxu1 %v10810_v43 }
 0x859   : > { %10215 = vmatmul.mubr.msk.bf16.gmra.mrb[200].mxu1 %vm6777_vm11, %v7182_v6 }
 0x85a   : > { %10218 = vmatprep.mubr.msk.bf16.mxu1 %vm10811_vm8, %v10810_v43 }
 0x861   : > { %10219 = vmatmul.mubr.msk.bf16.gmra.mrb[204].mxu1 %vm6777_vm11, %v7183_v63 }
 0x862   : > { %10234 = vmatprep.mubr.msk.bf16.mxu1 %vm10811_vm8, %v10810_v43 }
 0x8be   : > { %v6882_v14 = vpop.f32.mrb[160].mxu1  ;;  %v7140_v62 = vpop.f32.mrb[176].mxu0 }
 0x8bf   : > { %v10156_v52 = vpop.f32.mrb[161].mxu1  ;;  %v10198_v12 = vpop.f32.mrb[177].mxu0 }
 0x8c0   : > { %v6885_v42 = vpop.f32.mrb[162].mxu1  ;;  %v7143_v44 = vpop.f32.mrb[178].mxu0 }
 0x8c1   : > { %v10157_v4 = vpop.f32.mrb[163].mxu1  ;;  %v10199_v13 = vpop.f32.mrb[179].mxu0 }
 0x8c2   : > { %v8774_v4 = vld [vmem:[%s734_s30] ss:$0 sm:$0xff] }
 0x8d6   : > { %v6890_v39 = vpop.f32.mrb[164].mxu1  ;;  %v7148_v8 = vpop.f32.mrb[180].mxu0 }
 0x8d7   : > { %v10160_v26 = vpop.f32.mrb[165].mxu1  ;;  %v10202_v38 = vpop.f32.mrb[181].mxu0 }
 0x8d8   : > { %v6893_v1 = vpop.f32.mrb[166].mxu1  ;;  %v7151_v5 = vpop.f32.mrb[182].mxu0 }
 0x8d9   : > { %v10161_v20 = vpop.f32.mrb[167].mxu1  ;;  %v10203_v48 = vpop.f32.mrb[183].mxu0 }
 0x8ec   : > { %v6898_v35 = vpop.f32.mrb[168].mxu1  ;;  %v7156_v3 = vpop.f32.mrb[184].mxu0 }
 0x8ed   : > { %v10164_v58 = vpop.f32.mrb[169].mxu1  ;;  %v10206_v23 = vpop.f32.mrb[185].mxu0 }
 0x8ee   : > { %v6901_v32 = vpop.f32.mrb[170].mxu1  ;;  %v7159_v16 = vpop.f32.mrb[186].mxu0 }
 0x8ef   : > { %v10165_v45 = vpop.f32.mrb[171].mxu1  ;;  %v10207_v54 = vpop.f32.mrb[187].mxu0 }
 0x8f4   : > { %v6954_v19 = vpop.f32.mrb[172].mxu1 }
 0x8f5   : > { %v6955_v41 = vadd.f32 %v6954_v19, %v6882_v14  ;;  %v10170_v17 = vpop.f32.mrb[173].mxu1 }
 0x8f6   : > { %v6957_v33 = vpop.f32.mrb[174].mxu1 }
 0x8f7   : > { %v6958_v18 = vadd.f32 %v6957_v33, %v6885_v42  ;;  %v10171_v36 = vpop.f32.mrb[175].mxu1 }
 0x8fc   : > { %v6962_v30 = vpop.f32.mrb[176].mxu1 }
 0x8fd   : > { %v6963_v57 = vadd.f32 %v6962_v30, %v6890_v39  ;;  %v10174_v21 = vpop.f32.mrb[177].mxu1 }
 0x8fe   : > { %v6965_v34 = vpop.f32.mrb[178].mxu1 }
 0x8ff   : > { %v6966_v27 = vadd.f32 %v6965_v34, %v6893_v1  ;;  %v10175_v24 = vpop.f32.mrb[179].mxu1 }
 0x900   : > { %v10737_v24 = vld [vmem:[%s13124_s22 + $0x20] sm:$0xff]  }
 0x904   : > { %v6970_v61 = vpop.f32.mrb[180].mxu1 }
 0x905   : > { %v6971_v55 = vadd.f32 %v6970_v61, %v6898_v35  ;;  %v10178_v56 = vpop.f32.mrb[181].mxu1  ;;  %v10738_v61 = vld [vmem:[%s13124_s22 + $0x30] sm:$0xff]  }
 0x906   : > { %v6973_v46 = vpop.f32.mrb[182].mxu1 }
 0x907   : > { %v6974_v49 = vadd.f32 %v6973_v46, %v6901_v32  ;;  %v10179_v10 = vpop.f32.mrb[183].mxu1 }
 0x90c   : > { %v7044_v60 = vpop.f32.mrb[184].mxu1 }
 0x90d   : > { %v7067_v9 = vadd.f32 %v7044_v60, %v6955_v41  ;;  %v10184_v50 = vpop.f32.mrb[185].mxu1  ;;  %v10739_v60 = vld [vmem:[%s13124_s22 + $0x28] sm:$0xff]  }
 0x90e   : > { %v7047_v40 = vpop.f32.mrb[186].mxu1 }
 0x90f   : > { %v7068_v47 = vadd.f32 %v7047_v40, %v6958_v18  ;;  %v10185_v2 = vpop.f32.mrb[187].mxu1  ;;  %v7163_v7 = vadd.f32 %v7140_v62, %v7067_v9  ;;  %v10740_v9 = vld [vmem:[%s13124_s22 + $0x38] sm:$0xff]  }
 0x911   : > { %v7164_v37 = vadd.f32 %v7143_v44, %v7068_v47 }
 0x914   : > { %v7052_v11 = vpop.f32.mrb[188].mxu1 }
 0x915   : > { %v7069_v15 = vadd.f32 %v7052_v11, %v6963_v57  ;;  %v10188_v28 = vpop.f32.mrb[189].mxu1 }
 0x916   : > { %v7055_v53 = vpop.f32.mrb[190].mxu1 }
 0x917   : > { %v7070_v22 = vadd.f32 %v7055_v53, %v6966_v27  ;;  %v10189_v6 = vpop.f32.mrb[191].mxu1  ;;  %v7165_v0 = vadd.f32 %v7148_v8, %v7069_v15  ;;  %v10742_v15 = vld [vmem:[%s13124_s22 + $0x48] sm:$0xff]  }
 0x918   : > { %v10743_v6 = vld [vmem:[%s13175_s19 + $0x20] sm:$0xff]  }
 0x919   : > { %v7166_v51 = vadd.f32 %v7151_v5, %v7070_v22 }
 0x91c   : > { %v7060_v63 = vpop.f32.mrb[192].mxu1 }
 0x91d   : > { %v7071_v25 = vadd.f32 %v7060_v63, %v6971_v55  ;;  %v10192_v14 = vpop.f32.mrb[193].mxu1  ;;  %v10746_v63 = vld [vmem:[%s13175_s19 + $0x8] sm:$0xff]  }
 0x91e   : > { %v7063_v59 = vpop.f32.mrb[194].mxu1  ;;  %v10748_v14 = vld [vmem:[%s13175_s19 + $0x10] sm:$0xff]  }
 0x91f   : > { %v7072_v52 = vadd.f32 %v7063_v59, %v6974_v49  ;;  %v10193_v12 = vpop.f32.mrb[195].mxu1  ;;  %v7167_v42 = vadd.f32 %v7156_v3, %v7071_v25  ;;  %v10747_v25 = vld [vmem:[%s13175_s19 + $0x30] sm:$0xff]   ;;  %v10749_v59 = vld [vmem:[%s13175_s19 + $0x38] sm:$0xff]  }
 0x921   : > { %v7168_v62 = vadd.f32 %v7159_v16, %v7072_v52  ;;  %v10750_v52 = vld [vmem:[%s13175_s19 + $0x18] sm:$0xff]  }
 0x924   : > { %v7236_v44 = vpop.f32.mrb[196].mxu1 }
 0x925   : > { %v7259_v13 = vadd.f32 %v7236_v44, %v7163_v7  ;;  %v10212_v29 = vpop.f32.mrb[197].mxu1  ;;  %v10741_v7 = vld [vmem:[%s13124_s22 + $0x40] sm:$0xff]   ;;  %s8392_s22 = sshll.u32 %s10924_s26, 3 }
 0x926   : > { %v7239_v31 = vpop.f32.mrb[198].mxu1  ;;  %s754_s30 = scalar_lea.vmem %s13321_s13, %s8392_s22 }
 0x927   : > { %v7272_v39 = vadd.f32 %v8774_v4, %v7259_v13  ;;  %v7260_v8 = vadd.f32 %v7239_v31, %v7164_v37  ;;  %v10213_v26 = vpop.f32.mrb[199].mxu1 }
 0x929   : > { %v7278_v38 = vmax.f32 %v7272_v39, 0.0  ;;  %v7273_v1 = vadd.f32 %v8774_v4, %v7260_v8 }
 0x92b   : > { %7286 = vst.msk [vmem:[#allocation5 + $0x8] sm:$0xff] %vm7284_vm13, %v7278_v38  ;;  %v7279_v5 = vmax.f32 %v7273_v1, 0.0 }
 0x92c   : > { %v7244_v20 = vpop.f32.mrb[200].mxu1 }
 0x92d   : > { %7287 = vst.msk [vmem:[#allocation5 + $0x10] sm:$0xff] %vm7284_vm13, %v7279_v5  ;;  %v7261_v48 = vadd.f32 %v7244_v20, %v7165_v0  ;;  %v10216_v35 = vpop.f32.mrb[201].mxu1  ;;  %v10744_v0 = vld [vmem:[%s13175_s19] sm:$0xff]  }
 0x92e   : > { %v7247_v3 = vpop.f32.mrb[202].mxu1 }
 0x92f   : > { %v7274_v58 = vadd.f32 %v8774_v4, %v7261_v48  ;;  %v7262_v23 = vadd.f32 %v7247_v3, %v7166_v51  ;;  %v10217_v32 = vpop.f32.mrb[203].mxu1  ;;  %v10745_v51 = vld [vmem:[%s13175_s19 + $0x28] sm:$0xff]  }
 0x931   : > { %v7280_v16 = vmax.f32 %v7274_v58, 0.0  ;;  %v7275_v45 = vadd.f32 %v8774_v4, %v7262_v23 }
 0x933   : > { %7288 = vst.msk [vmem:[#allocation5 + $0x18] sm:$0xff] %vm7284_vm13, %v7280_v16  ;;  %v7281_v54 = vmax.f32 %v7275_v45, 0.0 }
 0x934   : > { %v7252_v19 = vpop.f32.mrb[204].mxu1 }
 0x935   : > { %7289 = vst.msk [vmem:[#allocation5 + $0x20] sm:$0xff] %vm7284_vm13, %v7281_v54  ;;  %v7263_v41 = vadd.f32 %v7252_v19, %v7167_v42  ;;  %v10220_v17 = vpop.f32.mrb[205].mxu1  ;;  %v8806_v54 = vld [vmem:[%s742_s21] ss:$0 sm:$0xff]  ;;  %s750_s21 = scalar_lea.vmem %s13320_s12, %s10924_s26 }
 0x936   : > { %v7255_v33 = vpop.f32.mrb[206].mxu1 }
 0x937   : > { %v7276_v18 = vadd.f32 %v8774_v4, %v7263_v41  ;;  %v7264_v36 = vadd.f32 %v7255_v33, %v7168_v62  ;;  %v10221_v30 = vpop.f32.mrb[207].mxu1 }
 0x939   : > { %v7282_v57 = vmax.f32 %v7276_v18, 0.0  ;;  %v7277_v21 = vadd.f32 %v8774_v4, %v7264_v36 }
 0x93a   : > { %v7296_v27 = vld [vmem:[#allocation5 + $0x6] ss:$3 sm:$0xff]  ;;  %v7305_v56 = vld [vmem:[#allocation5 + $0x7] ss:$3 sm:$0xff]  ;;  %v7427_v2 = vld [vmem:[#allocation5 + $0x8] ss:$3 sm:$0xff] }
 0x93b   : > { %7290 = vst.msk [vmem:[#allocation5 + $0x28] sm:$0xff] %vm7284_vm13, %v7282_v57  ;;  %v7283_v34 = vmax.f32 %v7277_v21, 0.0  ;;  %v7495_v47 = vld [vmem:[#allocation5 + $0x9] ss:$3 sm:$0xff]  ;;  %v7563_v53 = vld [vmem:[#allocation5 + $0xa] ss:$3 sm:$0xff] }
 0x93d   : > { %7292 = vst.msk [vmem:[#allocation5 + $0x30] sm:$0x3f] %vm7291_vm15, %v7283_v34 }
 0x944   : > { %v7298_v55 = vld [vmem:[#allocation5 + $0x1e] ss:$3 sm:$0xff]  ;;  %v7307_v46 = vld [vmem:[#allocation5 + $0x1f] ss:$3 sm:$0xff]  ;;  %v7429_v40 = vld [vmem:[#allocation5 + $0x20] ss:$3 sm:$0xff] }
 0x945   : > { %v7299_v49 = vpack.c.bf16 %v7298_v55, %v7296_v27  ;;  %v7308_v10 = vpack.c.bf16 %v7307_v46, %v7305_v56  ;;  %v7497_v50 = vld [vmem:[#allocation5 + $0x21] ss:$3 sm:$0xff]  ;;  %v7430_v11 = vpack.c.bf16 %v7429_v40, %v7427_v2  ;;  %v7565_v28 = vld [vmem:[#allocation5 + $0x22] ss:$3 sm:$0xff]  ;;  %v10751_v27 = vld [vmem:[%s13175_s19 + $0x40] sm:$0xff]  }
 0x946   : > { %v7498_v37 = vpack.c.bf16 %v7497_v50, %v7495_v47  ;;  %v7566_v22 = vpack.c.bf16 %v7565_v28, %v7563_v53  ;;  %v10752_v55 = vld [vmem:[%s13175_s19 + $0x60] sm:$0xff]   ;;  %v10753_v46 = vld [vmem:[%s13175_s19 + $0x48] sm:$0xff]   ;;  %v10758_v50 = vld [vmem:[%s13175_s19 + $0x78] sm:$0xff]  }
 0x947   : > { %10227 = vmatmul.mubr.msk.bf16.vlgmr.msra.gmra.mrb[188].mxu0 %vm7284_vm13, %v7308_v10  ;;  %10235 = vmatmul.mubr.msk.bf16.vlgmr.msra.gmra.mrb[208].mxu1 %vm7284_vm13, %v7299_v49  ;;  %v10754_v49 = vld [vmem:[%s13175_s19 + $0x68] sm:$0xff]   ;;  %v10755_v10 = vld [vmem:[%s13175_s19 + $0x50] sm:$0xff]   ;;  %v10759_v2 = vld [vmem:[%s13175_s19 + $0x80] sm:$0xff]  }
 0x948   : > { %10239 = vmatpush3.bf16.msra.mxu0 %v10737_v24  ;;  %10247 = vmatpush3.bf16.msra.mxu1 %v10738_v61  ;;  %v10762_v28 = vld [vmem:[%s13175_s19 + $0x98] sm:$0xff]  }
 0x949   : > { %10240 = vmatprep.subr.bf16.mxu0 %v10810_v43  ;;  %10248 = vmatprep.subr.bf16.mxu1 %v10810_v43 }
 0x94a   : > { %10242 = vmatprep.mubr.msk.bf16.mxu0 %vm10811_vm8, %v10810_v43  ;;  %10250 = vmatprep.mubr.msk.bf16.mxu1 %vm10811_vm8, %v10810_v43 }
 0x94c   : > { %10241 = vmatpush3.bf16.msra.mxu0 %v10739_v60  ;;  %10249 = vmatpush3.bf16.msra.mxu1 %v10740_v9  ;;  %v10756_v60 = vld [vmem:[%s13175_s19 + $0x70] sm:$0xff]   ;;  %v10757_v9 = vld [vmem:[%s13175_s19 + $0x58] sm:$0xff]  }
 0x94d   : > { %10254 = vmatprep.subr.bf16.mxu0 %v10810_v43  ;;  %10262 = vmatprep.subr.bf16.mxu1 %v10810_v43 }
 0x94f   : > { %10243 = vmatmul.mubr.msk.bf16.vlgmr.msra.gmra.mrb[192].mxu0 %vm7284_vm13, %v7430_v11  ;;  %10251 = vmatmul.mubr.msk.bf16.vlgmr.msra.gmra.mrb[212].mxu1 %vm7284_vm13, %v7498_v37  ;;  %v10760_v11 = vld [vmem:[%s13175_s19 + $0x88] sm:$0xff]  }
 0x950   : > { %10255 = vmatpush3.bf16.msra.mxu0 %v10741_v7  ;;  %10258 = vmatprep.mubr.msk.bf16.mxu0 %vm10811_vm8, %v10810_v43 }
 0x951   : > { %10256 = vmatprep.subr.bf16.mxu0 %v10810_v43  ;;  %10270 = vmatprep.mubr.msk.bf16.mxu1 %vm10811_vm8, %v10810_v43 }
 0x952   : > { %10263 = vmatpush3.bf16.msra.mxu1 %v10743_v6  ;;  %v8063_v6 = vld [vmem:[%s13322_s14] sm:$0xff] }
 0x953   : > { %10264 = vmatprep.subr.bf16.mxu1 %v10810_v43 }
 0x954   : > { %10257 = vmatpush3.bf16.msra.mxu0 %v10742_v15  ;;  %v10761_v15 = vld [vmem:[%s13175_s19 + $0x90] sm:$0xff]  }
 0x955   : > { %10274 = vmatprep.subr.bf16.mxu0 %v10810_v43 }
 0x956   : > { %10265 = vmatpush3.bf16.msra.mxu1 %v10745_v51  ;;  %v8065_v51 = vld [vmem:[%s13322_s14 + $0x10] sm:$0xff] }
 0x957   : > { %10259 = vmatmul.mubr.msk.bf16.vlgmr.msra.gmra.mrb[196].mxu0 %vm7284_vm13, %v7566_v22  ;;  %10266 = vmatprep.subr.bf16.mxu1 %v10810_v43 }
 0x958   : > { %10282 = vmatprep.mubr.msk.bf16.mxu0 %vm10811_vm8, %v10810_v43  ;;  %10275 = vmatpush3.bf16.msra.mxu0 %v10744_v0  ;;  %v8064_v0 = vld [vmem:[%s13322_s14 + $0x8] sm:$0xff] }
 0x959   : > { %10276 = vmatprep.subr.bf16.mxu0 %v10810_v43 }
 0x95a   : > { %10267 = vmatpush3.bf16.msra.mxu1 %v10747_v25  ;;  %v10356_v25 = vpack.c.bf16 %v8064_v0, %v8063_v6 }
 0x95b   : > { %10268 = vmatprep.subr.bf16.mxu1 %v10810_v43 }
 0x95c   : > { %10277 = vmatpush3.bf16.msra.mxu0 %v10746_v63  ;;  %v10812_v63 = vmov 0.0|0.0  }
 0x95d   : > { %10278 = vmatprep.subr.bf16.mxu0 %v10810_v43 }
 0x95e   : > { %10269 = vmatpush3.bf16.msra.mxu1 %v10749_v59 }
 0x95f   : > { %10286 = vmatprep.subr.bf16.mxu1 %v10810_v43 }
 0x960   : > { %10279 = vmatpush3.bf16.msra.mxu0 %v10748_v14  ;;  %v8066_v14 = vld [vmem:[%s13322_s14 + $0x18] sm:$0xff] }
 0x961   : > { %10280 = vmatprep.subr.bf16.mxu0 %v10810_v43  ;;  %v10359_v59 = vpack.c.bf16 %v8066_v14, %v8065_v51 }
 0x964   : > { %10281 = vmatpush3.bf16.msra.mxu0 %v10750_v52  ;;  %v8067_v52 = vld [vmem:[%s13322_s14 + $0x20] sm:$0xff] }
 0x965   : > { %10298 = vmatprep.subr.bf16.mxu0 %v10810_v43 }
 0xa1a   : > { %v7363_v12 = vpop.f32.mrb[188].mxu0  ;;  %v7419_v42 = vpop.f32.mrb[208].mxu1 }
 0xa1b   : > { %v7420_v62 = vadd.f32 %v7419_v42, %v7363_v12  ;;  %v10228_v44 = vpop.f32.mrb[189].mxu0  ;;  %v10236_v4 = vpop.f32.mrb[209].mxu1  ;;  %v8068_v12 = vld [vmem:[%s13322_s14 + $0x28] sm:$0xff] }
 0xa1c   : > { %v7366_v13 = vpop.f32.mrb[190].mxu0  ;;  %v7422_v29 = vpop.f32.mrb[210].mxu1  ;;  %v10362_v42 = vpack.c.bf16 %v8068_v12, %v8067_v52  ;;  %v8070_v44 = vld [vmem:[%s13322_s14 + $0x38] sm:$0xff] }
 0xa1d   : > { %v7423_v31 = vadd.f32 %v7422_v29, %v7366_v13  ;;  %v10229_v39 = vpop.f32.mrb[191].mxu0  ;;  %v10237_v8 = vpop.f32.mrb[211].mxu1  ;;  %v8071_v13 = vld [vmem:[%s13322_s14 + $0x40] sm:$0xff]  ;;  %v8072_v29 = vld [vmem:[%s13322_s14 + $0x48] sm:$0xff] }
 0xa1e   : > { %v8073_v39 = vld [vmem:[%s13322_s14 + $0x50] sm:$0xff]  ;;  %v8074_v8 = vld [vmem:[%s13322_s14 + $0x58] sm:$0xff] }
 0xa22   : > { %v7485_v26 = vpop.f32.mrb[192].mxu0  ;;  %v7553_v38 = vpop.f32.mrb[212].mxu1 }
 0xa23   : > { %v7492_v1 = vadd.f32 %v7485_v26, %v7420_v62  ;;  %v10244_v5 = vpop.f32.mrb[193].mxu0  ;;  %v10252_v20 = vpop.f32.mrb[213].mxu1  ;;  %v8069_v62 = vld [vmem:[%s13322_s14 + $0x30] sm:$0xff]  ;;  %v10371_v26 = vpack.c.bf16 %v8074_v8, %v8073_v39 }
 0xa24   : > { %v7488_v48 = vpop.f32.mrb[194].mxu0  ;;  %v7556_v35 = vpop.f32.mrb[214].mxu1  ;;  %v10365_v4 = vpack.c.bf16 %v8070_v44, %v8069_v62  ;;  %v8077_v20 = vld [vmem:[%s13322_s14 + $0x70] sm:$0xff] }
 0xa25   : > { %v7560_v3 = vadd.f32 %v7553_v38, %v7492_v1  ;;  %v7493_v58 = vadd.f32 %v7488_v48, %v7423_v31  ;;  %v10245_v23 = vpop.f32.mrb[195].mxu0  ;;  %v10253_v32 = vpop.f32.mrb[215].mxu1  ;;  %v10368_v31 = vpack.c.bf16 %v8072_v29, %v8071_v13  ;;  %v8075_v38 = vld [vmem:[%s13322_s14 + $0x60] sm:$0xff]  ;;  %v8076_v1 = vld [vmem:[%s13322_s14 + $0x68] sm:$0xff] }
 0xa26   : > { %v10374_v5 = vpack.c.bf16 %v8076_v1, %v8075_v38 }
 0xa27   : > { %v7561_v16 = vadd.f32 %v7556_v35, %v7493_v58 }
 0xa2a   : > { %v7621_v45 = vpop.f32.mrb[196].mxu0 }
 0xa2b   : > { %v7628_v19 = vadd.f32 %v7621_v45, %v7560_v3  ;;  %v10260_v41 = vpop.f32.mrb[197].mxu0 }
 0xa2c   : > { %v7624_v17 = vpop.f32.mrb[198].mxu0 }
 0xa2d   : > { %v7637_v33 = vadd.f32 %v8806_v54, %v7628_v19  ;;  %v7629_v18 = vadd.f32 %v7624_v17, %v7561_v16  ;;  %v10261_v36 = vpop.f32.mrb[199].mxu0 }
 0xa2f   : > { %v7639_v30 = vmax.f32 %v7637_v33, 0.0  ;;  %v7638_v57 = vadd.f32 %v8806_v54, %v7629_v18 }
 0xa31   : > { %7643 = vst.msk [vmem:[#allocation6 + $0x8] sm:$0xff] %vm7641_vm0, %v7639_v30  ;;  %v7640_v21 = vmax.f32 %v7638_v57, 0.0 }
 0xa33   : > { %7644 = vst.msk [vmem:[#allocation6 + $0x10] sm:$0xff] %vm7641_vm0, %v7640_v21 }
 0xa3a   : > { %v7659_v34 = vld [vmem:[#allocation6 + $0x7] ss:$3 sm:$0x3f]  ;;  %v7648_v61 = vld [vmem:[#allocation6 + $0x6] ss:$3 sm:$0x3f] }
 0xa3b   : > { %v7660_v24 = vpack.c.bf16 %v7659_v34, %v7659_v34  ;;  %v7649_v56 = vpack.c.bf16 %v7648_v61, %v7648_v61  ;;  %v7805_v40 = vld [vmem:[#allocation6 + $0x8] ss:$3 sm:$0x3f]  ;;  %v7885_v47 = vld [vmem:[#allocation6 + $0x9] ss:$3 sm:$0x3f] }
 0xa3c   : > { %v7806_v7 = vpack.c.bf16 %v7805_v40, %v7805_v40  ;;  %v7886_v37 = vpack.c.bf16 %v7885_v47, %v7885_v47  ;;  %v7965_v53 = vld [vmem:[#allocation6 + $0xa] ss:$3 sm:$0x3f] }
 0xa3d   : > { %10271 = vmatmul.mubr.msk.bf16.vlgmr.msra.gmra.mrb[216].mxu1 %vm7641_vm0, %v7660_v24  ;;  %10283 = vmatmul.mubr.msk.bf16.vlgmr.msra.gmra.mrb[200].mxu0 %vm7641_vm0, %v7649_v56  ;;  %v7966_v22 = vpack.c.bf16 %v7965_v53, %v7965_v53  ;;  %v10813_v53 = vmov (!%p8866_p5), 0  }
 0xa3e   : > { %10287 = vmatpush3.bf16.msra.mxu1 %v10751_v27  ;;  %10299 = vmatpush3.bf16.msra.mxu0 %v10752_v55  ;;  %v8864_v27 = vld [vmem:[%s750_s21] ss:$0 sm:$0xff] }
 0xa3f   : > { %10288 = vmatprep.subr.bf16.mxu1 %v10810_v43  ;;  %10300 = vmatprep.subr.bf16.mxu0 %v10810_v43 }
 0xa40   : > { %10294 = vmatprep.mubr.msk.bf16.mxu1 %vm10811_vm8, %v10810_v43  ;;  %10306 = vmatprep.mubr.msk.bf16.mxu0 %vm10811_vm8, %v10810_v43 }
 0xa41   : > { %10781 = vset.pattern.permute.xlu0 (!%p8866_p5), %v10813_v53 }
 0xa42   : > { %10289 = vmatpush3.bf16.msra.mxu1 %v10753_v46  ;;  %10301 = vmatpush3.bf16.msra.mxu0 %v10754_v49  ;;  %v8053_v49 = vld [vmem:[%s754_s30] sm:$0x3f] }
 0xa43   : > { %10290 = vmatprep.subr.bf16.mxu1 %v10810_v43  ;;  %10302 = vmatprep.subr.bf16.mxu0 %v10810_v43 }
 0xa46   : > { %10291 = vmatpush3.bf16.msra.mxu1 %v10755_v10  ;;  %10303 = vmatpush3.bf16.msra.mxu0 %v10756_v60 }
 0xa47   : > { %10292 = vmatprep.subr.bf16.mxu1 %v10810_v43  ;;  %10304 = vmatprep.subr.bf16.mxu0 %v10810_v43 }
 0xa4a   : > { %10293 = vmatpush3.bf16.msra.mxu1 %v10757_v9  ;;  %10305 = vmatpush3.bf16.msra.mxu0 %v10758_v50 }
 0xa4b   : > { %10310 = vmatprep.subr.bf16.mxu1 %v10810_v43  ;;  %10355 = vmatprep.subr.bf16.mxu0 %v10812_v63 }
 0xa4d   : > { %10295 = vmatmul.mubr.msk.bf16.vlgmr.msra.gmra.mrb[220].mxu1 %vm7641_vm0, %v7806_v7  ;;  %10307 = vmatmul.mubr.msk.bf16.vlgmr.msra.gmra.mrb[204].mxu0 %vm7641_vm0, %v7886_v37 }
 0xa4e   : > { %10311 = vmatpush3.bf16.msra.mxu1 %v10759_v2  ;;  %10318 = vmatprep.mubr.msk.bf16.mxu1 %vm10811_vm8, %v10810_v43 }
 0xa4f   : > { %10312 = vmatprep.subr.bf16.mxu1 %v10810_v43  ;;  %10352 = vmatprep.mubr.msk.f32.mxu0 %vm10811_vm8, %v10810_v43 }
 0xa50   : > { %10357 = vmatpush3.bf16.msra.mxu0 %v10356_v25 }
 0xa51   : > { %10358 = vmatprep.subr.bf16.mxu0 %v10812_v63 }
 0xa52   : > { %10313 = vmatpush3.bf16.msra.mxu1 %v10760_v11 }
 0xa53   : > { %10314 = vmatprep.subr.bf16.mxu1 %v10810_v43 }
 0xa54   : > { %10360 = vmatpush3.bf16.msra.mxu0 %v10359_v59 }
 0xa55   : > { %10361 = vmatprep.subr.bf16.mxu0 %v10812_v63 }
 0xa56   : > { %10315 = vmatpush3.bf16.msra.mxu1 %v10761_v15 }
 0xa57   : > { %10316 = vmatprep.subr.bf16.mxu1 %v10810_v43 }
 0xa58   : > { %10363 = vmatpush3.bf16.msra.mxu0 %v10362_v42 }
 0xa59   : > { %10364 = vmatprep.subr.bf16.mxu0 %v10812_v63 }
 0xa5a   : > { %10317 = vmatpush3.bf16.msra.mxu1 %v10762_v28  ;;  %v8156_v28 = vld [vmem:[#allocation8] sm:$0x1] (!%p8866_p5) }
 0xa5b   : > { %8159 = vperm.xlu0 (!%p8866_p5), %10781, %v8156_v28  }
 0xa5c   : > { %10366 = vmatpush3.bf16.msra.mxu0 %v10365_v4 }
 0xa5d   : > { %10319 = vmatmul.mubr.msk.bf16.vlgmr.msra.gmra.mrb[224].mxu1 %vm7641_vm0, %v7966_v22  ;;  %10367 = vmatprep.subr.bf16.mxu0 %v10812_v63  ;;  %v8162_v22 = vlaneseq (!%p8866_p5) }
 0xa5f   : > { %v8163_v6 = vshrl.u32 (!%p8866_p5), %v8162_v22, 7 }
 0xa60   : > { %10369 = vmatpush3.bf16.msra.mxu0 %v10368_v31 }
 0xa61   : > { %10370 = vmatprep.subr.bf16.mxu0 %v10812_v63  ;;  %v8164_v0 = vsub.s32 (!%p8866_p5), 0, %v8163_v6 }
 0xa64   : > { %10372 = vmatpush3.bf16.msra.mxu0 %v10371_v26 }
 0xa65   : > { %10373 = vmatprep.subr.bf16.mxu0 %v10812_v63 }
 0xa68   : > { %10375 = vmatpush3.bf16.msra.mxu0 %v10374_v5 }
 0xa69   : > { %10350 = vmatprep.subr.mxu0 %v10810_v43 }
 0xa6c   : > { %10351 = vmatpush3.msra.mxu0 %v8077_v20 }
 0xada   : > { %v8160_v51 = vpop.permute.xlu0 (!%p8866_p5), %8159 }
 0xadb   : > { %v8165_v63 = vrot.slane (!%p8866_p5), %v8160_v51, %v8164_v0 }
 0xb10   : > { %v7731_v48 = vpop.f32.mrb[216].mxu1  ;;  %v7798_v35 = vpop.f32.mrb[200].mxu0 }
 0xb11   : > { %v10272_v3 = vpop.f32.mrb[217].mxu1  ;;  %v7799_v58 = vadd.f32 %v7798_v35, %v7731_v48  ;;  %v10284_v23 = vpop.f32.mrb[201].mxu0 }
 0xb12   : > { %v7734_v32 = vpop.f32.mrb[218].mxu1  ;;  %v7801_v16 = vpop.f32.mrb[202].mxu0 }
 0xb13   : > { %v10273_v45 = vpop.f32.mrb[219].mxu1  ;;  %v10285_v54 = vpop.f32.mrb[203].mxu0 }
 0xb20   : > { %v7877_v19 = vpop.f32.mrb[220].mxu1  ;;  %v7957_v17 = vpop.f32.mrb[204].mxu0 }
 0xb21   : > { %v7883_v41 = vadd.f32 %v7877_v19, %v7799_v58  ;;  %v10296_v43 = vpop.f32.mrb[221].mxu1  ;;  %v10308_v33 = vpop.f32.mrb[205].mxu0 }
 0xb22   : > { %v7880_v18 = vpop.f32.mrb[222].mxu1  ;;  %v7960_v30 = vpop.f32.mrb[206].mxu0 }
 0xb23   : > { %v7963_v36 = vadd.f32 %v7957_v17, %v7883_v41  ;;  %v10297_v57 = vpop.f32.mrb[223].mxu1  ;;  %v10309_v21 = vpop.f32.mrb[207].mxu0 }
 0xb30   : > { %v8037_v34 = vpop.f32.mrb[224].mxu1 }
 0xb31   : > { %v8043_v24 = vadd.f32 %v8037_v34, %v7963_v36  ;;  %v10320_v61 = vpop.f32.mrb[225].mxu1 }
 0xb32   : > { %v8040_v55 = vpop.f32.mrb[226].mxu1 }
 0xb33   : > { %v8051_v56 = vadd.f32 %v8864_v27, %v8043_v24  ;;  %v10321_v46 = vpop.f32.mrb[227].mxu1 }
 0xb35   : > { %v8052_v10 = vmax.f32 %v8051_v56, 0.0 }
 0xb37   : > { %v8054_v60 = vmul.f32 %v8053_v49, %v8052_v10 }
 0xb39   : > { %v8056_v9 = vsel %vm8055_vm2, %v8054_v60, 0.0 }
 0xb3a   : > { %v8057_v50 = vrot.slane %v8056_v9, 4 }
 0xb3c   : > { %v8058_v40 = vadd.f32 %v8057_v50, %v8056_v9 }
 0xb3e   : > { %v8059_v47 = vrot.slane %v8058_v40, 2 }
 0xb40   : > { %v8060_v2 = vadd.f32 %v8059_v47, %v8058_v40 }
 0xb42   : > { %v8061_v7 = vrot.slane %v8060_v2, 1 }
 0xb44   : > { %v8062_v37 = vadd.f32 %v8061_v7, %v8060_v2 }
 0xb46   : > { %10353 = vmatmul.mubr.msk.f32.vlgmr.msra.gmra.mrb[208].mxu0 %vm8078_vm3, %v8062_v37 }
 0xc14   : > { %8155 = sbr.rel (%p8866_p5) target bundleno = 3101 (0xc1d), region = 88 }
 0xc19   : > { %v8148_v11 = vpop.f32.mrb[208].mxu0 }
 0xc1a   : > { %v10354_v15 = vpop.f32.mrb[209].mxu0  ;;  %v8166_v25 = vadd.f32 (!%p8866_p5), %v8165_v63, %v8148_v11 }
 0xc1c   : > { %8168 = vst.msk [vmem:[#allocation7] sm:$0x1] %vm8167_vm4, %v8166_v25 }
 0xc1d PF: > { %p8867_p6 = scmp.ne.s32.totalorder %s10800_s23, 1 }
 0xc1e   : > { %vm8181_vm5 = vcmask (!%p8867_p6), 8192  }
 0xc1f   : > { %8172 = sbr.rel (%p8867_p6) target bundleno = 3141 (0xc45), region = 92 }
 0xc23   : > { %v8173_v14 = vld [vmem:[#allocation7] sm:$0x1] (!%p8867_p6) }
 0xc24   : > { %v8174_v59 = vadd.f32 (!%p8867_p6), %v8173_v14, %v8148_v11 }
 0xc26   : > { %v8175_v52 = vsub.f32 0.0, %v8174_v59 }
 0xc28   : > { %v8176_v12 = vmul.f32 1.442695, %v8175_v52 }
 0xc2a   : > { %10782 = vpow2.f32 %v8176_v12 }
 0xc34   : > { %v10783_v42 = vpop.eup %10782 }
 0xc35   : > { %v8178_v62 = vadd.f32 1.0, %v10783_v42 }
 0xc37   : > { %10784 = vrcp.f32 %v8178_v62 }
 0xc41   : > { %v10785_v44 = vpop.eup %10784 }
 0xc42   : > { %8182 = vst.msk [vmem:[%s13324_s16] sm:$0x1] %vm8181_vm5, %v10785_v44  ;;  %v8183_v4 = vsub.f32 1.0, %v10785_v44 }
 0xc44   : > { %8184 = vst.msk [vmem:[%s13324_s16 + $0x1] sm:$0x1] %vm8181_vm5, %v8183_v4 }
 0xc45 PF: > { %s28_s25 = sadd.s32 1, %s10808_s25   ;;  %s13417_s23 = smov %s10804_s24 }
 0xc46   : > { %p25_p7 = scmp.ge.s32.totalorder %s28_s25, 4   ;;  %s13418_s24 = smov %s13420_s15 }
 0xc48   :  { %27 = sbr.rel (!%p25_p7) target bundleno = 3 (0x3), region = 485 }

</bundles_post_ra>
